<compile_context>
chip_gen: v6e
topology: v6e:2x2x1
jax: 0.10.0
libtpu: 0.0.40
codegen_flags: <defaults>
</compile_context>

<pallas_src>
import functools
import math

import jax
import jax.numpy as jnp
from jax.experimental import pallas as pl
from jax.experimental.pallas import tpu as pltpu


# ---------------------------------------------------------------------------
# Fused Inception_A Pallas kernel
# ---------------------------------------------------------------------------
def _inception_a_kernel(x_ref, wst_ref, sbst_ref,
                        wm_ref, sbm_ref, w22_ref, sb22_ref,
                        o_ref,
                        slab12, slab2, *, NB, H, W):
    M = NB * H * W

    def dx_pack(val):
        # val: (NB, H, W, C) -> (NB, H+2, W, 3C) with a 1-pixel zero border in
        # H and the three kw-shifted copies packed along the lane axis, so a
        # 3x3 conv needs only 3 matmuls over H-shifted slices.  The full
        # (borders included) slab is built in vregs and stored in one go.
        C = val.shape[-1]
        zc = jnp.zeros((NB, H, 1, C), val.dtype)
        left = jnp.concatenate([zc, val[:, :, :W - 1, :]], axis=2)   # kw = 0
        right = jnp.concatenate([val[:, :, 1:, :], zc], axis=2)      # kw = 2
        body = jnp.concatenate([left, val, right], axis=-1)          # (NB,H,W,3C)
        zr = jnp.zeros((NB, 1, W, 3 * C), val.dtype)
        return jnp.concatenate([zr, body, zr], axis=1)               # (NB,H+2,W,3C)

    def conv3(slab_ref, w_ref, sb_ref):
        # 3x3 conv, stride 1, from a (kw,Cin)-packed padded slab.
        K = w_ref.shape[1]
        acc = jnp.zeros((M, w_ref.shape[2]), jnp.float32)
        for dy in range(3):
            xs = slab_ref[:, dy:dy + H, :, :].reshape(M, K)           # bf16
            acc = acc + jnp.dot(xs, w_ref[dy],
                                preferred_element_type=jnp.float32)
        return jnp.maximum(acc * sb_ref[0:1, :] + sb_ref[1:2, :], 0.0)

    # ---- fused 1x1 stem: [branch1[0] | branch2[0] | branch0 | branch3[1]] --
    x_flat = x_ref[...].reshape(M, 384)                               # bf16
    y = jnp.dot(x_flat, wst_ref[...], preferred_element_type=jnp.float32)
    y = y * sbst_ref[0:1, :] + sbst_ref[1:2, :]                       # folded BN
    act = jnp.maximum(y[:, 0:224], 0.0)                               # ReLU b1/b2/b0
    x12 = act[:, 0:128]                                               # b1_0 || b2_0
    x0 = act[:, 128:224]                                              # branch0 out
    y3 = y[:, 224:320].reshape(NB, H, W, 96)                          # branch3 pre-pool

    # ---- merged branch1-3x3 + branch2-first-3x3 (block-diagonal weight) ----
    slab12[...] = dx_pack(x12.reshape(NB, H, W, 128).astype(jnp.bfloat16))
    r12 = conv3(slab12, wm_ref, sbm_ref)                              # (M, 192)
    out1 = r12[:, 0:96]                                               # branch1 out
    x2b = r12[:, 96:192]                                              # branch2 mid

    # ---- branch2: second 3x3 conv ------------------------------------------
    slab2[...] = dx_pack(x2b.reshape(NB, H, W, 96).astype(jnp.bfloat16))
    out2 = conv3(slab2, w22_ref, sb22_ref)                            # (M, 96)

    # ---- branch3: 3x3 avg-pool (count_include_pad=False), then ReLU --------
    # The 1x1 conv + folded BN were hoisted into the stem; this is valid only
    # because count_include_pad=False makes the pool a convex (weights-sum-1)
    # combination, which commutes with the affine conv+BN.  ReLU after pool.
    zr = jnp.zeros((NB, 1, W, 96), jnp.float32)
    yp = jnp.concatenate([zr, y3, zr], axis=1)                        # pad H
    rs = yp[:, 0:H] + yp[:, 1:H + 1] + yp[:, 2:H + 2]
    zc = jnp.zeros((NB, H, 1, 96), jnp.float32)
    rp = jnp.concatenate([zc, rs, zc], axis=2)                        # pad W
    sm = rp[:, :, 0:W] + rp[:, :, 1:W + 1] + rp[:, :, 2:W + 2]
    ri = jax.lax.broadcasted_iota(jnp.int32, (H, W), 0)
    ci = jax.lax.broadcasted_iota(jnp.int32, (H, W), 1)
    cnt = ((jnp.minimum(ri, 1) + jnp.minimum(H - 1 - ri, 1) + 1) *
           (jnp.minimum(ci, 1) + jnp.minimum(W - 1 - ci, 1) + 1))
    inv = (1.0 / cnt.astype(jnp.float32))[None, :, :, None]
    out3 = jnp.maximum((sm * inv).reshape(M, 96), 0.0)

    # ---- lane-dense 384-channel output, written once ------------------------
    out = jnp.concatenate([x0, out1, out2, out3], axis=-1)            # (M, 384)
    o_ref[...] = out.reshape(NB, H, W, 384).astype(o_ref.dtype)


# ---------------------------------------------------------------------------
# Wrappers
# ---------------------------------------------------------------------------
def _choose_nb(N, H, W):
    # Batch block so each step feeds >=256 MXU rows, capped at 1024 rows for
    # VMEM, while keeping >=2 grid steps when possible (v7x has 2 TensorCores).
    rows = H * W
    divs = [d for d in range(1, N + 1) if N % d == 0]
    cands = [d for d in divs if d * rows <= 1024] or [1]
    nb = max(cands)
    both = [d for d in cands if N // d >= 2 and d * rows >= 256]
    if both:
        nb = max(both)
    return nb


def inception_a_nhwc(x_nhwc, packed):
    N, H, W, Cin = x_nhwc.shape
    assert Cin == 384, Cin
    x = x_nhwc.astype(jnp.bfloat16)                    # bf16 MXU operands
    NB = _choose_nb(N, H, W)
    Hp = H + 2
    wst, sbst, wm, sbm, w22, sb22 = packed

    def const(*shape):
        return pl.BlockSpec(shape, lambda n: (0,) * len(shape))

    flops = 2 * N * H * W * (384 * 320 + 3 * 384 * 192 + 3 * 288 * 96)
    bytes_acc = (x.size * 2 + N * H * W * 384 * 4 +
                 (wst.size + wm.size + w22.size) * 2 +
                 (sbst.size + sbm.size + sb22.size) * 4)

    kernel = functools.partial(_inception_a_kernel, NB=NB, H=H, W=W)
    out = pl.pallas_call(
        kernel,
        out_shape=jax.ShapeDtypeStruct((N, H, W, 384), jnp.float32),
        grid=(N // NB,),
        in_specs=[
            pl.BlockSpec((NB, H, W, 384), lambda n: (n, 0, 0, 0)),
            const(384, 320), const(2, 320),            # fused 1x1 stem
            const(3, 384, 192), const(2, 192),         # merged b1/b2-first 3x3
            const(3, 288, 96), const(2, 96),           # b2 second 3x3
        ],
        out_specs=pl.BlockSpec((NB, H, W, 384), lambda n: (n, 0, 0, 0)),
        scratch_shapes=[
            pltpu.VMEM((NB, Hp, W, 3 * 128), jnp.bfloat16),  # dx-packed slab (merged)
            pltpu.VMEM((NB, Hp, W, 3 * 96), jnp.bfloat16),   # dx-packed slab (b2-2nd)
        ],
        compiler_params=pltpu.CompilerParams(
            dimension_semantics=("parallel",),
            vmem_limit_bytes=32 * 1024 * 1024),
        cost_estimate=pl.CostEstimate(
            flops=flops, transcendentals=0, bytes_accessed=bytes_acc),
    )(x, wst, sbst, wm, sbm, w22, sb22)
    return out


def inception_a(x_nchw, packed):
    # NCHW public interface (PyTorch layout).  For deployments keep
    # activations NHWC and call inception_a_nhwc directly to avoid the two
    # HBM-round-trip transposes below.
    x = jnp.transpose(x_nchw, (0, 2, 3, 1))            # NCHW -> NHWC
    out = inception_a_nhwc(x, packed)
    return jnp.transpose(out, (0, 3, 1, 2))            # NHWC -> NCHW


# ---------------------------------------------------------------------------
# Parameter init (deterministic, synthetic) + packing for the fused kernel
# ---------------------------------------------------------------------------
def _make_conv_bn(key, cin, cout, k):
    kw, kg, kb, km, kv = jax.random.split(key, 5)
    w = jax.random.normal(kw, (k, k, cin, cout), jnp.float32) \
        * (1.0 / math.sqrt(cin * k * k))                      # HWIO
    gamma = 1.0 + 0.1 * jax.random.normal(kg, (cout,), jnp.float32)
    beta = 0.1 * jax.random.normal(kb, (cout,), jnp.float32)
    mean = 0.1 * jax.random.normal(km, (cout,), jnp.float32)
    var = jax.random.uniform(kv, (cout,), jnp.float32, minval=0.5, maxval=1.5)
    scale = gamma / jnp.sqrt(var + 1e-3)                      # BN eps = 0.001
    bias = beta - mean * scale
    return dict(w=w, scale=scale, bias=bias)


def init_params(key):
    ks = jax.random.split(key, 7)
    return dict(
        b0=_make_conv_bn(ks[0], 384, 96, 1),
        b1_0=_make_conv_bn(ks[1], 384, 64, 1),
        b1_1=_make_conv_bn(ks[2], 64, 96, 3),
        b2_0=_make_conv_bn(ks[3], 384, 64, 1),
        b2_1=_make_conv_bn(ks[4], 64, 96, 3),
        b2_2=_make_conv_bn(ks[5], 96, 96, 3),
        b3_1=_make_conv_bn(ks[6], 384, 96, 1),
    )


def pack_params(p):
    bf16 = jnp.bfloat16
    # fused 1x1 stem, column order [branch1[0] | branch2[0] | branch0 | branch3[1]]
    # (the two 64-channel branches first so their 128 lanes start aligned).
    wst = jnp.concatenate([p['b1_0']['w'].reshape(384, 64),
                           p['b2_0']['w'].reshape(384, 64),
                           p['b0']['w'].reshape(384, 96),
                           p['b3_1']['w'].reshape(384, 96)], axis=-1)   # (384,320)
    sst = jnp.concatenate([p['b1_0']['scale'], p['b2_0']['scale'],
                           p['b0']['scale'], p['b3_1']['scale']])
    bst = jnp.concatenate([p['b1_0']['bias'], p['b2_0']['bias'],
                           p['b0']['bias'], p['b3_1']['bias']])
    sbst = jnp.stack([sst, bst])                                        # (2, 320)

    # block-diagonal merge of branch1 3x3 (64->96) and branch2-first 3x3 (64->96).
    wm = jnp.zeros((3, 3, 128, 192), jnp.float32)
    wm = wm.at[:, :, 0:64, 0:96].set(p['b1_1']['w'])
    wm = wm.at[:, :, 64:128, 96:192].set(p['b2_1']['w'])
    wm = wm.reshape(3, 3 * 128, 192)                                    # (3,384,192)
    sbm = jnp.stack([jnp.concatenate([p['b1_1']['scale'], p['b2_1']['scale']]),
                     jnp.concatenate([p['b1_1']['bias'], p['b2_1']['bias']])])

    w22 = p['b2_2']['w'].reshape(3, 3 * 96, 96)                         # (3,288,96)
    sb22 = jnp.stack([p['b2_2']['scale'], p['b2_2']['bias']])

    return (wst.astype(bf16), sbst,
            wm.astype(bf16), sbm,
            w22.astype(bf16), sb22)


# ---------------------------------------------------------------------------
# Pure-JAX f32 reference (independent path for validation)
# ---------------------------------------------------------------------------
def _ref_conv(x, w, scale, bias, pad):
    y = jax.lax.conv_general_dilated(
        x, w, (1, 1), [(pad, pad), (pad, pad)],
        dimension_numbers=('NHWC', 'HWIO', 'NHWC'))
    return jnp.maximum(y * scale + bias, 0.0)


def _ref_avgpool(x):
    s = jax.lax.reduce_window(x, 0.0, jax.lax.add, (1, 3, 3, 1), (1, 1, 1, 1),
                              [(0, 0), (1, 1), (1, 1), (0, 0)])
    c = jax.lax.reduce_window(jnp.ones_like(x[..., :1]), 0.0, jax.lax.add,
                              (1, 3, 3, 1), (1, 1, 1, 1),
                              [(0, 0), (1, 1), (1, 1), (0, 0)])
    return s / c


def inception_a_ref(x_nchw, p):
    x = jnp.transpose(x_nchw, (0, 2, 3, 1))
    x0 = _ref_conv(x, p['b0']['w'], p['b0']['scale'], p['b0']['bias'], 0)
    x1 = _ref_conv(x, p['b1_0']['w'], p['b1_0']['scale'], p['b1_0']['bias'], 0)
    x1 = _ref_conv(x1, p['b1_1']['w'], p['b1_1']['scale'], p['b1_1']['bias'], 1)
    x2 = _ref_conv(x, p['b2_0']['w'], p['b2_0']['scale'], p['b2_0']['bias'], 0)
    x2 = _ref_conv(x2, p['b2_1']['w'], p['b2_1']['scale'], p['b2_1']['bias'], 1)
    x2 = _ref_conv(x2, p['b2_2']['w'], p['b2_2']['scale'], p['b2_2']['bias'], 1)
    x3 = _ref_conv(_ref_avgpool(x), p['b3_1']['w'], p['b3_1']['scale'],
                   p['b3_1']['bias'], 0)
    out = jnp.concatenate([x0, x1, x2, x3], axis=-1)
    return jnp.transpose(out, (0, 3, 1, 2))


# ---------------------------------------------------------------------------
if __name__ == "__main__":
    key = jax.random.PRNGKey(0)
    kx, kp = jax.random.split(key)

    N, C, H, W = 8, 384, 8, 8          # Cin must be 384 per the module
    x = jax.random.normal(kx, (N, C, H, W), jnp.float32)
    params = init_params(kp)
    packed = pack_params(params)

    out = jax.block_until_ready(inception_a(x, packed))
    assert out.shape == (N, 384, H, W), out.shape

    ref = jax.block_until_ready(inception_a_ref(x, params))
    err = float(jnp.max(jnp.abs(out - ref)))
    rel = float(jnp.linalg.norm(out - ref) / jnp.linalg.norm(ref))
    # bf16 MXU operands (f32 accumulation) vs f32 reference.
    assert err < 8e-2 and rel < 8e-3, (err, rel)

    print("KERNEL_OK")
</pallas_src>

<mosaic_0001>
module attributes {stable_mosaic.version = 11 : i64} {
  func.func @_inception_a_kernel(%arg0: i32, %arg1: memref<4x8x8x384xbf16, #tpu.memory_space<vmem>>, %arg2: memref<384x320xbf16, #tpu.memory_space<vmem>>, %arg3: memref<2x320xf32, #tpu.memory_space<vmem>>, %arg4: memref<3x384x192xbf16, #tpu.memory_space<vmem>>, %arg5: memref<2x192xf32, #tpu.memory_space<vmem>>, %arg6: memref<3x288x96xbf16, #tpu.memory_space<vmem>>, %arg7: memref<2x96xf32, #tpu.memory_space<vmem>>, %arg8: memref<4x8x8x384xf32, #tpu.memory_space<vmem>>, %arg9: memref<4x10x8x384xbf16, #tpu.memory_space<vmem>>, %arg10: memref<4x10x8x288xbf16, #tpu.memory_space<vmem>>) attributes {dimension_semantics = [#tpu.dimension_semantics<parallel>], iteration_bounds = array<i64: 2>, scalar_prefetch = 0 : i64, scratch_operands = 2 : i64, tpu.core_type = #tpu.core_type<tc>, window_params = [{transform_indices = @transform_0, window_bounds = array<i64: 4, 8, 8, 384>}, {pipeline_mode = #tpu.pipeline_mode<synchronous>, transform_indices = @transform_1, window_bounds = array<i64: 384, 320>}, {pipeline_mode = #tpu.pipeline_mode<synchronous>, transform_indices = @transform_2, window_bounds = array<i64: 2, 320>}, {pipeline_mode = #tpu.pipeline_mode<synchronous>, transform_indices = @transform_3, window_bounds = array<i64: 3, 384, 192>}, {pipeline_mode = #tpu.pipeline_mode<synchronous>, transform_indices = @transform_4, window_bounds = array<i64: 2, 192>}, {pipeline_mode = #tpu.pipeline_mode<synchronous>, transform_indices = @transform_5, window_bounds = array<i64: 3, 288, 96>}, {pipeline_mode = #tpu.pipeline_mode<synchronous>, transform_indices = @transform_6, window_bounds = array<i64: 2, 96>}, {transform_indices = @transform_7, window_bounds = array<i64: 4, 8, 8, 384>}]} {
    %c0 = arith.constant 0 : index
    %c0_0 = arith.constant 0 : index
    %c0_1 = arith.constant 0 : index
    %c0_2 = arith.constant 0 : index
    %0 = vector.load %arg1[%c0, %c0_0, %c0_1, %c0_2] : memref<4x8x8x384xbf16, #tpu.memory_space<vmem>>, vector<4x8x8x384xbf16>
    %1 = vector.shape_cast %0 : vector<4x8x8x384xbf16> to vector<256x384xbf16>
    %c0_3 = arith.constant 0 : index
    %c0_4 = arith.constant 0 : index
    %2 = vector.load %arg2[%c0_3, %c0_4] : memref<384x320xbf16, #tpu.memory_space<vmem>>, vector<384x320xbf16>
    %cst = arith.constant dense<0.000000e+00> : vector<256x320xf32>
    %3 = tpu.matmul %1, %2, %cst {dimension_numbers = #tpu.dot_dimension_numbers<[1], [0], [0], [1], [0, 0, 1, 1], [], []>} : vector<256x384xbf16>, vector<384x320xbf16>, vector<256x320xf32> -> vector<256x320xf32>
    %c0_5 = arith.constant 0 : index
    %c0_6 = arith.constant 0 : index
    %4 = vector.load %arg3[%c0_5, %c0_6] : memref<2x320xf32, #tpu.memory_space<vmem>>, vector<1x320xf32>
    %5 = vector.broadcast %4 : vector<1x320xf32> to vector<256x320xf32>
    %6 = arith.mulf %3, %5 : vector<256x320xf32>
    %c1 = arith.constant 1 : index
    %c0_7 = arith.constant 0 : index
    %7 = vector.load %arg3[%c1, %c0_7] : memref<2x320xf32, #tpu.memory_space<vmem>>, vector<1x320xf32>
    %8 = vector.broadcast %7 : vector<1x320xf32> to vector<256x320xf32>
    %9 = arith.addf %6, %8 : vector<256x320xf32>
    %10 = vector.extract_strided_slice %9 {offsets = [0, 0], sizes = [256, 224], strides = [1, 1]} : vector<256x320xf32> to vector<256x224xf32>
    %cst_8 = arith.constant 0.000000e+00 : f32
    %11 = vector.broadcast %cst_8 : f32 to vector<256x224xf32>
    %12 = arith.maximumf %10, %11 : vector<256x224xf32>
    %13 = vector.extract_strided_slice %12 {offsets = [0, 0], sizes = [256, 128], strides = [1, 1]} : vector<256x224xf32> to vector<256x128xf32>
    %14 = vector.extract_strided_slice %12 {offsets = [0, 128], sizes = [256, 96], strides = [1, 1]} : vector<256x224xf32> to vector<256x96xf32>
    %15 = vector.extract_strided_slice %9 {offsets = [0, 224], sizes = [256, 96], strides = [1, 1]} : vector<256x320xf32> to vector<256x96xf32>
    %16 = vector.shape_cast %15 : vector<256x96xf32> to vector<4x8x8x96xf32>
    %17 = vector.shape_cast %13 : vector<256x128xf32> to vector<4x8x8x128xf32>
    %18 = arith.truncf %17 : vector<4x8x8x128xf32> to vector<4x8x8x128xbf16>
    %cst_9 = arith.constant 0.000000e+00 : bf16
    %19 = vector.broadcast %cst_9 : bf16 to vector<4x8x1x128xbf16>
    %20 = vector.extract_strided_slice %18 {offsets = [0, 0, 0, 0], sizes = [4, 8, 7, 128], strides = [1, 1, 1, 1]} : vector<4x8x8x128xbf16> to vector<4x8x7x128xbf16>
    %21 = tpu.concatenate %19, %20 in 2 : vector<4x8x1x128xbf16>, vector<4x8x7x128xbf16> -> vector<4x8x8x128xbf16>
    %22 = vector.extract_strided_slice %18 {offsets = [0, 0, 1, 0], sizes = [4, 8, 7, 128], strides = [1, 1, 1, 1]} : vector<4x8x8x128xbf16> to vector<4x8x7x128xbf16>
    %23 = tpu.concatenate %22, %19 in 2 : vector<4x8x7x128xbf16>, vector<4x8x1x128xbf16> -> vector<4x8x8x128xbf16>
    %24 = tpu.concatenate %21, %18, %23 in 3 : vector<4x8x8x128xbf16>, vector<4x8x8x128xbf16>, vector<4x8x8x128xbf16> -> vector<4x8x8x384xbf16>
    %cst_10 = arith.constant 0.000000e+00 : bf16
    %25 = vector.broadcast %cst_10 : bf16 to vector<4x1x8x384xbf16>
    %26 = tpu.concatenate %25, %24, %25 in 1 : vector<4x1x8x384xbf16>, vector<4x8x8x384xbf16>, vector<4x1x8x384xbf16> -> vector<4x10x8x384xbf16>
    %c0_11 = arith.constant 0 : index
    %c0_12 = arith.constant 0 : index
    %c0_13 = arith.constant 0 : index
    %c0_14 = arith.constant 0 : index
    %27 = vector.load %arg9[%c0_11, %c0_12, %c0_13, %c0_14] : memref<4x10x8x384xbf16, #tpu.memory_space<vmem>>, vector<4x10x8x384xbf16>
    tpu.vector_store %arg9[%c0_11, %c0_12, %c0_13, %c0_14], %26 {strides = array<i32>} : memref<4x10x8x384xbf16, #tpu.memory_space<vmem>>, vector<4x10x8x384xbf16>,
    %cst_15 = arith.constant 0.000000e+00 : f32
    %28 = vector.broadcast %cst_15 : f32 to vector<256x192xf32>
    %c0_16 = arith.constant 0 : index
    %c0_17 = arith.constant 0 : index
    %c0_18 = arith.constant 0 : index
    %c0_19 = arith.constant 0 : index
    %29 = vector.load %arg9[%c0_16, %c0_17, %c0_18, %c0_19] : memref<4x10x8x384xbf16, #tpu.memory_space<vmem>>, vector<4x8x8x384xbf16>
    %30 = vector.shape_cast %29 : vector<4x8x8x384xbf16> to vector<256x384xbf16>
    %c0_20 = arith.constant 0 : index
    %c0_21 = arith.constant 0 : index
    %c0_22 = arith.constant 0 : index
    %31 = vector.load %arg4[%c0_20, %c0_21, %c0_22] : memref<3x384x192xbf16, #tpu.memory_space<vmem>>, vector<1x384x192xbf16>
    %32 = vector.shape_cast %31 : vector<1x384x192xbf16> to vector<384x192xbf16>
    %cst_23 = arith.constant dense<0.000000e+00> : vector<256x192xf32>
    %33 = tpu.matmul %30, %32, %cst_23 {dimension_numbers = #tpu.dot_dimension_numbers<[1], [0], [0], [1], [0, 0, 1, 1], [], []>} : vector<256x384xbf16>, vector<384x192xbf16>, vector<256x192xf32> -> vector<256x192xf32>
    %34 = arith.addf %28, %33 : vector<256x192xf32>
    %c0_24 = arith.constant 0 : index
    %c1_25 = arith.constant 1 : index
    %c0_26 = arith.constant 0 : index
    %c0_27 = arith.constant 0 : index
    %35 = vector.load %arg9[%c0_24, %c1_25, %c0_26, %c0_27] : memref<4x10x8x384xbf16, #tpu.memory_space<vmem>>, vector<4x8x8x384xbf16>
    %36 = vector.shape_cast %35 : vector<4x8x8x384xbf16> to vector<256x384xbf16>
    %c1_28 = arith.constant 1 : index
    %c0_29 = arith.constant 0 : index
    %c0_30 = arith.constant 0 : index
    %37 = vector.load %arg4[%c1_28, %c0_29, %c0_30] : memref<3x384x192xbf16, #tpu.memory_space<vmem>>, vector<1x384x192xbf16>
    %38 = vector.shape_cast %37 : vector<1x384x192xbf16> to vector<384x192xbf16>
    %cst_31 = arith.constant dense<0.000000e+00> : vector<256x192xf32>
    %39 = tpu.matmul %36, %38, %cst_31 {dimension_numbers = #tpu.dot_dimension_numbers<[1], [0], [0], [1], [0, 0, 1, 1], [], []>} : vector<256x384xbf16>, vector<384x192xbf16>, vector<256x192xf32> -> vector<256x192xf32>
    %40 = arith.addf %34, %39 : vector<256x192xf32>
    %c0_32 = arith.constant 0 : index
    %c2 = arith.constant 2 : index
    %c0_33 = arith.constant 0 : index
    %c0_34 = arith.constant 0 : index
    %41 = vector.load %arg9[%c0_32, %c2, %c0_33, %c0_34] : memref<4x10x8x384xbf16, #tpu.memory_space<vmem>>, vector<4x8x8x384xbf16>
    %42 = vector.shape_cast %41 : vector<4x8x8x384xbf16> to vector<256x384xbf16>
    %c2_35 = arith.constant 2 : index
    %c0_36 = arith.constant 0 : index
    %c0_37 = arith.constant 0 : index
    %43 = vector.load %arg4[%c2_35, %c0_36, %c0_37] : memref<3x384x192xbf16, #tpu.memory_space<vmem>>, vector<1x384x192xbf16>
    %44 = vector.shape_cast %43 : vector<1x384x192xbf16> to vector<384x192xbf16>
    %cst_38 = arith.constant dense<0.000000e+00> : vector<256x192xf32>
    %45 = tpu.matmul %42, %44, %cst_38 {dimension_numbers = #tpu.dot_dimension_numbers<[1], [0], [0], [1], [0, 0, 1, 1], [], []>} : vector<256x384xbf16>, vector<384x192xbf16>, vector<256x192xf32> -> vector<256x192xf32>
    %46 = arith.addf %40, %45 : vector<256x192xf32>
    %c0_39 = arith.constant 0 : index
    %c0_40 = arith.constant 0 : index
    %47 = vector.load %arg5[%c0_39, %c0_40] : memref<2x192xf32, #tpu.memory_space<vmem>>, vector<1x192xf32>
    %48 = vector.broadcast %47 : vector<1x192xf32> to vector<256x192xf32>
    %49 = arith.mulf %46, %48 : vector<256x192xf32>
    %c1_41 = arith.constant 1 : index
    %c0_42 = arith.constant 0 : index
    %50 = vector.load %arg5[%c1_41, %c0_42] : memref<2x192xf32, #tpu.memory_space<vmem>>, vector<1x192xf32>
    %51 = vector.broadcast %50 : vector<1x192xf32> to vector<256x192xf32>
    %52 = arith.addf %49, %51 : vector<256x192xf32>
    %cst_43 = arith.constant 0.000000e+00 : f32
    %53 = vector.broadcast %cst_43 : f32 to vector<256x192xf32>
    %54 = arith.maximumf %52, %53 : vector<256x192xf32>
    %55 = vector.extract_strided_slice %54 {offsets = [0, 0], sizes = [256, 96], strides = [1, 1]} : vector<256x192xf32> to vector<256x96xf32>
    %56 = vector.extract_strided_slice %54 {offsets = [0, 96], sizes = [256, 96], strides = [1, 1]} : vector<256x192xf32> to vector<256x96xf32>
    %57 = vector.shape_cast %56 : vector<256x96xf32> to vector<4x8x8x96xf32>
    %58 = arith.truncf %57 : vector<4x8x8x96xf32> to vector<4x8x8x96xbf16>
    %cst_44 = arith.constant 0.000000e+00 : bf16
    %59 = vector.broadcast %cst_44 : bf16 to vector<4x8x1x96xbf16>
    %60 = vector.extract_strided_slice %58 {offsets = [0, 0, 0, 0], sizes = [4, 8, 7, 96], strides = [1, 1, 1, 1]} : vector<4x8x8x96xbf16> to vector<4x8x7x96xbf16>
    %61 = tpu.concatenate %59, %60 in 2 : vector<4x8x1x96xbf16>, vector<4x8x7x96xbf16> -> vector<4x8x8x96xbf16>
    %62 = vector.extract_strided_slice %58 {offsets = [0, 0, 1, 0], sizes = [4, 8, 7, 96], strides = [1, 1, 1, 1]} : vector<4x8x8x96xbf16> to vector<4x8x7x96xbf16>
    %63 = tpu.concatenate %62, %59 in 2 : vector<4x8x7x96xbf16>, vector<4x8x1x96xbf16> -> vector<4x8x8x96xbf16>
    %64 = tpu.concatenate %61, %58, %63 in 3 : vector<4x8x8x96xbf16>, vector<4x8x8x96xbf16>, vector<4x8x8x96xbf16> -> vector<4x8x8x288xbf16>
    %cst_45 = arith.constant 0.000000e+00 : bf16
    %65 = vector.broadcast %cst_45 : bf16 to vector<4x1x8x288xbf16>
    %66 = tpu.concatenate %65, %64, %65 in 1 : vector<4x1x8x288xbf16>, vector<4x8x8x288xbf16>, vector<4x1x8x288xbf16> -> vector<4x10x8x288xbf16>
    %c0_46 = arith.constant 0 : index
    %c0_47 = arith.constant 0 : index
    %c0_48 = arith.constant 0 : index
    %c0_49 = arith.constant 0 : index
    %67 = vector.load %arg10[%c0_46, %c0_47, %c0_48, %c0_49] : memref<4x10x8x288xbf16, #tpu.memory_space<vmem>>, vector<4x10x8x288xbf16>
    tpu.vector_store %arg10[%c0_46, %c0_47, %c0_48, %c0_49], %66 {strides = array<i32>} : memref<4x10x8x288xbf16, #tpu.memory_space<vmem>>, vector<4x10x8x288xbf16>,
    %cst_50 = arith.constant 0.000000e+00 : f32
    %68 = vector.broadcast %cst_50 : f32 to vector<256x96xf32>
    %c0_51 = arith.constant 0 : index
    %c0_52 = arith.constant 0 : index
    %c0_53 = arith.constant 0 : index
    %c0_54 = arith.constant 0 : index
    %69 = vector.load %arg10[%c0_51, %c0_52, %c0_53, %c0_54] : memref<4x10x8x288xbf16, #tpu.memory_space<vmem>>, vector<4x8x8x288xbf16>
    %70 = vector.shape_cast %69 : vector<4x8x8x288xbf16> to vector<256x288xbf16>
    %c0_55 = arith.constant 0 : index
    %c0_56 = arith.constant 0 : index
    %c0_57 = arith.constant 0 : index
    %71 = vector.load %arg6[%c0_55, %c0_56, %c0_57] : memref<3x288x96xbf16, #tpu.memory_space<vmem>>, vector<1x288x96xbf16>
    %72 = vector.shape_cast %71 : vector<1x288x96xbf16> to vector<288x96xbf16>
    %cst_58 = arith.constant dense<0.000000e+00> : vector<256x96xf32>
    %73 = tpu.matmul %70, %72, %cst_58 {dimension_numbers = #tpu.dot_dimension_numbers<[1], [0], [0], [1], [0, 0, 1, 1], [], []>} : vector<256x288xbf16>, vector<288x96xbf16>, vector<256x96xf32> -> vector<256x96xf32>
    %74 = arith.addf %68, %73 : vector<256x96xf32>
    %c0_59 = arith.constant 0 : index
    %c1_60 = arith.constant 1 : index
    %c0_61 = arith.constant 0 : index
    %c0_62 = arith.constant 0 : index
    %75 = vector.load %arg10[%c0_59, %c1_60, %c0_61, %c0_62] : memref<4x10x8x288xbf16, #tpu.memory_space<vmem>>, vector<4x8x8x288xbf16>
    %76 = vector.shape_cast %75 : vector<4x8x8x288xbf16> to vector<256x288xbf16>
    %c1_63 = arith.constant 1 : index
    %c0_64 = arith.constant 0 : index
    %c0_65 = arith.constant 0 : index
    %77 = vector.load %arg6[%c1_63, %c0_64, %c0_65] : memref<3x288x96xbf16, #tpu.memory_space<vmem>>, vector<1x288x96xbf16>
    %78 = vector.shape_cast %77 : vector<1x288x96xbf16> to vector<288x96xbf16>
    %cst_66 = arith.constant dense<0.000000e+00> : vector<256x96xf32>
    %79 = tpu.matmul %76, %78, %cst_66 {dimension_numbers = #tpu.dot_dimension_numbers<[1], [0], [0], [1], [0, 0, 1, 1], [], []>} : vector<256x288xbf16>, vector<288x96xbf16>, vector<256x96xf32> -> vector<256x96xf32>
    %80 = arith.addf %74, %79 : vector<256x96xf32>
    %c0_67 = arith.constant 0 : index
    %c2_68 = arith.constant 2 : index
    %c0_69 = arith.constant 0 : index
    %c0_70 = arith.constant 0 : index
    %81 = vector.load %arg10[%c0_67, %c2_68, %c0_69, %c0_70] : memref<4x10x8x288xbf16, #tpu.memory_space<vmem>>, vector<4x8x8x288xbf16>
    %82 = vector.shape_cast %81 : vector<4x8x8x288xbf16> to vector<256x288xbf16>
    %c2_71 = arith.constant 2 : index
    %c0_72 = arith.constant 0 : index
    %c0_73 = arith.constant 0 : index
    %83 = vector.load %arg6[%c2_71, %c0_72, %c0_73] : memref<3x288x96xbf16, #tpu.memory_space<vmem>>, vector<1x288x96xbf16>
    %84 = vector.shape_cast %83 : vector<1x288x96xbf16> to vector<288x96xbf16>
    %cst_74 = arith.constant dense<0.000000e+00> : vector<256x96xf32>
    %85 = tpu.matmul %82, %84, %cst_74 {dimension_numbers = #tpu.dot_dimension_numbers<[1], [0], [0], [1], [0, 0, 1, 1], [], []>} : vector<256x288xbf16>, vector<288x96xbf16>, vector<256x96xf32> -> vector<256x96xf32>
    %86 = arith.addf %80, %85 : vector<256x96xf32>
    %c0_75 = arith.constant 0 : index
    %c0_76 = arith.constant 0 : index
    %87 = vector.load %arg7[%c0_75, %c0_76] : memref<2x96xf32, #tpu.memory_space<vmem>>, vector<1x96xf32>
    %88 = vector.broadcast %87 : vector<1x96xf32> to vector<256x96xf32>
    %89 = arith.mulf %86, %88 : vector<256x96xf32>
    %c1_77 = arith.constant 1 : index
    %c0_78 = arith.constant 0 : index
    %90 = vector.load %arg7[%c1_77, %c0_78] : memref<2x96xf32, #tpu.memory_space<vmem>>, vector<1x96xf32>
    %91 = vector.broadcast %90 : vector<1x96xf32> to vector<256x96xf32>
    %92 = arith.addf %89, %91 : vector<256x96xf32>
    %cst_79 = arith.constant 0.000000e+00 : f32
    %93 = vector.broadcast %cst_79 : f32 to vector<256x96xf32>
    %94 = arith.maximumf %92, %93 : vector<256x96xf32>
    %cst_80 = arith.constant 0.000000e+00 : f32
    %95 = vector.broadcast %cst_80 : f32 to vector<4x1x8x96xf32>
    %96 = tpu.concatenate %95, %16, %95 in 1 : vector<4x1x8x96xf32>, vector<4x8x8x96xf32>, vector<4x1x8x96xf32> -> vector<4x10x8x96xf32>
    %97 = vector.extract_strided_slice %96 {offsets = [0, 0, 0, 0], sizes = [4, 8, 8, 96], strides = [1, 1, 1, 1]} : vector<4x10x8x96xf32> to vector<4x8x8x96xf32>
    %98 = vector.extract_strided_slice %96 {offsets = [0, 1, 0, 0], sizes = [4, 8, 8, 96], strides = [1, 1, 1, 1]} : vector<4x10x8x96xf32> to vector<4x8x8x96xf32>
    %99 = arith.addf %97, %98 : vector<4x8x8x96xf32>
    %100 = vector.extract_strided_slice %96 {offsets = [0, 2, 0, 0], sizes = [4, 8, 8, 96], strides = [1, 1, 1, 1]} : vector<4x10x8x96xf32> to vector<4x8x8x96xf32>
    %101 = arith.addf %99, %100 : vector<4x8x8x96xf32>
    %cst_81 = arith.constant 0.000000e+00 : f32
    %102 = vector.broadcast %cst_81 : f32 to vector<4x8x1x96xf32>
    %103 = tpu.concatenate %102, %101, %102 in 2 : vector<4x8x1x96xf32>, vector<4x8x8x96xf32>, vector<4x8x1x96xf32> -> vector<4x8x10x96xf32>
    %104 = vector.extract_strided_slice %103 {offsets = [0, 0, 0, 0], sizes = [4, 8, 8, 96], strides = [1, 1, 1, 1]} : vector<4x8x10x96xf32> to vector<4x8x8x96xf32>
    %105 = vector.extract_strided_slice %103 {offsets = [0, 0, 1, 0], sizes = [4, 8, 8, 96], strides = [1, 1, 1, 1]} : vector<4x8x10x96xf32> to vector<4x8x8x96xf32>
    %106 = arith.addf %104, %105 : vector<4x8x8x96xf32>
    %107 = vector.extract_strided_slice %103 {offsets = [0, 0, 2, 0], sizes = [4, 8, 8, 96], strides = [1, 1, 1, 1]} : vector<4x8x10x96xf32> to vector<4x8x8x96xf32>
    %108 = arith.addf %106, %107 : vector<4x8x8x96xf32>
    %109 = tpu.iota {dimensions = array<i32: 0>} : vector<8x8xi32>
    %110 = tpu.iota {dimensions = array<i32: 1>} : vector<8x8xi32>
    %c1_i32 = arith.constant 1 : i32
    %111 = vector.broadcast %c1_i32 : i32 to vector<8x8xi32>
    %112 = arith.minsi %109, %111 : vector<8x8xi32>
    %c7_i32 = arith.constant 7 : i32
    %113 = vector.broadcast %c7_i32 : i32 to vector<8x8xi32>
    %114 = arith.subi %113, %109 : vector<8x8xi32>
    %c1_i32_82 = arith.constant 1 : i32
    %115 = vector.broadcast %c1_i32_82 : i32 to vector<8x8xi32>
    %116 = arith.minsi %114, %115 : vector<8x8xi32>
    %117 = arith.addi %112, %116 : vector<8x8xi32>
    %c1_i32_83 = arith.constant 1 : i32
    %118 = vector.broadcast %c1_i32_83 : i32 to vector<8x8xi32>
    %119 = arith.addi %117, %118 : vector<8x8xi32>
    %c1_i32_84 = arith.constant 1 : i32
    %120 = vector.broadcast %c1_i32_84 : i32 to vector<8x8xi32>
    %121 = arith.minsi %110, %120 : vector<8x8xi32>
    %c7_i32_85 = arith.constant 7 : i32
    %122 = vector.broadcast %c7_i32_85 : i32 to vector<8x8xi32>
    %123 = arith.subi %122, %110 : vector<8x8xi32>
    %c1_i32_86 = arith.constant 1 : i32
    %124 = vector.broadcast %c1_i32_86 : i32 to vector<8x8xi32>
    %125 = arith.minsi %123, %124 : vector<8x8xi32>
    %126 = arith.addi %121, %125 : vector<8x8xi32>
    %c1_i32_87 = arith.constant 1 : i32
    %127 = vector.broadcast %c1_i32_87 : i32 to vector<8x8xi32>
    %128 = arith.addi %126, %127 : vector<8x8xi32>
    %129 = arith.muli %119, %128 : vector<8x8xi32>
    %130 = arith.sitofp %129 : vector<8x8xi32> to vector<8x8xf32>
    %cst_88 = arith.constant 1.000000e+00 : f32
    %131 = vector.broadcast %cst_88 : f32 to vector<8x8xf32>
    %132 = arith.divf %131, %130 : vector<8x8xf32>
    %133 = vector.shape_cast %132 : vector<8x8xf32> to vector<1x8x8x1xf32>
    %134 = vector.broadcast %133 : vector<1x8x8x1xf32> to vector<4x8x8x96xf32>
    %135 = arith.mulf %108, %134 : vector<4x8x8x96xf32>
    %136 = vector.shape_cast %135 : vector<4x8x8x96xf32> to vector<256x96xf32>
    %cst_89 = arith.constant 0.000000e+00 : f32
    %137 = vector.broadcast %cst_89 : f32 to vector<256x96xf32>
    %138 = arith.maximumf %136, %137 : vector<256x96xf32>
    %139 = tpu.concatenate %14, %55, %94, %138 in 1 : vector<256x96xf32>, vector<256x96xf32>, vector<256x96xf32>, vector<256x96xf32> -> vector<256x384xf32>
    %140 = vector.shape_cast %139 : vector<256x384xf32> to vector<4x8x8x384xf32>
    %c0_90 = arith.constant 0 : index
    %c0_91 = arith.constant 0 : index
    %c0_92 = arith.constant 0 : index
    %c0_93 = arith.constant 0 : index
    %141 = vector.load %arg8[%c0_90, %c0_91, %c0_92, %c0_93] : memref<4x8x8x384xf32, #tpu.memory_space<vmem>>, vector<4x8x8x384xf32>
    tpu.vector_store %arg8[%c0_90, %c0_91, %c0_92, %c0_93], %140 {strides = array<i32>} : memref<4x8x8x384xf32, #tpu.memory_space<vmem>>, vector<4x8x8x384xf32>,
    return
  }
  func.func @transform_0(%arg0: i32) -> (i32, i32, i32, i32) {
    %c0_i32 = arith.constant 0 : i32
    %c0_i32_0 = arith.constant 0 : i32
    %c0_i32_1 = arith.constant 0 : i32
    %c0_i32_2 = arith.constant 0 : i32
    return %arg0, %c0_i32, %c0_i32_0, %c0_i32_1 : i32, i32, i32, i32
  }
  func.func @transform_1(%arg0: i32) -> (i32, i32) {
    %c0_i32 = arith.constant 0 : i32
    %c0_i32_0 = arith.constant 0 : i32
    %c0_i32_1 = arith.constant 0 : i32
    return %c0_i32, %c0_i32_0 : i32, i32
  }
  func.func @transform_2(%arg0: i32) -> (i32, i32) {
    %c0_i32 = arith.constant 0 : i32
    %c0_i32_0 = arith.constant 0 : i32
    %c0_i32_1 = arith.constant 0 : i32
    return %c0_i32, %c0_i32_0 : i32, i32
  }
  func.func @transform_3(%arg0: i32) -> (i32, i32, i32) {
    %c0_i32 = arith.constant 0 : i32
    %c0_i32_0 = arith.constant 0 : i32
    %c0_i32_1 = arith.constant 0 : i32
    %c0_i32_2 = arith.constant 0 : i32
    return %c0_i32, %c0_i32_0, %c0_i32_1 : i32, i32, i32
  }
  func.func @transform_4(%arg0: i32) -> (i32, i32) {
    %c0_i32 = arith.constant 0 : i32
    %c0_i32_0 = arith.constant 0 : i32
    %c0_i32_1 = arith.constant 0 : i32
    return %c0_i32, %c0_i32_0 : i32, i32
  }
  func.func @transform_5(%arg0: i32) -> (i32, i32, i32) {
    %c0_i32 = arith.constant 0 : i32
    %c0_i32_0 = arith.constant 0 : i32
    %c0_i32_1 = arith.constant 0 : i32
    %c0_i32_2 = arith.constant 0 : i32
    return %c0_i32, %c0_i32_0, %c0_i32_1 : i32, i32, i32
  }
  func.func @transform_6(%arg0: i32) -> (i32, i32) {
    %c0_i32 = arith.constant 0 : i32
    %c0_i32_0 = arith.constant 0 : i32
    %c0_i32_1 = arith.constant 0 : i32
    return %c0_i32, %c0_i32_0 : i32, i32
  }
  func.func @transform_7(%arg0: i32) -> (i32, i32, i32, i32) {
    %c0_i32 = arith.constant 0 : i32
    %c0_i32_0 = arith.constant 0 : i32
    %c0_i32_1 = arith.constant 0 : i32
    %c0_i32_2 = arith.constant 0 : i32
    return %arg0, %c0_i32, %c0_i32_0, %c0_i32_1 : i32, i32, i32, i32
  }
}

</mosaic_0001>

<bundles_post_ra>
// kernel: tpu_custom_call.1
= control target key start
LH: loop header
LB: loop body
LE: loop exit
PB: predicated region body
PF: predicated region fallthrough
CT: control target
= control target key end

     0   :  { %12 = vsyncpa [#allocation5], 0  ;;  %s21734_s0 = inlined_call_operand.vmem [shape: bf16[8,8,8,384], index: 0, kind: input, shape index: {}]   ;;  %s21735_s1 = inlined_call_operand.vmem [shape: bf16[384,320], index: 1, kind: input, shape index: {}]   ;;  %s21736_s2 = inlined_call_operand.vmem [shape: f32[2,320], index: 2, kind: input, shape index: {}]   ;;  %s21737_s3 = inlined_call_operand.vmem [shape: bf16[3,384,192], index: 3, kind: input, shape index: {}]   ;;  %s21738_s4 = inlined_call_operand.vmem [shape: f32[2,192], index: 4, kind: input, shape index: {}]   ;;  %s21739_s5 = inlined_call_operand.vmem [shape: bf16[3,288,96], index: 5, kind: input, shape index: {}]   ;;  %s21740_s6 = inlined_call_operand.vmem [shape: f32[2,96], index: 6, kind: input, shape index: {}]   ;;  %s21741_s7 = inlined_call_operand.hbm [shape: f32[8,8,8,384], index: 7, kind: output, shape index: {}]  }
   0x1   :  { %14 = vsyncpa [#allocation5 + $0x1], 0  ;;  %s14716_s24 = smov 0   ;;  %s14718_s25 = smov 0  }
   0x2   :  { %s14720_s26 = smov 0   ;;  %s14722_s27 = smov 0  }
   0x3 LB: > { %s14737_s28 = sadd.s32 4294967295, %s14667_s27   ;;  %s12184_s29 = sadd.s32 4294967294, %s14667_s27   ;;  %s14667_s27 = sphi %s14722_s27, %s22722_s27   ;;  %s14663_s26 = sphi %s14720_s26, %s22721_s26   ;;  %s14659_s25 = sphi %s14718_s25, %s22720_s25   ;;  %s14655_s24 = sphi %s14716_s24, %s22719_s24  }
   0x4   : > { %s14741_s30 = sadd.s32 1, %s14667_s27   ;;  %s179_s8 = sadd.s32 1, %s14663_s26 }
   0x5   : > { %s176_s9 = ssub.s32 %s14667_s27, %s14741_s30  ;;  %p189_p0 = scmp.ne.s32.totalorder %s14663_s26, %s14659_s25 }
   0x6   : > { %p177_p1 = scmp.eq.s32.totalorder %s176_s9, 0  ;;  %p190_p2 = scmp.eq.s32.totalorder %s14737_s28, 1 }
   0x7   : > { %p195_p3 = scmp.ne.s32.totalorder %s14659_s25, %s14655_s24  ;;  %p196_p4 = scmp.eq.s32.totalorder %s12184_s29, 1 }
   0x8   : > { %s14752_s10 = scalar_select %p177_p1, %s14663_s26, %s179_s8  }
   0x9   : > { %p14754_p5 = por %p190_p2, %p189_p0  ;;  %p14758_p6 = por %p196_p4, %p195_p3 }
   0xa   : > { %p12187_p7 = scmp.ge.s32.totalorder %s14667_s27, 1  ;;  %p242_p8 = scmp.lt.s32.totalorder %s14667_s27, 3 }
   0xc   : > { %p243_p9 = pnand %p12187_p7, %p242_p8 }
   0xe   : > { %246 = sbr.rel (%p243_p9) target bundleno = 1746 (0x6d2), region = 48 }
  0x13   : > { %v13896_v0 = vld [vmem:[%s21735_s1 + $0xac] ss:$12 sps:$4 sm:$0xff]   ;;  %v21743_v2 = vmov 0   ;;  %v13900_v3 = vld [vmem:[%s21735_s1 + $0xa8] ss:$12 sps:$4 sm:$0xff]   ;;  %s12188_s17 = sshll.u32 %s14737_s28, 2 }
  0x14   : > { %v13898_v1 = vld [vmem:[%s21735_s1 + $0x22c] ss:$12 sps:$4 sm:$0xff]   ;;  %1309 = vmatprep.mubr.bf16.mxu1 %v21743_v2  ;;  %1084 = vmatprep.subr.bf16.mxu0 %v13896_v0  ;;  %v13901_v4 = vld [vmem:[%s21735_s1 + $0x228] ss:$12 sps:$4 sm:$0xff]   ;;  %v13906_v7 = vld [vmem:[%s21735_s1 + $0x90] ss:$12 sps:$4 sm:$0xff]  }
  0x15   : > { %1277 = vmatprep.subr.bf16.mxu1 %v13898_v1  ;;  %v13902_v5 = vld [vmem:[%s21735_s1 + $0x94] ss:$12 sps:$4 sm:$0xff]   ;;  %1085 = vmatpush1.bf16.msra.mxu0 %v13900_v3  ;;  %v13907_v8 = vld [vmem:[%s21735_s1 + $0x210] ss:$12 sps:$4 sm:$0xff]   ;;  %v13912_v11 = vld [vmem:[%s21735_s1 + $0x78] ss:$12 sps:$4 sm:$0xff]  }
  0x16   : > { %1278 = vmatpush1.bf16.msra.mxu1 %v13901_v4  ;;  %v13904_v6 = vld [vmem:[%s21735_s1 + $0x214] ss:$12 sps:$4 sm:$0xff]   ;;  %1086 = vmatprep.subr.bf16.mxu0 %v13902_v5  ;;  %v13908_v9 = vld [vmem:[%s21735_s1 + $0x7c] ss:$12 sps:$4 sm:$0xff]   ;;  %v13913_v12 = vld [vmem:[%s21735_s1 + $0x1f8] ss:$12 sps:$4 sm:$0xff]  }
  0x17   : > { %1279 = vmatprep.subr.bf16.mxu1 %v13904_v6  ;;  %v13910_v10 = vld [vmem:[%s21735_s1 + $0x1fc] ss:$12 sps:$4 sm:$0xff]   ;;  %v13914_v13 = vld [vmem:[%s21735_s1 + $0x64] ss:$12 sps:$4 sm:$0xff]   ;;  %p276_p10 = scmp.lt.s32.totalorder %s12188_s17, 7  ;;  %vm2371_vm0 = vcmask 1040384  }
  0x18   : > { %v13916_v14 = vld [vmem:[%s21735_s1 + $0x1e4] ss:$12 sps:$4 sm:$0xff]   ;;  %v13918_v15 = vld [vmem:[%s21735_s1 + $0x60] ss:$12 sps:$4 sm:$0xff]   ;;  %v13924_v19 = vld [vmem:[%s21735_s1 + $0x48] ss:$12 sps:$4 sm:$0xff]  }
  0x19   : > { %1087 = vmatpush1.bf16.msra.mxu0 %v13906_v7  ;;  %v13919_v16 = vld [vmem:[%s21735_s1 + $0x1e0] ss:$12 sps:$4 sm:$0xff]   ;;  %s22724_s17 = smov (!%p276_p10, %s12188_s17), 7  ;;  %v13925_v20 = vld [vmem:[%s21735_s1 + $0x1c8] ss:$12 sps:$4 sm:$0xff]   ;;  %vm2502_vm2 = vcmask 1043456  }
  0x1a   : > { %1280 = vmatpush1.bf16.msra.mxu1 %v13907_v8  ;;  %1088 = vmatprep.subr.bf16.mxu0 %v13908_v9  ;;  %v13920_v17 = vld [vmem:[%s21735_s1 + $0x4c] ss:$12 sps:$4 sm:$0xff]   ;;  %v13926_v21 = vld [vmem:[%s21735_s1 + $0x34] ss:$12 sps:$4 sm:$0xff]   ;;  %s13849_s18 = smul.u32 96, %s22724_s17  ;;  %s14671_s29 = smov 96  }
  0x1b   : > { %1281 = vmatprep.subr.bf16.mxu1 %v13910_v10  ;;  %v13922_v18 = vld [vmem:[%s21735_s1 + $0x1cc] ss:$12 sps:$4 sm:$0xff]   ;;  %v13928_v22 = vld [vmem:[%s21735_s1 + $0x1b4] ss:$12 sps:$4 sm:$0xff]   ;;  %v13930_v23 = vld [vmem:[%s21735_s1 + $0x30] ss:$12 sps:$4 sm:$0xff]  }
  0x1c   : > { %v13931_v24 = vld [vmem:[%s21735_s1 + $0x1b0] ss:$12 sps:$4 sm:$0xff]   ;;  %s14847_s14 = scalar_lea.vmem %s21734_s0, %s13849_s18  ;;  %v13936_v27 = vld [vmem:[%s21735_s1 + $0x18] ss:$12 sps:$4 sm:$0xff]   ;;  %v13942_v31 = vld [vmem:[%s21735_s1] ss:$12 sps:$4 sm:$0xff]  }
  0x1d   : > { %1089 = vmatpush1.bf16.msra.mxu0 %v13912_v11  ;;  %v13932_v25 = vld [vmem:[%s21735_s1 + $0x1c] ss:$12 sps:$4 sm:$0xff]   ;;  %v13937_v28 = vld [vmem:[%s21735_s1 + $0x198] ss:$12 sps:$4 sm:$0xff]   ;;  %v13943_v32 = vld [vmem:[%s21735_s1 + $0x180] ss:$12 sps:$4 sm:$0xff]  }
  0x1e   : > { %1282 = vmatpush1.bf16.msra.mxu1 %v13913_v12  ;;  %1090 = vmatprep.subr.bf16.mxu0 %v13914_v13  ;;  %v13934_v26 = vld [vmem:[%s21735_s1 + $0x19c] ss:$12 sps:$4 sm:$0xff]   ;;  %v13938_v29 = vld [vmem:[%s21735_s1 + $0x4] ss:$12 sps:$4 sm:$0xff]   ;;  %v13944_v33 = vld [vmem:[%s21735_s1 + $0x16c] ss:$12 sps:$4 sm:$0xff]  }
  0x1f   : > { %1283 = vmatprep.subr.bf16.mxu1 %v13916_v14  ;;  %v13940_v30 = vld [vmem:[%s21735_s1 + $0x184] ss:$12 sps:$4 sm:$0xff]   ;;  %v13946_v35 = vld [vmem:[%s14847_s14 + $0x8] ss:$12 sps:$4 sm:$0xff]   ;;  %v13955_v43 = vld [vmem:[%s14847_s14 + $0x20] ss:$12 sps:$4 sm:$0xff]  }
  0x20   : > { %v13948_v34 = vld [vmem:[%s21735_s1 + $0x170] ss:$12 sps:$4 sm:$0xff]   ;;  %v13947_v36 = vld [vmem:[%s21735_s1 + $0x168] ss:$12 sps:$4 sm:$0xff]   ;;  %v13964_v39 = vld [vmem:[%s21735_s1 + $0x158] ss:$12 sps:$4 sm:$0xff]  }
  0x21   : > { %1091 = vmatpush1.bf16.msra.mxu0 %v13918_v15  ;;  %v13949_v37 = vld [vmem:[%s21735_s1 + $0xb0] ss:$12 sps:$4 sm:$0xff]   ;;  %v13950_v38 = vld [vmem:[%s21735_s1 + $0x154] ss:$12 sps:$4 sm:$0xff]   ;;  %v13965_v41 = vld [vmem:[%s21735_s1 + $0x98] ss:$12 sps:$4 sm:$0xff]  }
  0x22   : > { %1284 = vmatpush1.bf16.msra.mxu1 %v13919_v16  ;;  %1092 = vmatprep.subr.bf16.mxu0 %v13920_v17  ;;  %v13952_v40 = vld [vmem:[%s21735_s1 + $0x150] ss:$12 sps:$4 sm:$0xff]   ;;  %v13956_v44 = vld [vmem:[%s21735_s1 + $0x138] ss:$12 sps:$4 sm:$0xff]   ;;  %v13959_v47 = vld [vmem:[%s21735_s1 + $0x120] ss:$12 sps:$4 sm:$0xff]  }
  0x23   : > { %1285 = vmatprep.subr.bf16.mxu1 %v13922_v18  ;;  %v13953_v42 = vld [vmem:[%s21735_s1 + $0x13c] ss:$12 sps:$4 sm:$0xff]   ;;  %v13957_v45 = vld [vmem:[%s21735_s1 + $0x124] ss:$12 sps:$4 sm:$0xff]   ;;  %v13980_v48 = vld [vmem:[%s21735_s1 + $0x140] ss:$12 sps:$4 sm:$0xff]  }
  0x24   : > { %v14904_v46 = vld [vmem:[%s14847_s14 + $0x4] ss:$12 sps:$4 sm:$0xff]   ;;  %v13981_v49 = vld [vmem:[%s21735_s1 + $0x80] ss:$12 sps:$4 sm:$0xff]   ;;  %v13963_v52 = vld [vmem:[%s21735_s1 + $0x108] ss:$12 sps:$4 sm:$0xff]  }
  0x25   : > { %1093 = vmatpush1.bf16.msra.mxu0 %v13924_v19  ;;  %1116 = vmatprep.mubr.bf16.mxu0 %v14904_v46  ;;  %v13960_v50 = vld [vmem:[%s21735_s1 + $0x10c] ss:$12 sps:$4 sm:$0xff]   ;;  %v13966_v53 = vld [vmem:[%s21735_s1 + $0xf4] ss:$12 sps:$4 sm:$0xff]   ;;  %v13968_v56 = vld [vmem:[%s21735_s1 + $0xf0] ss:$12 sps:$4 sm:$0xff]  }
  0x26   : > { %1286 = vmatpush1.bf16.msra.mxu1 %v13925_v20  ;;  %1094 = vmatprep.subr.bf16.mxu0 %v13926_v21  ;;  %v13962_v51 = vld [vmem:[%s14847_s14 + $0x38] ss:$12 sps:$4 sm:$0xff]   ;;  %v13990_v54 = vld [vmem:[%s21735_s1 + $0x128] ss:$12 sps:$4 sm:$0xff]   ;;  %v13971_v58 = vld [vmem:[%s14847_s14 + $0x50] ss:$12 sps:$4 sm:$0xff]  }
  0x27   : > { %1287 = vmatprep.subr.bf16.mxu1 %v13928_v22  ;;  %v13991_v55 = vld [vmem:[%s21735_s1 + $0x68] ss:$12 sps:$4 sm:$0xff]   ;;  %v13972_v59 = vld [vmem:[%s21735_s1 + $0xd8] ss:$12 sps:$4 sm:$0xff]   ;;  %v14000_v60 = vld [vmem:[%s21735_s1 + $0x110] ss:$12 sps:$4 sm:$0xff]  }
  0x28   : > { %v13969_v57 = vld [vmem:[%s21735_s1 + $0xdc] ss:$12 sps:$4 sm:$0xff]   ;;  %v13973_v61 = vld [vmem:[%s21735_s1 + $0xc4] ss:$12 sps:$4 sm:$0xff]   ;;  %v13975_v63 = vld [vmem:[%s21735_s1 + $0xc0] ss:$12 sps:$4 sm:$0xff]  }
  0x29   : > { %1095 = vmatpush1.bf16.msra.mxu0 %v13930_v23  ;;  %v14002_v62 = vld [vmem:[%s21735_s1 + $0x50] ss:$12 sps:$4 sm:$0xff]   ;;  %v14958_v0 = vld [vmem:[%s14847_s14] ss:$12 sps:$4 sm:$0xff]   ;;  %v13979_v3 = vld [vmem:[%s14847_s14 + $0x68] ss:$12 sps:$4 sm:$0xff]  }
  0x2a   : > { %1288 = vmatpush1.bf16.msra.mxu1 %v13931_v24  ;;  %1096 = vmatprep.subr.bf16.mxu0 %v13932_v25  ;;  %v14001_v1 = vld [vmem:[%s21735_s1 + $0x230] ss:$12 sps:$4 sm:$0xff]   ;;  %v14011_v5 = vld [vmem:[%s21735_s1 + $0xf8] ss:$12 sps:$4 sm:$0xff]   ;;  %v13985_v9 = vld [vmem:[%s14847_s14 + $0x80] ss:$12 sps:$4 sm:$0xff]  }
  0x2b   : > { %1289 = vmatprep.subr.bf16.mxu1 %v13934_v26  ;;  %v14965_v4 = vld [vmem:[%s14847_s14 + $0x1c] ss:$12 sps:$4 sm:$0xff]   ;;  %v14012_v6 = vld [vmem:[%s21735_s1 + $0x218] ss:$12 sps:$4 sm:$0xff]   ;;  %v14984_v10 = vld [vmem:[%s14847_s14 + $0x34] ss:$12 sps:$4 sm:$0xff]  }
  0x2c   : > { %v14013_v7 = vld [vmem:[%s21735_s1 + $0x38] ss:$12 sps:$4 sm:$0xff]   ;;  %v14022_v11 = vld [vmem:[%s21735_s1 + $0xe0] ss:$12 sps:$4 sm:$0xff]   ;;  %v14999_v14 = vld [vmem:[%s14847_s14 + $0x30] ss:$12 sps:$4 sm:$0xff]  }
  0x2d   : > { %1097 = vmatpush1.bf16.msra.mxu0 %v13936_v27  ;;  %v14980_v8 = vld [vmem:[%s14847_s14 + $0x18] ss:$12 sps:$4 sm:$0xff]   ;;  %v14023_v12 = vld [vmem:[%s21735_s1 + $0x200] ss:$12 sps:$4 sm:$0xff]   ;;  %v14033_v17 = vld [vmem:[%s21735_s1 + $0xc8] ss:$12 sps:$4 sm:$0xff]  }
  0x2e   : > { %1290 = vmatpush1.bf16.msra.mxu1 %v13937_v28  ;;  %1098 = vmatprep.subr.bf16.mxu0 %v13938_v29  ;;  %v14024_v13 = vld [vmem:[%s21735_s1 + $0x20] ss:$12 sps:$4 sm:$0xff]   ;;  %v15002_v15 = vld [vmem:[%s14847_s14 + $0x98] ss:$12 sps:$4 sm:$0xff]   ;;  %v14034_v18 = vld [vmem:[%s21735_s1 + $0x1e8] ss:$12 sps:$4 sm:$0xff]  }
  0x2f   : > { %1291 = vmatprep.subr.bf16.mxu1 %v13940_v30  ;;  %v15005_v16 = vld [vmem:[%s14847_s14 + $0x4c] ss:$12 sps:$4 sm:$0xff]   ;;  %v14035_v19 = vld [vmem:[%s21735_s1 + $0x8] ss:$12 sps:$4 sm:$0xff]   ;;  %v14043_v21 = vld [vmem:[%s21735_s1 + $0x1d0] ss:$12 sps:$4 sm:$0xff]  }
  0x30   : > { %v15021_v20 = vld [vmem:[%s14847_s14 + $0x48] ss:$12 sps:$4 sm:$0xff]   ;;  %v15027_v22 = vld [vmem:[%s14847_s14 + $0xb0] ss:$12 sps:$4 sm:$0xff]   ;;  %v14053_v25 = vld [vmem:[%s21735_s1 + $0x1b8] ss:$12 sps:$4 sm:$0xff]  }
  0x31   : > { %1099 = vmatpush1.bf16.msra.mxu0 %v13942_v31  ;;  %v14046_v23 = vld [vmem:[%s21737_s3 + $0x2f4] ss:$8 sps:$4 sm:$0xff]   ;;  %v15033_v24 = vld [vmem:[%s14847_s14 + $0x64] ss:$12 sps:$4 sm:$0xff]   ;;  %v15043_v26 = vld [vmem:[%s14847_s14 + $0x60] ss:$12 sps:$4 sm:$0xff]  }
  0x32   : > { %1292 = vmatpush1.bf16.msra.mxu1 %v13943_v32  ;;  %1100 = vmatprep.subr.bf16.mxu0 %v13944_v33  ;;  %v14060_v27 = vld [vmem:[%s21735_s1 + $0x1a0] ss:$12 sps:$4 sm:$0xff]   ;;  %v15049_v28 = vld [vmem:[%s14847_s14 + $0xc8] ss:$12 sps:$4 sm:$0xff]   ;;  %v15065_v32 = vld [vmem:[%s14847_s14 + $0x78] ss:$12 sps:$4 sm:$0xff]  }
  0x33   : > { %13150 = vmatprep.subr.bf16.mxu1 %v13948_v34  ;;  %v15052_v29 = vld [vmem:[%s14847_s14 + $0x7c] ss:$12 sps:$4 sm:$0xff]   ;;  %v15068_v33 = vld [vmem:[%s14847_s14 + $0xe0] ss:$12 sps:$4 sm:$0xff]   ;;  %vm2372_vm1 = vsmask.f32 256 }
  0x34   : > { %v14061_v30 = vld [vmem:[%s21735_s1 + $0x188] ss:$12 sps:$4 sm:$0xff]   ;;  %vm2503_vm3 = vsmask.f32 3328  ;;  %vm15460_vm4 = vmand %vm2371_vm0, %vm2372_vm1  ;;  %s14670_s18 = smov 32   ;;  %vm7845_vm6 = vcmask 257024  }
  0x35   : > { %1310 = vmatmul.mubr.bf16.vlgmr.msra.gmra.mxu1 %v13946_v35  ;;  %1101 = vmatpush2.bf16.msra.mxu0 %v13947_v36  ;;  %v14070_v31 = vld [vmem:[%s21737_s3 + $0x1f4] ss:$8 sps:$4 sm:$0xff]   ;;  %v15081_v36 = vld [vmem:[%s14847_s14 + $0xf8] ss:$12 sps:$4 sm:$0xff]   ;;  %vm15468_vm5 = vmand %vm2502_vm2, %vm2503_vm3  ;;  %vm7393_vm7 = vcmask 785408   ;;  %vm7491_vm8 = vcmask 523264  }
  0x36   : > { %13151 = vmatpush3.bf16.msra.mxu1 %v13949_v37  ;;  %1102 = vmatprep.subr.bf16.mxu0 %v13950_v38  ;;  %v15071_v34 = vld [vmem:[%s14847_s14 + $0x94] ss:$12 sps:$4 sm:$0xff]   ;;  %v15078_v35 = vld [vmem:[%s14847_s14 + $0x90] ss:$12 sps:$4 sm:$0xff]   ;;  %v15084_v37 = vld [vmem:[%s14847_s14 + $0xac] ss:$12 sps:$4 sm:$0xff]  }
  0x37   : > { %1319 = vmatprep.mubr.bf16.mxu1 %v21743_v2  ;;  %13152 = vmatprep.subr.bf16.mxu1 %v13964_v39  ;;  %v15091_v38 = vld [vmem:[%s14847_s14 + $0xa8] ss:$12 sps:$4 sm:$0xff]   ;;  %v15094_v39 = vld [vmem:[%s14847_s14 + $0x110] ss:$12 sps:$4 sm:$0xff]   ;;  %vm6848_vm9 = vcmask 261120   ;;  %vm11067_vm14 = vcmask 1046528  }
  0x38   : > { %vm11228_vm15 = vcmask 1045504   ;;  %s14672_s8 = smov 64  }
  0x39   : > { %1103 = vmatpush2.bf16.msra.mxu0 %v13952_v40  ;;  %v15097_v40 = vld [vmem:[%s14847_s14 + $0xc4] ss:$12 sps:$4 sm:$0xff]  }
  0x3a   : > { %13153 = vmatpush3.bf16.msra.mxu1 %v13965_v41  ;;  %1104 = vmatprep.subr.bf16.mxu0 %v13953_v42  ;;  %v15104_v41 = vld [vmem:[%s14847_s14 + $0xc0] ss:$12 sps:$4 sm:$0xff]   ;;  %v15107_v42 = vld [vmem:[%s14847_s14 + $0x128] ss:$12 sps:$4 sm:$0xff]  }
  0x3b   : > { %13154 = vmatprep.subr.bf16.mxu1 %v13980_v48  ;;  %v15130_v48 = vld [vmem:[%s14847_s14 + $0xf0] ss:$12 sps:$4 sm:$0xff]  }
  0x3d   : > { %1320 = vmatmul.mubr.bf16.gmra.mxu1 %v13955_v43  ;;  %1105 = vmatpush2.bf16.msra.mxu0 %v13956_v44  ;;  %v15110_v43 = vld [vmem:[%s14847_s14 + $0xdc] ss:$12 sps:$4 sm:$0xff]   ;;  %v15117_v44 = vld [vmem:[%s14847_s14 + $0xd8] ss:$12 sps:$4 sm:$0xff]  }
  0x3e   : > { %1329 = vmatprep.mubr.bf16.mxu1 %v21743_v2  ;;  %1106 = vmatprep.subr.bf16.mxu0 %v13957_v45  ;;  %v15120_v45 = vld [vmem:[%s14847_s14 + $0x140] ss:$12 sps:$4 sm:$0xff]  }
  0x3f   : > { %13155 = vmatpush3.bf16.msra.mxu1 %v13981_v49  ;;  %v15133_v49 = vld [vmem:[%s14847_s14 + $0x158] ss:$12 sps:$4 sm:$0xff]  }
  0x40   : > { %13156 = vmatprep.subr.bf16.mxu1 %v13990_v54  ;;  %v15156_v54 = vld [vmem:[%s14847_s14 + $0x120] ss:$12 sps:$4 sm:$0xff]  }
  0x41   : > { %1107 = vmatpush2.bf16.msra.mxu0 %v13959_v47  ;;  %v15123_v47 = vld [vmem:[%s14847_s14 + $0xf4] ss:$12 sps:$4 sm:$0xff]  }
  0x42   : > { %1108 = vmatprep.subr.bf16.mxu0 %v13960_v50  ;;  %v15136_v50 = vld [vmem:[%s14847_s14 + $0x10c] ss:$12 sps:$4 sm:$0xff]  }
  0x43   : > { %13157 = vmatpush3.bf16.msra.mxu1 %v13991_v55  ;;  %v14044_v55 = vld [vmem:[%s21737_s3 + $0x2f0] ss:$8 sps:$4 sm:$0xff]  }
  0x44   : > { %13158 = vmatprep.subr.bf16.mxu1 %v14000_v60  ;;  %v15181_v60 = vld [vmem:[%s14847_s14 + $0x154] ss:$12 sps:$4 sm:$0xff]  }
  0x45   : > { %1330 = vmatmul.mubr.bf16.gmra.mxu1 %v13962_v51  ;;  %1109 = vmatpush2.bf16.msra.mxu0 %v13963_v52  ;;  %v15143_v51 = vld [vmem:[%s14847_s14 + $0x108] ss:$12 sps:$4 sm:$0xff]   ;;  %v15146_v52 = vld [vmem:[%s14847_s14 + $0x170] ss:$12 sps:$4 sm:$0xff]  }
  0x46   : > { %1339 = vmatprep.mubr.bf16.mxu1 %v21743_v2  ;;  %1110 = vmatprep.subr.bf16.mxu0 %v13966_v53  ;;  %v15149_v53 = vld [vmem:[%s14847_s14 + $0x124] ss:$12 sps:$4 sm:$0xff]  }
  0x47   : > { %13159 = vmatpush3.bf16.msra.mxu1 %v14002_v62  ;;  %v14067_v62 = vld [vmem:[%s21737_s3 + $0x2c4] ss:$8 sps:$4 sm:$0xff]  }
  0x48   : > { %13160 = vmatprep.subr.bf16.mxu1 %v14011_v5  ;;  %v14088_v5 = vld [vmem:[%s21737_s3 + $0x2a4] ss:$8 sps:$4 sm:$0xff]  }
  0x49   : > { %1111 = vmatpush2.bf16.msra.mxu0 %v13968_v56  ;;  %v15162_v56 = vld [vmem:[%s14847_s14 + $0x13c] ss:$12 sps:$4 sm:$0xff]  }
  0x4a   : > { %1112 = vmatprep.subr.bf16.mxu0 %v13969_v57  ;;  %v14056_v57 = vld [vmem:[%s21737_s3 + $0x2e4] ss:$8 sps:$4 sm:$0xff]  }
  0x4b   : > { %13161 = vmatpush3.bf16.msra.mxu1 %v14013_v7  ;;  %v14103_v7 = vld [vmem:[%s21737_s3 + $0x294] ss:$8 sps:$4 sm:$0xff]  }
  0x4c   : > { %13162 = vmatprep.subr.bf16.mxu1 %v14022_v11  ;;  %v14116_v11 = vld [vmem:[%s21737_s3 + $0x280] ss:$8 sps:$4 sm:$0xff]  }
  0x4d   : > { %1340 = vmatmul.mubr.bf16.gmra.mxu1 %v13971_v58  ;;  %1113 = vmatpush2.bf16.msra.mxu0 %v13972_v59  ;;  %v14054_v58 = vld [vmem:[%s21737_s3 + $0x2e0] ss:$8 sps:$4 sm:$0xff]   ;;  %v15178_v59 = vld [vmem:[%s14847_s14 + $0x138] ss:$12 sps:$4 sm:$0xff]  }
  0x4e   : > { %1349 = vmatprep.mubr.bf16.mxu1 %v21743_v2  ;;  %1114 = vmatprep.subr.bf16.mxu0 %v13973_v61  ;;  %v14062_v61 = vld [vmem:[%s21737_s3 + $0x2d0] ss:$8 sps:$4 sm:$0xff]  }
  0x4f   : > { %13163 = vmatpush3.bf16.msra.mxu1 %v14024_v13  ;;  %v14134_v13 = vld [vmem:[%s21737_s3 + $0x174] ss:$8 sps:$4 sm:$0xff]  }
  0x50   : > { %13164 = vmatprep.subr.bf16.mxu1 %v14033_v17  ;;  %v14076_v17 = vld [vmem:[%s21737_s3 + $0x1e4] ss:$8 sps:$4 sm:$0xff]  }
  0x51   : > { %1115 = vmatpush2.bf16.msra.mxu0 %v13975_v63  ;;  %v14065_v63 = vld [vmem:[%s21737_s3 + $0x2c0] ss:$8 sps:$4 sm:$0xff]  }
  0x52   : > { %13676 = vmatprep.subr.bf16.mxu0 %v14001_v1 }
  0x53   : > { %13165 = vmatpush3.bf16.msra.mxu1 %v14035_v19  ;;  %v14534_v19 = vld [vmem:[%s14847_s14 + $0x38] ss:$12 sps:$4 sm:$0xff]  }
  0x54   : > { %1117 = vmatmul.mubr.bf16.vlgmr.msra.gmra.mxu0 %v14958_v0  ;;  %3856 = vmatprep.subr.bf16.mxu1 %v14046_v23  ;;  %v14077_v23 = vld [vmem:[%s21737_s3 + $0x1d0] ss:$8 sps:$4 sm:$0xff]  }
  0x55   : > { %1350 = vmatmul.mubr.bf16.gmra.mxu1 %v13979_v3  ;;  %1126 = vmatprep.mubr.bf16.mxu0 %v14965_v4  ;;  %v15203_v3 = vld [vmem:[%s14847_s14 + $0x16c] ss:$12 sps:$4 sm:$0xff]  }
  0x56   : > { %1359 = vmatprep.mubr.bf16.mxu1 %v21743_v2  ;;  %13677 = vmatpush3.bf16.msra.mxu0 %v14001_v1  ;;  %v15200_v1 = vld [vmem:[%s14847_s14 + $0x150] ss:$12 sps:$4 sm:$0xff]  }
  0x57   : > { %13678 = vmatprep.subr.bf16.mxu0 %v14012_v6 }
  0x5a   : > { %13679 = vmatpush3.bf16.msra.mxu0 %v14012_v6  ;;  %v14086_v6 = vld [vmem:[%s21737_s3 + $0x2a0] ss:$8 sps:$4 sm:$0xff]  }
  0x5b   : > { %13680 = vmatprep.subr.bf16.mxu0 %v14023_v12 }
  0x5c   : > { %1127 = vmatmul.mubr.bf16.gmra.mxu0 %v14980_v8 }
  0x5d   : > { %1360 = vmatmul.mubr.bf16.gmra.mxu1 %v13985_v9  ;;  %1136 = vmatprep.mubr.bf16.mxu0 %v14984_v10  ;;  %v14101_v9 = vld [vmem:[%s21737_s3 + $0x290] ss:$8 sps:$4 sm:$0xff]  }
  0x5e   : > { %1369 = vmatprep.mubr.bf16.mxu1 %v21743_v2  ;;  %13681 = vmatpush3.bf16.msra.mxu0 %v14023_v12  ;;  %v14532_v12 = vld [vmem:[%s14847_s14 + $0x8] ss:$12 sps:$4 sm:$0xff]  }
  0x5f   : > { %13682 = vmatprep.subr.bf16.mxu0 %v14034_v18 }
  0x62   : > { %13683 = vmatpush3.bf16.msra.mxu0 %v14034_v18  ;;  %v14533_v18 = vld [vmem:[%s14847_s14 + $0x20] ss:$12 sps:$4 sm:$0xff]  }
  0x63   : > { %13684 = vmatprep.subr.bf16.mxu0 %v14043_v21 }
  0x64   : > { %1137 = vmatmul.mubr.bf16.gmra.mxu0 %v14999_v14 }
  0x65   : > { %1370 = vmatmul.mubr.bf16.gmra.mxu1 %v15002_v15  ;;  %1146 = vmatprep.mubr.bf16.mxu0 %v15005_v16 }
  0x66   : > { %1379 = vmatprep.mubr.bf16.mxu1 %v21743_v2  ;;  %13685 = vmatpush3.bf16.msra.mxu0 %v14043_v21  ;;  %v14079_v21 = vld [vmem:[%s21737_s3 + $0x1d4] ss:$8 sps:$4 sm:$0xff]  }
  0x67   : > { %13686 = vmatprep.subr.bf16.mxu0 %v14053_v25 }
  0x6a   : > { %13687 = vmatpush3.bf16.msra.mxu0 %v14053_v25  ;;  %v14535_v25 = vld [vmem:[%s14847_s14 + $0x50] ss:$12 sps:$4 sm:$0xff]  }
  0x6b   : > { %13688 = vmatprep.subr.bf16.mxu0 %v14060_v27 }
  0x6c   : > { %1147 = vmatmul.mubr.bf16.gmra.mxu0 %v15021_v20 }
  0x6d   : > { %1380 = vmatmul.mubr.bf16.gmra.mxu1 %v15027_v22  ;;  %1156 = vmatprep.mubr.bf16.mxu0 %v15033_v24 }
  0x6e   : > { %1389 = vmatprep.mubr.bf16.mxu1 %v21743_v2  ;;  %13689 = vmatpush3.bf16.msra.mxu0 %v14060_v27  ;;  %v14536_v27 = vld [vmem:[%s14847_s14 + $0x68] ss:$12 sps:$4 sm:$0xff]  }
  0x6f   : > { %13690 = vmatprep.subr.bf16.mxu0 %v14061_v30 }
  0x72   : > { %13691 = vmatpush3.bf16.msra.mxu0 %v14061_v30  ;;  %v14083_v30 = vld [vmem:[%s21737_s3 + $0x1b0] ss:$8 sps:$4 sm:$0xff]  }
  0x73   : > { %3663 = vmatprep.subr.bf16.mxu0 %v14070_v31  ;;  %v14091_v31 = vld [vmem:[%s21737_s3 + $0x1a4] ss:$8 sps:$4 sm:$0xff]  }
  0x74   : > { %1157 = vmatmul.mubr.bf16.gmra.mxu0 %v15043_v26 }
  0x75   : > { %1390 = vmatmul.mubr.bf16.gmra.mxu1 %v15049_v28  ;;  %1166 = vmatprep.mubr.bf16.mxu0 %v15052_v29 }
  0x76   : > { %1399 = vmatprep.mubr.bf16.mxu1 %v21743_v2 }
  0x7c   : > { %1167 = vmatmul.mubr.bf16.gmra.mxu0 %v15065_v32 }
  0x7d   : > { %1400 = vmatmul.mubr.bf16.gmra.mxu1 %v15068_v33  ;;  %1176 = vmatprep.mubr.bf16.mxu0 %v15071_v34 }
  0x7e   : > { %1409 = vmatprep.mubr.bf16.mxu1 %v21743_v2 }
  0x84   : > { %1177 = vmatmul.mubr.bf16.gmra.mxu0 %v15078_v35 }
  0x85   : > { %1410 = vmatmul.mubr.bf16.gmra.mxu1 %v15081_v36  ;;  %1186 = vmatprep.mubr.bf16.mxu0 %v15084_v37 }
  0x86   : > { %1419 = vmatprep.mubr.bf16.mxu1 %v21743_v2 }
  0x8c   : > { %1187 = vmatmul.mubr.bf16.gmra.mxu0 %v15091_v38 }
  0x8d   : > { %1420 = vmatmul.mubr.bf16.gmra.mxu1 %v15094_v39  ;;  %1196 = vmatprep.mubr.bf16.mxu0 %v15097_v40 }
  0x8e   : > { %1429 = vmatprep.mubr.bf16.mxu1 %v21743_v2 }
  0x94   : > { %1197 = vmatmul.mubr.bf16.gmra.mxu0 %v15104_v41 }
  0x95   : > { %1430 = vmatmul.mubr.bf16.gmra.mxu1 %v15107_v42  ;;  %1206 = vmatprep.mubr.bf16.mxu0 %v15110_v43 }
  0x96   : > { %1439 = vmatprep.mubr.bf16.mxu1 %v21743_v2 }
  0x9c   : > { %1207 = vmatmul.mubr.bf16.gmra.mxu0 %v15117_v44 }
  0x9d   : > { %1440 = vmatmul.mubr.bf16.gmra.mxu1 %v15120_v45  ;;  %1216 = vmatprep.mubr.bf16.mxu0 %v15123_v47 }
  0x9e   : > { %1449 = vmatprep.mubr.bf16.mxu1 %v21743_v2 }
  0xa4   : > { %1217 = vmatmul.mubr.bf16.gmra.mxu0 %v15130_v48 }
  0xa5   : > { %1450 = vmatmul.mubr.bf16.gmra.mxu1 %v15133_v49  ;;  %1226 = vmatprep.mubr.bf16.mxu0 %v15136_v50 }
  0xa6   : > { %1459 = vmatprep.mubr.bf16.mxu1 %v21743_v2 }
  0xac   : > { %1227 = vmatmul.mubr.bf16.gmra.mxu0 %v15143_v51 }
  0xad   : > { %1460 = vmatmul.mubr.bf16.gmra.mxu1 %v15146_v52  ;;  %1236 = vmatprep.mubr.bf16.mxu0 %v15149_v53 }
  0xae   : > { %1502 = vmatprep.mubr.bf16.mxu1 %v14904_v46  ;;  %v14064_v46 = vld [vmem:[%s21737_s3 + $0x2d4] ss:$8 sps:$4 sm:$0xff]  }
  0xb4   : > { %1237 = vmatmul.mubr.bf16.gmra.mxu0 %v15156_v54 }
  0xb5   : > { %1503 = vmatmul.mubr.bf16.vlgmr.msra.gmra.mxu1 %v14958_v0  ;;  %1246 = vmatprep.mubr.bf16.mxu0 %v15162_v56  ;;  %v14073_v0 = vld [vmem:[%s21737_s3 + $0x2b4] ss:$8 sps:$4 sm:$0xff]  }
  0xb6   : > { %3857 = vmatpush1.bf16.msra.mxu1 %v14044_v55  ;;  %1510 = vmatprep.mubr.bf16.mxu1 %v14965_v4  ;;  %v14071_v4 = vld [vmem:[%s21737_s3 + $0x2b0] ss:$8 sps:$4 sm:$0xff]   ;;  %v14094_v55 = vld [vmem:[%s21737_s3 + $0x194] ss:$8 sps:$4 sm:$0xff]  }
  0xb7   : > { %3858 = vmatprep.subr.bf16.mxu1 %v14056_v57  ;;  %v14100_v57 = vld [vmem:[%s21737_s3 + $0x274] ss:$8 sps:$4 sm:$0xff]  }
  0xba   : > { %3859 = vmatpush1.bf16.msra.mxu1 %v14054_v58  ;;  %v14104_v58 = vld [vmem:[%s21737_s3 + $0x260] ss:$8 sps:$4 sm:$0xff]  }
  0xbb   : > { %3860 = vmatprep.subr.bf16.mxu1 %v14064_v46  ;;  %v14109_v46 = vld [vmem:[%s21737_s3 + $0x254] ss:$8 sps:$4 sm:$0xff]  }
  0xbc   : > { %1247 = vmatmul.mubr.bf16.gmra.mxu0 %v15178_v59 }
  0xbd   : > { %1511 = vmatmul.mubr.bf16.gmra.mxu1 %v14980_v8  ;;  %1256 = vmatprep.mubr.bf16.mxu0 %v15181_v60  ;;  %v15222_v8 = vld [vmem:[%s14847_s14 + $0x168] ss:$12 sps:$4 sm:$0xff]  }
  0xbe   : > { %1518 = vmatprep.mubr.bf16.mxu1 %v14984_v10  ;;  %3861 = vmatpush1.bf16.msra.mxu1 %v14062_v61  ;;  %v14118_v10 = vld [vmem:[%s21737_s3 + $0x284] ss:$8 sps:$4 sm:$0xff]  }
  0xbf   : > { %3862 = vmatprep.subr.bf16.mxu1 %v14067_v62 }
  0xc2   : > { %3863 = vmatpush1.bf16.msra.mxu1 %v14065_v63  ;;  %v14110_v63 = vld [vmem:[%s21737_s3 + $0x240] ss:$8 sps:$4 sm:$0xff]  }
  0xc3   : > { %3864 = vmatprep.subr.bf16.mxu1 %v14073_v0  ;;  %v14115_v0 = vld [vmem:[%s21737_s3 + $0x234] ss:$8 sps:$4 sm:$0xff]  }
  0xc4   : > { %1257 = vmatmul.mubr.bf16.gmra.mxu0 %v15200_v1 }
  0xc5   : > { %1519 = vmatmul.mubr.bf16.gmra.mxu1 %v14999_v14  ;;  %1266 = vmatprep.mubr.bf16.mxu0 %v15203_v3  ;;  %v12311_v14 = vcombine.low %v21743_v2, %v21743_v2 }
  0xc6   : > { %1526 = vmatprep.mubr.bf16.mxu1 %v15005_v16  ;;  %3865 = vmatpush1.bf16.msra.mxu1 %v14071_v4  ;;  %v14068_v16 = vld [vmem:[%s21737_s3 + $0x1f0] ss:$8 sps:$4 sm:$0xff]  }
  0xc7   : > { %3866 = vmatprep.subr.bf16.mxu1 %v14088_v5  ;;  %2861 = vst [vmem:[#allocation2] sm:$0xff] %v12311_v14  ;;  %2862 = vst [vmem:[#allocation2 + $0x8] sm:$0xf] %v12311_v14 }
  0xc8   : > { %2879 = vst [vmem:[#allocation2 + $0x6c] sm:$0xff] %v12311_v14  ;;  %2880 = vst [vmem:[#allocation2 + $0x74] sm:$0xf] %v12311_v14 }
  0xc9   : > { %2882 = vst [vmem:[#allocation2 + $0x80] sm:$0xf] %v12311_v14  ;;  %2899 = vst [vmem:[#allocation2 + $0xe4] sm:$0xff] %v12311_v14 }
  0xca   : > { %3867 = vmatpush1.bf16.msra.mxu1 %v14086_v6  ;;  %2900 = vst [vmem:[#allocation2 + $0xec] sm:$0xf] %v12311_v14  ;;  %2902 = vst [vmem:[#allocation2 + $0xf8] sm:$0xf] %v12311_v14  ;;  %v14119_v6 = vld [vmem:[%s21737_s3 + $0x220] ss:$8 sps:$4 sm:$0xff]  }
  0xcb   : > { %3868 = vmatprep.subr.bf16.mxu1 %v14103_v7  ;;  %2919 = vst [vmem:[#allocation2 + $0x15c] sm:$0xff] %v12311_v14  ;;  %2920 = vst [vmem:[#allocation2 + $0x164] sm:$0xf] %v12311_v14  ;;  %v21742_v7 = vlaneseq }
  0xcc   : > { %1267 = vmatmul.mubr.bf16.gmra.mxu0 %v15222_v8  ;;  %2922 = vst [vmem:[#allocation2 + $0x170] sm:$0xf] %v12311_v14  ;;  %2939 = vst [vmem:[#allocation2 + $0x1d4] sm:$0xff] %v12311_v14 }
  0xcd   : > { %1527 = vmatmul.mubr.bf16.gmra.mxu1 %v15021_v20  ;;  %13692 = vmatprep.mubr.bf16.mxu0 %v14532_v12  ;;  %2940 = vst [vmem:[#allocation2 + $0x1dc] sm:$0xf] %v12311_v14  ;;  %7844 = vst [vmem:[#allocation3] sm:$0xff] %v12311_v14  ;;  %v14074_v20 = vld [vmem:[%s21737_s3 + $0x1e0] ss:$8 sps:$4 sm:$0xff]  }
  0xce   : > { %1534 = vmatprep.mubr.bf16.mxu1 %v15033_v24  ;;  %3869 = vmatpush1.bf16.msra.mxu1 %v14101_v9  ;;  %7863 = vst [vmem:[#allocation3 + $0x6c] sm:$0xff] %v12311_v14  ;;  %7865 = vst [vmem:[#allocation3 + $0x78] sm:$0xff] %v12311_v14  ;;  %v14082_v24 = vld [vmem:[%s21737_s3 + $0x1c4] ss:$8 sps:$4 sm:$0xff]   ;;  %v14124_v9 = vld [vmem:[%s21737_s3 + $0x214] ss:$8 sps:$4 sm:$0xff]  }
  0xcf   : > { %3870 = vmatprep.subr.bf16.mxu1 %v14118_v10  ;;  %7883 = vst [vmem:[#allocation3 + $0xe4] sm:$0xff] %v12311_v14  ;;  %7885 = vst [vmem:[#allocation3 + $0xf0] sm:$0xff] %v12311_v14  ;;  %v14127_v10 = vld [vmem:[%s21737_s3 + $0x204] ss:$8 sps:$4 sm:$0xff]  }
  0xd0   : > { %7903 = vst [vmem:[#allocation3 + $0x15c] sm:$0xff] %v12311_v14  ;;  %7905 = vst [vmem:[#allocation3 + $0x168] sm:$0xff] %v12311_v14 }
  0xd1   : > { %7923 = vst [vmem:[#allocation3 + $0x1d4] sm:$0xff] %v12311_v14 }
  0xd2   : > { %3871 = vmatpush1.bf16.msra.mxu1 %v14116_v11 }
  0xd3   : > { %4738 = vmatprep.subr.bf16.mxu1 %v14134_v13  ;;  %v14125_v13 = vld [vmem:[%s21737_s3 + $0x200] ss:$8 sps:$4 sm:$0xff]  }
  0xd4   : > { %13693 = vmatmul.mubr.bf16.vlgmr.msra.gmra.mxu0 %v14533_v18 }
  0xd5   : > { %1535 = vmatmul.mubr.bf16.gmra.mxu1 %v15043_v26  ;;  %13696 = vmatprep.mubr.bf16.mxu0 %v14534_v19  ;;  %v14080_v26 = vld [vmem:[%s21737_s3 + $0x1c0] ss:$8 sps:$4 sm:$0xff]  }
  0xd6   : > { %1542 = vmatprep.mubr.bf16.mxu1 %v15052_v29  ;;  %3664 = vmatpush1.bf16.msra.mxu0 %v14068_v16  ;;  %v14085_v29 = vld [vmem:[%s21737_s3 + $0x1b4] ss:$8 sps:$4 sm:$0xff]  }
  0xd7   : > { %3665 = vmatprep.subr.bf16.mxu0 %v14076_v17  ;;  %v14131_v16 = vld [vmem:[%s21737_s3 + $0x74] ss:$8 sps:$4 sm:$0xff]   ;;  %v12310_v17 = vld [vmem:[%s21736_s2 + $0x1] ss:$2 sm:$0x7] }
  0xda   : > { %3666 = vmatpush1.bf16.msra.mxu0 %v14074_v20 }
  0xdb   : > { %3667 = vmatprep.subr.bf16.mxu0 %v14079_v21 }
  0xdc   : > { %13697 = vmatmul.mubr.bf16.gmra.mxu0 %v14535_v25 }
  0xdd   : > { %1543 = vmatmul.mubr.bf16.gmra.mxu1 %v15065_v32  ;;  %13700 = vmatprep.mubr.bf16.mxu0 %v14536_v27  ;;  %v14537_v32 = vld [vmem:[%s14847_s14 + $0x80] ss:$12 sps:$4 sm:$0xff]  }
  0xde   : > { %1550 = vmatprep.mubr.bf16.mxu1 %v15071_v34  ;;  %3668 = vmatpush1.bf16.msra.mxu0 %v14077_v23  ;;  %v14089_v34 = vld [vmem:[%s21737_s3 + $0x1a0] ss:$8 sps:$4 sm:$0xff]  }
  0xdf   : > { %3669 = vmatprep.subr.bf16.mxu0 %v14082_v24 }
  0xe2   : > { %3670 = vmatpush1.bf16.msra.mxu0 %v14080_v26 }
  0xe3   : > { %3671 = vmatprep.subr.bf16.mxu0 %v14085_v29 }
  0xe4   : > { %13701 = vmatmul.mubr.bf16.gmra.mxu0 %v14537_v32 }
  0xe5   : > { %1551 = vmatmul.mubr.bf16.gmra.mxu1 %v15078_v35  ;;  %13704 = vmatprep.mubr.bf16.mxu0 %v15002_v15  ;;  %v14092_v35 = vld [vmem:[%s21737_s3 + $0x190] ss:$8 sps:$4 sm:$0xff]   ;;  %v14097_v15 = vld [vmem:[%s21737_s3 + $0x184] ss:$8 sps:$4 sm:$0xff]  }
  0xe6   : > { %1558 = vmatprep.mubr.bf16.mxu1 %v15084_v37  ;;  %3672 = vmatpush1.bf16.msra.mxu0 %v14083_v30  ;;  %v14095_v37 = vld [vmem:[%s21737_s3 + $0x180] ss:$8 sps:$4 sm:$0xff]  }
  0xe7   : > { %3673 = vmatprep.subr.bf16.mxu0 %v14091_v31 }
  0xea   : > { %3674 = vmatpush1.bf16.msra.mxu0 %v14089_v34 }
  0xeb   : > { %3675 = vmatprep.subr.bf16.mxu0 %v14094_v55 }
  0xec   : > { %13705 = vmatmul.mubr.bf16.gmra.mxu0 %v15027_v22  ;;  %v14106_v22 = vld [vmem:[%s21737_s3 + $0x264] ss:$8 sps:$4 sm:$0xff]  }
  0xed   : > { %1559 = vmatmul.mubr.bf16.gmra.mxu1 %v15091_v38  ;;  %13708 = vmatprep.mubr.bf16.mxu0 %v15049_v28  ;;  %v14098_v38 = vld [vmem:[%s21737_s3 + $0x270] ss:$8 sps:$4 sm:$0xff]  }
  0xee   : > { %1566 = vmatprep.mubr.bf16.mxu1 %v15097_v40  ;;  %3676 = vmatpush1.bf16.msra.mxu0 %v14092_v35 }
  0xef   : > { %3677 = vmatprep.subr.bf16.mxu0 %v14097_v15 }
  0xf2   : > { %3678 = vmatpush1.bf16.msra.mxu0 %v14095_v37 }
  0xf3   : > { %3679 = vmatprep.subr.bf16.mxu0 %v14100_v57 }
  0xf4   : > { %13709 = vmatmul.mubr.bf16.gmra.mxu0 %v15068_v33  ;;  %v14107_v33 = vld [vmem:[%s21737_s3 + $0x250] ss:$8 sps:$4 sm:$0xff]  }
  0xf5   : > { %v15312_v28 = vpop.f32.mrf.mxu1  ;;  %1567 = vmatmul.mubr.bf16.gmra.mxu1 %v15104_v41  ;;  %13712 = vmatprep.mubr.bf16.mxu0 %v15081_v36  ;;  %v14112_v36 = vld [vmem:[%s21737_s3 + $0x244] ss:$8 sps:$4 sm:$0xff]  }
  0xf6   : > { %1574 = vmatprep.mubr.bf16.mxu1 %v15110_v43  ;;  %3680 = vmatpush2.bf16.msra.mxu0 %v14098_v38 }
  0xf7   : > { %v15318_v40 = vpop.f32.mrf.mxu1  ;;  %3681 = vmatprep.subr.bf16.mxu0 %v14106_v22 }
  0xf9   : > { %v15326_v61 = vpop.f32.mrf.mxu1 }
  0xfa   : > { %3682 = vmatpush2.bf16.msra.mxu0 %v14104_v58 }
  0xfb   : > { %v15328_v41 = vpop.f32.mrf.mxu1  ;;  %3683 = vmatprep.subr.bf16.mxu0 %v14109_v46 }
  0xfc   : > { %21902 = vst [vmem:[#allocation7_spill] sm:$0xff] %v15328_v41  ;;  %13713 = vmatmul.mubr.bf16.gmra.mxu0 %v15094_v39  ;;  %v14113_v39 = vld [vmem:[%s21737_s3 + $0x230] ss:$8 sps:$4 sm:$0xff]  }
  0xfd   : > { %v15336_v43 = vpop.f32.mrf.mxu1  ;;  %1575 = vmatmul.mubr.bf16.gmra.mxu1 %v15117_v44  ;;  %13716 = vmatprep.mubr.bf16.mxu0 %v15107_v42  ;;  %v14121_v42 = vld [vmem:[%s21737_s3 + $0x224] ss:$8 sps:$4 sm:$0xff]  }
  0xfe   : > { %1582 = vmatprep.mubr.bf16.mxu1 %v15123_v47  ;;  %3684 = vmatpush2.bf16.msra.mxu0 %v14107_v33 }
  0xff   : > { %v15342_v62 = vpop.f32.mrf.mxu1  ;;  %3685 = vmatprep.subr.bf16.mxu0 %v14112_v36 }
 0x101   : > { %v15350_v4 = vpop.f32.mrf.mxu1 }
 0x102   : > { %3686 = vmatpush2.bf16.msra.mxu0 %v14110_v63 }
 0x103   : > { %v15352_v44 = vpop.f32.mrf.mxu1  ;;  %3687 = vmatprep.subr.bf16.mxu0 %v14115_v0 }
 0x104   : > { %21903 = vst [vmem:[#allocation8_spill] sm:$0xff] %v15352_v44  ;;  %13717 = vmatmul.mubr.bf16.gmra.mxu0 %v15120_v45 }
 0x105   : > { %v15360_v47 = vpop.f32.mrf.mxu1  ;;  %1583 = vmatmul.mubr.bf16.gmra.mxu1 %v15130_v48  ;;  %13720 = vmatprep.mubr.bf16.mxu0 %v15133_v49  ;;  %v14122_v49 = vld [vmem:[%s21737_s3 + $0x210] ss:$8 sps:$4 sm:$0xff]  }
 0x106   : > { %1590 = vmatprep.mubr.bf16.mxu1 %v15136_v50  ;;  %3688 = vmatpush2.bf16.msra.mxu0 %v14113_v39  ;;  %v15382_v50 = vshrl.u32 %v21742_v7, 7 }
 0x107   : > { %v15366_v5 = vpop.f32.mrf.mxu1  ;;  %3689 = vmatprep.subr.bf16.mxu0 %v14121_v42  ;;  %v21915_v42 = vmov 0 }
 0x108   : > { %21905 = vst [vmem:[#allocation10_spill] sm:$0xff] %v15382_v50  ;;  %v15398_v14 = vsub.s32 0, %v15382_v50  ;;  %v21916_v42 = vsel %vm15468_vm5, 4294967295, %v21915_v42 }
 0x109   : > { %v15374_v48 = vpop.f32.mrf.mxu1  ;;  %21917 = vst [vmem:[#allocation18_spill] sm:$0xff] %v21916_v42 }
 0x10a   : > { %3690 = vmatpush2.bf16.msra.mxu0 %v14119_v6  ;;  %21906 = vst [vmem:[#allocation11_spill] sm:$0xff] %v15398_v14  ;;  %v15421_v23 = vrot.slane %v12310_v17, %v15398_v14 }
 0x10b   : > { %v15376_v45 = vpop.f32.mrf.mxu1  ;;  %3691 = vmatprep.subr.bf16.mxu0 %v14124_v9 }
 0x10c   : > { %21904 = vst [vmem:[#allocation9_spill] sm:$0xff] %v15376_v45  ;;  %13721 = vmatmul.mubr.bf16.gmra.mxu0 %v15146_v52  ;;  %v1792_v52 = vld [vmem:[%s21736_s2] ss:$2 sm:$0x7] }
 0x10d   : > { %v15387_v11 = vpop.f32.mrf.mxu1  ;;  %1591 = vmatmul.mubr.bf16.gmra.mxu1 %v15143_v51  ;;  %v15414_v18 = vrot.slane %v1792_v52, %v15398_v14 }
 0x10e   : > { %1598 = vmatprep.mubr.bf16.mxu1 %v15149_v53  ;;  %3692 = vmatpush2.bf16.msra.mxu0 %v14122_v49 }
 0x10f   : > { %v15392_v12 = vpop.f32.mrf.mxu1  ;;  %3693 = vmatprep.subr.bf16.mxu0 %v14127_v10 }
 0x111   : > { %v15403_v51 = vpop.f32.mrf.mxu1 }
 0x112   : > { %3694 = vmatpush2.bf16.msra.mxu0 %v14125_v13 }
 0x113   : > { %v15408_v53 = vpop.f32.mrf.mxu1  ;;  %4545 = vmatprep.subr.bf16.mxu0 %v14131_v16 }
 0x114   : > { %21907 = vst [vmem:[#allocation12_spill] sm:$0xff] %v15408_v53  ;;  %v1118_v19 = vpop.f32.mrf.mxu0 }
 0x115   : > { %v15416_v20 = vpop.f32.mrf.mxu1  ;;  %1599 = vmatmul.mubr.bf16.gmra.mxu1 %v15156_v54  ;;  %v1312_v21 = vadd.f32 %v15312_v28, %v1118_v19 }
 0x116   : > { %1606 = vmatprep.mubr.bf16.mxu1 %v15162_v56  ;;  %v1120_v24 = vpop.f32.mrf.mxu0 }
 0x117   : > { %v15424_v25 = vpop.f32.mrf.mxu1  ;;  %v1809_v26 = vmul.f32 %v15414_v18, %v1312_v21  ;;  %v15428_v27 = vadd.f32 %v15318_v40, %v1120_v24 }
 0x118   : > { %v1122_v29 = vpop.f32.mrf.mxu0 }
 0x119   : > { %21908 = vst [vmem:[#allocation13_spill] sm:$0xff] %v15428_v27  ;;  %v15430_v30 = vpop.f32.mrf.mxu1  ;;  %v1923_v54 = vadd.f32 %v15421_v23, %v1809_v26  ;;  %v1316_v31 = vadd.f32 %v15326_v61, %v1122_v29 }
 0x11a   : > { %v15434_v32 = vpop.f32.mrf.mxu0 }
 0x11b   : > { %21909 = vst [vmem:[#allocation14_spill] sm:$0xff] %v15434_v32  ;;  %v15436_v34 = vpop.f32.mrf.mxu1  ;;  %v15438_v56 = vmax.f32 %v1923_v54, 0.0  ;;  %v1812_v55 = vmul.f32 %v15414_v18, %v1316_v31 }
 0x11c   : > { %21910 = vst [vmem:[#allocation15_spill] sm:$0xff] %v15436_v34  ;;  %v1128_v35 = vpop.f32.mrf.mxu0 }
 0x11d   : > { %v15441_v15 = vpop.f32.mrf.mxu1  ;;  %1607 = vmatmul.mubr.bf16.gmra.mxu1 %v15178_v59  ;;  %v2083_v37 = vpack.c.bf16 %v15438_v56, %v15438_v56  ;;  %v1926_v57 = vadd.f32 %v15421_v23, %v1812_v55  ;;  %v1322_v38 = vadd.f32 %v15336_v43, %v1128_v35  ;;  %v21912_v43 = vmov 0 }
 0x11e   : > { %1614 = vmatprep.mubr.bf16.mxu1 %v15181_v60  ;;  %v1130_v22 = vpop.f32.mrf.mxu0  ;;  %v21913_v43 = vsel %vm15460_vm4, 4294967295, %v21912_v43 }
 0x11f   : > { %v15449_v28 = vpop.f32.mrf.mxu1  ;;  %v2116_v40 = vshrl.u32 %v2083_v37, 16  ;;  %v2119_v58 = vshll.u32 %v2083_v37, 16  ;;  %v15451_v46 = vmax.f32 %v1926_v57, 0.0  ;;  %v1815_v59 = vmul.f32 %v15414_v18, %v1322_v38  ;;  %21914 = vst [vmem:[#allocation17_spill] sm:$0xff] %v21913_v43 }
 0x120   : > { %v15455_v61 = vadd.f32 %v15342_v62, %v1130_v22  ;;  %v1132_v33 = vpop.f32.mrf.mxu0 }
 0x121   : > { %v15457_v36 = vpop.f32.mrf.mxu1  ;;  %v2118_v60 = vrot.slane %v2116_v40, 7  ;;  %v2406_v63 = vrot.slane %v2119_v58, 1  ;;  %v2084_v0 = vpack.c.bf16 %v15451_v46, %v15451_v46  ;;  %v1326_v39 = vadd.f32 %v15350_v4, %v1132_v33 }
 0x122   : > { %21911 = vst [vmem:[#allocation16_spill] sm:$0xff] %v15455_v61  ;;  %v1929_v62 = vadd.f32 %v15421_v23, %v1815_v59  ;;  %v15473_v6 = vpop.f32.mrf.mxu0 }
 0x123   : > { %21918 = vst [vmem:[#allocation19_spill] sm:$0xff] %v15473_v6  ;;  %v15475_v9 = vpop.f32.mrf.mxu1  ;;  %v2121_v49 = vor.u32 %v2119_v58, %v2118_v60  ;;  %v2407_v10 = vor.u32 %v2406_v63, %v2116_v40  ;;  %v2123_v13 = vshrl.u32 %v2084_v0, 16  ;;  %v2126_v16 = vshll.u32 %v2084_v0, 16 }
 0x124   : > { %21919 = vst [vmem:[#allocation20_spill] sm:$0xff] %v15475_v9  ;;  %v15477_v52 = vmax.f32 %v1929_v62, 0.0  ;;  %v1818_v17 = vmul.f32 %v15414_v18, %v1326_v39  ;;  %v1138_v4 = vpop.f32.mrf.mxu0  ;;  %v14143_v9 = vld [vmem:[%s21737_s3 + $0x160] ss:$8 sps:$4 sm:$0xff]  }
 0x125   : > { %v15480_v19 = vpop.f32.mrf.mxu1  ;;  %1615 = vmatmul.mubr.bf16.gmra.mxu1 %v15200_v1  ;;  %v15485_v21 = vsel %vm15460_vm4, 0, %v2121_v49  ;;  %v2505_v24 = vsel %vm15468_vm5, %v2407_v10, 0  ;;  %v2125_v26 = vrot.slane %v2123_v13, 7  ;;  %v2408_v29 = vrot.slane %v2126_v16, 1 }
 0x126   : > { %1622 = vmatprep.mubr.bf16.mxu1 %v15203_v3  ;;  %v12312_v54 = vcombine.low %v15485_v21, %v2083_v37  ;;  %v12313_v31 = vcombine.low %v2505_v24, %v2505_v24  ;;  %v2085_v55 = vpack.c.bf16 %v15477_v52, %v15477_v52  ;;  %v1932_v35 = vadd.f32 %v15421_v23, %v1818_v17  ;;  %v1140_v1 = vpop.f32.mrf.mxu0 }
 0x127   : > { %v15494_v57 = vpop.f32.mrf.mxu1  ;;  %v2128_v38 = vor.u32 %v2126_v16, %v2125_v26  ;;  %v2409_v22 = vor.u32 %v2408_v29, %v2123_v13  ;;  %v1332_v40 = vadd.f32 %v15360_v47, %v1138_v4  ;;  %v15500_v37 = vadd.f32 %v15366_v5, %v1140_v1 }
 0x128   : > { %2863 = vst [vmem:[#allocation2 + $0xc] sm:$0xff] %v12312_v54  ;;  %2864 = vst [vmem:[#allocation2 + $0x14] sm:$0xf] %v12313_v31  ;;  %v2130_v58 = vshrl.u32 %v2085_v55, 16  ;;  %v2133_v59 = vshll.u32 %v2085_v55, 16  ;;  %v15497_v3 = vmax.f32 %v1932_v35, 0.0  ;;  %v1142_v33 = vpop.f32.mrf.mxu0 }
 0x129   : > { %21920 = vst [vmem:[#allocation21_spill] sm:$0xff] %v15500_v37  ;;  %v15502_v60 = vpop.f32.mrf.mxu1  ;;  %v15506_v63 = vsel %vm15460_vm4, 0, %v2128_v38  ;;  %v2506_v39 = vsel %vm15468_vm5, %v2409_v22, 0  ;;  %v1821_v47 = vmul.f32 %v15414_v18, %v1332_v40  ;;  %v1336_v24 = vadd.f32 %v15374_v48, %v1142_v33 }
 0x12a   : > { %v12314_v62 = vcombine.low %v15506_v63, %v2084_v0  ;;  %v12315_v49 = vcombine.low %v2506_v39, %v2506_v39  ;;  %v2132_v10 = vrot.slane %v2130_v58, 7  ;;  %v2410_v13 = vrot.slane %v2133_v59, 1  ;;  %v15512_v16 = vpop.f32.mrf.mxu0 }
 0x12b   : > { %21921 = vst [vmem:[#allocation22_spill] sm:$0xff] %v15512_v16  ;;  %v15514_v5 = vpop.f32.mrf.mxu1  ;;  %v2086_v17 = vpack.c.bf16 %v15497_v3, %v15497_v3  ;;  %v1935_v4 = vadd.f32 %v15421_v23, %v1821_v47  ;;  %v1824_v22 = vmul.f32 %v15414_v18, %v1336_v24 }
 0x12c   : > { %21922 = vst [vmem:[#allocation23_spill] sm:$0xff] %v15514_v5  ;;  %2865 = vst [vmem:[#allocation2 + $0x18] sm:$0xff] %v12314_v62  ;;  %v2135_v26 = vor.u32 %v2133_v59, %v2132_v10  ;;  %v2411_v29 = vor.u32 %v2410_v13, %v2130_v58  ;;  %v1148_v54 = vpop.f32.mrf.mxu0 }
 0x12d   : > { %2866 = vst [vmem:[#allocation2 + $0x20] sm:$0xf] %v12315_v49  ;;  %v15520_v0 = vpop.f32.mrf.mxu1  ;;  %1623 = vmatmul.mubr.bf16.gmra.mxu1 %v15222_v8  ;;  %v2137_v31 = vshrl.u32 %v2086_v17, 16  ;;  %v2140_v35 = vshll.u32 %v2086_v17, 16  ;;  %v15523_v1 = vmax.f32 %v1935_v4, 0.0  ;;  %v1938_v62 = vadd.f32 %v15421_v23, %v1824_v22 }
 0x12e   : > { %3888 = vmatprep.mubr.bf16.mxu1 %v21743_v2  ;;  %v15528_v38 = vsel %vm15460_vm4, 0, %v2135_v26  ;;  %v2507_v48 = vsel %vm15468_vm5, %v2411_v29, 0  ;;  %v1150_v40 = vpop.f32.mrf.mxu0  ;;  %v1342_v49 = vadd.f32 %v15387_v11, %v1148_v54  ;;  %v14132_v29 = vld [vmem:[%s21737_s3 + $0x170] ss:$8 sps:$4 sm:$0xff]  }
 0x12f   : > { %v15533_v58 = vpop.f32.mrf.mxu1  ;;  %v12316_v8 = vcombine.low %v15528_v38, %v2085_v55  ;;  %v12317_v59 = vcombine.low %v2507_v48, %v2507_v48  ;;  %v2139_v33 = vrot.slane %v2137_v31, 7  ;;  %v2412_v39 = vrot.slane %v2140_v35, 1 }
 0x130   : > { %v15538_v47 = vpack.c.bf16 %v15523_v1, %v15523_v1  ;;  %v1152_v10 = vpop.f32.mrf.mxu0  ;;  %v15545_v55 = vadd.f32 %v15392_v12, %v1150_v40  ;;  %v15553_v54 = vmax.f32 %v1938_v62, 0.0  ;;  %v1827_v22 = vmul.f32 %v15414_v18, %v1342_v49  ;;  %v14145_v12 = vld [vmem:[%s21737_s3 + $0x164] ss:$8 sps:$4 sm:$0xff]  }
 0x131   : > { %v15542_v13 = vpop.f32.mrf.mxu1  ;;  %2867 = vst [vmem:[#allocation2 + $0x24] sm:$0xff] %v12316_v8  ;;  %2868 = vst [vmem:[#allocation2 + $0x2c] sm:$0xf] %v12317_v59  ;;  %v2142_v4 = vor.u32 %v2140_v35, %v2139_v33  ;;  %v2413_v24 = vor.u32 %v2412_v39, %v2137_v31  ;;  %v1346_v26 = vadd.f32 %v15403_v51, %v1152_v10 }
 0x132   : > { %21923 = vst [vmem:[#allocation24_spill] sm:$0xff] %v15545_v55  ;;  %v2144_v48 = vshrl.u32 %v15538_v47, 16  ;;  %v2147_v11 = vshll.u32 %v15538_v47, 16  ;;  %v15556_v8 = vpop.f32.mrf.mxu0  ;;  %v15575_v2 = vpack.c.bf16 %v15553_v54, %v15553_v54 }
 0x133   : > { %21924 = vst [vmem:[#allocation25_spill] sm:$0xff] %v15556_v8  ;;  %v15558_v31 = vpop.f32.mrf.mxu1  ;;  %v15565_v51 = vsel %vm15460_vm4, 0, %v2142_v4  ;;  %v2508_v35 = vsel %vm15468_vm5, %v2413_v24, 0  ;;  %v1830_v40 = vmul.f32 %v15414_v18, %v1346_v26  ;;  %v1941_v4 = vadd.f32 %v15421_v23, %v1827_v22 }
 0x134   : > { %21925 = vst [vmem:[#allocation26_spill] sm:$0xff] %v15558_v31  ;;  %v14128_v59 = vld [vmem:[#allocation2 + $0x14] ss:$12 sps:$4 sm:$0xff]   ;;  %v12318_v33 = vcombine.low %v15565_v51, %v2086_v17  ;;  %v12319_v39 = vcombine.low %v2508_v35, %v2508_v35  ;;  %v2146_v62 = vrot.slane %v2144_v48, 7  ;;  %v2414_v49 = vrot.slane %v2147_v11, 1  ;;  %v1158_v10 = vpop.f32.mrf.mxu0 }
 0x135   : > { %v15571_v7 = vpop.f32.mrf.mxu1  ;;  %v1944_v31 = vadd.f32 %v15421_v23, %v1830_v40  ;;  %3889 = vmatmul.mubr.bf16.vlgmr.msra.gmra.mxu1 %v14128_v59  ;;  %v1352_v17 = vadd.f32 %v15416_v20, %v1158_v10  ;;  %v2151_v34 = vshrl.u32 %v15575_v2, 16  ;;  %v2154_v22 = vshll.u32 %v15575_v2, 16  ;;  %v14156_v20 = vld [vmem:[%s21737_s3 + $0x154] ss:$8 sps:$4 sm:$0xff]  }
 0x136   : > { %2869 = vst [vmem:[#allocation2 + $0x30] sm:$0xff] %v12318_v33  ;;  %2870 = vst [vmem:[#allocation2 + $0x38] sm:$0xf] %v12319_v39  ;;  %v2149_v24 = vor.u32 %v2147_v11, %v2146_v62  ;;  %v2415_v26 = vor.u32 %v2414_v49, %v2144_v48  ;;  %v1160_v35 = vpop.f32.mrf.mxu0  ;;  %4739 = vmatpush1.bf16.msra.mxu1 %v14132_v29  ;;  %v15587_v40 = vmax.f32 %v1941_v4, 0.0  ;;  %v21926_v11 = vmov 0  }
 0x137   : > { %v15580_v5 = vpop.f32.mrf.mxu1  ;;  %v15589_v59 = vmax.f32 %v1944_v31, 0.0  ;;  %3898 = vmatprep.mubr.bf16.mxu1 %v21926_v11  ;;  %4740 = vmatprep.subr.bf16.mxu1 %v14145_v12  ;;  %v1833_v33 = vmul.f32 %v15414_v18, %v1352_v17  ;;  %v2153_v49 = vrot.slane %v2151_v34, 7  ;;  %v2416_v10 = vrot.slane %v2154_v22, 1 }
 0x138   : > { %v15597_v29 = vsel %vm15460_vm4, 0, %v2149_v24  ;;  %v2509_v48 = vsel %vm15468_vm5, %v2415_v26, 0  ;;  %v1162_v39 = vpop.f32.mrf.mxu0  ;;  %v15608_v4 = vpack.c.bf16 %v15587_v40, %v15587_v40  ;;  %v14543_v17 = vcombine.low %v15485_v21, %v15506_v63  ;;  %v14129_v21 = vld [vmem:[%s21737_s3 + $0x70] ss:$8 sps:$4 sm:$0xff]  }
 0x139   : > { %v15602_v62 = vpop.f32.mrf.mxu1  ;;  %v12320_v31 = vcombine.low %v15597_v29, %v15538_v47  ;;  %v12321_v12 = vcombine.low %v2509_v48, %v2509_v48  ;;  %v15612_v24 = vpack.c.bf16 %v15589_v59, %v15589_v59  ;;  %v1947_v26 = vadd.f32 %v15421_v23, %v1833_v33  ;;  %v14154_v47 = vld [vmem:[%s21737_s3 + $0x150] ss:$8 sps:$4 sm:$0xff]  }
 0x13a   : > { %v15617_v53 = vpop.f32.mrf.mxu0  ;;  %4741 = vmatpush1.bf16.msra.mxu1 %v14143_v9  ;;  %v2156_v48 = vor.u32 %v2154_v22, %v2153_v49  ;;  %v2417_v55 = vor.u32 %v2416_v10, %v2151_v34  ;;  %v15625_v37 = vadd.f32 %v15424_v25, %v1160_v35  ;;  %v14544_v33 = vpack.c.bf16 %v15451_v46, %v15438_v56  ;;  %v14167_v9 = vld [vmem:[%s21737_s3 + $0x144] ss:$8 sps:$4 sm:$0xff]  }
 0x13b   : > { %21927 = vst [vmem:[#allocation27_spill] sm:$0xff] %v15617_v53  ;;  %v15619_v8 = vpop.f32.mrf.mxu1  ;;  %2871 = vst [vmem:[#allocation2 + $0x3c] sm:$0xff] %v12320_v31  ;;  %4742 = vmatprep.subr.bf16.mxu1 %v14156_v20  ;;  %v2158_v63 = vshrl.u32 %v15608_v4, 16  ;;  %v2161_v22 = vshll.u32 %v15608_v4, 16  ;;  %v2165_v34 = vshrl.u32 %v15612_v24, 16  ;;  %v2168_v25 = vshll.u32 %v15612_v24, 16 }
 0x13c   : > { %21928 = vst [vmem:[#allocation28_spill] sm:$0xff] %v15619_v8  ;;  %2872 = vst [vmem:[#allocation2 + $0x44] sm:$0xf] %v12321_v12  ;;  %v15639_v35 = vpop.f32.mrf.mxu0  ;;  %v14138_v46 = vld [vmem:[%s21737_s3 + $0x64] ss:$8 sps:$4 sm:$0xff]   ;;  %v15648_v20 = vsel %vm15460_vm4, 0, %v2156_v48  ;;  %3695 = vmatprep.mubr.bf16.mxu0 %v14544_v33  ;;  %v1356_v44 = vadd.f32 %v15430_v30, %v1162_v39 }
 0x13d   : > { %21929 = vst [vmem:[#allocation29_spill] sm:$0xff] %v15625_v37  ;;  %v15641_v56 = vpop.f32.mrf.mxu1  ;;  %v2510_v31 = vsel %vm15468_vm5, %v2417_v55, 0  ;;  %v15652_v12 = vmax.f32 %v1947_v26, 0.0  ;;  %v12322_v49 = vcombine.low %v15648_v20, %v15575_v2  ;;  %v2160_v8 = vrot.slane %v2158_v63, 7  ;;  %3696 = vmatmul.mubr.bf16.vlgmr.msra.gmra.mxu0 %v14543_v17  ;;  %v14135_v16 = vld [vmem:[#allocation2 + $0x2c] ss:$12 sps:$4 sm:$0xff]  }
 0x13e   : > { %v12323_v10 = vcombine.low %v2510_v31, %v2510_v31  ;;  %v2418_v37 = vrot.slane %v2161_v22, 1  ;;  %v1170_v53 = vpop.f32.mrf.mxu0  ;;  %4743 = vmatpush1.bf16.msra.mxu1 %v14154_v47  ;;  %v14165_v48 = vld [vmem:[%s21737_s3 + $0x140] ss:$8 sps:$4 sm:$0xff]   ;;  %v2167_v55 = vrot.slane %v2165_v34, 7  ;;  %v2420_v26 = vrot.slane %v2168_v25, 1  ;;  %4546 = vmatpush1.bf16.msra.mxu0 %v14129_v21 }
 0x13f   : > { %v15656_v45 = vpop.f32.mrf.mxu1  ;;  %v15663_v33 = vpack.c.bf16 %v15652_v12, %v15652_v12  ;;  %v14136_v2 = vld [vmem:[%s21737_s3 + $0x60] ss:$8 sps:$4 sm:$0xff]   ;;  %4744 = vmatprep.subr.bf16.mxu1 %v14167_v9  ;;  %v14178_v17 = vld [vmem:[%s21737_s3 + $0x134] ss:$8 sps:$4 sm:$0xff]   ;;  %2873 = vst [vmem:[#allocation2 + $0x48] sm:$0xff] %v12322_v49  ;;  %v2163_v47 = vor.u32 %v2161_v22, %v2160_v8  ;;  %3899 = vmatmul.mubr.bf16.gmra.mxu1 %v14135_v16 }
 0x140   : > { %2874 = vst [vmem:[#allocation2 + $0x50] sm:$0xf] %v12323_v10  ;;  %v2419_v31 = vor.u32 %v2418_v37, %v2158_v63  ;;  %v1172_v6 = vpop.f32.mrf.mxu0  ;;  %v14142_v21 = vld [vmem:[%s21737_s3 + $0x54] ss:$8 sps:$4 sm:$0xff]   ;;  %v2170_v27 = vor.u32 %v2168_v25, %v2167_v55  ;;  %v2421_v9 = vor.u32 %v2420_v26, %v2165_v34  ;;  %4547 = vmatprep.subr.bf16.mxu0 %v14138_v46  ;;  %v14140_v30 = vld [vmem:[%s21737_s3 + $0x50] ss:$8 sps:$4 sm:$0xff]  }
 0x141   : > { %v15672_v61 = vpop.f32.mrf.mxu1  ;;  %v2172_v41 = vshrl.u32 %v15663_v33, 16  ;;  %v2175_v32 = vshll.u32 %v15663_v33, 16  ;;  %3908 = vmatprep.mubr.bf16.mxu1 %v21926_v11  ;;  %v15685_v37 = vsel %vm15460_vm4, 0, %v2163_v47  ;;  %v1836_v8 = vmul.f32 %v15414_v18, %v1356_v44  ;;  %v14176_v22 = vld [vmem:[%s21737_s3 + $0x130] ss:$8 sps:$4 sm:$0xff]  }
 0x142   : > { %v2511_v16 = vsel %vm15468_vm5, %v2419_v31, 0  ;;  %v15690_v39 = vpop.f32.mrf.mxu0  ;;  %4745 = vmatpush1.bf16.msra.mxu1 %v14165_v48  ;;  %v12324_v34 = vcombine.low %v15685_v37, %v15608_v4  ;;  %v15701_v46 = vsel %vm15460_vm4, 0, %v2170_v27  ;;  %v2512_v44 = vsel %vm15468_vm5, %v2421_v9, 0  ;;  %4548 = vmatpush1.bf16.msra.mxu0 %v14136_v2  ;;  %v14149_v49 = vld [vmem:[%s21737_s3 + $0x44] ss:$8 sps:$4 sm:$0xff]  }
 0x143   : > { %21930 = vst [vmem:[#allocation30_spill] sm:$0xff] %v15690_v39  ;;  %v15692_v63 = vpop.f32.mrf.mxu1  ;;  %v12325_v25 = vcombine.low %v2511_v16, %v2511_v16  ;;  %4746 = vmatprep.subr.bf16.mxu1 %v14178_v17  ;;  %v14189_v10 = vld [vmem:[%s21737_s3 + $0x124] ss:$8 sps:$4 sm:$0xff]   ;;  %v12326_v4 = vcombine.low %v15701_v46, %v15612_v24  ;;  %v12327_v48 = vcombine.low %v2512_v44, %v2512_v44  ;;  %v2174_v55 = vrot.slane %v2172_v41, 7  ;;  %v14187_v44 = vld [vmem:[%s21737_s3 + $0x120] ss:$8 sps:$4 sm:$0xff]  }
 0x144   : > { %21931 = vst [vmem:[#allocation31_spill] sm:$0xff] %v15692_v63  ;;  %v2422_v27 = vrot.slane %v2175_v32, 1  ;;  %v1178_v26 = vpop.f32.mrf.mxu0  ;;  %4549 = vmatprep.subr.bf16.mxu0 %v14142_v21  ;;  %2875 = vst [vmem:[#allocation2 + $0x54] sm:$0xff] %v12324_v34  ;;  %v1950_v2 = vadd.f32 %v15421_v23, %v1836_v8  ;;  %v1362_v17 = vadd.f32 %v15441_v15, %v15639_v35  ;;  %v14147_v15 = vld [vmem:[%s21737_s3 + $0x40] ss:$8 sps:$4 sm:$0xff]  }
 0x145   : > { %v15713_v47 = vpop.f32.mrf.mxu1  ;;  %2876 = vst [vmem:[#allocation2 + $0x5c] sm:$0xf] %v12325_v25  ;;  %v15719_v31 = vadd.f32 %v15449_v28, %v1170_v53  ;;  %2877 = vst [vmem:[#allocation2 + $0x60] sm:$0xff] %v12326_v4  ;;  %v2177_v24 = vor.u32 %v2175_v32, %v2174_v55  ;;  %v14545_v16 = vpack.c.bf16 %v15497_v3, %v15477_v52  ;;  %v14153_v53 = vld [vmem:[%s21737_s3 + $0x34] ss:$8 sps:$4 sm:$0xff]  }
 0x146   : > { %2878 = vst [vmem:[#allocation2 + $0x68] sm:$0xf] %v12327_v48  ;;  %v2423_v9 = vor.u32 %v2422_v27, %v2172_v41  ;;  %v14546_v21 = vcombine.low %v15528_v38, %v15565_v51  ;;  %v1180_v34 = vpop.f32.mrf.mxu0  ;;  %4747 = vmatpush1.bf16.msra.mxu1 %v14176_v22  ;;  %v15733_v32 = vmax.f32 %v1950_v2, 0.0  ;;  %v1839_v41 = vmul.f32 %v15414_v18, %v1362_v17  ;;  %v14151_v4 = vld [vmem:[%s21737_s3 + $0x30] ss:$8 sps:$4 sm:$0xff]  }
 0x147   : > { %21932 = vst [vmem:[#allocation32_spill] sm:$0xff] %v15719_v31  ;;  %v15725_v25 = vpop.f32.mrf.mxu1  ;;  %v1366_v28 = vadd.f32 %v15457_v36, %v1172_v6  ;;  %v14139_v52 = vld [vmem:[#allocation2 + $0x44] ss:$12 sps:$4 sm:$0xff]   ;;  %4550 = vmatpush1.bf16.msra.mxu0 %v14140_v30  ;;  %4748 = vmatprep.subr.bf16.mxu1 %v14189_v10  ;;  %v15739_v3 = vsel %vm15460_vm4, 0, %v2177_v24  ;;  %v1372_v51 = vadd.f32 %v15480_v19, %v1178_v26  ;;  %v14200_v55 = vld [vmem:[%s21737_s3 + $0x114] ss:$8 sps:$4 sm:$0xff]  }
 0x148   : > { %v2513_v38 = vsel %vm15468_vm5, %v2423_v9, 0  ;;  %3705 = vmatprep.mubr.bf16.mxu0 %v14545_v16  ;;  %v1182_v35 = vpop.f32.mrf.mxu0  ;;  %4551 = vmatprep.subr.bf16.mxu0 %v14149_v49  ;;  %v12328_v36 = vcombine.low %v15739_v3, %v15663_v33  ;;  %v15750_v30 = vpack.c.bf16 %v15733_v32, %v15733_v32  ;;  %v1953_v22 = vadd.f32 %v15421_v23, %v1839_v41  ;;  %v14160_v48 = vld [vmem:[%s21737_s3 + $0x24] ss:$8 sps:$4 sm:$0xff]   ;;  %v14198_v24 = vld [vmem:[%s21737_s3 + $0x110] ss:$8 sps:$4 sm:$0xff]  }
 0x149   : > { %v15744_v8 = vpop.f32.mrf.mxu1  ;;  %v12329_v6 = vcombine.low %v2513_v38, %v2513_v38  ;;  %3706 = vmatmul.mubr.bf16.gmra.mxu0 %v14546_v21  ;;  %v1842_v19 = vmul.f32 %v15414_v18, %v1366_v28  ;;  %v1845_v10 = vmul.f32 %v15414_v18, %v1372_v51  ;;  %3909 = vmatmul.mubr.bf16.gmra.mxu1 %v14139_v52 }
 0x14a   : > { %v15758_v49 = vpop.f32.mrf.mxu0  ;;  %2883 = vst [vmem:[#allocation2 + $0x84] sm:$0xff] %v12328_v36  ;;  %v2179_v27 = vshrl.u32 %v15750_v30, 16  ;;  %v2182_v26 = vshll.u32 %v15750_v30, 16  ;;  %v15773_v2 = vmax.f32 %v1953_v22, 0.0  ;;  %v15776_v17 = vadd.f32 %v15494_v57, %v1180_v34  ;;  %3918 = vmatprep.mubr.bf16.mxu1 %v21926_v11  ;;  %v14211_v57 = vld [vmem:[%s21737_s3 + $0x104] ss:$8 sps:$4 sm:$0xff]   ;;  %4749 = vmatpush1.bf16.msra.mxu1 %v14187_v44 }
 0x14b   : > { %21933 = vst [vmem:[#allocation33_spill] sm:$0xff] %v15758_v49  ;;  %v15760_v33 = vpop.f32.mrf.mxu1  ;;  %2884 = vst [vmem:[#allocation2 + $0x8c] sm:$0xf] %v12329_v6  ;;  %4552 = vmatpush1.bf16.msra.mxu0 %v14147_v15  ;;  %v1956_v9 = vadd.f32 %v15421_v23, %v1842_v19  ;;  %v1959_v16 = vadd.f32 %v15421_v23, %v1845_v10  ;;  %v14547_v21 = vpack.c.bf16 %v15553_v54, %v15523_v1 }
 0x14c   : > { %21934 = vst [vmem:[#allocation34_spill] sm:$0xff] %v15760_v33  ;;  %21935 = vst [vmem:[#allocation35_spill] sm:$0xff] %v15776_v17  ;;  %v15786_v41 = vpop.f32.mrf.mxu0  ;;  %4553 = vmatprep.subr.bf16.mxu0 %v14153_v53  ;;  %v2181_v34 = vrot.slane %v2179_v27, 7  ;;  %v2424_v15 = vrot.slane %v2182_v26, 1  ;;  %v15795_v52 = vpack.c.bf16 %v15773_v2, %v15773_v2  ;;  %v14548_v54 = vcombine.low %v15597_v29, %v15648_v20 }
 0x14d   : > { %v15788_v28 = vpop.f32.mrf.mxu1  ;;  %v14146_v38 = vld [vmem:[#allocation2 + $0x5c] ss:$12 sps:$4 sm:$0xff]   ;;  %v15797_v51 = vmax.f32 %v1956_v9, 0.0  ;;  %v15799_v1 = vmax.f32 %v1959_v16, 0.0  ;;  %3715 = vmatprep.mubr.bf16.mxu0 %v14547_v21  ;;  %v1376_v53 = vadd.f32 %v15502_v60, %v1182_v35  ;;  %4750 = vmatprep.subr.bf16.mxu1 %v14200_v55 }
 0x14e   : > { %v15804_v36 = vpop.f32.mrf.mxu0  ;;  %v2184_v22 = vor.u32 %v2182_v26, %v2181_v34  ;;  %v2425_v19 = vor.u32 %v2424_v15, %v2179_v27  ;;  %v2186_v10 = vshrl.u32 %v15795_v52, 16  ;;  %v2189_v44 = vshll.u32 %v15795_v52, 16  ;;  %v14158_v9 = vld [vmem:[%s21737_s3 + $0x20] ss:$8 sps:$4 sm:$0xff]   ;;  %4751 = vmatpush1.bf16.msra.mxu1 %v14198_v24 }
 0x14f   : > { %v15806_v6 = vpop.f32.mrf.mxu1  ;;  %4554 = vmatpush1.bf16.msra.mxu0 %v14151_v4  ;;  %v15815_v29 = vpack.c.bf16 %v15797_v51, %v15797_v51  ;;  %v15819_v60 = vpack.c.bf16 %v15799_v1, %v15799_v1  ;;  %v1848_v20 = vmul.f32 %v15414_v18, %v1376_v53  ;;  %v14164_v4 = vld [vmem:[%s21737_s3 + $0x14] ss:$8 sps:$4 sm:$0xff]   ;;  %v14209_v34 = vld [vmem:[%s21737_s3 + $0x100] ss:$8 sps:$4 sm:$0xff]   ;;  %4752 = vmatprep.subr.bf16.mxu1 %v14211_v57 }
 0x150   : > { %v15822_v35 = vpop.f32.mrf.mxu0  ;;  %4555 = vmatprep.subr.bf16.mxu0 %v14160_v48  ;;  %v15831_v27 = vsel %vm15460_vm4, 0, %v2184_v22  ;;  %v2514_v26 = vsel %vm15468_vm5, %v2425_v19, 0  ;;  %v2188_v16 = vrot.slane %v2186_v10, 7  ;;  %v2426_v21 = vrot.slane %v2189_v44, 1 }
 0x151   : > { %v15824_v55 = vpop.f32.mrf.mxu1  ;;  %3716 = vmatmul.mubr.bf16.gmra.mxu0 %v14548_v54  ;;  %v12330_v48 = vcombine.low %v15831_v27, %v15750_v30  ;;  %v12331_v15 = vcombine.low %v2514_v26, %v2514_v26  ;;  %v2193_v53 = vshrl.u32 %v15815_v29, 16  ;;  %v2196_v22 = vshll.u32 %v15815_v29, 16  ;;  %3919 = vmatmul.mubr.bf16.gmra.mxu1 %v14146_v38  ;;  %v14162_v30 = vld [vmem:[%s21737_s3 + $0x10] ss:$8 sps:$4 sm:$0xff]   ;;  %v14222_v38 = vld [vmem:[%s21737_s3 + $0x474] ss:$8 sps:$4 sm:$0xff]  }
 0x152   : > { %v15842_v33 = vpop.f32.mrf.mxu0  ;;  %v2191_v54 = vor.u32 %v2189_v44, %v2188_v16  ;;  %v2427_v24 = vor.u32 %v2426_v21, %v2186_v10  ;;  %v2200_v63 = vshrl.u32 %v15819_v60, 16  ;;  %v2203_v17 = vshll.u32 %v15819_v60, 16  ;;  %3928 = vmatprep.mubr.bf16.mxu1 %v21926_v11  ;;  %4753 = vmatpush1.bf16.msra.mxu1 %v14209_v34 }
 0x153   : > { %21936 = vst [vmem:[#allocation36_spill] sm:$0xff] %v15842_v33  ;;  %v15844_v19 = vpop.f32.mrf.mxu1  ;;  %4556 = vmatpush1.bf16.msra.mxu0 %v14158_v9  ;;  %2885 = vst [vmem:[#allocation2 + $0x90] sm:$0xff] %v12330_v48  ;;  %v2195_v57 = vrot.slane %v2193_v53, 7  ;;  %v2428_v44 = vrot.slane %v2196_v22, 1  ;;  %v1962_v10 = vadd.f32 %v15421_v23, %v1848_v20  ;;  %v14171_v9 = vld [vmem:[%s21737_s3 + $0x4] ss:$8 sps:$4 sm:$0xff]   ;;  %5734 = vmatprep.subr.bf16.mxu1 %v14222_v38 }
 0x154   : > { %21937 = vst [vmem:[#allocation37_spill] sm:$0xff] %v15844_v19  ;;  %2886 = vst [vmem:[#allocation2 + $0x98] sm:$0xf] %v12331_v15  ;;  %v1198_v26 = vpop.f32.mrf.mxu0  ;;  %4557 = vmatprep.subr.bf16.mxu0 %v14164_v4  ;;  %v15863_v21 = vsel %vm15460_vm4, 0, %v2191_v54  ;;  %v2515_v48 = vsel %vm15468_vm5, %v2427_v24, 0  ;;  %v2202_v15 = vrot.slane %v2200_v63, 7 }
 0x155   : > { %v15856_v16 = vpop.f32.mrf.mxu1  ;;  %v2430_v19 = vrot.slane %v2203_v17, 1  ;;  %v12332_v20 = vcombine.low %v15863_v21, %v15795_v52  ;;  %v12333_v33 = vcombine.low %v2515_v48, %v2515_v48  ;;  %v2198_v49 = vor.u32 %v2196_v22, %v2195_v57  ;;  %v14169_v24 = vld [vmem:[%s21737_s3] ss:$8 sps:$4 sm:$0xff]  }
 0x156   : > { %v2429_v4 = vor.u32 %v2428_v44, %v2193_v53  ;;  %v1200_v39 = vpop.f32.mrf.mxu0  ;;  %v2205_v14 = vor.u32 %v2203_v17, %v2202_v15  ;;  %v15871_v54 = vmax.f32 %v1962_v10, 0.0  ;;  %v1382_v17 = vadd.f32 %v15520_v0, %v15786_v41 }
 0x157   : > { %v15869_v31 = vpop.f32.mrf.mxu1  ;;  %v2431_v50 = vor.u32 %v2430_v19, %v2200_v63  ;;  %4558 = vmatpush1.bf16.msra.mxu0 %v14162_v30  ;;  %2887 = vst [vmem:[#allocation2 + $0x9c] sm:$0xff] %v12332_v20  ;;  %2888 = vst [vmem:[#allocation2 + $0xa4] sm:$0xf] %v12333_v33  ;;  %v15878_v52 = vsel %vm15460_vm4, 0, %v2198_v49  ;;  %v15886_v63 = vadd.f32 %v15533_v58, %v15804_v36  ;;  %v14175_v33 = vld [vmem:[%s21737_s3 + $0xf4] ss:$8 sps:$4 sm:$0xff]  }
 0x158   : > { %v2516_v34 = vsel %vm15468_vm5, %v2429_v4, 0  ;;  %v1202_v53 = vpop.f32.mrf.mxu0  ;;  %4559 = vmatprep.subr.bf16.mxu0 %v14171_v9  ;;  %v12334_v49 = vcombine.low %v15878_v52, %v15815_v29  ;;  %v15897_v30 = vsel %vm15460_vm4, 0, %v2205_v14  ;;  %v15905_v36 = vpack.c.bf16 %v15871_v54, %v15871_v54  ;;  %v14173_v14 = vld [vmem:[%s21737_s3 + $0xf0] ss:$8 sps:$4 sm:$0xff]  }
 0x159   : > { %21938 = vst [vmem:[#allocation38_spill] sm:$0xff] %v15886_v63  ;;  %v15888_v22 = vpop.f32.mrf.mxu1  ;;  %v12335_v19 = vcombine.low %v2516_v34, %v2516_v34  ;;  %v2517_v0 = vsel %vm15468_vm5, %v2431_v50, 0  ;;  %v12336_v58 = vcombine.low %v15897_v30, %v15819_v60  ;;  %v1851_v50 = vmul.f32 %v15414_v18, %v1382_v17  ;;  %v14180_v17 = vld [vmem:[%s21737_s3 + $0xe0] ss:$8 sps:$4 sm:$0xff]  }
 0x15a   : > { %v12337_v41 = vcombine.low %v2517_v0, %v2517_v0  ;;  %v15907_v38 = vpop.f32.mrf.mxu0  ;;  %2889 = vst [vmem:[#allocation2 + $0xa8] sm:$0xff] %v12334_v49  ;;  %v14549_v29 = vpack.c.bf16 %v15589_v59, %v15587_v40  ;;  %v14550_v60 = vcombine.low %v15685_v37, %v15701_v46  ;;  %v2207_v10 = vshrl.u32 %v15905_v36, 16  ;;  %v14182_v40 = vld [vmem:[%s21737_s3 + $0xe4] ss:$8 sps:$4 sm:$0xff]   ;;  %v14186_v0 = vld [vmem:[%s21737_s3 + $0xd4] ss:$8 sps:$4 sm:$0xff]  }
 0x15b   : > { %21939 = vst [vmem:[#allocation39_spill] sm:$0xff] %v15907_v38  ;;  %v15909_v57 = vpop.f32.mrf.mxu1  ;;  %2890 = vst [vmem:[#allocation2 + $0xb0] sm:$0xf] %v12335_v19  ;;  %v14150_v44 = vld [vmem:[#allocation2 + $0x8c] ss:$12 sps:$4 sm:$0xff]   ;;  %4560 = vmatpush1.bf16.msra.mxu0 %v14169_v24  ;;  %v2210_v9 = vshll.u32 %v15905_v36, 16  ;;  %v1386_v48 = vadd.f32 %v15542_v13, %v15822_v35  ;;  %v1965_v59 = vadd.f32 %v15421_v23, %v1851_v50 }
 0x15c   : > { %21940 = vst [vmem:[#allocation40_spill] sm:$0xff] %v15909_v57  ;;  %2891 = vst [vmem:[#allocation2 + $0xb4] sm:$0xff] %v12336_v58  ;;  %v1208_v15 = vpop.f32.mrf.mxu0  ;;  %4561 = vmatprep.subr.bf16.mxu0 %v14175_v33  ;;  %3725 = vmatprep.mubr.bf16.mxu0 %v14549_v29  ;;  %v1392_v37 = vadd.f32 %v15571_v7, %v1198_v26  ;;  %v15931_v46 = vadd.f32 %v15580_v5, %v1200_v39  ;;  %v2209_v4 = vrot.slane %v2207_v10, 7 }
 0x15d   : > { %2892 = vst [vmem:[#allocation2 + $0xbc] sm:$0xf] %v12337_v41  ;;  %v15923_v20 = vpop.f32.mrf.mxu1  ;;  %v2432_v24 = vrot.slane %v2210_v9, 1  ;;  %3726 = vmatmul.mubr.bf16.gmra.mxu0 %v14550_v60  ;;  %v1854_v13 = vmul.f32 %v15414_v18, %v1386_v48  ;;  %3929 = vmatmul.mubr.bf16.gmra.mxu1 %v14150_v44  ;;  %v15939_v33 = vmax.f32 %v1965_v59, 0.0  ;;  %v14552_v50 = vpack.c.bf16 %v15733_v32, %v15652_v12 }
 0x15e   : > { %21941 = vst [vmem:[#allocation41_spill] sm:$0xff] %v15931_v46  ;;  %v1210_v35 = vpop.f32.mrf.mxu0  ;;  %v1857_v7 = vmul.f32 %v15414_v18, %v1392_v37  ;;  %3938 = vmatprep.mubr.bf16.mxu1 %v21926_v11  ;;  %v2212_v5 = vor.u32 %v2210_v9, %v2209_v4 }
 0x15f   : > { %v15934_v34 = vpop.f32.mrf.mxu1  ;;  %4562 = vmatpush2.bf16.msra.mxu0 %v14173_v14  ;;  %v2433_v39 = vor.u32 %v2432_v24, %v2207_v10  ;;  %v1968_v26 = vadd.f32 %v15421_v23, %v1854_v13  ;;  %v15953_v58 = vpack.c.bf16 %v15939_v33, %v15939_v33  ;;  %v14551_v14 = vcombine.low %v15739_v3, %v15831_v27  ;;  %v14193_v24 = vld [vmem:[%s21737_s3 + $0xc4] ss:$8 sps:$4 sm:$0xff]  }
 0x160   : > { %v15944_v49 = vpop.f32.mrf.mxu0  ;;  %4563 = vmatprep.subr.bf16.mxu0 %v14182_v40  ;;  %v1971_v41 = vadd.f32 %v15421_v23, %v1857_v7  ;;  %v15962_v29 = vsel %vm15460_vm4, 0, %v2212_v5  ;;  %v1396_v10 = vadd.f32 %v15602_v62, %v1202_v53  ;;  %3735 = vmatprep.mubr.bf16.mxu0 %v14552_v50  ;;  %v1402_v7 = vadd.f32 %v15641_v56, %v1208_v15 }
 0x161   : > { %v15946_v19 = vpop.f32.mrf.mxu1  ;;  %v2518_v60 = vsel %vm15468_vm5, %v2433_v39, 0  ;;  %v15966_v44 = vmax.f32 %v1968_v26, 0.0  ;;  %v12338_v3 = vcombine.low %v15962_v29, %v15905_v36  ;;  %v2214_v12 = vshrl.u32 %v15953_v58, 16  ;;  %v14184_v36 = vld [vmem:[%s21737_s3 + $0xd0] ss:$8 sps:$4 sm:$0xff]  }
 0x162   : > { %v15969_v9 = vpop.f32.mrf.mxu0  ;;  %v12339_v27 = vcombine.low %v2518_v60, %v2518_v60  ;;  %v2217_v32 = vshll.u32 %v15953_v58, 16  ;;  %v14157_v40 = vld [vmem:[#allocation2 + $0xa4] ss:$12 sps:$4 sm:$0xff]   ;;  %v15981_v62 = vmax.f32 %v1971_v41, 0.0  ;;  %v1860_v53 = vmul.f32 %v15414_v18, %v1396_v10 }
 0x163   : > { %21942 = vst [vmem:[#allocation42_spill] sm:$0xff] %v15969_v9  ;;  %v15971_v48 = vpop.f32.mrf.mxu1  ;;  %4564 = vmatpush2.bf16.msra.mxu0 %v14180_v17  ;;  %v15979_v59 = vpack.c.bf16 %v15966_v44, %v15966_v44  ;;  %2893 = vst [vmem:[#allocation2 + $0xc0] sm:$0xff] %v12338_v3  ;;  %v2216_v13 = vrot.slane %v2214_v12, 7  ;;  %v15996_v5 = vadd.f32 %v15656_v45, %v1210_v35 }
 0x164   : > { %21943 = vst [vmem:[#allocation43_spill] sm:$0xff] %v15971_v48  ;;  %v15984_v37 = vpop.f32.mrf.mxu0  ;;  %4565 = vmatprep.subr.bf16.mxu0 %v14186_v0  ;;  %2894 = vst [vmem:[#allocation2 + $0xc8] sm:$0xf] %v12339_v27  ;;  %v2434_v17 = vrot.slane %v2217_v32, 1  ;;  %v16002_v0 = vpack.c.bf16 %v15981_v62, %v15981_v62  ;;  %v1974_v41 = vadd.f32 %v15421_v23, %v1860_v53 }
 0x165   : > { %v15986_v4 = vpop.f32.mrf.mxu1  ;;  %21944 = vst [vmem:[#allocation44_spill] sm:$0xff] %v15996_v5  ;;  %v2221_v39 = vshrl.u32 %v15979_v59, 16  ;;  %v2224_v26 = vshll.u32 %v15979_v59, 16  ;;  %3736 = vmatmul.mubr.bf16.gmra.mxu0 %v14551_v14  ;;  %3939 = vmatmul.mubr.bf16.gmra.mxu1 %v14157_v40  ;;  %v2219_v56 = vor.u32 %v2217_v32, %v2216_v13  ;;  %v1863_v45 = vmul.f32 %v15414_v18, %v1402_v7  ;;  %v14191_v32 = vld [vmem:[%s21737_s3 + $0xc0] ss:$8 sps:$4 sm:$0xff]  }
 0x166   : > { %v16005_v50 = vpop.f32.mrf.mxu0  ;;  %v2435_v15 = vor.u32 %v2434_v17, %v2214_v12  ;;  %3948 = vmatprep.mubr.bf16.mxu1 %v21926_v11  ;;  %v2228_v3 = vshrl.u32 %v16002_v0, 16  ;;  %v2231_v27 = vshll.u32 %v16002_v0, 16  ;;  %v16026_v13 = vmax.f32 %v1974_v41, 0.0  ;;  %v14197_v17 = vld [vmem:[%s21737_s3 + $0xb4] ss:$8 sps:$4 sm:$0xff]  }
 0x167   : > { %v16007_v60 = vpop.f32.mrf.mxu1  ;;  %v2223_v35 = vrot.slane %v2221_v39, 7  ;;  %v2436_v10 = vrot.slane %v2224_v26, 1  ;;  %4566 = vmatpush2.bf16.msra.mxu0 %v14184_v36  ;;  %v16022_v12 = vsel %vm15460_vm4, 0, %v2219_v56 }
 0x168   : > { %v16013_v14 = vpop.f32.mrf.mxu0  ;;  %v2519_v40 = vsel %vm15468_vm5, %v2435_v15, 0  ;;  %4567 = vmatprep.subr.bf16.mxu0 %v14193_v24  ;;  %v12340_v36 = vcombine.low %v16022_v12, %v15953_v58  ;;  %v2230_v9 = vrot.slane %v2228_v3, 7  ;;  %v2438_v38 = vrot.slane %v2231_v27, 1  ;;  %v14195_v15 = vld [vmem:[%s21737_s3 + $0xb0] ss:$8 sps:$4 sm:$0xff]  }
 0x169   : > { %v16015_v53 = vpop.f32.mrf.mxu1  ;;  %v12341_v7 = vcombine.low %v2519_v40, %v2519_v40  ;;  %v2226_v48 = vor.u32 %v2224_v26, %v2223_v35  ;;  %v2437_v57 = vor.u32 %v2436_v10, %v2221_v39  ;;  %v16039_v41 = vpack.c.bf16 %v16026_v13, %v16026_v13 }
 0x16a   : > { %v16033_v5 = vpop.f32.mrf.mxu0  ;;  %v1977_v24 = vadd.f32 %v15421_v23, %v1863_v45  ;;  %2895 = vst [vmem:[#allocation2 + $0xcc] sm:$0xff] %v12340_v36  ;;  %v2439_v36 = vor.u32 %v2438_v38, %v2228_v3 }
 0x16b   : > { %21945 = vst [vmem:[#allocation45_spill] sm:$0xff] %v16033_v5  ;;  %v16035_v56 = vpop.f32.mrf.mxu1  ;;  %2896 = vst [vmem:[#allocation2 + $0xd4] sm:$0xf] %v12341_v7  ;;  %v16047_v58 = vsel %vm15460_vm4, 0, %v2226_v48  ;;  %v2520_v39 = vsel %vm15468_vm5, %v2437_v57, 0  ;;  %4568 = vmatpush2.bf16.msra.mxu0 %v14191_v32  ;;  %v2235_v7 = vshrl.u32 %v16039_v41, 16  ;;  %v14553_v57 = vcombine.low %v15863_v21, %v15878_v52 }
 0x16c   : > { %21946 = vst [vmem:[#allocation46_spill] sm:$0xff] %v16035_v56  ;;  %v14161_v26 = vld [vmem:[#allocation2 + $0xbc] ss:$12 sps:$4 sm:$0xff]   ;;  %v16051_v35 = vpop.f32.mrf.mxu0  ;;  %v12342_v45 = vcombine.low %v16047_v58, %v15979_v59  ;;  %v12343_v40 = vcombine.low %v2520_v39, %v2520_v39  ;;  %v2233_v56 = vor.u32 %v2231_v27, %v2230_v9  ;;  %4569 = vmatprep.subr.bf16.mxu0 %v14197_v17  ;;  %v2238_v48 = vshll.u32 %v16039_v41, 16  ;;  %v14204_v52 = vld [vmem:[%s21737_s3 + $0xa4] ss:$8 sps:$4 sm:$0xff]  }
 0x16d   : > { %v16053_v10 = vpop.f32.mrf.mxu1  ;;  %v16059_v5 = vmax.f32 %v1977_v24, 0.0  ;;  %3949 = vmatmul.mubr.bf16.gmra.mxu1 %v14161_v26  ;;  %v2521_v9 = vsel %vm15468_vm5, %v2439_v36, 0  ;;  %v14554_v59 = vpack.c.bf16 %v15797_v51, %v15773_v2  ;;  %v1406_v21 = vadd.f32 %v15672_v61, %v15944_v49  ;;  %v14202_v61 = vld [vmem:[%s21737_s3 + $0xa0] ss:$8 sps:$4 sm:$0xff]  }
 0x16e   : > { %v16063_v46 = vpop.f32.mrf.mxu0  ;;  %2897 = vst [vmem:[#allocation2 + $0xd8] sm:$0xff] %v12342_v45  ;;  %2898 = vst [vmem:[#allocation2 + $0xe0] sm:$0xf] %v12343_v40  ;;  %v16069_v38 = vsel %vm15460_vm4, 0, %v2233_v56  ;;  %3958 = vmatprep.mubr.bf16.mxu1 %v21926_v11  ;;  %v12345_v27 = vcombine.low %v2521_v9, %v2521_v9  ;;  %v2237_v17 = vrot.slane %v2235_v7, 7  ;;  %v2440_v56 = vrot.slane %v2238_v48, 1 }
 0x16f   : > { %v16065_v32 = vpop.f32.mrf.mxu1  ;;  %v12344_v3 = vcombine.low %v16069_v38, %v16002_v0  ;;  %4570 = vmatpush2.bf16.msra.mxu0 %v14195_v15  ;;  %v16092_v2 = vpack.c.bf16 %v16059_v5, %v16059_v5  ;;  %3745 = vmatprep.mubr.bf16.mxu0 %v14554_v59  ;;  %v1866_v51 = vmul.f32 %v15414_v18, %v1406_v21  ;;  %v14208_v0 = vld [vmem:[%s21737_s3 + $0x94] ss:$8 sps:$4 sm:$0xff]  }
 0x170   : > { %v16083_v24 = vpop.f32.mrf.mxu0  ;;  %v1412_v49 = vadd.f32 %v15713_v47, %v15984_v37  ;;  %2904 = vst [vmem:[#allocation2 + $0x104] sm:$0xf] %v12345_v27  ;;  %v2240_v15 = vor.u32 %v2238_v48, %v2237_v17  ;;  %v2441_v26 = vor.u32 %v2440_v56, %v2235_v7  ;;  %3746 = vmatmul.mubr.bf16.gmra.mxu0 %v14553_v57  ;;  %v14206_v7 = vld [vmem:[%s21737_s3 + $0x90] ss:$8 sps:$4 sm:$0xff]   ;;  %v14215_v17 = vld [vmem:[%s21737_s3 + $0x84] ss:$8 sps:$4 sm:$0xff]  }
 0x171   : > { %v16085_v39 = vpop.f32.mrf.mxu1  ;;  %2903 = vst [vmem:[#allocation2 + $0xfc] sm:$0xff] %v12344_v3  ;;  %v16102_v45 = vadd.f32 %v15725_v25, %v16005_v50  ;;  %v2242_v9 = vshrl.u32 %v16092_v2, 16  ;;  %v2245_v47 = vshll.u32 %v16092_v2, 16  ;;  %v1980_v37 = vadd.f32 %v15421_v23, %v1866_v51  ;;  %4571 = vmatprep.subr.bf16.mxu0 %v14204_v52 }
 0x172   : > { %21947 = vst [vmem:[#allocation47_spill] sm:$0xff] %v16085_v39  ;;  %v16104_v40 = vpop.f32.mrf.mxu0  ;;  %v16116_v48 = vsel %vm15460_vm4, 0, %v2240_v15  ;;  %v2522_v25 = vsel %vm15468_vm5, %v2441_v26, 0  ;;  %v1869_v50 = vmul.f32 %v15414_v18, %v1412_v49  ;;  %v14555_v49 = vcombine.low %v15897_v30, %v15962_v29 }
 0x173   : > { %21948 = vst [vmem:[#allocation48_spill] sm:$0xff] %v16102_v45  ;;  %21949 = vst [vmem:[#allocation49_spill] sm:$0xff] %v16104_v40  ;;  %v16106_v36 = vpop.f32.mrf.mxu1  ;;  %4572 = vmatpush2.bf16.msra.mxu0 %v14202_v61  ;;  %v12346_v21 = vcombine.low %v16116_v48, %v16039_v41  ;;  %v12347_v52 = vcombine.low %v2522_v25, %v2522_v25  ;;  %v2244_v3 = vrot.slane %v2242_v9, 7  ;;  %v2442_v27 = vrot.slane %v2245_v47, 1 }
 0x174   : > { %21950 = vst [vmem:[#allocation50_spill] sm:$0xff] %v16106_v36  ;;  %v16121_v57 = vpop.f32.mrf.mxu0  ;;  %4573 = vmatprep.subr.bf16.mxu0 %v14208_v0  ;;  %v16130_v56 = vmax.f32 %v1980_v37, 0.0  ;;  %v1983_v51 = vadd.f32 %v15421_v23, %v1869_v50  ;;  %v14556_v25 = vpack.c.bf16 %v15871_v54, %v15799_v1  ;;  %v1416_v37 = vadd.f32 %v15744_v8, %v16013_v14  ;;  %v14213_v1 = vld [vmem:[%s21737_s3 + $0x80] ss:$8 sps:$4 sm:$0xff]  }
 0x175   : > { %v16123_v59 = vpop.f32.mrf.mxu1  ;;  %v14168_v15 = vld [vmem:[#allocation2 + $0xd4] ss:$12 sps:$4 sm:$0xff]   ;;  %2905 = vst [vmem:[#allocation2 + $0x108] sm:$0xff] %v12346_v21  ;;  %2906 = vst [vmem:[#allocation2 + $0x110] sm:$0xf] %v12347_v52  ;;  %v2247_v41 = vor.u32 %v2245_v47, %v2244_v3  ;;  %v2443_v0 = vor.u32 %v2442_v27, %v2242_v9  ;;  %v1422_v29 = vadd.f32 %v15788_v28, %v16051_v35 }
 0x176   : > { %v16135_v61 = vpop.f32.mrf.mxu0  ;;  %v16145_v50 = vpack.c.bf16 %v16130_v56, %v16130_v56  ;;  %v16147_v30 = vmax.f32 %v1983_v51, 0.0  ;;  %3959 = vmatmul.mubr.bf16.gmra.mxu1 %v14168_v15  ;;  %3755 = vmatprep.mubr.bf16.mxu0 %v14556_v25  ;;  %v1872_v28 = vmul.f32 %v15414_v18, %v1416_v37  ;;  %v16167_v14 = vadd.f32 %v15806_v6, %v16063_v46  ;;  %v14219_v35 = vld [vmem:[%s21737_s3 + $0x374] ss:$8 sps:$4 sm:$0xff]  }
 0x177   : > { %v16137_v26 = vpop.f32.mrf.mxu1  ;;  %4574 = vmatpush2.bf16.msra.mxu0 %v14206_v7  ;;  %v16160_v8 = vsel %vm15460_vm4, 0, %v2247_v41  ;;  %v2523_v54 = vsel %vm15468_vm5, %v2443_v0, 0  ;;  %3968 = vmatprep.mubr.bf16.mxu1 %v21926_v11  ;;  %v1875_v15 = vmul.f32 %v15414_v18, %v1422_v29  ;;  %v14557_v29 = vcombine.low %v16022_v12, %v16047_v58 }
 0x178   : > { %v16151_v21 = vpop.f32.mrf.mxu0  ;;  %21951 = vst [vmem:[#allocation51_spill] sm:$0xff] %v16167_v14  ;;  %v12348_v9 = vcombine.low %v16160_v8, %v16092_v2  ;;  %v12349_v7 = vcombine.low %v2523_v54, %v2523_v54  ;;  %v2249_v52 = vshrl.u32 %v16145_v50, 16  ;;  %v2252_v3 = vshll.u32 %v16145_v50, 16  ;;  %3756 = vmatmul.mubr.bf16.gmra.mxu0 %v14555_v49  ;;  %4575 = vmatprep.subr.bf16.mxu0 %v14215_v17 }
 0x179   : > { %v16153_v47 = vpop.f32.mrf.mxu1  ;;  %v2103_v6 = vpack.c.bf16 %v16147_v30, %v16147_v30  ;;  %v1986_v46 = vadd.f32 %v15421_v23, %v1872_v28  ;;  %v1989_v28 = vadd.f32 %v15421_v23, %v1875_v15 }
 0x17a   : > { %v16177_v27 = vpop.f32.mrf.mxu0  ;;  %2907 = vst [vmem:[#allocation2 + $0x114] sm:$0xff] %v12348_v9  ;;  %2908 = vst [vmem:[#allocation2 + $0x11c] sm:$0xf] %v12349_v7  ;;  %v2251_v2 = vrot.slane %v2249_v52, 7  ;;  %v2444_v41 = vrot.slane %v2252_v3, 1 }
 0x17b   : > { %21952 = vst [vmem:[#allocation52_spill] sm:$0xff] %v16177_v27  ;;  %v16179_v51 = vpop.f32.mrf.mxu1  ;;  %4576 = vmatpush2.bf16.msra.mxu0 %v14213_v1  ;;  %v2256_v49 = vshrl.u32 %v2103_v6, 16  ;;  %v2259_v37 = vshll.u32 %v2103_v6, 16  ;;  %v16189_v54 = vmax.f32 %v1986_v46, 0.0  ;;  %v16208_v58 = vmax.f32 %v1989_v28, 0.0 }
 0x17c   : > { %v16185_v0 = vpop.f32.mrf.mxu0  ;;  %5541 = vmatprep.subr.bf16.mxu0 %v14219_v35  ;;  %v2254_v17 = vor.u32 %v2252_v3, %v2251_v2  ;;  %v2445_v36 = vor.u32 %v2444_v41, %v2249_v52  ;;  %v14172_v9 = vld [vmem:[#allocation2 + $0x104] ss:$12 sps:$4 sm:$0xff]   ;;  %v14558_v35 = vpack.c.bf16 %v15966_v44, %v15939_v33  ;;  %v1426_v3 = vadd.f32 %v15824_v55, %v16083_v24 }
 0x17d   : > { %v16187_v25 = vpop.f32.mrf.mxu1  ;;  %v2258_v40 = vrot.slane %v2256_v49, 7  ;;  %v2446_v14 = vrot.slane %v2259_v37, 1  ;;  %v2104_v1 = vpack.c.bf16 %v16189_v54, %v16189_v54 }
 0x17e   : > { %v16194_v7 = vpop.f32.mrf.mxu0  ;;  %v16204_v52 = vsel %vm15460_vm4, 0, %v2254_v17  ;;  %v2524_v12 = vsel %vm15468_vm5, %v2445_v36, 0  ;;  %3969 = vmatmul.mubr.bf16.gmra.mxu1 %v14172_v9  ;;  %3765 = vmatprep.mubr.bf16.mxu0 %v14558_v35  ;;  %v16220_v36 = vpack.c.bf16 %v16208_v58, %v16208_v58  ;;  %v1878_v55 = vmul.f32 %v15414_v18, %v1426_v3 }
 0x17f   : > { %v16196_v27 = vpop.f32.mrf.mxu1  ;;  %v12350_v33 = vcombine.low %v16204_v52, %v16145_v50  ;;  %v12351_v44 = vcombine.low %v2524_v12, %v2524_v12  ;;  %v2261_v2 = vor.u32 %v2259_v37, %v2258_v40  ;;  %v2447_v41 = vor.u32 %v2446_v14, %v2256_v49  ;;  %3978 = vmatprep.mubr.bf16.mxu1 %v21926_v11 }
 0x180   : > { %v16212_v46 = vpop.f32.mrf.mxu0  ;;  %v2263_v17 = vshrl.u32 %v2104_v1, 16  ;;  %v2266_v45 = vshll.u32 %v2104_v1, 16  ;;  %3766 = vmatmul.mubr.bf16.gmra.mxu0 %v14557_v29  ;;  %v1432_v14 = vadd.f32 %v15856_v16, %v16121_v57  ;;  %v2270_v3 = vshrl.u32 %v16220_v36, 16 }
 0x181   : > { %v16214_v15 = vpop.f32.mrf.mxu1  ;;  %2909 = vst [vmem:[#allocation2 + $0x120] sm:$0xff] %v12350_v33  ;;  %2910 = vst [vmem:[#allocation2 + $0x128] sm:$0xf] %v12351_v44  ;;  %v16230_v40 = vsel %vm15460_vm4, 0, %v2261_v2  ;;  %v2525_v50 = vsel %vm15468_vm5, %v2447_v41, 0  ;;  %v2273_v33 = vshll.u32 %v16220_v36, 16  ;;  %v1992_v44 = vadd.f32 %v15421_v23, %v1878_v55 }
 0x182   : > { %v16224_v24 = vpop.f32.mrf.mxu0  ;;  %v12352_v49 = vcombine.low %v16230_v40, %v2103_v6  ;;  %v12353_v37 = vcombine.low %v2525_v50, %v2525_v50  ;;  %v2265_v29 = vrot.slane %v2263_v17, 7  ;;  %v2448_v9 = vrot.slane %v2266_v45, 1 }
 0x183   : > { %21953 = vst [vmem:[#allocation53_spill] sm:$0xff] %v16224_v24  ;;  %v16226_v28 = vpop.f32.mrf.mxu1  ;;  %v1881_v16 = vmul.f32 %v15414_v18, %v1432_v14  ;;  %v16247_v57 = vadd.f32 %v15869_v31, %v16135_v61  ;;  %v2272_v24 = vrot.slane %v2270_v3, 7  ;;  %v2450_v63 = vrot.slane %v2273_v33, 1 }
 0x184   : > { %v16237_v35 = vpop.f32.mrf.mxu0  ;;  %2911 = vst [vmem:[#allocation2 + $0x12c] sm:$0xff] %v12352_v49  ;;  %2912 = vst [vmem:[#allocation2 + $0x134] sm:$0xf] %v12353_v37  ;;  %v2268_v2 = vor.u32 %v2266_v45, %v2265_v29  ;;  %v2449_v41 = vor.u32 %v2448_v9, %v2263_v17  ;;  %v16253_v39 = vmax.f32 %v1992_v44, 0.0 }
 0x185   : > { %v16239_v12 = vpop.f32.mrf.mxu1  ;;  %21954 = vst [vmem:[#allocation54_spill] sm:$0xff] %v16247_v57  ;;  %v1995_v17 = vadd.f32 %v15421_v23, %v1881_v16  ;;  %v2275_v37 = vor.u32 %v2273_v33, %v2272_v24  ;;  %v2451_v29 = vor.u32 %v2450_v63, %v2270_v3  ;;  %v14559_v24 = vcombine.low %v16069_v38, %v16116_v48 }
 0x186   : > { %v16249_v6 = vpop.f32.mrf.mxu0  ;;  %v16257_v55 = vsel %vm15460_vm4, 0, %v2268_v2  ;;  %v2526_v45 = vsel %vm15468_vm5, %v2449_v41, 0  ;;  %v2106_v9 = vpack.c.bf16 %v16253_v39, %v16253_v39  ;;  %v16273_v2 = vadd.f32 %v16137_v26, %v16123_v59 }
 0x187   : > { %v16251_v50 = vpop.f32.mrf.mxu1  ;;  %v12354_v61 = vcombine.low %v16257_v55, %v2104_v1  ;;  %v12355_v49 = vcombine.low %v2526_v45, %v2526_v45  ;;  %v16269_v44 = vmax.f32 %v1995_v17, 0.0  ;;  %v16281_v1 = vsel %vm15460_vm4, 0, %v2275_v37 }
 0x188   : > { %v16262_v14 = vpop.f32.mrf.mxu0  ;;  %v14179_v41 = vld [vmem:[#allocation2 + $0x11c] ss:$12 sps:$4 sm:$0xff]   ;;  %v2527_v63 = vsel %vm15468_vm5, %v2451_v29, 0  ;;  %v14560_v59 = vpack.c.bf16 %v16026_v13, %v15981_v62  ;;  %v12356_v26 = vcombine.low %v16281_v1, %v16220_v36  ;;  %v2277_v33 = vshrl.u32 %v2106_v9, 16 }
 0x189   : > { %v16264_v31 = vpop.f32.mrf.mxu1  ;;  %2913 = vst [vmem:[#allocation2 + $0x138] sm:$0xff] %v12354_v61  ;;  %2914 = vst [vmem:[#allocation2 + $0x140] sm:$0xf] %v12355_v49  ;;  %v12357_v3 = vcombine.low %v2527_v63, %v2527_v63  ;;  %v2280_v45 = vshll.u32 %v2106_v9, 16  ;;  %3979 = vmatmul.mubr.bf16.gmra.mxu1 %v14179_v41  ;;  %v2107_v49 = vpack.c.bf16 %v16269_v44, %v16269_v44 }
 0x18a   : > { %v16275_v16 = vpop.f32.mrf.mxu0  ;;  %3775 = vmatprep.mubr.bf16.mxu0 %v14560_v59  ;;  %v1436_v38 = vadd.f32 %v15888_v22, %v16151_v21  ;;  %v16301_v62 = vadd.f32 %v16179_v51, %v16153_v47  ;;  %2915 = vst [vmem:[#allocation2 + $0x144] sm:$0xff] %v12356_v26  ;;  %v2279_v13 = vrot.slane %v2277_v33, 7  ;;  %v1442_v36 = vadd.f32 %v15923_v20, %v16185_v0 }
 0x18b   : > { %21955 = vst [vmem:[#allocation55_spill] sm:$0xff] %v16275_v16  ;;  %v16277_v57 = vpop.f32.mrf.mxu1  ;;  %2916 = vst [vmem:[#allocation2 + $0x14c] sm:$0xf] %v12357_v3  ;;  %v2452_v48 = vrot.slane %v2280_v45, 1  ;;  %3776 = vmatmul.mubr.bf16.gmra.mxu0 %v14559_v24  ;;  %v16307_v37 = vadd.f32 %v15934_v34, %v16194_v7  ;;  %3988 = vmatprep.mubr.bf16.mxu1 %v21926_v11  ;;  %v2284_v21 = vshrl.u32 %v2107_v49, 16  ;;  %v2287_v47 = vshll.u32 %v2107_v49, 16 }
 0x18c   : > { %v16291_v17 = vpop.f32.mrf.mxu0  ;;  %21956 = vst [vmem:[#allocation56_spill] sm:$0xff] %v16301_v62  ;;  %v1884_v51 = vmul.f32 %v15414_v18, %v1436_v38  ;;  %v2282_v41 = vor.u32 %v2280_v45, %v2279_v13  ;;  %v1887_v24 = vmul.f32 %v15414_v18, %v1442_v36 }
 0x18d   : > { %v16293_v61 = vpop.f32.mrf.mxu1  ;;  %21957 = vst [vmem:[#allocation57_spill] sm:$0xff] %v16307_v37  ;;  %v2453_v63 = vor.u32 %v2452_v48, %v2277_v33  ;;  %v2286_v34 = vrot.slane %v2284_v21, 7  ;;  %v2454_v0 = vrot.slane %v2287_v47, 1 }
 0x18e   : > { %v16310_v29 = vpop.f32.mrf.mxu0  ;;  %v1998_v7 = vadd.f32 %v15421_v23, %v1884_v51  ;;  %v16323_v26 = vsel %vm15460_vm4, 0, %v2282_v41  ;;  %v2001_v45 = vadd.f32 %v15421_v23, %v1887_v24  ;;  %v16339_v41 = vadd.f32 %v16196_v27, %v16187_v25 }
 0x18f   : > { %v16312_v22 = vpop.f32.mrf.mxu1  ;;  %v2528_v3 = vsel %vm15468_vm5, %v2453_v63, 0  ;;  %v12358_v48 = vcombine.low %v16323_v26, %v2106_v9  ;;  %v2289_v16 = vor.u32 %v2287_v47, %v2286_v34  ;;  %v2455_v37 = vor.u32 %v2454_v0, %v2284_v21 }
 0x190   : > { %v16316_v59 = vpop.f32.mrf.mxu0  ;;  %v14183_v33 = vld [vmem:[#allocation2 + $0x134] ss:$12 sps:$4 sm:$0xff]   ;;  %v12359_v36 = vcombine.low %v2528_v3, %v2528_v3  ;;  %v16333_v51 = vmax.f32 %v1998_v7, 0.0  ;;  %v16335_v62 = vmax.f32 %v2001_v45, 0.0  ;;  %v14561_v63 = vcombine.low %v16160_v8, %v16204_v52 }
 0x191   : > { %v16318_v20 = vpop.f32.mrf.mxu1  ;;  %3989 = vmatmul.mubr.bf16.gmra.mxu1 %v14183_v33  ;;  %2917 = vst [vmem:[#allocation2 + $0x150] sm:$0xff] %v12358_v48  ;;  %v16349_v9 = vsel %vm15460_vm4, 0, %v2289_v16  ;;  %v2529_v21 = vsel %vm15468_vm5, %v2455_v37, 0  ;;  %v14562_v27 = vpack.c.bf16 %v16130_v56, %v16059_v5  ;;  %v1446_v8 = vadd.f32 %v15946_v19, %v16212_v46 }
 0x192   : > { %v16328_v38 = vpop.f32.mrf.mxu0  ;;  %21959 = vst [vmem:[#allocation59_spill] sm:$0xff] %v16335_v62  ;;  %2918 = vst [vmem:[#allocation2 + $0x158] sm:$0xf] %v12359_v36  ;;  %3998 = vmatprep.mubr.bf16.mxu1 %v21926_v11  ;;  %v12360_v25 = vcombine.low %v16349_v9, %v2107_v49  ;;  %v12361_v52 = vcombine.low %v2529_v21, %v2529_v21  ;;  %v2108_v47 = vpack.c.bf16 %v16333_v51, %v16333_v51 }
 0x193   : > { %21958 = vst [vmem:[#allocation58_spill] sm:$0xff] %v16328_v38  ;;  %v16330_v13 = vpop.f32.mrf.mxu1  ;;  %v2109_v16 = vpack.c.bf16 %v16335_v62, %v16335_v62  ;;  %3785 = vmatprep.mubr.bf16.mxu0 %v14562_v27  ;;  %v1890_v5 = vmul.f32 %v15414_v18, %v1446_v8  ;;  %v16370_v19 = vadd.f32 %v16226_v28, %v16214_v15 }
 0x194   : > { %v16345_v38 = vpop.f32.mrf.mxu0  ;;  %v1452_v56 = vadd.f32 %v15986_v4, %v16237_v35  ;;  %2923 = vst [vmem:[#allocation2 + $0x174] sm:$0xff] %v12360_v25  ;;  %2924 = vst [vmem:[#allocation2 + $0x17c] sm:$0xf] %v12361_v52  ;;  %v2291_v46 = vshrl.u32 %v2108_v47, 16  ;;  %v2294_v49 = vshll.u32 %v2108_v47, 16  ;;  %3786 = vmatmul.mubr.bf16.gmra.mxu0 %v14561_v63  ;;  %v16382_v15 = vadd.f32 %v16007_v60, %v16249_v6 }
 0x195   : > { %v16343_v24 = vpop.f32.mrf.mxu1  ;;  %v2298_v0 = vshrl.u32 %v2109_v16, 16  ;;  %v2301_v7 = vshll.u32 %v2109_v16, 16  ;;  %v2004_v33 = vadd.f32 %v15421_v23, %v1890_v5 }
 0x196   : > { %v16365_v37 = vpop.f32.mrf.mxu0  ;;  %v1893_v48 = vmul.f32 %v15414_v18, %v1452_v56  ;;  %21961 = vst [vmem:[#allocation61_spill] sm:$0xff] %v16382_v15  ;;  %v2293_v4 = vrot.slane %v2291_v46, 7  ;;  %v2456_v28 = vrot.slane %v2294_v49, 1 }
 0x197   : > { %v16363_v34 = vpop.f32.mrf.mxu1  ;;  %v2300_v35 = vrot.slane %v2298_v0, 7  ;;  %v2458_v36 = vrot.slane %v2301_v7, 1  ;;  %v16388_v63 = vmax.f32 %v2004_v33, 0.0  ;;  %v16403_v33 = vadd.f32 %v16251_v50, %v16239_v12 }
 0x198   : > { %v16376_v45 = vpop.f32.mrf.mxu0  ;;  %v2007_v8 = vadd.f32 %v15421_v23, %v1893_v48  ;;  %v2296_v25 = vor.u32 %v2294_v49, %v2293_v4  ;;  %v2457_v52 = vor.u32 %v2456_v28, %v2291_v46 }
 0x199   : > { %v16374_v3 = vpop.f32.mrf.mxu1  ;;  %v2303_v5 = vor.u32 %v2301_v7, %v2300_v35  ;;  %v2459_v56 = vor.u32 %v2458_v36, %v2298_v0  ;;  %v14190_v62 = vld [vmem:[#allocation2 + $0x14c] ss:$12 sps:$4 sm:$0xff]   ;;  %v16397_v6 = vpack.c.bf16 %v16388_v63, %v16388_v63 }
 0x19a   : > { %21960 = vst [vmem:[#allocation60_spill] sm:$0xff] %v16374_v3  ;;  %v16386_v27 = vpop.f32.mrf.mxu0  ;;  %v16399_v15 = vmax.f32 %v2007_v8, 0.0  ;;  %v16407_v46 = vsel %vm15460_vm4, 0, %v2296_v25  ;;  %v2530_v49 = vsel %vm15468_vm5, %v2457_v52, 0  ;;  %3999 = vmatmul.mubr.bf16.gmra.mxu1 %v14190_v62  ;;  %v14563_v62 = vcombine.low %v16230_v40, %v16257_v55 }
 0x19b   : > { %v16384_v21 = vpop.f32.mrf.mxu1  ;;  %21962 = vst [vmem:[#allocation62_spill] sm:$0xff] %v16386_v27  ;;  %v16413_v0 = vsel %vm15460_vm4, 0, %v2303_v5  ;;  %v2531_v7 = vsel %vm15468_vm5, %v2459_v56, 0  ;;  %v12362_v12 = vcombine.low %v16407_v46, %v2108_v47  ;;  %v12363_v50 = vcombine.low %v2530_v49, %v2530_v49  ;;  %4008 = vmatprep.mubr.bf16.mxu1 %v21926_v11 }
 0x19c   : > { %v16393_v60 = vpop.f32.mrf.mxu0  ;;  %v12364_v28 = vcombine.low %v16413_v0, %v2109_v16  ;;  %v12365_v35 = vcombine.low %v2531_v7, %v2531_v7  ;;  %v2305_v36 = vshrl.u32 %v16397_v6, 16  ;;  %v2308_v8 = vshll.u32 %v16397_v6, 16 }
 0x19d   : > { %v16391_v3 = vpop.f32.mrf.mxu1  ;;  %v2111_v25 = vpack.c.bf16 %v16399_v15, %v16399_v15  ;;  %2925 = vst [vmem:[#allocation2 + $0x180] sm:$0xff] %v12362_v12  ;;  %2926 = vst [vmem:[#allocation2 + $0x188] sm:$0xf] %v12363_v50  ;;  %v14564_v47 = vpack.c.bf16 %v16189_v54, %v16147_v30  ;;  %v1456_v16 = vadd.f32 %v16015_v53, %v16262_v14 }
 0x19e   : > { %v16419_v4 = vpop.f32.mrf.mxu0  ;;  %2927 = vst [vmem:[#allocation2 + $0x18c] sm:$0xff] %v12364_v28  ;;  %2928 = vst [vmem:[#allocation2 + $0x194] sm:$0xf] %v12365_v35  ;;  %v16440_v56 = vadd.f32 %v16277_v57, %v16264_v31  ;;  %v2307_v49 = vrot.slane %v2305_v36, 7  ;;  %v2460_v40 = vrot.slane %v2308_v8, 1  ;;  %v1462_v30 = vadd.f32 %v16053_v10, %v16291_v17 }
 0x19f   : > { %v16417_v48 = vpop.f32.mrf.mxu1  ;;  %v2312_v55 = vshrl.u32 %v2111_v25, 16  ;;  %v2315_v7 = vshll.u32 %v2111_v25, 16  ;;  %3795 = vmatprep.mubr.bf16.mxu0 %v14564_v47  ;;  %v1896_v50 = vmul.f32 %v15414_v18, %v1456_v16  ;;  %v16451_v53 = vadd.f32 %v16065_v32, %v16310_v29 }
 0x1a0   : > { %v16432_v5 = vpop.f32.mrf.mxu0  ;;  %21963 = vst [vmem:[#allocation63_spill] sm:$0xff] %v16440_v56  ;;  %v2310_v54 = vor.u32 %v2308_v8, %v2307_v49  ;;  %v2461_v57 = vor.u32 %v2460_v40, %v2305_v36  ;;  %3796 = vmatmul.mubr.bf16.gmra.mxu0 %v14563_v62  ;;  %v1899_v16 = vmul.f32 %v15414_v18, %v1462_v30 }
 0x1a1   : > { %v16430_v52 = vpop.f32.mrf.mxu1  ;;  %21965 = vst [vmem:[#allocation65_spill] sm:$0xff] %v16451_v53  ;;  %v2314_v14 = vrot.slane %v2312_v55, 7  ;;  %v2462_v31 = vrot.slane %v2315_v7, 1  ;;  %v2010_v47 = vadd.f32 %v15421_v23, %v1896_v50  ;;  %v13192_v53 = vadd.f32 %v16363_v34, %v16343_v24 }
 0x1a2   : > { %v16444_v12 = vpop.f32.mrf.mxu0  ;;  %v16461_v10 = vsel %vm15460_vm4, 0, %v2310_v54  ;;  %v2532_v32 = vsel %vm15468_vm5, %v2461_v57, 0  ;;  %v2013_v50 = vadd.f32 %v15421_v23, %v1899_v16 }
 0x1a3   : > { %v16442_v27 = vpop.f32.mrf.mxu1  ;;  %21964 = vst [vmem:[#allocation64_spill] sm:$0xff] %v16444_v12  ;;  %v2317_v17 = vor.u32 %v2315_v7, %v2314_v14  ;;  %v2463_v29 = vor.u32 %v2462_v31, %v2312_v55  ;;  %v12366_v62 = vcombine.low %v16461_v10, %v16397_v6  ;;  %v12367_v49 = vcombine.low %v2532_v32, %v2532_v32 }
 0x1a4   : > { %v16455_v35 = vpop.f32.mrf.mxu0  ;;  %v16471_v40 = vmax.f32 %v2010_v47, 0.0  ;;  %v16482_v55 = vadd.f32 %v16312_v22, %v16293_v61  ;;  %v14194_v54 = vld [vmem:[#allocation2 + $0x17c] ss:$12 sps:$4 sm:$0xff]   ;;  %v16491_v16 = vmax.f32 %v2013_v50, 0.0  ;;  %v14565_v32 = vcombine.low %v16281_v1, %v16323_v26  ;;  %v21966_v22 = vld [vmem:[#allocation47_spill] sm:$0xff] }
 0x1a5   : > { %v16453_v28 = vpop.f32.mrf.mxu1  ;;  %v16476_v30 = vsel %vm15460_vm4, 0, %v2317_v17  ;;  %v2533_v7 = vsel %vm15468_vm5, %v2463_v29, 0  ;;  %2929 = vst [vmem:[#allocation2 + $0x198] sm:$0xff] %v12366_v62  ;;  %2930 = vst [vmem:[#allocation2 + $0x1a0] sm:$0xf] %v12367_v49  ;;  %v14566_v61 = vpack.c.bf16 %v16253_v39, %v16208_v58  ;;  %v1466_v17 = vadd.f32 %v21966_v22, %v16316_v59  ;;  %4009 = vmatmul.mubr.bf16.gmra.mxu1 %v14194_v54 }
 0x1a6   : > { %v16467_v8 = vpop.f32.mrf.mxu0  ;;  %v12368_v14 = vcombine.low %v16476_v30, %v2111_v25  ;;  %v12369_v31 = vcombine.low %v2533_v7, %v2533_v7  ;;  %v2112_v47 = vpack.c.bf16 %v16471_v40, %v16471_v40  ;;  %v2113_v50 = vpack.c.bf16 %v16491_v16, %v16491_v16  ;;  %4018 = vmatprep.mubr.bf16.mxu1 %v21926_v11  ;;  %v16936_v12 = vld [vmem:[#allocation2 + $0x184] ss:$12 sps:$4 sm:$0xff]  }
 0x1a7   : > { %v16465_v36 = vpop.f32.mrf.mxu1  ;;  %v16507_v1 = vadd.f32 %v16330_v13, %v16318_v20  ;;  %3805 = vmatprep.mubr.bf16.mxu0 %v14566_v61  ;;  %v1902_v39 = vmul.f32 %v15414_v18, %v1466_v17  ;;  %v16513_v58 = vadd.f32 %v16345_v38, %v16339_v41 }
 0x1a8   : > { %v16486_v6 = vpop.f32.mrf.mxu0  ;;  %2931 = vst [vmem:[#allocation2 + $0x1a4] sm:$0xff] %v12368_v14  ;;  %2932 = vst [vmem:[#allocation2 + $0x1ac] sm:$0xf] %v12369_v31  ;;  %v2319_v25 = vshrl.u32 %v2112_v47, 16  ;;  %v2322_v49 = vshll.u32 %v2112_v47, 16  ;;  %v2326_v14 = vshrl.u32 %v2113_v50, 16  ;;  %3806 = vmatmul.mubr.bf16.gmra.mxu0 %v14565_v32 }
 0x1a9   : > { %v16484_v57 = vpop.f32.mrf.mxu1  ;;  %21968 = vst [vmem:[#allocation66_spill] sm:$0xff] %v16513_v58  ;;  %v2329_v31 = vshll.u32 %v2113_v50, 16  ;;  %v2016_v20 = vadd.f32 %v15421_v23, %v1902_v39 }
 0x1aa   : > { %v16501_v62 = vpop.f32.mrf.mxu0  ;;  %v2321_v7 = vrot.slane %v2319_v25, 7  ;;  %v2464_v54 = vrot.slane %v2322_v49, 1  ;;  %v2328_v17 = vrot.slane %v2326_v14, 7 }
 0x1ab   : > { %v16499_v29 = vpop.f32.mrf.mxu1  ;;  %21967 = vst [vmem:[#allocation47_spill] sm:$0xff] %v16501_v62  ;;  %v2466_v38 = vrot.slane %v2329_v31, 1  ;;  %v16524_v41 = vmax.f32 %v2016_v20, 0.0  ;;  %v16530_v62 = vadd.f32 %v16273_v2, %v16365_v37 }
 0x1ac   : > { %v16517_v26 = vpop.f32.mrf.mxu0  ;;  %v2324_v18 = vor.u32 %v2322_v49, %v2321_v7  ;;  %v2465_v22 = vor.u32 %v2464_v54, %v2319_v25  ;;  %v14201_v32 = vld [vmem:[#allocation2 + $0x194] ss:$12 sps:$4 sm:$0xff]   ;;  %v2331_v39 = vor.u32 %v2329_v31, %v2328_v17 }
 0x1ad   : > { %v16515_v59 = vpop.f32.mrf.mxu1  ;;  %21969 = vst [vmem:[#allocation67_spill] sm:$0xff] %v16530_v62  ;;  %v2467_v7 = vor.u32 %v2466_v38, %v2326_v14  ;;  %v2114_v2 = vpack.c.bf16 %v16524_v41, %v16524_v41  ;;  %4019 = vmatmul.mubr.bf16.gmra.mxu1 %v14201_v32  ;;  %v14567_v14 = vcombine.low %v16349_v9, %v16407_v46  ;;  %v21972_v9 = vld [vmem:[#allocation60_spill] sm:$0xff] }
 0x1ae   : > { %v16522_v61 = vpop.f32.mrf.mxu0  ;;  %v16538_v49 = vsel %vm15460_vm4, 0, %v2324_v18  ;;  %v2534_v25 = vsel %vm15468_vm5, %v2465_v22, 0  ;;  %v16551_v20 = vsel %vm15460_vm4, 0, %v2331_v39  ;;  %4028 = vmatprep.mubr.bf16.mxu1 %v21926_v11  ;;  %v16565_v39 = vadd.f32 %v16376_v45, %v16370_v19 }
 0x1af   : > { %v16520_v13 = vpop.f32.mrf.mxu1  ;;  %v12370_v24 = vcombine.low %v16538_v49, %v2112_v47  ;;  %v12371_v34 = vcombine.low %v2534_v25, %v2534_v25  ;;  %v2535_v18 = vsel %vm15468_vm5, %v2467_v7, 0  ;;  %v12372_v47 = vcombine.low %v16551_v20, %v2113_v50  ;;  %v16950_v62 = vld [vmem:[#allocation2 + $0x19c] ss:$12 sps:$4 sm:$0xff]  }
 0x1b0   : > { %v16534_v23 = vpop.f32.mrf.mxu0  ;;  %v12373_v31 = vcombine.low %v2535_v18, %v2535_v18  ;;  %v2333_v22 = vshrl.u32 %v2114_v2, 16  ;;  %v2336_v17 = vshll.u32 %v2114_v2, 16  ;;  %v14568_v25 = vpack.c.bf16 %v16333_v51, %v16269_v44  ;;  %21971 = vst [vmem:[#allocation69_spill] sm:$0xff] %v16565_v39 }
 0x1b1   : > { %v16532_v56 = vpop.f32.mrf.mxu1  ;;  %2933 = vst [vmem:[#allocation2 + $0x1b0] sm:$0xff] %v12370_v24  ;;  %2934 = vst [vmem:[#allocation2 + $0x1b8] sm:$0xf] %v12371_v34  ;;  %v16569_v46 = vadd.f32 %v16384_v21, %v21972_v9  ;;  %v16573_v24 = vadd.f32 %v16393_v60, %v16482_v55  ;;  %v13198_v44 = vadd.f32 %v16417_v48, %v16391_v3 }
 0x1b2   : > { %v16547_v54 = vpop.f32.mrf.mxu0  ;;  %2935 = vst [vmem:[#allocation2 + $0x1bc] sm:$0xff] %v12372_v47  ;;  %2936 = vst [vmem:[#allocation2 + $0x1c4] sm:$0xf] %v12373_v31  ;;  %v2335_v50 = vrot.slane %v2333_v22, 7  ;;  %v2468_v7 = vrot.slane %v2336_v17, 1  ;;  %3815 = vmatprep.mubr.bf16.mxu0 %v14568_v25  ;;  %v16579_v51 = vadd.f32 %v16403_v33, %v16419_v4  ;;  %v21976_v47 = vld [vmem:[#allocation59_spill] sm:$0xff]  ;;  %v16585_v60 = vadd.f32 %v16432_v5, %v16507_v1 }
 0x1b3   : > { %v16545_v37 = vpop.f32.mrf.mxu1  ;;  %21970 = vst [vmem:[#allocation68_spill] sm:$0xff] %v16547_v54  ;;  %21973 = vst [vmem:[#allocation60_spill] sm:$0xff] %v16569_v46  ;;  %3816 = vmatmul.mubr.bf16.gmra.mxu0 %v14567_v14  ;;  %v14569_v31 = vpack.c.bf16 %v16388_v63, %v21976_v47  ;;  %v14570_v63 = vcombine.low %v16413_v0, %v16461_v10  ;;  %v13201_v5 = vadd.f32 %v16442_v27, %v16430_v52  ;;  %v14309_v54 = vld [vmem:[#allocation2 + $0x170] ss:$12 sps:$4 sm:$0xff]  }
 0x1b4   : > { %v16559_v32 = vpop.f32.mrf.mxu0  ;;  %21974 = vst [vmem:[#allocation70_spill] sm:$0xff] %v16573_v24  ;;  %21975 = vst [vmem:[#allocation71_spill] sm:$0xff] %v16579_v51  ;;  %v2338_v19 = vor.u32 %v2336_v17, %v2335_v50  ;;  %v2469_v45 = vor.u32 %v2468_v7, %v2333_v22  ;;  %v16599_v1 = vadd.f32 %v16455_v35, %v13198_v44 }
 0x1b5   : > { %v13214_v38 = vpop.f32.mrf.mxu1  ;;  %21977 = vst [vmem:[#allocation59_spill] sm:$0xff] %v16585_v60  ;;  %3825 = vmatprep.mubr.bf16.mxu0 %v14569_v31  ;;  %v13204_v22 = vadd.f32 %v16465_v36, %v16453_v28  ;;  %v14571_v9 = vpack.c.bf16 %v16471_v40, %v16399_v15  ;;  %v16609_v0 = vadd.f32 %v16486_v6, %v13201_v5 }
 0x1b6   : > { %v1729_v18 = vpop.f32.mrf.mxu0  ;;  %v16589_v55 = vsel %vm15460_vm4, 0, %v2338_v19  ;;  %v2536_v3 = vsel %vm15468_vm5, %v2469_v45, 0  ;;  %21978 = vst [vmem:[#allocation72_spill] sm:$0xff] %v16599_v1  ;;  %v16613_v27 = vadd.f32 %v16499_v29, %v16484_v57  ;;  %v13210_v28 = vadd.f32 %v16520_v13, %v16515_v59  ;;  %v2943_v45 = vld [vmem:[#allocation2 + $0xc] sm:$0xff] }
 0x1b7   : > { %v13215_v34 = vpop.f32.mrf.mxu1  ;;  %v12374_v48 = vcombine.low %v16589_v55, %v2114_v2  ;;  %v12375_v4 = vcombine.low %v2536_v3, %v2536_v3  ;;  %v16604_v2 = vadd.f32 %v13192_v53, %v16467_v8  ;;  %21980 = vst [vmem:[#allocation74_spill] sm:$0xff] %v16609_v0  ;;  %v16619_v53 = vadd.f32 %v13204_v22, %v16522_v61 }
 0x1b8   : > { %v14205_v14 = vld [vmem:[#allocation2 + $0x1ac] ss:$12 sps:$4 sm:$0xff]   ;;  %v13711_v17 = vpop.f32.mrf.mxu0  ;;  %21981 = vst [vmem:[#allocation75_spill] sm:$0xff] %v16613_v27  ;;  %v16624_v10 = vadd.f32 %v16517_v26, %v13210_v28  ;;  %v13213_v40 = vadd.f32 %v16545_v37, %v16532_v56  ;;  %v14572_v57 = vcombine.low %v16476_v30, %v16538_v49  ;;  %v13216_v29 = vadd.f32 %v13215_v34, %v13214_v38 }
 0x1b9   : > { %v13217_v21 = vpop.f32.mrf.mxu1  ;;  %2937 = vst [vmem:[#allocation2 + $0x1c8] sm:$0xff] %v12374_v48  ;;  %2938 = vst [vmem:[#allocation2 + $0x1d0] sm:$0xf] %v12375_v4  ;;  %4029 = vmatmul.mubr.bf16.gmra.mxu1 %v14205_v14  ;;  %v14573_v50 = vpack.c.bf16 %v16524_v41, %v16491_v16 }
 0x1ba   : > { %21979 = vst [vmem:[#allocation73_spill] sm:$0xff] %v16604_v2  ;;  %4038 = vmatprep.mubr.bf16.mxu1 %v21926_v11  ;;  %21982 = vst [vmem:[#allocation76_spill] sm:$0xff] %v16619_v53  ;;  %v16621_v35 = vpop.f32.mrf.mxu0  ;;  %v16635_v26 = vadd.f32 %v16534_v23, %v13213_v40  ;;  %v16637_v44 = vadd.f32 %v13216_v29, %v1729_v18  ;;  %v14220_v23 = vld [vmem:[%s21737_s3 + $0x470] ss:$8 sps:$4 sm:$0xff]   ;;  %v14239_v18 = vld [vmem:[%s21737_s3 + $0x464] ss:$8 sps:$4 sm:$0xff]  }
 0x1bb   : > { %v13218_v33 = vpop.f32.mrf.mxu1  ;;  %3826 = vmatmul.mubr.bf16.gmra.mxu0 %v14570_v63  ;;  %21983 = vst [vmem:[#allocation77_spill] sm:$0xff] %v16621_v35  ;;  %21984 = vst [vmem:[#allocation78_spill] sm:$0xff] %v16624_v10  ;;  %v14253_v63 = vld [vmem:[%s21737_s3 + $0x454] ss:$8 sps:$4 sm:$0xff]  }
 0x1bc   : > { %3835 = vmatprep.mubr.bf16.mxu0 %v14571_v9  ;;  %v13714_v8 = vpop.f32.mrf.mxu0  ;;  %v16630_v59 = vadd.f32 %v13218_v33, %v13217_v21  ;;  %21986 = vst [vmem:[#allocation80_spill] sm:$0xff] %v16635_v26  ;;  %21987 = vst [vmem:[#allocation81_spill] sm:$0xff] %v16637_v44  ;;  %v14216_v21 = vld [vmem:[#allocation2 + $0x8] ss:$12 sps:$4 sm:$0xff]   ;;  %v16657_v33 = vld [vmem:[#allocation2] sm:$0xff] }
 0x1bd   : > { %v13220_v25 = vpop.f32.mrf.mxu1  ;;  %v12521_v48 = vcombine.high %v16657_v33, %v2943_v45  ;;  %v14251_v9 = vld [vmem:[%s21737_s3 + $0x450] ss:$8 sps:$4 sm:$0xff]   ;;  %v12520_v40 = vcombine.low %v16657_v33, %v2943_v45  ;;  %v16911_v26 = vld [vmem:[#allocation2 + $0x120] ss:$12 sps:$4 sm:$0xff]   ;;  %v16913_v10 = vld [vmem:[#allocation2 + $0x13c] ss:$12 sps:$4 sm:$0xff]  }
 0x1be   : > { %21985 = vst [vmem:[#allocation79_spill] sm:$0xff] %v16630_v59  ;;  %v1745_v49 = vpop.f32.mrf.mxu0  ;;  %v14233_v45 = vld [vmem:[#allocation2 + $0x38] ss:$12 sps:$4 sm:$0xff]   ;;  %v14319_v2 = vld [vmem:[#allocation2 + $0x188] ss:$12 sps:$4 sm:$0xff]  }
 0x1bf   : > { %v13221_v52 = vpop.f32.mrf.mxu1 }
 0x1c0   : > { %v14212_v6 = vld [vmem:[#allocation2 + $0x1c4] ss:$12 sps:$4 sm:$0xff]   ;;  %v13222_v13 = vadd.f32 %v13221_v52, %v13220_v25  ;;  %v13715_v47 = vpop.f32.mrf.mxu0  ;;  %v14226_v52 = vld [vmem:[#allocation2 + $0x20] ss:$12 sps:$4 sm:$0xff]  }
 0x1c1   : > { %v13223_v15 = vpop.f32.mrf.mxu1  ;;  %4039 = vmatmul.mubr.bf16.gmra.mxu1 %v14212_v6 }
 0x1c2   : > { %v16640_v56 = vadd.f32 %v16559_v32, %v13222_v13  ;;  %4770 = vmatprep.mubr.bf16.mxu1 %v21926_v11  ;;  %v14574_v32 = vcombine.low %v16551_v20, %v16589_v55  ;;  %v14237_v20 = vld [vmem:[%s21737_s3 + $0x460] ss:$8 sps:$4 sm:$0xff]   ;;  %v16664_v4 = vpop.f32.mrf.mxu0 }
 0x1c3   : > { %v13224_v36 = vpop.f32.mrf.mxu1  ;;  %3836 = vmatmul.mubr.bf16.gmra.mxu0 %v14572_v57  ;;  %21992 = vst [vmem:[#allocation86_spill] sm:$0xff] %v16664_v4  ;;  %v14229_v57 = vld [vmem:[%s21737_s3 + $0x364] ss:$8 sps:$4 sm:$0xff]   ;;  %v16686_v13 = vld [vmem:[#allocation2 + $0x1c] ss:$12 sps:$4 sm:$0xff]  }
 0x1c4   : > { %v13225_v7 = vadd.f32 %v13224_v36, %v13223_v15  ;;  %21988 = vst [vmem:[#allocation82_spill] sm:$0xff] %v16640_v56  ;;  %3845 = vmatprep.mubr.bf16.mxu0 %v14573_v50  ;;  %v14270_v15 = vld [vmem:[%s21737_s3 + $0x444] ss:$8 sps:$4 sm:$0xff]   ;;  %v14217_v36 = vld [vmem:[%s21737_s3 + $0x370] ss:$8 sps:$4 sm:$0xff]  }
 0x1c5   : > { %v13226_v61 = vpop.f32.mrf.mxu1  ;;  %v14268_v50 = vld [vmem:[%s21737_s3 + $0x440] ss:$8 sps:$4 sm:$0xff]  }
 0x1c6   : > { %v16643_v37 = vadd.f32 %v13711_v17, %v13225_v7  ;;  %v13718_v17 = vpop.f32.mrf.mxu0 }
 0x1c7   : > { %v13227_v30 = vpop.f32.mrf.mxu1 }
 0x1c8   : > { %21989 = vst [vmem:[#allocation83_spill] sm:$0xff] %v16643_v37  ;;  %v13228_v38 = vadd.f32 %v13227_v30, %v13226_v61  ;;  %v1761_v29 = vpop.f32.mrf.mxu0  ;;  %v14284_v30 = vld [vmem:[%s21737_s3 + $0x434] ss:$8 sps:$4 sm:$0xff]  }
 0x1c9   : > { %v13229_v34 = vpop.f32.mrf.mxu1  ;;  %4771 = vmatmul.mubr.bf16.vlgmr.msra.gmra.mxu1 %v14216_v21 }
 0x1ca   : > { %v16645_v16 = vadd.f32 %v13228_v38, %v1745_v49  ;;  %5735 = vmatpush1.bf16.msra.mxu1 %v14220_v23  ;;  %4780 = vmatprep.mubr.bf16.mxu1 %v21926_v11  ;;  %v14227_v49 = vld [vmem:[%s21737_s3 + $0x360] ss:$8 sps:$4 sm:$0xff]   ;;  %v13719_v21 = vpop.f32.mrf.mxu0 }
 0x1cb   : > { %v13230_v41 = vpop.f32.mrf.mxu1  ;;  %3846 = vmatmul.mubr.bf16.gmra.mxu0 %v14574_v32  ;;  %5736 = vmatprep.subr.bf16.mxu1 %v14239_v18  ;;  %v14282_v32 = vld [vmem:[%s21737_s3 + $0x430] ss:$8 sps:$4 sm:$0xff]  }
 0x1cc   : > { %21990 = vst [vmem:[#allocation84_spill] sm:$0xff] %v16645_v16  ;;  %v16650_v19 = vadd.f32 %v13230_v41, %v13229_v34  ;;  %4577 = vmatprep.mubr.bf16.mxu0 %v12521_v48  ;;  %v14236_v34 = vld [vmem:[%s21737_s3 + $0x354] ss:$8 sps:$4 sm:$0xff]   ;;  %v14246_v48 = vld [vmem:[%s21737_s3 + $0x344] ss:$8 sps:$4 sm:$0xff]  }
 0x1cd   : > { %v13232_v31 = vpop.f32.mrf.mxu1 }
 0x1ce   : > { %21991 = vst [vmem:[#allocation85_spill] sm:$0xff] %v16650_v19  ;;  %5737 = vmatpush1.bf16.msra.mxu1 %v14237_v20 }
 0x1cf   : > { %v13233_v3 = vpop.f32.mrf.mxu1  ;;  %5738 = vmatprep.subr.bf16.mxu1 %v14253_v63  ;;  %v14299_v63 = vld [vmem:[%s21737_s3 + $0x420] ss:$8 sps:$4 sm:$0xff]  }
 0x1d0   : > { %v13234_v55 = vadd.f32 %v13233_v3, %v13232_v31  ;;  %v14234_v31 = vld [vmem:[%s21737_s3 + $0x350] ss:$8 sps:$4 sm:$0xff]  }
 0x1d1   : > { %v13235_v14 = vpop.f32.mrf.mxu1  ;;  %4781 = vmatmul.mubr.bf16.gmra.mxu1 %v14226_v52  ;;  %v16715_v3 = vld [vmem:[#allocation2 + $0x18] ss:$12 sps:$4 sm:$0xff]   ;;  %v14244_v52 = vld [vmem:[%s21737_s3 + $0x340] ss:$8 sps:$4 sm:$0xff]  }
 0x1d2   : > { %v16669_v5 = vadd.f32 %v13714_v8, %v13234_v55  ;;  %4790 = vmatprep.mubr.bf16.mxu1 %v21926_v11  ;;  %5739 = vmatpush1.bf16.msra.mxu1 %v14251_v9  ;;  %v16720_v55 = vld [vmem:[#allocation2 + $0x34] ss:$12 sps:$4 sm:$0xff]  }
 0x1d3   : > { %v13236_v22 = vpop.f32.mrf.mxu1  ;;  %4578 = vmatmul.mubr.bf16.vlgmr.msra.gmra.mxu0 %v12520_v40  ;;  %5740 = vmatprep.subr.bf16.mxu1 %v14270_v15  ;;  %v14315_v9 = vld [vmem:[%s21737_s3 + $0x414] ss:$8 sps:$4 sm:$0xff]  }
 0x1d4   : > { %21993 = vst [vmem:[#allocation87_spill] sm:$0xff] %v16669_v5  ;;  %v13237_v25 = vadd.f32 %v13236_v22, %v13235_v14  ;;  %5542 = vmatpush1.bf16.msra.mxu0 %v14217_v36  ;;  %4587 = vmatprep.mubr.bf16.mxu0 %v16686_v13  ;;  %v16727_v22 = vpop.f32.mrf.mxu0  ;;  %v14250_v15 = vld [vmem:[%s21737_s3 + $0x334] ss:$8 sps:$4 sm:$0xff]  }
 0x1d5   : > { %v13238_v28 = vpop.f32.mrf.mxu1  ;;  %5543 = vmatprep.subr.bf16.mxu0 %v14229_v57  ;;  %21997 = vst [vmem:[#allocation91_spill] sm:$0xff] %v16727_v22  ;;  %v14339_v22 = vld [vmem:[%s21737_s3 + $0x384] ss:$8 sps:$4 sm:$0xff]   ;;  %v14288_v5 = vld [vmem:[#allocation2 + $0x110] ss:$12 sps:$4 sm:$0xff]  }
 0x1d6   : > { %v16680_v8 = vadd.f32 %v13715_v47, %v13237_v25  ;;  %5741 = vmatpush1.bf16.msra.mxu1 %v14268_v50  ;;  %v14301_v47 = vld [vmem:[%s21737_s3 + $0x424] ss:$8 sps:$4 sm:$0xff]   ;;  %v13722_v40 = vpop.f32.mrf.mxu0  ;;  %v14248_v50 = vld [vmem:[%s21737_s3 + $0x330] ss:$8 sps:$4 sm:$0xff]  }
 0x1d7   : > { %v13239_v6 = vpop.f32.mrf.mxu1  ;;  %5742 = vmatprep.subr.bf16.mxu1 %v14284_v30  ;;  %v16752_v30 = vld [vmem:[#allocation2 + $0x30] ss:$12 sps:$4 sm:$0xff]  }
 0x1d8   : > { %21994 = vst [vmem:[#allocation88_spill] sm:$0xff] %v16680_v8  ;;  %v13240_v61 = vadd.f32 %v13239_v6, %v13238_v28  ;;  %5544 = vmatpush1.bf16.msra.mxu0 %v14227_v49  ;;  %v14313_v6 = vld [vmem:[%s21737_s3 + $0x410] ss:$8 sps:$4 sm:$0xff]   ;;  %v14260_v49 = vld [vmem:[%s21737_s3 + $0x324] ss:$8 sps:$4 sm:$0xff]  }
 0x1d9   : > { %v13241_v7 = vpop.f32.mrf.mxu1  ;;  %4791 = vmatmul.mubr.bf16.gmra.mxu1 %v14233_v45  ;;  %5545 = vmatprep.subr.bf16.mxu0 %v14236_v34 }
 0x1da   : > { %v16699_v38 = vadd.f32 %v13240_v61, %v1761_v29  ;;  %4800 = vmatprep.mubr.bf16.mxu1 %v21926_v11  ;;  %5743 = vmatpush1.bf16.msra.mxu1 %v14282_v32  ;;  %v14243_v29 = vld [vmem:[#allocation2 + $0x50] ss:$12 sps:$4 sm:$0xff]   ;;  %v16757_v32 = vld [vmem:[#allocation2 + $0x4c] ss:$12 sps:$4 sm:$0xff]  }
 0x1db   : > { %v13242_v41 = vpop.f32.mrf.mxu1  ;;  %4588 = vmatmul.mubr.bf16.gmra.mxu0 %v16715_v3  ;;  %5744 = vmatprep.subr.bf16.mxu1 %v14301_v47  ;;  %v14258_v47 = vld [vmem:[%s21737_s3 + $0x320] ss:$8 sps:$4 sm:$0xff]  }
 0x1dc   : > { %21995 = vst [vmem:[#allocation89_spill] sm:$0xff] %v16699_v38  ;;  %v16704_v23 = vadd.f32 %v13242_v41, %v13241_v7  ;;  %4597 = vmatprep.mubr.bf16.mxu0 %v16720_v55  ;;  %5546 = vmatpush1.bf16.msra.mxu0 %v14234_v31  ;;  %v1777_v41 = vpop.f32.mrf.mxu0 }
 0x1dd   : > { %v13244_v18 = vpop.f32.mrf.mxu1  ;;  %5547 = vmatprep.subr.bf16.mxu0 %v14246_v48  ;;  %v14267_v48 = vld [vmem:[%s21737_s3 + $0x314] ss:$8 sps:$4 sm:$0xff]  }
 0x1de   : > { %21996 = vst [vmem:[#allocation90_spill] sm:$0xff] %v16704_v23  ;;  %5745 = vmatpush1.bf16.msra.mxu1 %v14299_v63  ;;  %v2959_v63 = vld [vmem:[#allocation2 + $0x84] sm:$0xff] }
 0x1df   : > { %v13245_v20 = vpop.f32.mrf.mxu1  ;;  %5746 = vmatprep.subr.bf16.mxu1 %v14315_v9 }
 0x1e0   : > { %v13246_v14 = vadd.f32 %v13245_v20, %v13244_v18  ;;  %5548 = vmatpush1.bf16.msra.mxu0 %v14244_v52  ;;  %v14265_v52 = vld [vmem:[%s21737_s3 + $0x310] ss:$8 sps:$4 sm:$0xff]  }
 0x1e1   : > { %v13247_v25 = vpop.f32.mrf.mxu1  ;;  %4801 = vmatmul.mubr.bf16.gmra.mxu1 %v14243_v29  ;;  %5549 = vmatprep.subr.bf16.mxu0 %v14250_v15  ;;  %v16778_v15 = vld [vmem:[#allocation2 + $0x48] ss:$12 sps:$4 sm:$0xff]  }
 0x1e2   : > { %v16736_v28 = vadd.f32 %v13718_v17, %v13246_v14  ;;  %v14332_v17 = vld [vmem:[%s21737_s3 + $0x404] ss:$8 sps:$4 sm:$0xff]   ;;  %4810 = vmatprep.mubr.bf16.mxu1 %v21926_v11  ;;  %5747 = vmatpush1.bf16.msra.mxu1 %v14313_v6  ;;  %v12533_v6 = vcombine.high %v16657_v33, %v2959_v63 }
 0x1e3   : > { %v13248_v36 = vpop.f32.mrf.mxu1  ;;  %4598 = vmatmul.mubr.bf16.gmra.mxu0 %v16752_v30  ;;  %5748 = vmatprep.subr.bf16.mxu1 %v14332_v17 }
 0x1e4   : > { %21998 = vst [vmem:[#allocation92_spill] sm:$0xff] %v16736_v28  ;;  %v13249_v57 = vadd.f32 %v13248_v36, %v13247_v25  ;;  %4607 = vmatprep.mubr.bf16.mxu0 %v16757_v32  ;;  %5550 = vmatpush1.bf16.msra.mxu0 %v14248_v50  ;;  %v14247_v25 = vld [vmem:[#allocation2 + $0x80] ss:$12 sps:$4 sm:$0xff]  }
 0x1e5   : > { %v13250_v61 = vpop.f32.mrf.mxu1  ;;  %5551 = vmatprep.subr.bf16.mxu0 %v14260_v49  ;;  %v14275_v50 = vld [vmem:[%s21737_s3 + $0x300] ss:$8 sps:$4 sm:$0xff]  }
 0x1e6   : > { %v16750_v7 = vadd.f32 %v13719_v21, %v13249_v57  ;;  %v14330_v21 = vld [vmem:[%s21737_s3 + $0x400] ss:$8 sps:$4 sm:$0xff]   ;;  %v14277_v57 = vld [vmem:[%s21737_s3 + $0x304] ss:$8 sps:$4 sm:$0xff]  }
 0x1e7   : > { %v13251_v34 = vpop.f32.mrf.mxu1  ;;  %5749 = vmatpush1.bf16.msra.mxu1 %v14330_v21  ;;  %v13723_v21 = vpop.f32.mrf.mxu0 }
 0x1e8   : > { %21999 = vst [vmem:[#allocation93_spill] sm:$0xff] %v16750_v7  ;;  %v13252_v45 = vadd.f32 %v13251_v34, %v13250_v61  ;;  %5552 = vmatpush1.bf16.msra.mxu0 %v14258_v47  ;;  %v14281_v34 = vld [vmem:[%s21737_s3 + $0x3f4] ss:$8 sps:$4 sm:$0xff]  }
 0x1e9   : > { %v13253_v18 = vpop.f32.mrf.mxu1  ;;  %4811 = vmatmul.mubr.bf16.gmra.mxu1 %v14247_v25  ;;  %5553 = vmatprep.subr.bf16.mxu0 %v14267_v48  ;;  %v12532_v48 = vcombine.low %v16657_v33, %v2959_v63  ;;  %v16803_v25 = vld [vmem:[#allocation2 + $0x94] ss:$12 sps:$4 sm:$0xff]  }
 0x1ea   : > { %v16768_v31 = vadd.f32 %v13252_v45, %v1777_v41  ;;  %4820 = vmatprep.mubr.bf16.mxu1 %v21926_v11  ;;  %v14257_v45 = vld [vmem:[#allocation2 + $0x98] ss:$12 sps:$4 sm:$0xff]   ;;  %v14289_v63 = vld [vmem:[%s21737_s3 + $0x3e0] ss:$8 sps:$4 sm:$0xff]  }
 0x1eb   : > { %v13254_v20 = vpop.f32.mrf.mxu1  ;;  %4608 = vmatmul.mubr.bf16.gmra.mxu0 %v16778_v15 }
 0x1ec   : > { %22000 = vst [vmem:[#allocation94_spill] sm:$0xff] %v16768_v31  ;;  %v16773_v14 = vadd.f32 %v13254_v20, %v13253_v18  ;;  %4617 = vmatprep.mubr.bf16.mxu0 %v12533_v6  ;;  %5554 = vmatpush1.bf16.msra.mxu0 %v14265_v52  ;;  %v14291_v20 = vld [vmem:[%s21737_s3 + $0x3e4] ss:$8 sps:$4 sm:$0xff]   ;;  %v14264_v6 = vld [vmem:[#allocation2 + $0xb0] ss:$12 sps:$4 sm:$0xff]  }
 0x1ed   : > { %v13256_v9 = vpop.f32.mrf.mxu1  ;;  %5555 = vmatprep.subr.bf16.mxu0 %v14277_v57  ;;  %v14298_v57 = vld [vmem:[%s21737_s3 + $0x3d4] ss:$8 sps:$4 sm:$0xff]   ;;  %v14278_v31 = vld [vmem:[#allocation2 + $0xf8] ss:$12 sps:$4 sm:$0xff]  }
 0x1ee   : > { %22001 = vst [vmem:[#allocation95_spill] sm:$0xff] %v16773_v14 }
 0x1ef   : > { %v13257_v36 = vpop.f32.mrf.mxu1 }
 0x1f0   : > { %v13258_v29 = vadd.f32 %v13257_v36, %v13256_v9  ;;  %5556 = vmatpush1.bf16.msra.mxu0 %v14275_v50  ;;  %v16810_v36 = vpop.f32.mrf.mxu0  ;;  %v16818_v50 = vld [vmem:[#allocation2 + $0x90] ss:$12 sps:$4 sm:$0xff]  }
 0x1f1   : > { %v13259_v61 = vpop.f32.mrf.mxu1  ;;  %4821 = vmatmul.mubr.bf16.gmra.mxu1 %v14257_v45  ;;  %5557 = vmatprep.subr.bf16.mxu0 %v14281_v34  ;;  %22004 = vst [vmem:[#allocation98_spill] sm:$0xff] %v16810_v36  ;;  %v14308_v34 = vld [vmem:[%s21737_s3 + $0x3c4] ss:$8 sps:$4 sm:$0xff]   ;;  %v2975_v36 = vld [vmem:[#allocation2 + $0xfc] sm:$0xff] }
 0x1f2   : > { %v16786_v17 = vadd.f32 %v13722_v40, %v13258_v29  ;;  %v14279_v40 = vld [vmem:[%s21737_s3 + $0x3f0] ss:$8 sps:$4 sm:$0xff]   ;;  %4830 = vmatprep.mubr.bf16.mxu1 %v21926_v11 }
 0x1f3   : > { %v13260_v49 = vpop.f32.mrf.mxu1  ;;  %4618 = vmatmul.mubr.bf16.gmra.mxu0 %v12532_v48 }
 0x1f4   : > { %22002 = vst [vmem:[#allocation96_spill] sm:$0xff] %v16786_v17  ;;  %v13261_v41 = vadd.f32 %v13260_v49, %v13259_v61  ;;  %4627 = vmatprep.mubr.bf16.mxu0 %v16803_v25  ;;  %5558 = vmatpush2.bf16.msra.mxu0 %v14279_v40  ;;  %v14296_v61 = vld [vmem:[%s21737_s3 + $0x3d0] ss:$8 sps:$4 sm:$0xff]  }
 0x1f5   : > { %v3890_v47 = vpop.f32.mrf.mxu1  ;;  %5559 = vmatprep.subr.bf16.mxu0 %v14291_v20  ;;  %v14306_v20 = vld [vmem:[%s21737_s3 + $0x3c0] ss:$8 sps:$4 sm:$0xff]  }
 0x1f6   : > { %v16794_v18 = vadd.f32 %v13723_v21, %v13261_v41  ;;  %v16823_v41 = vld [vmem:[#allocation2 + $0xac] ss:$12 sps:$4 sm:$0xff]  }
 0x1f7   : > { %v3892_v9 = vpop.f32.mrf.mxu1 }
 0x1f8   : > { %22003 = vst [vmem:[#allocation97_spill] sm:$0xff] %v16794_v18  ;;  %5560 = vmatpush2.bf16.msra.mxu0 %v14289_v63 }
 0x1f9   : > { %v3894_v52 = vpop.f32.mrf.mxu1  ;;  %4831 = vmatmul.mubr.bf16.gmra.mxu1 %v14264_v6  ;;  %5561 = vmatprep.subr.bf16.mxu0 %v14298_v57 }
 0x1fa   : > { %4840 = vmatprep.mubr.bf16.mxu1 %v21926_v11 }
 0x1fb   : > { %v3896_v29 = vpop.f32.mrf.mxu1  ;;  %4628 = vmatmul.mubr.bf16.gmra.mxu0 %v16818_v50 }
 0x1fc   : > { %4637 = vmatprep.mubr.bf16.mxu0 %v16823_v41  ;;  %5562 = vmatpush2.bf16.msra.mxu0 %v14296_v61  ;;  %v16845_v61 = vld [vmem:[#allocation2 + $0xa8] ss:$12 sps:$4 sm:$0xff]  }
 0x1fd   : > { %v3697_v49 = vpop.f32.mrf.mxu0  ;;  %5563 = vmatprep.subr.bf16.mxu0 %v14308_v34 }
 0x1fe   : > { %v16826_v45 = vadd.f32 %v3890_v47, %v3697_v49  ;;  %v14312_v47 = vld [vmem:[%s21737_s3 + $0x3b4] ss:$8 sps:$4 sm:$0xff]  }
 0x1ff   : > { %v3699_v21 = vpop.f32.mrf.mxu0  ;;  %v3900_v40 = vpop.f32.mrf.mxu1  ;;  %v14274_v49 = vld [vmem:[#allocation2 + $0xc8] ss:$12 sps:$4 sm:$0xff]  }
 0x200   : > { %v16830_v48 = vadd.f32 %v3892_v9, %v3699_v21  ;;  %5564 = vmatpush2.bf16.msra.mxu0 %v14306_v20  ;;  %v14310_v9 = vld [vmem:[%s21737_s3 + $0x3b0] ss:$8 sps:$4 sm:$0xff]  }
 0x201   : > { %v3701_v63 = vpop.f32.mrf.mxu0  ;;  %v3902_v57 = vpop.f32.mrf.mxu1  ;;  %4841 = vmatmul.mubr.bf16.gmra.mxu1 %v14274_v49  ;;  %5565 = vmatprep.subr.bf16.mxu0 %v14312_v47  ;;  %v16850_v21 = vld [vmem:[#allocation2 + $0xc4] ss:$12 sps:$4 sm:$0xff]   ;;  %v14329_v47 = vld [vmem:[%s21737_s3 + $0x394] ss:$8 sps:$4 sm:$0xff]  }
 0x202   : > { %v16838_v6 = vadd.f32 %v3894_v52, %v3701_v63  ;;  %v14322_v52 = vld [vmem:[%s21737_s3 + $0x3a4] ss:$8 sps:$4 sm:$0xff]   ;;  %4850 = vmatprep.mubr.bf16.mxu1 %v21926_v11 }
 0x203   : > { %v3703_v18 = vpop.f32.mrf.mxu0  ;;  %v3904_v17 = vpop.f32.mrf.mxu1  ;;  %4638 = vmatmul.mubr.bf16.gmra.mxu0 %v16845_v61 }
 0x204   : > { %v16840_v14 = vadd.f32 %v3896_v29, %v3703_v18  ;;  %4647 = vmatprep.mubr.bf16.mxu0 %v16850_v21  ;;  %5566 = vmatpush2.bf16.msra.mxu0 %v14310_v9  ;;  %v14320_v29 = vld [vmem:[%s21737_s3 + $0x3a0] ss:$8 sps:$4 sm:$0xff]   ;;  %v14327_v9 = vld [vmem:[%s21737_s3 + $0x390] ss:$8 sps:$4 sm:$0xff]  }
 0x205   : > { %v3906_v34 = vpop.f32.mrf.mxu1  ;;  %5567 = vmatprep.subr.bf16.mxu0 %v14322_v52 }
 0x208   : > { %5568 = vmatpush2.bf16.msra.mxu0 %v14320_v29 }
 0x209   : > { %v3707_v18 = vpop.f32.mrf.mxu0  ;;  %v3910_v63 = vpop.f32.mrf.mxu1  ;;  %4851 = vmatmul.mubr.bf16.gmra.mxu1 %v14278_v31  ;;  %5569 = vmatprep.subr.bf16.mxu0 %v14329_v47 }
 0x20a   : > { %v16858_v20 = vadd.f32 %v3900_v40, %v3707_v18  ;;  %v16868_v40 = vld [vmem:[#allocation2 + $0xc0] ss:$12 sps:$4 sm:$0xff]   ;;  %4860 = vmatprep.mubr.bf16.mxu1 %v21926_v11 }
 0x20b   : > { %v3709_v49 = vpop.f32.mrf.mxu0  ;;  %v3912_v28 = vpop.f32.mrf.mxu1  ;;  %4648 = vmatmul.mubr.bf16.gmra.mxu0 %v16868_v40 }
 0x20c   : > { %v16863_v7 = vadd.f32 %v3902_v57, %v3709_v49  ;;  %v12545_v57 = vcombine.high %v16657_v33, %v2975_v36  ;;  %5570 = vmatpush2.bf16.msra.mxu0 %v14327_v9 }
 0x20d   : > { %v3711_v23 = vpop.f32.mrf.mxu0  ;;  %v3914_v18 = vpop.f32.mrf.mxu1  ;;  %5571 = vmatprep.subr.bf16.mxu0 %v14339_v22 }
 0x20e   : > { %v16870_v52 = vadd.f32 %v3904_v17, %v3711_v23  ;;  %4657 = vmatprep.mubr.bf16.mxu0 %v12545_v57  ;;  %v14337_v23 = vld [vmem:[%s21737_s3 + $0x380] ss:$8 sps:$4 sm:$0xff]  }
 0x20f   : > { %v3713_v29 = vpop.f32.mrf.mxu0  ;;  %v3916_v38 = vpop.f32.mrf.mxu1 }
 0x210   : > { %v16878_v49 = vadd.f32 %v3906_v34, %v3713_v29  ;;  %5572 = vmatpush2.bf16.msra.mxu0 %v14337_v23  ;;  %v12544_v34 = vcombine.low %v16657_v33, %v2975_v36  ;;  %v16890_v29 = vld [vmem:[#allocation2 + $0x10c] ss:$12 sps:$4 sm:$0xff]  }
 0x211   : > { %v3717_v31 = vpop.f32.mrf.mxu0  ;;  %v3920_v47 = vpop.f32.mrf.mxu1  ;;  %4861 = vmatmul.mubr.bf16.gmra.mxu1 %v14288_v5 }
 0x212   : > { %v16883_v17 = vadd.f32 %v3910_v63, %v3717_v31  ;;  %4870 = vmatprep.mubr.bf16.mxu1 %v21926_v11  ;;  %v16896_v31 = vld [vmem:[#allocation2 + $0x108] ss:$12 sps:$4 sm:$0xff]  }
 0x213   : > { %v3719_v8 = vpop.f32.mrf.mxu0  ;;  %v3922_v4 = vpop.f32.mrf.mxu1  ;;  %4658 = vmatmul.mubr.bf16.gmra.mxu0 %v12544_v34 }
 0x214   : > { %v16885_v19 = vadd.f32 %v3912_v28, %v3719_v8  ;;  %4667 = vmatprep.mubr.bf16.mxu0 %v16890_v29  ;;  %v14295_v28 = vld [vmem:[#allocation2 + $0x128] ss:$12 sps:$4 sm:$0xff]  }
 0x215   : > { %v3721_v16 = vpop.f32.mrf.mxu0  ;;  %v3924_v9 = vpop.f32.mrf.mxu1 }
 0x216   : > { %v16888_v57 = vadd.f32 %v3914_v18, %v3721_v16  ;;  %v16898_v16 = vld [vmem:[#allocation2 + $0x124] ss:$12 sps:$4 sm:$0xff]  }
 0x217   : > { %v3723_v63 = vpop.f32.mrf.mxu0  ;;  %v3926_v8 = vpop.f32.mrf.mxu1 }
 0x218   : > { %v16893_v22 = vadd.f32 %v3916_v38, %v3723_v63 }
 0x219   : > { %4871 = vmatmul.mubr.bf16.gmra.mxu1 %v14295_v28  ;;  %v14305_v28 = vld [vmem:[#allocation2 + $0x140] ss:$12 sps:$4 sm:$0xff]  }
 0x21a   : > { %4880 = vmatprep.mubr.bf16.mxu1 %v21926_v11 }
 0x21b   : > { %4668 = vmatmul.mubr.bf16.gmra.mxu0 %v16896_v31 }
 0x21c   : > { %4677 = vmatprep.mubr.bf16.mxu0 %v16898_v16 }
 0x21d   : > { %v3727_v36 = vpop.f32.mrf.mxu0  ;;  %v3930_v5 = vpop.f32.mrf.mxu1 }
 0x21e   : > { %v16901_v18 = vadd.f32 %v3920_v47, %v3727_v36 }
 0x21f   : > { %v3729_v23 = vpop.f32.mrf.mxu0  ;;  %v3932_v38 = vpop.f32.mrf.mxu1 }
 0x220   : > { %v16905_v34 = vadd.f32 %v3922_v4, %v3729_v23 }
 0x221   : > { %v3731_v63 = vpop.f32.mrf.mxu0  ;;  %v3934_v37 = vpop.f32.mrf.mxu1  ;;  %4881 = vmatmul.mubr.bf16.gmra.mxu1 %v14305_v28  ;;  %v2991_v28 = vld [vmem:[#allocation2 + $0x174] sm:$0xff] }
 0x222   : > { %v16907_v56 = vadd.f32 %v3924_v9, %v3731_v63  ;;  %4890 = vmatprep.mubr.bf16.mxu1 %v21926_v11  ;;  %v12557_v46 = vcombine.high %v16657_v33, %v2991_v28 }
 0x223   : > { %v3733_v59 = vpop.f32.mrf.mxu0  ;;  %v3936_v35 = vpop.f32.mrf.mxu1  ;;  %4678 = vmatmul.mubr.bf16.gmra.mxu0 %v16911_v26 }
 0x224   : > { %v16909_v44 = vadd.f32 %v3926_v8, %v3733_v59  ;;  %4687 = vmatprep.mubr.bf16.mxu0 %v16913_v10 }
 0x225   : > { %v3737_v47 = vpop.f32.mrf.mxu0  ;;  %v3940_v36 = vpop.f32.mrf.mxu1 }
 0x226   : > { %v16916_v4 = vadd.f32 %v3930_v5, %v3737_v47  ;;  %v16926_v5 = vld [vmem:[#allocation2 + $0x138] ss:$12 sps:$4 sm:$0xff]  }
 0x227   : > { %v3739_v9 = vpop.f32.mrf.mxu0  ;;  %v3942_v23 = vpop.f32.mrf.mxu1 }
 0x228   : > { %v16920_v63 = vadd.f32 %v3932_v38, %v3739_v9 }
 0x229   : > { %v3741_v59 = vpop.f32.mrf.mxu0  ;;  %v3944_v8 = vpop.f32.mrf.mxu1  ;;  %4891 = vmatmul.mubr.bf16.gmra.mxu1 %v14309_v54  ;;  %v12556_v54 = vcombine.low %v16657_v33, %v2991_v28  ;;  %v14326_v33 = vld [vmem:[#allocation2 + $0x1a0] ss:$12 sps:$4 sm:$0xff]  }
 0x22a   : > { %v16922_v27 = vadd.f32 %v3934_v37, %v3741_v59  ;;  %4900 = vmatprep.mubr.bf16.mxu1 %v21926_v11 }
 0x22b   : > { %v3743_v53 = vpop.f32.mrf.mxu0  ;;  %v3946_v0 = vpop.f32.mrf.mxu1  ;;  %4688 = vmatmul.mubr.bf16.gmra.mxu0 %v16926_v5 }
 0x22c   : > { %v16924_v1 = vadd.f32 %v3936_v35, %v3743_v53  ;;  %4697 = vmatprep.mubr.bf16.mxu0 %v12557_v46 }
 0x22d   : > { %v3950_v47 = vpop.f32.mrf.mxu1 }
 0x22e   : > { %22005 = vst [vmem:[#allocation99_spill] sm:$0xff] %v16924_v1 }
 0x22f   : > { %v3952_v38 = vpop.f32.mrf.mxu1 }
 0x230   : > { %v3747_v37 = vpop.f32.mrf.mxu0 }
 0x231   : > { %v3954_v9 = vpop.f32.mrf.mxu1  ;;  %v16931_v59 = vadd.f32 %v3940_v36, %v3747_v37  ;;  %4901 = vmatmul.mubr.bf16.gmra.mxu1 %v14319_v2 }
 0x232   : > { %v3749_v60 = vpop.f32.mrf.mxu0  ;;  %4910 = vmatprep.mubr.bf16.mxu1 %v21926_v11 }
 0x233   : > { %v3956_v53 = vpop.f32.mrf.mxu1  ;;  %v16933_v35 = vadd.f32 %v3942_v23, %v3749_v60  ;;  %4698 = vmatmul.mubr.bf16.gmra.mxu0 %v12556_v54 }
 0x234   : > { %v3751_v24 = vpop.f32.mrf.mxu0  ;;  %4707 = vmatprep.mubr.bf16.mxu0 %v16936_v12 }
 0x235   : > { %v16938_v51 = vadd.f32 %v3944_v8, %v3751_v24  ;;  %v16948_v24 = vld [vmem:[#allocation2 + $0x180] ss:$12 sps:$4 sm:$0xff]  }
 0x236   : > { %v3753_v46 = vpop.f32.mrf.mxu0  ;;  %v3960_v39 = vpop.f32.mrf.mxu1 }
 0x237   : > { %22006 = vst [vmem:[#allocation100_spill] sm:$0xff] %v16938_v51  ;;  %v16942_v36 = vadd.f32 %v3946_v0, %v3753_v46 }
 0x238   : > { %v3757_v37 = vpop.f32.mrf.mxu0  ;;  %v3962_v60 = vpop.f32.mrf.mxu1 }
 0x239   : > { %22007 = vst [vmem:[#allocation101_spill] sm:$0xff] %v16942_v36  ;;  %v16944_v23 = vadd.f32 %v3950_v47, %v3757_v37  ;;  %4911 = vmatmul.mubr.bf16.gmra.mxu1 %v14326_v33  ;;  %v14336_v33 = vld [vmem:[#allocation2 + $0x1b8] ss:$12 sps:$4 sm:$0xff]  }
 0x23a   : > { %v3759_v2 = vpop.f32.mrf.mxu0  ;;  %v3964_v28 = vpop.f32.mrf.mxu1  ;;  %4920 = vmatprep.mubr.bf16.mxu1 %v21926_v11 }
 0x23b   : > { %22008 = vst [vmem:[#allocation102_spill] sm:$0xff] %v16944_v23  ;;  %v16946_v58 = vadd.f32 %v3952_v38, %v3759_v2  ;;  %4708 = vmatmul.mubr.bf16.gmra.mxu0 %v16948_v24 }
 0x23c   : > { %v3761_v8 = vpop.f32.mrf.mxu0  ;;  %v3966_v54 = vpop.f32.mrf.mxu1  ;;  %4717 = vmatprep.mubr.bf16.mxu0 %v16950_v62 }
 0x23d   : > { %22009 = vst [vmem:[#allocation103_spill] sm:$0xff] %v16946_v58  ;;  %v16952_v43 = vadd.f32 %v3954_v9, %v3761_v8  ;;  %v16963_v9 = vld [vmem:[#allocation2 + $0x198] ss:$12 sps:$4 sm:$0xff]  }
 0x23e   : > { %v3763_v0 = vpop.f32.mrf.mxu0  ;;  %v3970_v47 = vpop.f32.mrf.mxu1 }
 0x23f   : > { %22010 = vst [vmem:[#allocation104_spill] sm:$0xff] %v16952_v43  ;;  %v16957_v46 = vadd.f32 %v3956_v53, %v3763_v0  ;;  %v16965_v43 = vld [vmem:[#allocation2 + $0x1b4] ss:$12 sps:$4 sm:$0xff]  }
 0x240   : > { %v3767_v38 = vpop.f32.mrf.mxu0  ;;  %v3972_v37 = vpop.f32.mrf.mxu1 }
 0x241   : > { %22011 = vst [vmem:[#allocation105_spill] sm:$0xff] %v16957_v46  ;;  %v16959_v2 = vadd.f32 %v3960_v39, %v3767_v38  ;;  %4921 = vmatmul.mubr.bf16.gmra.mxu1 %v14336_v33  ;;  %v16974_v38 = vld [vmem:[#allocation2 + $0x1b0] ss:$12 sps:$4 sm:$0xff]  }
 0x242   : > { %v3769_v36 = vpop.f32.mrf.mxu0  ;;  %v3974_v1 = vpop.f32.mrf.mxu1  ;;  %5766 = vmatprep.mubr.bf16.mxu1 %v21926_v11 }
 0x243   : > { %22012 = vst [vmem:[#allocation106_spill] sm:$0xff] %v16959_v2  ;;  %v16961_v42 = vadd.f32 %v3962_v60, %v3769_v36  ;;  %4718 = vmatmul.mubr.bf16.gmra.mxu0 %v16963_v9  ;;  %v14340_v36 = vld [vmem:[#allocation2 + $0x20] ss:$12 sps:$4 sm:$0xff]  }
 0x244   : > { %v3771_v8 = vpop.f32.mrf.mxu0  ;;  %v3976_v39 = vpop.f32.mrf.mxu1  ;;  %4727 = vmatprep.mubr.bf16.mxu0 %v16965_v43 }
 0x245   : > { %22013 = vst [vmem:[#allocation107_spill] sm:$0xff] %v16961_v42  ;;  %v16967_v58 = vadd.f32 %v3964_v28, %v3771_v8 }
 0x246   : > { %v3773_v53 = vpop.f32.mrf.mxu0 }
 0x247   : > { %22014 = vst [vmem:[#allocation108_spill] sm:$0xff] %v16967_v58  ;;  %v16972_v0 = vadd.f32 %v3966_v54, %v3773_v53 }
 0x249   : > { %22015 = vst [vmem:[#allocation109_spill] sm:$0xff] %v16972_v0  ;;  %v3980_v60 = vpop.f32.mrf.mxu1  ;;  %5767 = vmatmul.mubr.bf16.vlgmr.msra.gmra.mxu1 %v14340_v36  ;;  %v14341_v36 = vld [vmem:[#allocation2 + $0x38] ss:$12 sps:$4 sm:$0xff]  }
 0x24a   : > { %5776 = vmatprep.mubr.bf16.mxu1 %v21926_v11 }
 0x24b   : > { %v3777_v33 = vpop.f32.mrf.mxu0  ;;  %v3982_v46 = vpop.f32.mrf.mxu1  ;;  %4728 = vmatmul.mubr.bf16.gmra.mxu0 %v16974_v38 }
 0x24c   : > { %v16976_v42 = vadd.f32 %v3970_v47, %v3777_v33  ;;  %5573 = vmatprep.mubr.bf16.mxu0 %v16686_v13 }
 0x24d   : > { %v3779_v28 = vpop.f32.mrf.mxu0  ;;  %v3984_v8 = vpop.f32.mrf.mxu1 }
 0x24e   : > { %22016 = vst [vmem:[#allocation110_spill] sm:$0xff] %v16976_v42  ;;  %v16981_v58 = vadd.f32 %v3972_v37, %v3779_v28 }
 0x24f   : > { %v3781_v54 = vpop.f32.mrf.mxu0  ;;  %v3986_v53 = vpop.f32.mrf.mxu1 }
 0x250   : > { %v16983_v0 = vadd.f32 %v3974_v1, %v3781_v54 }
 0x251   : > { %v3783_v2 = vpop.f32.mrf.mxu0  ;;  %v3990_v23 = vpop.f32.mrf.mxu1  ;;  %5777 = vmatmul.mubr.bf16.gmra.mxu1 %v14341_v36 }
 0x252   : > { %22017 = vst [vmem:[#allocation111_spill] sm:$0xff] %v16983_v0  ;;  %v16985_v51 = vadd.f32 %v3976_v39, %v3783_v2  ;;  %5786 = vmatprep.mubr.bf16.mxu1 %v21926_v11  ;;  %v14342_v0 = vld [vmem:[#allocation2 + $0x50] ss:$12 sps:$4 sm:$0xff]  }
 0x253   : > { %v3992_v47 = vpop.f32.mrf.mxu1  ;;  %5574 = vmatmul.mubr.bf16.vlgmr.msra.gmra.mxu0 %v16715_v3 }
 0x254   : > { %22018 = vst [vmem:[#allocation112_spill] sm:$0xff] %v16985_v51  ;;  %v3787_v33 = vpop.f32.mrf.mxu0  ;;  %5583 = vmatprep.mubr.bf16.mxu0 %v16720_v55 }
 0x255   : > { %v3994_v42 = vpop.f32.mrf.mxu1  ;;  %v16990_v13 = vadd.f32 %v3980_v60, %v3787_v33 }
 0x256   : > { %v3789_v37 = vpop.f32.mrf.mxu0 }
 0x257   : > { %v3996_v1 = vpop.f32.mrf.mxu1  ;;  %v16992_v28 = vadd.f32 %v3982_v46, %v3789_v37  ;;  %v14346_v46 = vld [vmem:[#allocation2 + $0x68] ss:$12 sps:$4 sm:$0xff]  }
 0x258   : > { %v3791_v54 = vpop.f32.mrf.mxu0 }
 0x259   : > { %v16994_v2 = vadd.f32 %v3984_v8, %v3791_v54  ;;  %5787 = vmatmul.mubr.bf16.gmra.mxu1 %v14342_v0  ;;  %v14345_v54 = vld [vmem:[#allocation2 + $0x64] ss:$12 sps:$4 sm:$0xff]  }
 0x25a   : > { %v3793_v39 = vpop.f32.mrf.mxu0  ;;  %v4000_v36 = vpop.f32.mrf.mxu1  ;;  %5796 = vmatprep.mubr.bf16.mxu1 %v21926_v11 }
 0x25b   : > { %22019 = vst [vmem:[#allocation113_spill] sm:$0xff] %v16994_v2  ;;  %v16996_v51 = vadd.f32 %v3986_v53, %v3793_v39  ;;  %5584 = vmatmul.mubr.bf16.gmra.mxu0 %v16752_v30 }
 0x25c   : > { %v4002_v3 = vpop.f32.mrf.mxu1  ;;  %5593 = vmatprep.mubr.bf16.mxu0 %v16757_v32 }
 0x25d   : > { %22020 = vst [vmem:[#allocation114_spill] sm:$0xff] %v16996_v51 }
 0x25e   : > { %v4004_v55 = vpop.f32.mrf.mxu1 }
 0x260   : > { %v3797_v60 = vpop.f32.mrf.mxu0  ;;  %v4006_v8 = vpop.f32.mrf.mxu1 }
 0x261   : > { %v17001_v33 = vadd.f32 %v3990_v23, %v3797_v60  ;;  %5797 = vmatmul.mubr.bf16.gmra.mxu1 %v14346_v46  ;;  %v14347_v23 = vld [vmem:[#allocation2 + $0x98] ss:$12 sps:$4 sm:$0xff]   ;;  %v14343_v46 = vld [vmem:[#allocation2 + $0x60] ss:$12 sps:$4 sm:$0xff]  }
 0x262   : > { %v3799_v37 = vpop.f32.mrf.mxu0  ;;  %5806 = vmatprep.mubr.bf16.mxu1 %v21926_v11 }
 0x263   : > { %22021 = vst [vmem:[#allocation115_spill] sm:$0xff] %v17001_v33  ;;  %v17003_v0 = vadd.f32 %v3992_v47, %v3799_v37  ;;  %5594 = vmatmul.mubr.bf16.gmra.mxu0 %v16778_v15 }
 0x264   : > { %v3801_v53 = vpop.f32.mrf.mxu0  ;;  %5603 = vmatprep.mubr.bf16.mxu0 %v14345_v54 }
 0x265   : > { %v17007_v30 = vadd.f32 %v3994_v42, %v3801_v53  ;;  %v4010_v39 = vpop.f32.mrf.mxu1 }
 0x266   : > { %v3803_v32 = vpop.f32.mrf.mxu0 }
 0x267   : > { %v17009_v51 = vadd.f32 %v3996_v1, %v3803_v32  ;;  %v4012_v60 = vpop.f32.mrf.mxu1 }
 0x268   : > { %v3807_v33 = vpop.f32.mrf.mxu0 }
 0x269   : > { %22022 = vst [vmem:[#allocation116_spill] sm:$0xff] %v17009_v51  ;;  %v17011_v2 = vadd.f32 %v4000_v36, %v3807_v33  ;;  %5807 = vmatmul.mubr.bf16.gmra.mxu1 %v14347_v23  ;;  %v4014_v47 = vpop.f32.mrf.mxu1  ;;  %v14348_v36 = vld [vmem:[#allocation2 + $0xb0] ss:$12 sps:$4 sm:$0xff]  }
 0x26a   : > { %v3809_v37 = vpop.f32.mrf.mxu0  ;;  %5816 = vmatprep.mubr.bf16.mxu1 %v21926_v11 }
 0x26b   : > { %22023 = vst [vmem:[#allocation117_spill] sm:$0xff] %v17011_v2  ;;  %5604 = vmatmul.mubr.bf16.gmra.mxu0 %v14343_v46  ;;  %v17014_v15 = vadd.f32 %v4002_v3, %v3809_v37  ;;  %v4016_v42 = vpop.f32.mrf.mxu1 }
 0x26c   : > { %5613 = vmatprep.mubr.bf16.mxu0 %v16803_v25  ;;  %v3811_v54 = vpop.f32.mrf.mxu0 }
 0x26d   : > { %v17017_v1 = vadd.f32 %v4004_v55, %v3811_v54  ;;  %v4020_v53 = vpop.f32.mrf.mxu1 }
 0x26e   : > { %v3813_v32 = vpop.f32.mrf.mxu0 }
 0x26f   : > { %22024 = vst [vmem:[#allocation118_spill] sm:$0xff] %v17017_v1  ;;  %v17019_v51 = vadd.f32 %v4006_v8, %v3813_v32  ;;  %v4022_v33 = vpop.f32.mrf.mxu1  ;;  %v14349_v8 = vld [vmem:[#allocation2 + $0xc8] ss:$12 sps:$4 sm:$0xff]  }
 0x271   : > { %22025 = vst [vmem:[#allocation119_spill] sm:$0xff] %v17019_v51  ;;  %5817 = vmatmul.mubr.bf16.gmra.mxu1 %v14348_v36  ;;  %v4024_v23 = vpop.f32.mrf.mxu1 }
 0x272   : > { %5826 = vmatprep.mubr.bf16.mxu1 %v21926_v11 }
 0x273   : > { %v3817_v2 = vpop.f32.mrf.mxu0  ;;  %5614 = vmatmul.mubr.bf16.gmra.mxu0 %v16818_v50  ;;  %v4026_v25 = vpop.f32.mrf.mxu1 }
 0x274   : > { %v17023_v3 = vadd.f32 %v4010_v39, %v3817_v2  ;;  %5623 = vmatprep.mubr.bf16.mxu0 %v16823_v41 }
 0x275   : > { %v3819_v55 = vpop.f32.mrf.mxu0 }
 0x276   : > { %v17026_v46 = vadd.f32 %v4012_v60, %v3819_v55 }
 0x277   : > { %v3821_v37 = vpop.f32.mrf.mxu0 }
 0x278   : > { %v17028_v54 = vadd.f32 %v4014_v47, %v3821_v37  ;;  %v14353_v37 = vld [vmem:[#allocation2 + $0xe0] ss:$12 sps:$4 sm:$0xff]  }
 0x279   : > { %v4030_v32 = vpop.f32.mrf.mxu1  ;;  %v3823_v36 = vpop.f32.mrf.mxu0  ;;  %5827 = vmatmul.mubr.bf16.gmra.mxu1 %v14349_v8 }
 0x27a   : > { %22026 = vst [vmem:[#allocation120_spill] sm:$0xff] %v17028_v54  ;;  %v17030_v51 = vadd.f32 %v4016_v42, %v3823_v36  ;;  %5836 = vmatprep.mubr.bf16.mxu1 %v21926_v11  ;;  %v14352_v54 = vld [vmem:[#allocation2 + $0xdc] ss:$12 sps:$4 sm:$0xff]  }
 0x27b   : > { %v4032_v1 = vpop.f32.mrf.mxu1  ;;  %v3827_v50 = vpop.f32.mrf.mxu0  ;;  %5624 = vmatmul.mubr.bf16.gmra.mxu0 %v16845_v61 }
 0x27c   : > { %22027 = vst [vmem:[#allocation121_spill] sm:$0xff] %v17030_v51  ;;  %v17034_v41 = vadd.f32 %v4020_v53, %v3827_v50  ;;  %5633 = vmatprep.mubr.bf16.mxu0 %v16850_v21 }
 0x27d   : > { %v4034_v2 = vpop.f32.mrf.mxu1  ;;  %v3829_v39 = vpop.f32.mrf.mxu0 }
 0x27e   : > { %v17037_v60 = vadd.f32 %v4022_v33, %v3829_v39 }
 0x27f   : > { %v4036_v47 = vpop.f32.mrf.mxu1  ;;  %v3831_v55 = vpop.f32.mrf.mxu0 }
 0x280   : > { %22028 = vst [vmem:[#allocation122_spill] sm:$0xff] %v17037_v60  ;;  %v17039_v8 = vadd.f32 %v4024_v23, %v3831_v55 }
 0x281   : > { %v3833_v42 = vpop.f32.mrf.mxu0  ;;  %v4040_v36 = vpop.f32.mrf.mxu1  ;;  %5837 = vmatmul.mubr.bf16.gmra.mxu1 %v14353_v37 }
 0x282   : > { %22029 = vst [vmem:[#allocation123_spill] sm:$0xff] %v17039_v8  ;;  %v17041_v51 = vadd.f32 %v4026_v25, %v3833_v42  ;;  %5846 = vmatprep.mubr.bf16.mxu1 %v21926_v11  ;;  %v14354_v8 = vld [vmem:[#allocation2 + $0x110] ss:$12 sps:$4 sm:$0xff]   ;;  %v14350_v25 = vld [vmem:[#allocation2 + $0xd8] ss:$12 sps:$4 sm:$0xff]  }
 0x283   : > { %v3837_v61 = vpop.f32.mrf.mxu0  ;;  %5634 = vmatmul.mubr.bf16.gmra.mxu0 %v16868_v40  ;;  %v4042_v21 = vpop.f32.mrf.mxu1 }
 0x284   : > { %22030 = vst [vmem:[#allocation124_spill] sm:$0xff] %v17041_v51  ;;  %v17045_v53 = vadd.f32 %v4030_v32, %v3837_v61  ;;  %5643 = vmatprep.mubr.bf16.mxu0 %v14352_v54 }
 0x285   : > { %v3839_v33 = vpop.f32.mrf.mxu0  ;;  %v4044_v50 = vpop.f32.mrf.mxu1 }
 0x286   : > { %v17047_v39 = vadd.f32 %v4032_v1, %v3839_v33 }
 0x287   : > { %v3841_v23 = vpop.f32.mrf.mxu0  ;;  %v4046_v55 = vpop.f32.mrf.mxu1 }
 0x288   : > { %22031 = vst [vmem:[#allocation125_spill] sm:$0xff] %v17047_v39  ;;  %v17049_v37 = vadd.f32 %v4034_v2, %v3841_v23 }
 0x289   : > { %v3843_v42 = vpop.f32.mrf.mxu0  ;;  %v4772_v51 = vpop.f32.mrf.mxu1  ;;  %5847 = vmatmul.mubr.bf16.gmra.mxu1 %v14354_v8 }
 0x28a   : > { %22032 = vst [vmem:[#allocation126_spill] sm:$0xff] %v17049_v37  ;;  %v17051_v60 = vadd.f32 %v4036_v47, %v3843_v42  ;;  %5856 = vmatprep.mubr.bf16.mxu1 %v21926_v11  ;;  %v14355_v37 = vld [vmem:[#allocation2 + $0x128] ss:$12 sps:$4 sm:$0xff]  }
 0x28b   : > { %v3847_v40 = vpop.f32.mrf.mxu0  ;;  %5644 = vmatmul.mubr.bf16.gmra.mxu0 %v14350_v25  ;;  %v4774_v54 = vpop.f32.mrf.mxu1 }
 0x28c   : > { %22033 = vst [vmem:[#allocation127_spill] sm:$0xff] %v17051_v60  ;;  %v17054_v32 = vadd.f32 %v4040_v36, %v3847_v40  ;;  %5653 = vmatprep.mubr.bf16.mxu0 %v16890_v29 }
 0x28d   : > { %v3849_v1 = vpop.f32.mrf.mxu0  ;;  %v4776_v61 = vpop.f32.mrf.mxu1 }
 0x28e   : > { %v17057_v33 = vadd.f32 %v4042_v21, %v3849_v1 }
 0x28f   : > { %v3851_v2 = vpop.f32.mrf.mxu0  ;;  %v4778_v23 = vpop.f32.mrf.mxu1 }
 0x290   : > { %v17059_v39 = vadd.f32 %v4044_v50, %v3851_v2 }
 0x291   : > { %v3853_v47 = vpop.f32.mrf.mxu0  ;;  %v4782_v8 = vpop.f32.mrf.mxu1  ;;  %5857 = vmatmul.mubr.bf16.gmra.mxu1 %v14355_v37 }
 0x292   : > { %22034 = vst [vmem:[#allocation128_spill] sm:$0xff] %v17059_v39  ;;  %v17061_v42 = vadd.f32 %v4046_v55, %v3853_v47  ;;  %5866 = vmatprep.mubr.bf16.mxu1 %v21926_v11  ;;  %v14356_v55 = vld [vmem:[#allocation2 + $0x140] ss:$12 sps:$4 sm:$0xff]  }
 0x293   : > { %v4579_v36 = vpop.f32.mrf.mxu0  ;;  %5654 = vmatmul.mubr.bf16.gmra.mxu0 %v16896_v31  ;;  %v4784_v29 = vpop.f32.mrf.mxu1 }
 0x294   : > { %22035 = vst [vmem:[#allocation129_spill] sm:$0xff] %v17061_v42  ;;  %v4580_v25 = vadd.f32 %v4579_v36, %v16826_v45  ;;  %5663 = vmatprep.mubr.bf16.mxu0 %v16898_v16 }
 0x295   : > { %v4581_v21 = vpop.f32.mrf.mxu0  ;;  %v4786_v40 = vpop.f32.mrf.mxu1 }
 0x296   : > { %v17067_v1 = vadd.f32 %v4772_v51, %v4580_v25  ;;  %v4582_v50 = vadd.f32 %v4581_v21, %v16830_v48 }
 0x297   : > { %v4583_v2 = vpop.f32.mrf.mxu0  ;;  %v4788_v37 = vpop.f32.mrf.mxu1 }
 0x298   : > { %v17070_v47 = vadd.f32 %v4774_v54, %v4582_v50  ;;  %v4584_v42 = vadd.f32 %v4583_v2, %v16838_v6 }
 0x299   : > { %v4585_v60 = vpop.f32.mrf.mxu0  ;;  %v4792_v31 = vpop.f32.mrf.mxu1  ;;  %5867 = vmatmul.mubr.bf16.gmra.mxu1 %v14356_v55 }
 0x29a   : > { %v17073_v39 = vadd.f32 %v4776_v61, %v4584_v42  ;;  %v4586_v45 = vadd.f32 %v4585_v60, %v16840_v14  ;;  %5876 = vmatprep.mubr.bf16.mxu1 %v21926_v11  ;;  %v14360_v60 = vld [vmem:[#allocation2 + $0x158] ss:$12 sps:$4 sm:$0xff]  }
 0x29b   : > { %v4589_v51 = vpop.f32.mrf.mxu0  ;;  %5664 = vmatmul.mubr.bf16.gmra.mxu0 %v16911_v26  ;;  %v4794_v48 = vpop.f32.mrf.mxu1 }
 0x29c   : > { %v17078_v16 = vadd.f32 %v4778_v23, %v4586_v45  ;;  %v4590_v54 = vadd.f32 %v4589_v51, %v16858_v20  ;;  %5673 = vmatprep.mubr.bf16.mxu0 %v16913_v10  ;;  %v14359_v20 = vld [vmem:[#allocation2 + $0x154] ss:$12 sps:$4 sm:$0xff]  }
 0x29d   : > { %v4591_v6 = vpop.f32.mrf.mxu0  ;;  %v4796_v36 = vpop.f32.mrf.mxu1 }
 0x29e   : > { %v17082_v25 = vadd.f32 %v4782_v8, %v4590_v54  ;;  %v4592_v61 = vadd.f32 %v4591_v6, %v16863_v7  ;;  %v14361_v6 = vld [vmem:[#allocation2 + $0x188] ss:$12 sps:$4 sm:$0xff]  }
 0x29f   : > { %v4593_v42 = vpop.f32.mrf.mxu0  ;;  %v4798_v14 = vpop.f32.mrf.mxu1 }
 0x2a0   : > { %v17085_v21 = vadd.f32 %v4784_v29, %v4592_v61  ;;  %v4594_v26 = vadd.f32 %v4593_v42, %v16870_v52 }
 0x2a1   : > { %v4595_v50 = vpop.f32.mrf.mxu0  ;;  %v4802_v23 = vpop.f32.mrf.mxu1  ;;  %5877 = vmatmul.mubr.bf16.gmra.mxu1 %v14360_v60 }
 0x2a2   : > { %v17088_v2 = vadd.f32 %v4786_v40, %v4594_v26  ;;  %v4596_v10 = vadd.f32 %v4595_v50, %v16878_v49  ;;  %5886 = vmatprep.mubr.bf16.mxu1 %v21926_v11 }
 0x2a3   : > { %v4599_v8 = vpop.f32.mrf.mxu0  ;;  %5674 = vmatmul.mubr.bf16.gmra.mxu0 %v16926_v5  ;;  %v4804_v7 = vpop.f32.mrf.mxu1  ;;  %v14357_v5 = vld [vmem:[#allocation2 + $0x150] ss:$12 sps:$4 sm:$0xff]  }
 0x2a4   : > { %v17093_v55 = vadd.f32 %v4788_v37, %v4596_v10  ;;  %v4600_v29 = vadd.f32 %v4599_v8, %v16883_v17  ;;  %5683 = vmatprep.mubr.bf16.mxu0 %v14359_v20 }
 0x2a5   : > { %v4601_v52 = vpop.f32.mrf.mxu0  ;;  %v4806_v45 = vpop.f32.mrf.mxu1 }
 0x2a6   : > { %v17096_v51 = vadd.f32 %v4792_v31, %v4600_v29  ;;  %v4602_v40 = vadd.f32 %v4601_v52, %v16885_v19 }
 0x2a7   : > { %v4603_v54 = vpop.f32.mrf.mxu0  ;;  %v4808_v49 = vpop.f32.mrf.mxu1 }
 0x2a8   : > { %v17099_v61 = vadd.f32 %v4794_v48, %v4602_v40  ;;  %v4604_v42 = vadd.f32 %v4603_v54, %v16888_v57 }
 0x2a9   : > { %v4605_v60 = vpop.f32.mrf.mxu0  ;;  %v4812_v37 = vpop.f32.mrf.mxu1  ;;  %5887 = vmatmul.mubr.bf16.gmra.mxu1 %v14361_v6 }
 0x2aa   : > { %v17102_v26 = vadd.f32 %v4796_v36, %v4604_v42  ;;  %v4606_v17 = vadd.f32 %v4605_v60, %v16893_v22  ;;  %5896 = vmatprep.mubr.bf16.mxu1 %v21926_v11  ;;  %v14362_v22 = vld [vmem:[#allocation2 + $0x1a0] ss:$12 sps:$4 sm:$0xff]  }
 0x2ab   : > { %v4609_v31 = vpop.f32.mrf.mxu0  ;;  %5684 = vmatmul.mubr.bf16.gmra.mxu0 %v14357_v5  ;;  %v4814_v19 = vpop.f32.mrf.mxu1 }
 0x2ac   : > { %v17106_v50 = vadd.f32 %v4798_v14, %v4606_v17  ;;  %v4610_v48 = vadd.f32 %v4609_v31, %v16901_v18  ;;  %5693 = vmatprep.mubr.bf16.mxu0 %v16936_v12  ;;  %v14363_v17 = vld [vmem:[#allocation2 + $0x1b8] ss:$12 sps:$4 sm:$0xff]  }
 0x2ad   : > { %v4611_v57 = vpop.f32.mrf.mxu0  ;;  %v4816_v10 = vpop.f32.mrf.mxu1 }
 0x2ae   : > { %v17110_v20 = vadd.f32 %v4802_v23, %v4610_v48  ;;  %v4612_v36 = vadd.f32 %v4611_v57, %v16905_v34 }
 0x2af   : > { %v4613_v8 = vpop.f32.mrf.mxu0  ;;  %v17113_v29 = vpop.f32.mrf.mxu1 }
 0x2b0   : > { %v17115_v52 = vadd.f32 %v4804_v7, %v4612_v36  ;;  %v4614_v40 = vadd.f32 %v4613_v8, %v16907_v56 }
 0x2b1   : > { %v4615_v14 = vpop.f32.mrf.mxu0  ;;  %v4822_v54 = vpop.f32.mrf.mxu1  ;;  %5897 = vmatmul.mubr.bf16.gmra.mxu1 %v14362_v22 }
 0x2b2   : > { %v17118_v18 = vadd.f32 %v4806_v45, %v4614_v40  ;;  %v4616_v12 = vadd.f32 %v4615_v14, %v16909_v44  ;;  %5906 = vmatprep.mubr.bf16.mxu1 %v21926_v11 }
 0x2b3   : > { %v4619_v23 = vpop.f32.mrf.mxu0  ;;  %5694 = vmatmul.mubr.bf16.gmra.mxu0 %v16948_v24  ;;  %v4824_v34 = vpop.f32.mrf.mxu1 }
 0x2b4   : > { %v17123_v6 = vadd.f32 %v4808_v49, %v4616_v12  ;;  %v4620_v7 = vadd.f32 %v4619_v23, %v16916_v4  ;;  %5703 = vmatprep.mubr.bf16.mxu0 %v16950_v62 }
 0x2b5   : > { %v4621_v56 = vpop.f32.mrf.mxu0  ;;  %v4826_v42 = vpop.f32.mrf.mxu1 }
 0x2b6   : > { %v17127_v5 = vadd.f32 %v4812_v37, %v4620_v7  ;;  %v4622_v45 = vadd.f32 %v4621_v56, %v16920_v63 }
 0x2b7   : > { %v4623_v60 = vpop.f32.mrf.mxu0  ;;  %v17130_v44 = vpop.f32.mrf.mxu1 }
 0x2b8   : > { %v17132_v31 = vadd.f32 %v4814_v19, %v4622_v45  ;;  %v4624_v24 = vadd.f32 %v4623_v60, %v16922_v27  ;;  %v22043_v60 = vld [vmem:[#allocation103_spill] sm:$0xff] }
 0x2b9   : > { %v17135_v49 = vpop.f32.mrf.mxu0  ;;  %v4832_v48 = vpop.f32.mrf.mxu1  ;;  %5907 = vmatmul.mubr.bf16.gmra.mxu1 %v14363_v17 }
 0x2ba   : > { %v17137_v4 = vadd.f32 %v4816_v10, %v4624_v24  ;;  %5916 = vmatprep.mubr.bf16.mxu1 %v21926_v11  ;;  %v14367_v10 = vld [vmem:[#allocation2 + $0x1d0] ss:$12 sps:$4 sm:$0xff]   ;;  %v22039_v11 = vld [vmem:[#allocation100_spill] sm:$0xff] }
 0x2bb   : > { %v4629_v62 = vpop.f32.mrf.mxu0  ;;  %5704 = vmatmul.mubr.bf16.gmra.mxu0 %v16963_v9  ;;  %v4834_v63 = vpop.f32.mrf.mxu1 }
 0x2bc   : > { %v4630_v37 = vadd.f32 %v4629_v62, %v16931_v59  ;;  %5713 = vmatprep.mubr.bf16.mxu0 %v16965_v43  ;;  %v14366_v43 = vld [vmem:[#allocation2 + $0x1cc] ss:$12 sps:$4 sm:$0xff]  }
 0x2bd   : > { %v4631_v19 = vpop.f32.mrf.mxu0  ;;  %v4836_v57 = vpop.f32.mrf.mxu1 }
 0x2be   : > { %v17143_v36 = vadd.f32 %v4822_v54, %v4630_v37  ;;  %v4632_v27 = vadd.f32 %v4631_v19, %v16933_v35  ;;  %v22041_v35 = vld [vmem:[#allocation102_spill] sm:$0xff] }
 0x2bf   : > { %v4633_v8 = vpop.f32.mrf.mxu0  ;;  %v17146_v22 = vpop.f32.mrf.mxu1 }
 0x2c0   : > { %22036 = vst [vmem:[#allocation130_spill] sm:$0xff] %v17143_v36  ;;  %22037 = vst [vmem:[#allocation131_spill] sm:$0xff] %v17146_v22  ;;  %v17148_v40 = vadd.f32 %v4824_v34, %v4632_v27  ;;  %v4634_v14 = vadd.f32 %v4633_v8, %v22039_v11  ;;  %v14364_v27 = vld [vmem:[#allocation2 + $0x1c8] ss:$12 sps:$4 sm:$0xff]  }
 0x2c1   : > { %v17151_v9 = vpop.f32.mrf.mxu0  ;;  %v4842_v12 = vpop.f32.mrf.mxu1  ;;  %5917 = vmatmul.mubr.bf16.gmra.mxu1 %v14367_v10 }
 0x2c2   : > { %22038 = vst [vmem:[#allocation132_spill] sm:$0xff] %v17148_v40  ;;  %v17153_v59 = vadd.f32 %v4826_v42, %v4634_v14  ;;  %v22046_v42 = vld [vmem:[#allocation104_spill] sm:$0xff] }
 0x2c3   : > { %v4639_v23 = vpop.f32.mrf.mxu0  ;;  %5714 = vmatmul.mubr.bf16.gmra.mxu0 %v16974_v38  ;;  %v4844_v54 = vpop.f32.mrf.mxu1 }
 0x2c4   : > { %22040 = vst [vmem:[#allocation100_spill] sm:$0xff] %v17153_v59  ;;  %v4640_v7 = vadd.f32 %v4639_v23, %v22041_v35  ;;  %5723 = vmatprep.mubr.bf16.mxu0 %v14366_v43 }
 0x2c5   : > { %v4641_v56 = vpop.f32.mrf.mxu0  ;;  %v4846_v45 = vpop.f32.mrf.mxu1 }
 0x2c6   : > { %v17157_v34 = vadd.f32 %v4832_v48, %v4640_v7  ;;  %v4642_v17 = vadd.f32 %v4641_v56, %v22043_v60  ;;  %v22049_v48 = vld [vmem:[#allocation106_spill] sm:$0xff]  ;;  %v22051_v56 = vld [vmem:[#allocation107_spill] sm:$0xff] }
 0x2c7   : > { %v4643_v24 = vpop.f32.mrf.mxu0  ;;  %v17160_v62 = vpop.f32.mrf.mxu1 }
 0x2c8   : > { %22042 = vst [vmem:[#allocation102_spill] sm:$0xff] %v17157_v34  ;;  %22044 = vst [vmem:[#allocation103_spill] sm:$0xff] %v17160_v62  ;;  %v17162_v37 = vadd.f32 %v4834_v63, %v4642_v17  ;;  %v4644_v19 = vadd.f32 %v4643_v24, %v22046_v42  ;;  %v22054_v42 = vld [vmem:[#allocation108_spill] sm:$0xff] }
 0x2c9   : > { %v17165_v8 = vpop.f32.mrf.mxu0  ;;  %v4852_v38 = vpop.f32.mrf.mxu1 }
 0x2ca   : > { %22045 = vst [vmem:[#allocation133_spill] sm:$0xff] %v17162_v37  ;;  %22047 = vst [vmem:[#allocation104_spill] sm:$0xff] %v17165_v8  ;;  %v17167_v10 = vadd.f32 %v4836_v57, %v4644_v19 }
 0x2cb   : > { %v4649_v11 = vpop.f32.mrf.mxu0  ;;  %5724 = vmatmul.mubr.bf16.gmra.mxu0 %v14364_v27  ;;  %v4854_v14 = vpop.f32.mrf.mxu1 }
 0x2cc   : > { %22048 = vst [vmem:[#allocation134_spill] sm:$0xff] %v17167_v10  ;;  %v4650_v43 = vadd.f32 %v4649_v11, %v22049_v48  ;;  %v22057_v48 = vld [vmem:[#allocation110_spill] sm:$0xff] }
 0x2cd   : > { %v4651_v23 = vpop.f32.mrf.mxu0  ;;  %v4856_v35 = vpop.f32.mrf.mxu1 }
 0x2ce   : > { %v17170_v7 = vadd.f32 %v4842_v12, %v4650_v43  ;;  %v4652_v63 = vadd.f32 %v4651_v23, %v22051_v56 }
 0x2cf   : > { %v4653_v60 = vpop.f32.mrf.mxu0  ;;  %v17173_v17 = vpop.f32.mrf.mxu1 }
 0x2d0   : > { %22050 = vst [vmem:[#allocation106_spill] sm:$0xff] %v17170_v7  ;;  %22052 = vst [vmem:[#allocation107_spill] sm:$0xff] %v17173_v17  ;;  %v17175_v24 = vadd.f32 %v4844_v54, %v4652_v63  ;;  %v4654_v37 = vadd.f32 %v4653_v60, %v22054_v42  ;;  %v22061_v60 = vld [vmem:[#allocation111_spill] sm:$0xff] }
 0x2d1   : > { %v17178_v57 = vpop.f32.mrf.mxu0  ;;  %v4862_v19 = vpop.f32.mrf.mxu1 }
 0x2d2   : > { %22053 = vst [vmem:[#allocation135_spill] sm:$0xff] %v17175_v24  ;;  %22055 = vst [vmem:[#allocation108_spill] sm:$0xff] %v17178_v57  ;;  %v17180_v27 = vadd.f32 %v4846_v45, %v4654_v37  ;;  %v14368_v57 = vld [vmem:[%s21739_s5 + $0x108] sm:$0xff]  }
 0x2d3   : > { %v4659_v10 = vpop.f32.mrf.mxu0  ;;  %v4864_v11 = vpop.f32.mrf.mxu1  ;;  %13286 = vmatprep.subr.bf16.mxu0 %v14368_v57  ;;  %13832 = vmatprep.subr.bf16.mxu1 %v14368_v57  ;;  %v14370_v57 = vld [vmem:[%s21739_s5 + $0x100] sm:$0xff]  }
 0x2d4   : > { %22056 = vst [vmem:[#allocation136_spill] sm:$0xff] %v17180_v27  ;;  %v4660_v34 = vadd.f32 %v4659_v10, %v22057_v48 }
 0x2d5   : > { %v4661_v12 = vpop.f32.mrf.mxu0  ;;  %v4866_v43 = vpop.f32.mrf.mxu1 }
 0x2d6   : > { %v17183_v7 = vadd.f32 %v4852_v38, %v4660_v34  ;;  %v4662_v23 = vadd.f32 %v4661_v12, %v16981_v58 }
 0x2d7   : > { %v4663_v56 = vpop.f32.mrf.mxu0  ;;  %v17186_v54 = vpop.f32.mrf.mxu1 }
 0x2d8   : > { %22058 = vst [vmem:[#allocation110_spill] sm:$0xff] %v17183_v7  ;;  %22059 = vst [vmem:[#allocation137_spill] sm:$0xff] %v17186_v54  ;;  %v17188_v63 = vadd.f32 %v4854_v14, %v4662_v23  ;;  %v4664_v42 = vadd.f32 %v4663_v56, %v22061_v60  ;;  %v22067_v56 = vld [vmem:[#allocation113_spill] sm:$0xff] }
 0x2d9   : > { %v17191_v24 = vpop.f32.mrf.mxu0  ;;  %v4872_v45 = vpop.f32.mrf.mxu1 }
 0x2da   : > { %22060 = vst [vmem:[#allocation138_spill] sm:$0xff] %v17188_v63  ;;  %22062 = vst [vmem:[#allocation111_spill] sm:$0xff] %v17191_v24  ;;  %v17193_v37 = vadd.f32 %v4856_v35, %v4664_v42 }
 0x2db   : > { %v4669_v27 = vpop.f32.mrf.mxu0  ;;  %v4874_v10 = vpop.f32.mrf.mxu1 }
 0x2dc   : > { %22063 = vst [vmem:[#allocation139_spill] sm:$0xff] %v17193_v37  ;;  %v4670_v48 = vadd.f32 %v4669_v27, %v16990_v13  ;;  %v22070_v27 = vld [vmem:[#allocation115_spill] sm:$0xff] }
 0x2dd   : > { %v4671_v34 = vpop.f32.mrf.mxu0  ;;  %v4876_v38 = vpop.f32.mrf.mxu1 }
 0x2de   : > { %v17196_v7 = vadd.f32 %v4862_v19, %v4670_v48  ;;  %v4672_v58 = vadd.f32 %v4671_v34, %v16992_v28 }
 0x2df   : > { %v4673_v12 = vpop.f32.mrf.mxu0  ;;  %v17199_v14 = vpop.f32.mrf.mxu1 }
 0x2e0   : > { %22064 = vst [vmem:[#allocation140_spill] sm:$0xff] %v17196_v7  ;;  %22065 = vst [vmem:[#allocation141_spill] sm:$0xff] %v17199_v14  ;;  %v17201_v23 = vadd.f32 %v4864_v11, %v4672_v58  ;;  %v4674_v60 = vadd.f32 %v4673_v12, %v22067_v56 }
 0x2e1   : > { %v17204_v63 = vpop.f32.mrf.mxu0  ;;  %v4882_v35 = vpop.f32.mrf.mxu1 }
 0x2e2   : > { %22066 = vst [vmem:[#allocation142_spill] sm:$0xff] %v17201_v23  ;;  %22068 = vst [vmem:[#allocation113_spill] sm:$0xff] %v17204_v63  ;;  %v17206_v42 = vadd.f32 %v4866_v43, %v4674_v60 }
 0x2e3   : > { %v4679_v37 = vpop.f32.mrf.mxu0  ;;  %v4884_v13 = vpop.f32.mrf.mxu1 }
 0x2e4   : > { %22069 = vst [vmem:[#allocation143_spill] sm:$0xff] %v17206_v42  ;;  %v4680_v54 = vadd.f32 %v4679_v37, %v22070_v27  ;;  %v22076_v27 = vld [vmem:[#allocation117_spill] sm:$0xff] }
 0x2e5   : > { %v4681_v19 = vpop.f32.mrf.mxu0  ;;  %v4886_v48 = vpop.f32.mrf.mxu1 }
 0x2e6   : > { %v17209_v7 = vadd.f32 %v4872_v45, %v4680_v54  ;;  %v4682_v28 = vadd.f32 %v4681_v19, %v17003_v0 }
 0x2e7   : > { %v4683_v34 = vpop.f32.mrf.mxu0  ;;  %v17212_v11 = vpop.f32.mrf.mxu1 }
 0x2e8   : > { %22071 = vst [vmem:[#allocation115_spill] sm:$0xff] %v17209_v7  ;;  %22072 = vst [vmem:[#allocation144_spill] sm:$0xff] %v17212_v11  ;;  %v17214_v58 = vadd.f32 %v4874_v10, %v4682_v28  ;;  %v4684_v12 = vadd.f32 %v4683_v34, %v17007_v30  ;;  %v22080_v30 = vld [vmem:[#allocation118_spill] sm:$0xff] }
 0x2e9   : > { %v17217_v56 = vpop.f32.mrf.mxu0  ;;  %v4892_v43 = vpop.f32.mrf.mxu1 }
 0x2ea   : > { %22073 = vst [vmem:[#allocation145_spill] sm:$0xff] %v17214_v58  ;;  %22074 = vst [vmem:[#allocation146_spill] sm:$0xff] %v17217_v56  ;;  %v17219_v60 = vadd.f32 %v4876_v38, %v4684_v12 }
 0x2eb   : > { %v4689_v42 = vpop.f32.mrf.mxu0  ;;  %v4894_v37 = vpop.f32.mrf.mxu1 }
 0x2ec   : > { %22075 = vst [vmem:[#allocation147_spill] sm:$0xff] %v17219_v60  ;;  %v4690_v23 = vadd.f32 %v4689_v42, %v22076_v27 }
 0x2ed   : > { %v4691_v54 = vpop.f32.mrf.mxu0  ;;  %v4896_v45 = vpop.f32.mrf.mxu1 }
 0x2ee   : > { %v17222_v14 = vadd.f32 %v4882_v35, %v4690_v23  ;;  %v4692_v0 = vadd.f32 %v4691_v54, %v17014_v15 }
 0x2ef   : > { %v4693_v19 = vpop.f32.mrf.mxu0  ;;  %v17225_v10 = vpop.f32.mrf.mxu1 }
 0x2f0   : > { %22077 = vst [vmem:[#allocation117_spill] sm:$0xff] %v17222_v14  ;;  %22078 = vst [vmem:[#allocation148_spill] sm:$0xff] %v17225_v10  ;;  %v17227_v28 = vadd.f32 %v4884_v13, %v4692_v0  ;;  %v4694_v34 = vadd.f32 %v4693_v19, %v22080_v30  ;;  %v22086_v19 = vld [vmem:[#allocation120_spill] sm:$0xff] }
 0x2f1   : > { %v17230_v11 = vpop.f32.mrf.mxu0  ;;  %v4902_v38 = vpop.f32.mrf.mxu1 }
 0x2f2   : > { %22079 = vst [vmem:[#allocation149_spill] sm:$0xff] %v17227_v28  ;;  %22081 = vst [vmem:[#allocation118_spill] sm:$0xff] %v17230_v11  ;;  %v17232_v12 = vadd.f32 %v4886_v48, %v4694_v34 }
 0x2f3   : > { %v4699_v56 = vpop.f32.mrf.mxu0  ;;  %v4904_v42 = vpop.f32.mrf.mxu1 }
 0x2f4   : > { %22082 = vst [vmem:[#allocation150_spill] sm:$0xff] %v17232_v12  ;;  %v4700_v27 = vadd.f32 %v4699_v56, %v17023_v3 }
 0x2f5   : > { %v4701_v23 = vpop.f32.mrf.mxu0  ;;  %v4906_v35 = vpop.f32.mrf.mxu1 }
 0x2f6   : > { %v17235_v63 = vadd.f32 %v4892_v43, %v4700_v27  ;;  %v4702_v15 = vadd.f32 %v4701_v23, %v17026_v46  ;;  %v22090_v46 = vld [vmem:[#allocation122_spill] sm:$0xff] }
 0x2f7   : > { %v4703_v54 = vpop.f32.mrf.mxu0  ;;  %v17238_v13 = vpop.f32.mrf.mxu1 }
 0x2f8   : > { %22083 = vst [vmem:[#allocation151_spill] sm:$0xff] %v17235_v63  ;;  %22084 = vst [vmem:[#allocation152_spill] sm:$0xff] %v17238_v13  ;;  %v17240_v0 = vadd.f32 %v4894_v37, %v4702_v15  ;;  %v4704_v30 = vadd.f32 %v4703_v54, %v22086_v19  ;;  %v22093_v54 = vld [vmem:[#allocation123_spill] sm:$0xff] }
 0x2f9   : > { %v17243_v10 = vpop.f32.mrf.mxu0  ;;  %v4912_v48 = vpop.f32.mrf.mxu1 }
 0x2fa   : > { %22085 = vst [vmem:[#allocation153_spill] sm:$0xff] %v17240_v0  ;;  %22087 = vst [vmem:[#allocation120_spill] sm:$0xff] %v17243_v10  ;;  %v17245_v34 = vadd.f32 %v4896_v45, %v4704_v30 }
 0x2fb   : > { %v4709_v11 = vpop.f32.mrf.mxu0  ;;  %v4914_v3 = vpop.f32.mrf.mxu1 }
 0x2fc   : > { %22088 = vst [vmem:[#allocation154_spill] sm:$0xff] %v17245_v34  ;;  %v4710_v56 = vadd.f32 %v4709_v11, %v17034_v41 }
 0x2fd   : > { %v4711_v43 = vpop.f32.mrf.mxu0  ;;  %v4916_v27 = vpop.f32.mrf.mxu1 }
 0x2fe   : > { %v17248_v63 = vadd.f32 %v4902_v38, %v4710_v56  ;;  %v4712_v23 = vadd.f32 %v4711_v43, %v22090_v46  ;;  %v22097_v43 = vld [vmem:[#allocation125_spill] sm:$0xff] }
 0x2ff   : > { %v4713_v13 = vpop.f32.mrf.mxu0  ;;  %v17251_v37 = vpop.f32.mrf.mxu1 }
 0x300   : > { %22089 = vst [vmem:[#allocation155_spill] sm:$0xff] %v17248_v63  ;;  %22091 = vst [vmem:[#allocation122_spill] sm:$0xff] %v17251_v37  ;;  %v17253_v15 = vadd.f32 %v4904_v42, %v4712_v23  ;;  %v4714_v19 = vadd.f32 %v4713_v13, %v22093_v54  ;;  %v22100_v13 = vld [vmem:[#allocation126_spill] sm:$0xff] }
 0x301   : > { %v17256_v10 = vpop.f32.mrf.mxu0  ;;  %v4922_v45 = vpop.f32.mrf.mxu1 }
 0x302   : > { %22092 = vst [vmem:[#allocation156_spill] sm:$0xff] %v17253_v15  ;;  %22094 = vst [vmem:[#allocation123_spill] sm:$0xff] %v17256_v10  ;;  %v17258_v30 = vadd.f32 %v4906_v35, %v4714_v19 }
 0x303   : > { %v4719_v34 = vpop.f32.mrf.mxu0  ;;  %v4924_v41 = vpop.f32.mrf.mxu1 }
 0x304   : > { %22095 = vst [vmem:[#allocation157_spill] sm:$0xff] %v17258_v30  ;;  %v4720_v11 = vadd.f32 %v4719_v34, %v17045_v53 }
 0x305   : > { %v4721_v38 = vpop.f32.mrf.mxu0  ;;  %v4926_v56 = vpop.f32.mrf.mxu1 }
 0x306   : > { %v17261_v63 = vadd.f32 %v4912_v48, %v4720_v11  ;;  %v4722_v46 = vadd.f32 %v4721_v38, %v22097_v43 }
 0x307   : > { %v4723_v37 = vpop.f32.mrf.mxu0  ;;  %v17264_v42 = vpop.f32.mrf.mxu1 }
 0x308   : > { %22096 = vst [vmem:[#allocation158_spill] sm:$0xff] %v17261_v63  ;;  %22098 = vst [vmem:[#allocation125_spill] sm:$0xff] %v17264_v42  ;;  %v17266_v23 = vadd.f32 %v4914_v3, %v4722_v46  ;;  %v4724_v54 = vadd.f32 %v4723_v37, %v22100_v13  ;;  %v22105_v37 = vld [vmem:[#allocation128_spill] sm:$0xff] }
 0x309   : > { %v17269_v10 = vpop.f32.mrf.mxu0  ;;  %v5768_v35 = vpop.f32.mrf.mxu1 }
 0x30a   : > { %22099 = vst [vmem:[#allocation159_spill] sm:$0xff] %v17266_v23  ;;  %22101 = vst [vmem:[#allocation126_spill] sm:$0xff] %v17269_v10  ;;  %v17271_v19 = vadd.f32 %v4916_v27, %v4724_v54  ;;  %v5991_v27 = vld [vmem:[%s21738_s4] ss:$2 sm:$0x3] }
 0x30b   : > { %v4729_v30 = vpop.f32.mrf.mxu0  ;;  %v5770_v53 = vpop.f32.mrf.mxu1 }
 0x30c   : > { %22102 = vst [vmem:[#allocation160_spill] sm:$0xff] %v17271_v19  ;;  %v4730_v34 = vadd.f32 %v4729_v30, %v17054_v32 }
 0x30d   : > { %v4731_v48 = vpop.f32.mrf.mxu0  ;;  %v5772_v11 = vpop.f32.mrf.mxu1 }
 0x30e   : > { %v17274_v63 = vadd.f32 %v4922_v45, %v4730_v34  ;;  %v4732_v38 = vadd.f32 %v4731_v48, %v17057_v33  ;;  %v12760_v33 = vld [vmem:[%s21738_s4 + $0x1] ss:$2 sm:$0x3]  ;;  %v22108_v34 = vld [vmem:[#allocation10_spill] sm:$0xff] }
 0x30f   : > { %v4733_v43 = vpop.f32.mrf.mxu0  ;;  %v5774_v3 = vpop.f32.mrf.mxu1 }
 0x310   : > { %22103 = vst [vmem:[#allocation161_spill] sm:$0xff] %v17274_v63  ;;  %v17277_v46 = vadd.f32 %v4924_v41, %v4732_v38  ;;  %v4734_v13 = vadd.f32 %v4733_v43, %v22105_v37  ;;  %v17291_v41 = vsub.s32 1, %v22108_v34  ;;  %v22110_v38 = vld [vmem:[#allocation11_spill] sm:$0xff] }
 0x311   : > { %v17280_v23 = vpop.f32.mrf.mxu0  ;;  %v5778_v54 = vpop.f32.mrf.mxu1  ;;  %v17294_v43 = vrot.slane %v5991_v27, %v22110_v38 }
 0x312   : > { %22104 = vst [vmem:[#allocation162_spill] sm:$0xff] %v17277_v46  ;;  %22106 = vst [vmem:[#allocation128_spill] sm:$0xff] %v17280_v23  ;;  %v17285_v32 = vadd.f32 %v4926_v56, %v4734_v13  ;;  %v17298_v56 = vrot.slane %v12760_v33, %v22110_v38 }
 0x313   : > { %v5575_v30 = vpop.f32.mrf.mxu0  ;;  %v5780_v45 = vpop.f32.mrf.mxu1  ;;  %22109 = vst [vmem:[#allocation164_spill] sm:$0xff] %v17291_v41 }
 0x314   : > { %22107 = vst [vmem:[#allocation163_spill] sm:$0xff] %v17285_v32  ;;  %v5769_v48 = vadd.f32 %v5768_v35, %v5575_v30  ;;  %v17301_v32 = vrot.slane %v5991_v27, %v17291_v41  ;;  %v17308_v30 = vrot.slane %v12760_v33, %v17291_v41 }
 0x315   : > { %v5577_v37 = vpop.f32.mrf.mxu0  ;;  %v5782_v46 = vpop.f32.mrf.mxu1 }
 0x316   : > { %v5927_v63 = vadd.f32 %v5769_v48, %v17067_v1  ;;  %v5771_v13 = vadd.f32 %v5770_v53, %v5577_v37 }
 0x317   : > { %v5579_v19 = vpop.f32.mrf.mxu0  ;;  %v17303_v42 = vpop.f32.mrf.mxu1 }
 0x318   : > { %v6003_v34 = vmul.f32 %v17294_v43, %v5927_v63  ;;  %v5928_v35 = vadd.f32 %v5771_v13, %v17070_v47  ;;  %v5773_v23 = vadd.f32 %v5772_v11, %v5579_v19 }
 0x319   : > { %v5581_v15 = vpop.f32.mrf.mxu0  ;;  %v17310_v1 = vpop.f32.mrf.mxu1 }
 0x31a   : > { %v6080_v48 = vadd.f32 %v17298_v56, %v6003_v34  ;;  %v6004_v53 = vmul.f32 %v17301_v32, %v5928_v35  ;;  %v5929_v27 = vadd.f32 %v5773_v23, %v17073_v39  ;;  %v5775_v37 = vadd.f32 %v5774_v3, %v5581_v15 }
 0x31b   : > { %v5585_v38 = vpop.f32.mrf.mxu0  ;;  %v17315_v10 = vpop.f32.mrf.mxu1 }
 0x31c   : > { %v17317_v63 = vmax.f32 %v6080_v48, 0.0  ;;  %v6081_v47 = vadd.f32 %v17308_v30, %v6004_v53  ;;  %v6005_v33 = vmul.f32 %v17294_v43, %v5929_v27  ;;  %v5930_v13 = vadd.f32 %v5775_v37, %v17078_v16 }
 0x31d   : > { %v5587_v19 = vpop.f32.mrf.mxu0  ;;  %v17321_v11 = vpop.f32.mrf.mxu1  ;;  %v5779_v23 = vadd.f32 %v5778_v54, %v5585_v38 }
 0x31e   : > { %22111 = vst [vmem:[#allocation165_spill] sm:$0xff] %v17317_v63  ;;  %v6145_v34 = vmax.f32 %v6081_v47, 0.0  ;;  %v6082_v35 = vadd.f32 %v17298_v56, %v6005_v33  ;;  %v17327_v39 = vpack.c.bf16 %v17317_v63, %v17317_v63  ;;  %v6006_v16 = vmul.f32 %v17301_v32, %v5930_v13 }
 0x31f   : > { %v5589_v41 = vpop.f32.mrf.mxu0  ;;  %v17329_v15 = vpop.f32.mrf.mxu1  ;;  %v5781_v54 = vadd.f32 %v5780_v45, %v5587_v19  ;;  %v5931_v38 = vadd.f32 %v5779_v23, %v17082_v25 }
 0x320   : > { %22112 = vst [vmem:[#allocation166_spill] sm:$0xff] %v17327_v39  ;;  %v6273_v48 = vshrl.u32 %v17327_v39, 16  ;;  %v6276_v53 = vshll.u32 %v17327_v39, 16  ;;  %v17336_v37 = vpack.c.bf16 %v6145_v34, %v6145_v34  ;;  %v17338_v47 = vmax.f32 %v6082_v35, 0.0 }
 0x321   : > { %v5591_v3 = vpop.f32.mrf.mxu0  ;;  %v17333_v27 = vpop.f32.mrf.mxu1  ;;  %v6083_v34 = vadd.f32 %v17308_v30, %v6006_v16  ;;  %v6007_v23 = vmul.f32 %v17294_v43, %v5931_v38  ;;  %v5783_v59 = vadd.f32 %v5782_v46, %v5589_v41 }
 0x322   : > { %22113 = vst [vmem:[#allocation167_spill] sm:$0xff] %v17336_v37  ;;  %22114 = vst [vmem:[#allocation168_spill] sm:$0xff] %v17338_v47  ;;  %v6275_v63 = vrot.slane %v6273_v48, 7  ;;  %v6945_v0 = vrot.slane %v6276_v53, 1  ;;  %v17351_v13 = vpack.c.bf16 %v17338_v47, %v17338_v47  ;;  %v6283_v45 = vshll.u32 %v17336_v37, 16 }
 0x323   : > { %v17340_v33 = vpop.f32.mrf.mxu0  ;;  %v17342_v12 = vpop.f32.mrf.mxu1  ;;  %v6280_v47 = vshrl.u32 %v17336_v37, 16  ;;  %v6147_v60 = vmax.f32 %v6083_v34, 0.0  ;;  %v6084_v38 = vadd.f32 %v17298_v56, %v6007_v23  ;;  %v5785_v37 = vadd.f32 %v17303_v42, %v5591_v3 }
 0x324   : > { %v6278_v39 = vor.u32 %v6276_v53, %v6275_v63  ;;  %22115 = vst [vmem:[#allocation169_spill] sm:$0xff] %v17351_v13  ;;  %v6946_v19 = vor.u32 %v6945_v0, %v6273_v48  ;;  %v5932_v63 = vadd.f32 %v5781_v54, %v17085_v21  ;;  %v6947_v14 = vrot.slane %v6283_v45, 1 }
 0x325   : > { %v17345_v17 = vpop.f32.mrf.mxu0  ;;  %v17347_v28 = vpop.f32.mrf.mxu1  ;;  %v6287_v21 = vshrl.u32 %v17351_v13, 16  ;;  %v6282_v22 = vrot.slane %v6280_v47, 7 }
 0x326   : > { %6720 = vrot.lane.b32.xlu0 %v6278_v39, %s14670_s18  ;;  %v7137_v24 = vsel %vm15468_vm5, %v6946_v19, 0  ;;  %v6948_v62 = vor.u32 %v6947_v14, %v6280_v47  ;;  %v6008_v54 = vmul.f32 %v17301_v32, %v5932_v63  ;;  %v17385_v19 = vpack.c.bf16 %v6147_v60, %v6147_v60  ;;  %v22334_v39 = vld [vmem:[#allocation8_spill] sm:$0xff] }
 0x327   : > { %v17355_v35 = vpop.f32.mrf.mxu0  ;;  %v17358_v25 = vpop.f32.mrf.mxu1  ;;  %v6289_v34 = vrot.slane %v6287_v21, 7  ;;  %v6290_v63 = vshll.u32 %v17351_v13, 16  ;;  %v6285_v42 = vor.u32 %v6283_v45, %v6282_v22  ;;  %v5789_v45 = vadd.f32 %v17310_v1, %v17340_v33 }
 0x328   : > { %v7138_v46 = vsel %vm15468_vm5, %v6948_v62, 0  ;;  %22117 = vst [vmem:[#allocation18_spill] sm:$0xff] %v17385_v19  ;;  %v6085_v62 = vadd.f32 %v17308_v30, %v6008_v54  ;;  %v5934_v54 = vadd.f32 %v5785_v37, %v17093_v55  ;;  %v6294_v13 = vshrl.u32 %v17385_v19, 16  ;;  %v14371_v55 = vld [vmem:[%s21739_s5 + $0xc0] sm:$0xff]  }
 0x329   : > { %v17362_v53 = vpop.f32.mrf.mxu0  ;;  %v17365_v16 = vpop.f32.mrf.mxu1  ;;  %7267 = vrot.lane.b32.xlu1 %v7138_v46, %s14671_s29  ;;  %v6292_v60 = vor.u32 %v6290_v63, %v6289_v34 }
 0x32a   : > { %7265 = vrot.lane.b32.xlu0 %v7137_v24, %s14671_s29  ;;  %v5933_v24 = vadd.f32 %v5783_v59, %v17088_v2  ;;  %v14369_v2 = vld [vmem:[%s21739_s5 + $0xc8] sm:$0xff]   ;;  %v17400_v59 = vmax.f32 %v6084_v38, 0.0  ;;  %v6149_v22 = vmax.f32 %v6085_v62, 0.0  ;;  %v6949_v62 = vrot.slane %v6290_v63, 1 }
 0x32b   : > { %v17370_v0 = vpop.f32.mrf.mxu0  ;;  %v17373_v48 = vpop.f32.mrf.mxu1  ;;  %13287 = vmatpush3.bf16.msra.mxu0 %v14369_v2  ;;  %13840 = vmatpush3.bf16.msra.mxu1 %v14369_v2  ;;  %v6010_v8 = vmul.f32 %v17301_v32, %v5934_v54  ;;  %v5935_v63 = vadd.f32 %v5789_v45, %v17096_v51  ;;  %v14372_v2 = vld [vmem:[%s21739_s5 + $0xf8] sm:$0xff]  }
 0x32c   : > { %22118 = vst [vmem:[#allocation170_spill] sm:$0xff] %v17400_v59  ;;  %v6009_v46 = vmul.f32 %v17294_v43, %v5933_v24  ;;  %v17425_v37 = vpack.c.bf16 %v17400_v59, %v17400_v59  ;;  %v6296_v24 = vrot.slane %v6294_v13, 7  ;;  %13288 = vmatprep.subr.bf16.mxu0 %v14370_v57  ;;  %13833 = vmatprep.subr.bf16.mxu1 %v14370_v57 }
 0x32d   : > { %v17379_v41 = vpop.f32.mrf.mxu0  ;;  %v17381_v14 = vpop.f32.mrf.mxu1  ;;  %6724 = vrot.lane.b32.xlu1 %v6292_v60, %s14670_s18  ;;  %v6297_v60 = vshll.u32 %v17385_v19, 16  ;;  %v6950_v36 = vor.u32 %v6949_v62, %v6287_v21  ;;  %v5791_v19 = vadd.f32 %v17315_v10, %v17345_v17  ;;  %v14373_v21 = vld [vmem:[%s21739_s5 + $0xb8] sm:$0xff]   ;;  %v6087_v45 = vadd.f32 %v17308_v30, %v6010_v8  ;;  %v14374_v8 = vld [vmem:[%s21739_s5 + $0xf0] sm:$0xff]  }
 0x32e   : > { %6722 = vrot.lane.b32.xlu0 %v6285_v42, %s14670_s18  ;;  %22120 = vst [vmem:[#allocation172_spill] sm:$0xff] %v17425_v37  ;;  %v6086_v33 = vadd.f32 %v17298_v56, %v6009_v46  ;;  %v6301_v51 = vshrl.u32 %v17425_v37, 16  ;;  %v6011_v62 = vmul.f32 %v17294_v43, %v5935_v63 }
 0x32f   : > { %v17389_v23 = vpop.f32.mrf.mxu0  ;;  %v17391_v40 = vpop.f32.mrf.mxu1  ;;  %v6299_v58 = vor.u32 %v6297_v60, %v6296_v24  ;;  %13289 = vmatpush3.bf16.msra.mxu0 %v14371_v55  ;;  %v7139_v46 = vsel %vm15468_vm5, %v6950_v36, 0  ;;  %v6951_v54 = vrot.slane %v6297_v60, 1  ;;  %13841 = vmatpush3.bf16.msra.mxu1 %v14371_v55  ;;  %v6304_v24 = vshll.u32 %v17425_v37, 16 }
 0x330   : > { %v17457_v10 = vmax.f32 %v6086_v33, 0.0  ;;  %13290 = vmatprep.subr.bf16.mxu0 %v14372_v2  ;;  %13834 = vmatprep.subr.bf16.mxu1 %v14372_v2  ;;  %v5936_v55 = vadd.f32 %v5791_v19, %v17099_v61 }
 0x331   : > { %v17402_v3 = vpop.f32.mrf.mxu0  ;;  %v17404_v47 = vpop.f32.mrf.mxu1  ;;  %6726 = vrot.lane.b32.xlu1 %v6299_v58, %s14670_s18  ;;  %v6952_v57 = vor.u32 %v6951_v54, %v6294_v13  ;;  %v6303_v58 = vrot.slane %v6301_v51, 7  ;;  %v14375_v13 = vld [vmem:[%s21739_s5 + $0xb0] sm:$0xff]  }
 0x332   : > { %22122 = vst [vmem:[#allocation174_spill] sm:$0xff] %v17457_v10  ;;  %7269 = vrot.lane.b32.xlu0 %v7139_v46, %s14671_s29  ;;  %v5793_v46 = vadd.f32 %v17321_v11, %v17355_v35  ;;  %v17485_v19 = vpack.c.bf16 %v17457_v10, %v17457_v10  ;;  %v6151_v11 = vmax.f32 %v6087_v45, 0.0  ;;  %v6953_v35 = vrot.slane %v6304_v24, 1  ;;  %v14377_v45 = vld [vmem:[%s21739_s5 + $0xa8] sm:$0xff]  }
 0x333   : > { %v17411_v38 = vpop.f32.mrf.mxu0  ;;  %v17413_v34 = vpop.f32.mrf.mxu1  ;;  %13291 = vmatpush3.bf16.msra.mxu0 %v14373_v21  ;;  %v7140_v2 = vsel %vm15468_vm5, %v6952_v57, 0  ;;  %v6306_v63 = vor.u32 %v6304_v24, %v6303_v58  ;;  %13842 = vmatpush3.bf16.msra.mxu1 %v14373_v21  ;;  %v6088_v21 = vadd.f32 %v17298_v56, %v6011_v62  ;;  %v6012_v10 = vmul.f32 %v17301_v32, %v5936_v55 }
 0x334   : > { %22119 = vst [vmem:[#allocation171_spill] sm:$0xff] %v17413_v34  ;;  %v17438_v34 = vpack.c.bf16 %v6149_v22, %v6149_v22  ;;  %22125 = vst [vmem:[#allocation177_spill] sm:$0xff] %v17485_v19  ;;  %13292 = vmatprep.subr.bf16.mxu0 %v14374_v8  ;;  %13835 = vmatprep.subr.bf16.mxu1 %v14374_v8  ;;  %v5937_v24 = vadd.f32 %v5793_v46, %v17102_v26  ;;  %v6315_v62 = vshrl.u32 %v17485_v19, 16 }
 0x335   : > { %v17428_v42 = vpop.f32.mrf.mxu0  ;;  %v17430_v1 = vpop.f32.mrf.mxu1  ;;  %7271 = vrot.lane.b32.xlu1 %v7140_v2, %s14671_s29  ;;  %v14376_v2 = vld [vmem:[%s21739_s5 + $0xe8] sm:$0xff]   ;;  %v17511_v55 = vpack.c.bf16 %v6151_v11, %v6151_v11  ;;  %v14378_v11 = vld [vmem:[%s21739_s5 + $0xe0] sm:$0xff]  }
 0x336   : > { %22121 = vst [vmem:[#allocation173_spill] sm:$0xff] %v17438_v34  ;;  %v6308_v33 = vshrl.u32 %v17438_v34, 16  ;;  %6728 = vrot.lane.b32.xlu0 %v6306_v63, %s14670_s18  ;;  %v6954_v63 = vor.u32 %v6953_v35, %v6301_v51 }
 0x337   : > { %v17434_v7 = vpop.f32.mrf.mxu0  ;;  %v17436_v59 = vpop.f32.mrf.mxu1  ;;  %13293 = vmatpush3.bf16.msra.mxu0 %v14375_v13  ;;  %13843 = vmatpush3.bf16.msra.mxu1 %v14375_v13  ;;  %22128 = vst [vmem:[#allocation180_spill] sm:$0xff] %v17511_v55  ;;  %v17519_v13 = vmax.f32 %v6088_v21, 0.0 }
 0x338   : > { %v6310_v37 = vrot.slane %v6308_v33, 7  ;;  %13294 = vmatprep.subr.bf16.mxu0 %v14376_v2  ;;  %v7141_v26 = vsel %vm15468_vm5, %v6954_v63, 0  ;;  %13836 = vmatprep.subr.bf16.mxu1 %v14376_v2 }
 0x339   : > { %v17453_v22 = vpop.f32.mrf.mxu0  ;;  %v17455_v17 = vpop.f32.mrf.mxu1  ;;  %22130 = vst [vmem:[#allocation182_spill] sm:$0xff] %v17519_v13 }
 0x33a   : > { %7273 = vrot.lane.b32.xlu0 %v7141_v26, %s14671_s29  ;;  %v5799_v26 = vadd.f32 %v17333_v27, %v17370_v0  ;;  %v14380_v27 = vld [vmem:[%s21739_s5 + $0xd8] sm:$0xff]  }
 0x33b   : > { %v17462_v36 = vpop.f32.mrf.mxu0  ;;  %v17464_v60 = vpop.f32.mrf.mxu1  ;;  %13295 = vmatpush3.bf16.msra.mxu0 %v14377_v45  ;;  %13844 = vmatpush3.bf16.msra.mxu1 %v14377_v45  ;;  %v17549_v45 = vpack.c.bf16 %v17519_v13, %v17519_v13  ;;  %v14381_v0 = vld [vmem:[%s21739_s5 + $0x98] sm:$0xff]  }
 0x33c   : > { %22123 = vst [vmem:[#allocation175_spill] sm:$0xff] %v17464_v60  ;;  %v6311_v60 = vshll.u32 %v17438_v34, 16  ;;  %13296 = vmatprep.subr.bf16.mxu0 %v14378_v11  ;;  %13837 = vmatprep.subr.bf16.mxu1 %v14378_v11 }
 0x33d   : > { %v17479_v54 = vpop.f32.mrf.mxu0  ;;  %v17481_v61 = vpop.f32.mrf.mxu1  ;;  %22133 = vst [vmem:[#allocation185_spill] sm:$0xff] %v17549_v45 }
 0x33e   : > { %22124 = vst [vmem:[#allocation176_spill] sm:$0xff] %v17481_v61  ;;  %v6313_v61 = vor.u32 %v6311_v60, %v6310_v37  ;;  %v6955_v34 = vrot.slane %v6311_v60, 1  ;;  %v5795_v37 = vadd.f32 %v17329_v15, %v17362_v53  ;;  %v6089_v15 = vadd.f32 %v17308_v30, %v6012_v10 }
 0x33f   : > { %v17490_v57 = vpop.f32.mrf.mxu0  ;;  %v17492_v58 = vpop.f32.mrf.mxu1  ;;  %v6317_v53 = vrot.slane %v6315_v62, 7 }
 0x340   : > { %22126 = vst [vmem:[#allocation178_spill] sm:$0xff] %v17492_v58  ;;  %6730 = vrot.lane.b32.xlu1 %v6313_v61, %s14670_s18  ;;  %v6956_v51 = vor.u32 %v6955_v34, %v6308_v33  ;;  %v6318_v61 = vshll.u32 %v17485_v19, 16  ;;  %v14379_v34 = vld [vmem:[%s21739_s5 + $0xa0] sm:$0xff]   ;;  %v6013_v33 = vmul.f32 %v17294_v43, %v5937_v24  ;;  %v5938_v2 = vadd.f32 %v5795_v37, %v17106_v50 }
 0x341   : > { %v17503_v58 = vpop.f32.mrf.mxu0  ;;  %v17505_v8 = vpop.f32.mrf.mxu1  ;;  %v6322_v19 = vshrl.u32 %v17511_v55, 16  ;;  %v6325_v24 = vshll.u32 %v17511_v55, 16  ;;  %v6153_v50 = vmax.f32 %v6089_v15, 0.0  ;;  %13297 = vmatpush3.bf16.msra.mxu0 %v14379_v34  ;;  %13845 = vmatpush3.bf16.msra.mxu1 %v14379_v34  ;;  %v5801_v55 = vadd.f32 %v17342_v12, %v17379_v41  ;;  %v14383_v12 = vld [vmem:[%s21739_s5 + $0x90] sm:$0xff]  }
 0x342   : > { %22127 = vst [vmem:[#allocation179_spill] sm:$0xff] %v17505_v8  ;;  %v7142_v35 = vsel %vm15468_vm5, %v6956_v51, 0  ;;  %v6320_v63 = vor.u32 %v6318_v61, %v6317_v53  ;;  %v6957_v37 = vrot.slane %v6318_v61, 1  ;;  %v6090_v53 = vadd.f32 %v17298_v56, %v6013_v33  ;;  %13298 = vmatprep.subr.bf16.mxu0 %v14380_v27  ;;  %13838 = vmatprep.subr.bf16.mxu1 %v14380_v27 }
 0x343   : > { %v17515_v60 = vpop.f32.mrf.mxu0  ;;  %v17517_v46 = vpop.f32.mrf.mxu1  ;;  %v6324_v11 = vrot.slane %v6322_v19, 7  ;;  %v6014_v15 = vmul.f32 %v17301_v32, %v5938_v2 }
 0x344   : > { %22129 = vst [vmem:[#allocation181_spill] sm:$0xff] %v17517_v46  ;;  %7275 = vrot.lane.b32.xlu1 %v7142_v35, %s14671_s29  ;;  %6732 = vrot.lane.b32.xlu0 %v6320_v63, %s14670_s18  ;;  %v6958_v61 = vor.u32 %v6957_v37, %v6315_v62  ;;  %v5939_v63 = vadd.f32 %v5799_v26, %v17110_v20  ;;  %v6329_v62 = vshrl.u32 %v17549_v45, 16  ;;  %v14382_v20 = vld [vmem:[%s21739_s5 + $0xd0] sm:$0xff]   ;;  %v17582_v41 = vmax.f32 %v6090_v53, 0.0 }
 0x345   : > { %v17533_v10 = vpop.f32.mrf.mxu0  ;;  %v17535_v21 = vpop.f32.mrf.mxu1  ;;  %13299 = vmatpush3.bf16.msra.mxu0 %v14381_v0  ;;  %v6332_v26 = vshll.u32 %v17549_v45, 16  ;;  %v6091_v37 = vadd.f32 %v17308_v30, %v6014_v15  ;;  %13846 = vmatpush3.bf16.msra.mxu1 %v14381_v0  ;;  %v5940_v53 = vadd.f32 %v5801_v55, %v17115_v52 }
 0x346   : > { %22131 = vst [vmem:[#allocation183_spill] sm:$0xff] %v17535_v21  ;;  %v6959_v21 = vrot.slane %v6325_v24, 1  ;;  %v7143_v34 = vsel %vm15468_vm5, %v6958_v61, 0  ;;  %22136 = vst [vmem:[#allocation188_spill] sm:$0xff] %v17582_v41  ;;  %v6331_v27 = vrot.slane %v6329_v62, 7  ;;  %13300 = vmatprep.subr.bf16.mxu0 %v14382_v20  ;;  %13839 = vmatprep.subr.bf16.mxu1 %v14382_v20  ;;  %v17605_v0 = vpack.c.bf16 %v17582_v41, %v17582_v41 }
 0x347   : > { %v17543_v46 = vpop.f32.mrf.mxu0  ;;  %v17545_v51 = vpop.f32.mrf.mxu1  ;;  %v6961_v55 = vrot.slane %v6332_v26, 1 }
 0x348   : > { %22132 = vst [vmem:[#allocation184_spill] sm:$0xff] %v17545_v51  ;;  %v6327_v51 = vor.u32 %v6325_v24, %v6324_v11  ;;  %7277 = vrot.lane.b32.xlu0 %v7143_v34, %s14671_s29  ;;  %v6960_v2 = vor.u32 %v6959_v21, %v6322_v19  ;;  %v6015_v11 = vmul.f32 %v17294_v43, %v5939_v63  ;;  %22138 = vst [vmem:[#allocation190_spill] sm:$0xff] %v17605_v0 }
 0x349   : > { %v17559_v35 = vpop.f32.mrf.mxu0  ;;  %v17561_v13 = vpop.f32.mrf.mxu1  ;;  %v5803_v19 = vadd.f32 %v17347_v28, %v17389_v23  ;;  %v6334_v34 = vor.u32 %v6332_v26, %v6331_v27  ;;  %13301 = vmatpush3.bf16.msra.mxu0 %v14383_v12  ;;  %v6155_v28 = vmax.f32 %v6091_v37, 0.0  ;;  %13847 = vmatpush3.bf16.msra.mxu1 %v14383_v12  ;;  %v6016_v27 = vmul.f32 %v17301_v32, %v5940_v53 }
 0x34a   : > { %22134 = vst [vmem:[#allocation186_spill] sm:$0xff] %v17559_v35  ;;  %v17571_v35 = vpack.c.bf16 %v6153_v50, %v6153_v50  ;;  %6734 = vrot.lane.b32.xlu1 %v6327_v51, %s14670_s18  ;;  %v7144_v21 = vsel %vm15468_vm5, %v6960_v2, 0  ;;  %v6092_v2 = vadd.f32 %v17298_v56, %v6015_v11  ;;  %v6962_v41 = vor.u32 %v6961_v55, %v6329_v62 }
 0x34b   : > { %v17567_v8 = vpop.f32.mrf.mxu0  ;;  %v17569_v33 = vpop.f32.mrf.mxu1  ;;  %v5941_v26 = vadd.f32 %v5803_v19, %v17118_v18  ;;  %v5805_v37 = vadd.f32 %v17358_v25, %v17402_v3  ;;  %v6343_v12 = vshrl.u32 %v17605_v0, 16  ;;  %v17630_v62 = vpack.c.bf16 %v6155_v28, %v6155_v28 }
 0x34c   : > { %22135 = vst [vmem:[#allocation187_spill] sm:$0xff] %v17571_v35  ;;  %v6336_v15 = vshrl.u32 %v17571_v35, 16  ;;  %v6339_v52 = vshll.u32 %v17571_v35, 16  ;;  %6736 = vrot.lane.b32.xlu0 %v6334_v34, %s14670_s18  ;;  %v7145_v34 = vsel %vm15468_vm5, %v6962_v41, 0  ;;  %v17634_v19 = vmax.f32 %v6092_v2, 0.0 }
 0x34d   : > { %v17587_v24 = vpop.f32.mrf.mxu0  ;;  %v17589_v50 = vpop.f32.mrf.mxu1  ;;  %22142 = vst [vmem:[#allocation194_spill] sm:$0xff] %v17630_v62  ;;  %v6093_v25 = vadd.f32 %v17308_v30, %v6016_v27  ;;  %v6345_v3 = vrot.slane %v6343_v12, 7  ;;  %v6346_v41 = vshll.u32 %v17605_v0, 16  ;;  %v5942_v28 = vadd.f32 %v5805_v37, %v17123_v6 }
 0x34e   : > { %7279 = vrot.lane.b32.xlu1 %v7144_v21, %s14671_s29  ;;  %v6338_v23 = vrot.slane %v6336_v15, 7  ;;  %22143 = vst [vmem:[#allocation195_spill] sm:$0xff] %v17634_v19  ;;  %v5809_v2 = vadd.f32 %v17365_v16, %v17411_v38  ;;  %v6350_v27 = vshrl.u32 %v17630_v62, 16  ;;  %v6353_v0 = vshll.u32 %v17630_v62, 16 }
 0x34f   : > { %v17594_v61 = vpop.f32.mrf.mxu0  ;;  %v17596_v51 = vpop.f32.mrf.mxu1  ;;  %v17657_v6 = vpack.c.bf16 %v17634_v19, %v17634_v19  ;;  %v6965_v37 = vrot.slane %v6346_v41, 1 }
 0x350   : > { %22137 = vst [vmem:[#allocation189_spill] sm:$0xff] %v17596_v51  ;;  %v6341_v35 = vor.u32 %v6339_v52, %v6338_v23  ;;  %v6963_v51 = vrot.slane %v6339_v52, 1  ;;  %7281 = vrot.lane.b32.xlu0 %v7145_v34, %s14671_s29  ;;  %v6017_v23 = vmul.f32 %v17294_v43, %v5941_v26  ;;  %v6348_v34 = vor.u32 %v6346_v41, %v6345_v3 }
 0x351   : > { %v17609_v63 = vpop.f32.mrf.mxu0  ;;  %v17611_v20 = vpop.f32.mrf.mxu1  ;;  %22145 = vst [vmem:[#allocation197_spill] sm:$0xff] %v17657_v6  ;;  %v6157_v26 = vmax.f32 %v6093_v25, 0.0  ;;  %v6352_v38 = vrot.slane %v6350_v27, 7  ;;  %v5943_v19 = vadd.f32 %v5809_v2, %v17127_v5  ;;  %v5811_v25 = vadd.f32 %v17373_v48, %v17428_v42 }
 0x352   : > { %22139 = vst [vmem:[#allocation191_spill] sm:$0xff] %v17611_v20  ;;  %6738 = vrot.lane.b32.xlu1 %v6341_v35, %s14670_s18  ;;  %v6964_v18 = vor.u32 %v6963_v51, %v6336_v15  ;;  %v6094_v16 = vadd.f32 %v17298_v56, %v6017_v23  ;;  %v6357_v20 = vshrl.u32 %v17657_v6, 16  ;;  %v6360_v48 = vshll.u32 %v17657_v6, 16  ;;  %v22152_v6 = vld [vmem:[#allocation99_spill] sm:$0xff] }
 0x353   : > { %v17616_v45 = vpop.f32.mrf.mxu0  ;;  %v17618_v21 = vpop.f32.mrf.mxu1  ;;  %v6355_v41 = vor.u32 %v6353_v0, %v6352_v38 }
 0x354   : > { %22140 = vst [vmem:[#allocation192_spill] sm:$0xff] %v17618_v21  ;;  %v7146_v35 = vsel %vm15468_vm5, %v6964_v18, 0  ;;  %6740 = vrot.lane.b32.xlu0 %v6348_v34, %s14670_s18  ;;  %v6967_v34 = vrot.slane %v6353_v0, 1  ;;  %v17673_v21 = vpack.c.bf16 %v6157_v26, %v6157_v26  ;;  %v6359_v0 = vrot.slane %v6357_v20, 7 }
 0x355   : > { %v17626_v11 = vpop.f32.mrf.mxu0  ;;  %v17628_v53 = vpop.f32.mrf.mxu1 }
 0x356   : > { %22141 = vst [vmem:[#allocation193_spill] sm:$0xff] %v17628_v53  ;;  %7283 = vrot.lane.b32.xlu1 %v7146_v35, %s14671_s29  ;;  %v6018_v35 = vmul.f32 %v17301_v32, %v5942_v28  ;;  %22146 = vst [vmem:[#allocation198_spill] sm:$0xff] %v17673_v21  ;;  %v6968_v5 = vor.u32 %v6967_v34, %v6350_v27  ;;  %v6362_v27 = vor.u32 %v6360_v48, %v6359_v0 }
 0x357   : > { %v17638_v52 = vpop.f32.mrf.mxu0  ;;  %v17640_v55 = vpop.f32.mrf.mxu1 }
 0x358   : > { %22144 = vst [vmem:[#allocation196_spill] sm:$0xff] %v17640_v55  ;;  %v6966_v55 = vor.u32 %v6965_v37, %v6343_v12  ;;  %v17680_v12 = vmax.f32 %v6094_v16, 0.0  ;;  %v6095_v42 = vadd.f32 %v17308_v30, %v6018_v35  ;;  %v5944_v37 = vadd.f32 %v5811_v25, %v17132_v31 }
 0x359   : > { %v17646_v51 = vpop.f32.mrf.mxu0  ;;  %v17648_v15 = vpop.f32.mrf.mxu1  ;;  %v5813_v16 = vadd.f32 %v17381_v14, %v17434_v7  ;;  %v7148_v38 = vsel %vm15468_vm5, %v6968_v5, 0 }
 0x35a   : > { %v7147_v23 = vsel %vm15468_vm5, %v6966_v55, 0  ;;  %22148 = vst [vmem:[#allocation200_spill] sm:$0xff] %v17680_v12  ;;  %6742 = vrot.lane.b32.xlu1 %v6355_v41, %s14670_s18  ;;  %v6019_v55 = vmul.f32 %v17294_v43, %v5943_v19  ;;  %v6364_v41 = vshrl.u32 %v17673_v21, 16  ;;  %v17699_v35 = vpack.c.bf16 %v17680_v12, %v17680_v12 }
 0x35b   : > { %v17660_v18 = vpop.f32.mrf.mxu0  ;;  %v17662_v3 = vpop.f32.mrf.mxu1  ;;  %7285 = vrot.lane.b32.xlu0 %v7147_v23, %s14671_s29  ;;  %v6367_v19 = vshll.u32 %v17673_v21, 16  ;;  %v6969_v23 = vrot.slane %v6360_v48, 1  ;;  %v6159_v31 = vmax.f32 %v6095_v42, 0.0  ;;  %v6020_v0 = vmul.f32 %v17301_v32, %v5944_v37 }
 0x35c   : > { %22151 = vst [vmem:[#allocation203_spill] sm:$0xff] %v17699_v35  ;;  %v6366_v7 = vrot.slane %v6364_v41, 7  ;;  %v6096_v5 = vadd.f32 %v17298_v56, %v6019_v55  ;;  %v4626_v12 = vadd.f32 %v17135_v49, %v22152_v6  ;;  %v5815_v42 = vadd.f32 %v17391_v40, %v17453_v22 }
 0x35d   : > { %v17666_v53 = vpop.f32.mrf.mxu0  ;;  %v17668_v62 = vpop.f32.mrf.mxu1  ;;  %v6971_v21 = vrot.slane %v6367_v19, 1  ;;  %v17717_v37 = vpack.c.bf16 %v6159_v31, %v6159_v31  ;;  %v6097_v40 = vadd.f32 %v17308_v30, %v6020_v0 }
 0x35e   : > { %7287 = vrot.lane.b32.xlu1 %v7148_v38, %s14671_s29  ;;  %v5945_v38 = vadd.f32 %v5813_v16, %v17137_v4  ;;  %v4819_v55 = vadd.f32 %v17113_v29, %v4626_v12  ;;  %v17725_v6 = vmax.f32 %v6096_v5, 0.0 }
 0x35f   : > { %v17678_v28 = vpop.f32.mrf.mxu0  ;;  %v17688_v26 = vpop.f32.mrf.mxu1  ;;  %6744 = vrot.lane.b32.xlu0 %v6362_v27, %s14670_s18  ;;  %22153 = vst [vmem:[#allocation99_spill] sm:$0xff] %v17717_v37  ;;  %v6972_v49 = vor.u32 %v6971_v21, %v6364_v41  ;;  %v22156_v41 = vld [vmem:[#allocation101_spill] sm:$0xff]  ;;  %v6378_v31 = vshrl.u32 %v17717_v37, 16 }
 0x360   : > { %22147 = vst [vmem:[#allocation199_spill] sm:$0xff] %v17678_v28  ;;  %22150 = vst [vmem:[#allocation202_spill] sm:$0xff] %v17688_v26  ;;  %v6970_v26 = vor.u32 %v6969_v23, %v6357_v20  ;;  %v6371_v28 = vshrl.u32 %v17699_v35, 16  ;;  %v6021_v29 = vmul.f32 %v17294_v43, %v5945_v38  ;;  %v5946_v16 = vadd.f32 %v5815_v42, %v4819_v55 }
 0x361   : > { %v17686_v2 = vpop.f32.mrf.mxu0  ;;  %v17704_v25 = vpop.f32.mrf.mxu1  ;;  %22155 = vst [vmem:[#allocation205_spill] sm:$0xff] %v17725_v6  ;;  %v5819_v23 = vadd.f32 %v17404_v47, %v17462_v36  ;;  %v17745_v38 = vpack.c.bf16 %v17725_v6, %v17725_v6  ;;  %v6161_v42 = vmax.f32 %v6097_v40, 0.0  ;;  %v6380_v55 = vrot.slane %v6378_v31, 7 }
 0x362   : > { %22149 = vst [vmem:[#allocation201_spill] sm:$0xff] %v17686_v2  ;;  %v6369_v2 = vor.u32 %v6367_v19, %v6366_v7  ;;  %v7149_v27 = vsel %vm15468_vm5, %v6970_v26, 0  ;;  %v6373_v22 = vrot.slane %v6371_v28, 7  ;;  %v6374_v26 = vshll.u32 %v17699_v35, 16 }
 0x363   : > { %v5675_v34 = vpop.f32.mrf.mxu0  ;;  %7289 = vrot.lane.b32.xlu0 %v7149_v27, %s14671_s29  ;;  %v17723_v20 = vpop.f32.mrf.mxu1  ;;  %v4636_v19 = vadd.f32 %v17151_v9, %v22156_v41  ;;  %v6381_v7 = vshll.u32 %v17717_v37, 16  ;;  %22157 = vst [vmem:[#allocation101_spill] sm:$0xff] %v17745_v38  ;;  %v6098_v36 = vadd.f32 %v17298_v56, %v6021_v29  ;;  %v22158_v41 = vld [vmem:[#allocation171_spill] sm:$0xff] }
 0x364   : > { %6746 = vrot.lane.b32.xlu1 %v6369_v2, %s14670_s18  ;;  %v7150_v2 = vsel %vm15468_vm5, %v6972_v49, 0  ;;  %v6376_v21 = vor.u32 %v6374_v26, %v6373_v22  ;;  %v6973_v9 = vrot.slane %v6374_v26, 1  ;;  %v5869_v27 = vadd.f32 %v17648_v15, %v5675_v34  ;;  %v22159_v37 = vld [vmem:[#allocation115_spill] sm:$0xff]  ;;  %v22160_v26 = vld [vmem:[#allocation130_spill] sm:$0xff] }
 0x365   : > { %v5677_v14 = vpop.f32.mrf.mxu0  ;;  %v17741_v0 = vpop.f32.mrf.mxu1  ;;  %v4829_v47 = vadd.f32 %v17130_v44, %v4636_v19  ;;  %v5821_v6 = vadd.f32 %v22158_v41, %v17479_v54  ;;  %v5947_v15 = vadd.f32 %v5819_v23, %v22160_v26  ;;  %v6383_v34 = vor.u32 %v6381_v7, %v6380_v55  ;;  %v22161_v44 = vld [vmem:[#allocation145_spill] sm:$0xff]  ;;  %v22169_v41 = vld [vmem:[#allocation132_spill] sm:$0xff] }
 0x366   : > { %v5871_v49 = vadd.f32 %v17662_v3, %v5677_v14  ;;  %v6974_v40 = vor.u32 %v6973_v9, %v6371_v28  ;;  %v6975_v29 = vrot.slane %v6381_v7, 1  ;;  %v22163_v3 = vld [vmem:[#allocation105_spill] sm:$0xff]  ;;  %v22164_v14 = vld [vmem:[#allocation104_spill] sm:$0xff]  ;;  %v6385_v28 = vshrl.u32 %v17745_v38, 16 }
 0x367   : > { %v5679_v48 = vpop.f32.mrf.mxu0  ;;  %6748 = vrot.lane.b32.xlu0 %v6376_v21, %s14670_s18  ;;  %v17758_v21 = vadd.f32 %v5869_v27, %v22159_v37  ;;  %v17764_v35 = vpop.f32.mrf.mxu1  ;;  %v22166_v37 = vld [vmem:[#allocation109_spill] sm:$0xff]  ;;  %v22167_v9 = vld [vmem:[#allocation108_spill] sm:$0xff]  ;;  %v17775_v27 = vmax.f32 %v6098_v36, 0.0  ;;  %v6388_v55 = vshll.u32 %v17745_v38, 16  ;;  %v22171_v36 = vld [vmem:[#allocation103_spill] sm:$0xff] }
 0x368   : > { %7291 = vrot.lane.b32.xlu1 %v7150_v2, %s14671_s29  ;;  %v6022_v2 = vmul.f32 %v17301_v32, %v5946_v16  ;;  %v17762_v19 = vadd.f32 %v5871_v49, %v22161_v44  ;;  %22162 = vst [vmem:[#allocation171_spill] sm:$0xff] %v17764_v35  ;;  %v17768_v16 = vpack.c.bf16 %v6161_v42, %v6161_v42  ;;  %v7151_v54 = vsel %vm15468_vm5, %v6974_v40, 0 }
 0x369   : > { %v17721_v4 = vpop.f32.mrf.mxu0  ;;  %v4656_v23 = vadd.f32 %v22167_v9, %v22166_v37  ;;  %22168 = vst [vmem:[#allocation130_spill] sm:$0xff] %v17775_v27  ;;  %v6976_v7 = vor.u32 %v6975_v29, %v6378_v31  ;;  %v5948_v40 = vadd.f32 %v5821_v6, %v22169_v41  ;;  %v6387_v26 = vrot.slane %v6385_v28, 7  ;;  %v5888_v29 = vpop.f32.mrf.mxu1  ;;  %v22172_v6 = vld [vmem:[#allocation147_spill] sm:$0xff] }
 0x36a   : > { %22154 = vst [vmem:[#allocation204_spill] sm:$0xff] %v17721_v4  ;;  %v4646_v4 = vadd.f32 %v22164_v14, %v22163_v3  ;;  %22165 = vst [vmem:[#allocation115_spill] sm:$0xff] %v17768_v16  ;;  %v6099_v42 = vadd.f32 %v17308_v30, %v6022_v2  ;;  %v5873_v44 = vadd.f32 %v17668_v62, %v5679_v48  ;;  %v22170_v3 = vld [vmem:[#allocation131_spill] sm:$0xff]  ;;  %v6392_v62 = vshrl.u32 %v17768_v16, 16 }
 0x36b   : > { %v17730_v12 = vpop.f32.mrf.mxu0  ;;  %7293 = vrot.lane.b32.xlu0 %v7151_v54, %s14671_s29  ;;  %v17789_v37 = vadd.f32 %v22171_v36, %v4656_v23  ;;  %v5823_v31 = vadd.f32 %v17430_v1, %v17490_v57  ;;  %v7152_v2 = vsel %vm15468_vm5, %v6976_v7, 0  ;;  %v6390_v54 = vor.u32 %v6388_v55, %v6387_v26 }
 0x36c   : > { %6750 = vrot.lane.b32.xlu1 %v6383_v34, %s14670_s18  ;;  %v17786_v14 = vadd.f32 %v22170_v3, %v4646_v4  ;;  %v6023_v34 = vmul.f32 %v17294_v43, %v5947_v15  ;;  %v17797_v9 = vadd.f32 %v5873_v44, %v22172_v6  ;;  %v17802_v48 = vpack.c.bf16 %v17775_v27, %v17775_v27  ;;  %v22173_v44 = vld [vmem:[#allocation112_spill] sm:$0xff]  ;;  %v22174_v3 = vld [vmem:[#allocation111_spill] sm:$0xff]  ;;  %v5890_v6 = vpop.f32.mrf.mxu1 }
 0x36d   : > { %v5687_v5 = vpop.f32.mrf.mxu0  ;;  %v5825_v4 = vadd.f32 %v17436_v59, %v17503_v58  ;;  %v6395_v1 = vshll.u32 %v17768_v16, 16  ;;  %v6977_v57 = vrot.slane %v6388_v55, 1  ;;  %v6163_v23 = vmax.f32 %v6099_v42, 0.0  ;;  %v22175_v55 = vld [vmem:[#allocation100_spill] sm:$0xff]  ;;  %v22176_v16 = vld [vmem:[#allocation117_spill] sm:$0xff] }
 0x36e   : > { %v6024_v7 = vmul.f32 %v17301_v32, %v5948_v40  ;;  %v6394_v41 = vrot.slane %v6392_v62, 7  ;;  %v5879_v26 = vadd.f32 %v17704_v25, %v17730_v12  ;;  %v4666_v36 = vadd.f32 %v22174_v3, %v22173_v44  ;;  %v22177_v12 = vld [vmem:[#allocation149_spill] sm:$0xff] }
 0x36f   : > { %v17752_v22 = vpop.f32.mrf.mxu0  ;;  %6752 = vrot.lane.b32.xlu0 %v6390_v54, %s14670_s18  ;;  %v6100_v59 = vadd.f32 %v17298_v56, %v6023_v34  ;;  %v6978_v58 = vor.u32 %v6977_v57, %v6385_v28  ;;  %v5949_v27 = vadd.f32 %v5823_v31, %v22175_v55  ;;  %v6979_v54 = vrot.slane %v6395_v1, 1  ;;  %v22181_v44 = vld [vmem:[#allocation113_spill] sm:$0xff]  ;;  %v22182_v55 = vld [vmem:[#allocation150_spill] sm:$0xff] }
 0x370   : > { %7295 = vrot.lane.b32.xlu1 %v7152_v2, %s14671_s29  ;;  %v5881_v2 = vadd.f32 %v17723_v20, %v5687_v5  ;;  %v6397_v42 = vor.u32 %v6395_v1, %v6394_v41  ;;  %v17818_v40 = vadd.f32 %v5879_v26, %v22176_v16  ;;  %v5950_v38 = vadd.f32 %v5825_v4, %v4829_v47  ;;  %v5892_v1 = vpop.f32.mrf.mxu1  ;;  %v22179_v41 = vld [vmem:[#allocation107_spill] sm:$0xff] }
 0x371   : > { %v17780_v49 = vpop.f32.mrf.mxu0  ;;  %v7153_v25 = vsel %vm15468_vm5, %v6978_v58, 0  ;;  %v6399_v34 = vshrl.u32 %v17802_v48, 16  ;;  %v17826_v57 = vpack.c.bf16 %v6163_v23, %v6163_v23  ;;  %v6101_v20 = vadd.f32 %v17308_v30, %v6024_v7  ;;  %v22180_v23 = vld [vmem:[#allocation114_spill] sm:$0xff] }
 0x372   : > { %v17823_v35 = vadd.f32 %v5881_v2, %v22177_v12  ;;  %v6980_v5 = vor.u32 %v6979_v54, %v6392_v62  ;;  %v17831_v16 = vmax.f32 %v6100_v59, 0.0  ;;  %v6402_v31 = vshll.u32 %v17802_v48, 16 }
 0x373   : > { %v5695_v15 = vpop.f32.mrf.mxu0  ;;  %7297 = vrot.lane.b32.xlu0 %v7153_v25, %s14671_s29  ;;  %v6401_v47 = vrot.slane %v6399_v34, 7  ;;  %v5883_v4 = vadd.f32 %v17741_v0, %v17752_v22  ;;  %v17837_v26 = vadd.f32 %v22179_v41, %v4666_v36  ;;  %v4676_v7 = vadd.f32 %v22181_v44, %v22180_v23  ;;  %v22183_v36 = vld [vmem:[#allocation137_spill] sm:$0xff] }
 0x374   : > { %6754 = vrot.lane.b32.xlu1 %v6397_v42, %s14670_s18  ;;  %22178 = vst [vmem:[#allocation145_spill] sm:$0xff] %v17831_v16  ;;  %v6025_v3 = vmul.f32 %v17294_v43, %v5949_v27  ;;  %v5829_v62 = vadd.f32 %v17455_v17, %v17515_v60  ;;  %v6026_v59 = vmul.f32 %v17301_v32, %v5950_v38  ;;  %v7154_v58 = vsel %vm15468_vm5, %v6980_v5, 0  ;;  %v22185_v38 = vld [vmem:[#allocation175_spill] sm:$0xff] }
 0x375   : > { %v5697_v28 = vpop.f32.mrf.mxu0  ;;  %v6404_v2 = vor.u32 %v6402_v31, %v6401_v47  ;;  %v17848_v0 = vadd.f32 %v5883_v4, %v22182_v55  ;;  %v17851_v42 = vadd.f32 %v22183_v36, %v4676_v7  ;;  %v6165_v54 = vmax.f32 %v6101_v20, 0.0  ;;  %v17863_v47 = vpop.f32.mrf.mxu1  ;;  %v22187_v4 = vld [vmem:[#allocation102_spill] sm:$0xff] }
 0x376   : > { %v6406_v27 = vshrl.u32 %v17826_v57, 16  ;;  %v6409_v17 = vshll.u32 %v17826_v57, 16  ;;  %v17858_v60 = vpack.c.bf16 %v17831_v16, %v17831_v16  ;;  %v5831_v25 = vadd.f32 %v22185_v38, %v17533_v10  ;;  %22186 = vst [vmem:[#allocation104_spill] sm:$0xff] %v17863_v47  ;;  %v22189_v16 = vld [vmem:[#allocation151_spill] sm:$0xff] }
 0x377   : > { %v5699_v22 = vpop.f32.mrf.mxu0  ;;  %6756 = vrot.lane.b32.xlu0 %v6404_v2, %s14670_s18  ;;  %v6981_v12 = vrot.slane %v6402_v31, 1  ;;  %v5889_v5 = vadd.f32 %v5888_v29, %v5695_v15  ;;  %v6102_v20 = vadd.f32 %v17298_v56, %v6025_v3  ;;  %v5951_v41 = vadd.f32 %v5829_v62, %v22187_v4  ;;  %v22190_v29 = vld [vmem:[#allocation186_spill] sm:$0xff]  ;;  %v22192_v3 = vld [vmem:[#allocation153_spill] sm:$0xff] }
 0x378   : > { %7299 = vrot.lane.b32.xlu1 %v7154_v58, %s14671_s29  ;;  %22184 = vst [vmem:[#allocation105_spill] sm:$0xff] %v17858_v60  ;;  %v6408_v23 = vrot.slane %v6406_v27, 7  ;;  %v5891_v44 = vadd.f32 %v5890_v6, %v5697_v28  ;;  %v6103_v7 = vadd.f32 %v17308_v30, %v6026_v59  ;;  %v22188_v58 = vld [vmem:[#allocation176_spill] sm:$0xff]  ;;  %v22191_v15 = vld [vmem:[#allocation178_spill] sm:$0xff]  ;;  %v6983_v62 = vrot.slane %v6409_v17, 1 }
 0x379   : > { %v5833_v55 = vadd.f32 %v22188_v58, %v17543_v46  ;;  %v6982_v36 = vor.u32 %v6981_v12, %v6399_v34  ;;  %v17871_v10 = vadd.f32 %v5889_v5, %v22189_v16  ;;  %v17873_v2 = vpop.f32.mrf.mxu0  ;;  %v5835_v31 = vadd.f32 %v22191_v15, %v22190_v29  ;;  %v22194_v6 = vld [vmem:[#allocation116_spill] sm:$0xff]  ;;  %v22195_v28 = vld [vmem:[#allocation146_spill] sm:$0xff]  ;;  %v5898_v16 = vpop.f32.mrf.mxu1  ;;  %v22198_v5 = vld [vmem:[#allocation133_spill] sm:$0xff] }
 0x37a   : > { %v6411_v38 = vor.u32 %v6409_v17, %v6408_v23  ;;  %v17878_v47 = vadd.f32 %v5891_v44, %v22192_v3  ;;  %v4686_v59 = vadd.f32 %v22195_v28, %v22194_v6  ;;  %v17882_v4 = vpack.c.bf16 %v6165_v54, %v6165_v54  ;;  %v22199_v44 = vld [vmem:[#allocation134_spill] sm:$0xff]  ;;  %v22200_v6 = vld [vmem:[#allocation141_spill] sm:$0xff] }
 0x37b   : > { %v7155_v46 = vsel %vm15468_vm5, %v6982_v36, 0  ;;  %v6413_v34 = vshrl.u32 %v17858_v60, 16  ;;  %v17887_v12 = vmax.f32 %v6102_v20, 0.0  ;;  %v5952_v58 = vadd.f32 %v5831_v25, %v22198_v5  ;;  %v5705_v3 = vpop.f32.mrf.mxu0  ;;  %v22201_v20 = vld [vmem:[#allocation127_spill] sm:$0xff] }
 0x37c   : > { %22193 = vst [vmem:[#allocation109_spill] sm:$0xff] %v17878_v47  ;;  %22196 = vst [vmem:[#allocation108_spill] sm:$0xff] %v17882_v4  ;;  %6758 = vrot.lane.b32.xlu1 %v6411_v38, %s14670_s18  ;;  %7301 = vrot.lane.b32.xlu0 %v7155_v46, %s14671_s29  ;;  %v6984_v17 = vor.u32 %v6983_v62, %v6406_v27  ;;  %v6416_v23 = vshll.u32 %v17858_v60, 16  ;;  %v6027_v54 = vmul.f32 %v17294_v43, %v5951_v41  ;;  %v22202_v47 = vld [vmem:[#allocation126_spill] sm:$0xff] }
 0x37d   : > { %22197 = vst [vmem:[#allocation132_spill] sm:$0xff] %v17887_v12  ;;  %v5953_v29 = vadd.f32 %v5833_v55, %v22199_v44  ;;  %v6415_v15 = vrot.slane %v6413_v34, 7  ;;  %v5893_v36 = vadd.f32 %v5892_v1, %v5699_v22  ;;  %v17896_v28 = vadd.f32 %v22200_v6, %v4686_v59  ;;  %v22203_v46 = vld [vmem:[#allocation154_spill] sm:$0xff]  ;;  %v5900_v1 = vpop.f32.mrf.mxu1  ;;  %v22205_v6 = vld [vmem:[#allocation179_spill] sm:$0xff] }
 0x37e   : > { %v4726_v25 = vadd.f32 %v22202_v47, %v22201_v20  ;;  %v6167_v5 = vmax.f32 %v6103_v7, 0.0  ;;  %v5954_v38 = vadd.f32 %v5835_v31, %v17786_v14  ;;  %v7156_v27 = vsel %vm15468_vm5, %v6984_v17, 0 }
 0x37f   : > { %v6418_v62 = vor.u32 %v6416_v23, %v6415_v15  ;;  %v17904_v41 = vadd.f32 %v5893_v36, %v22203_v46  ;;  %v6420_v55 = vshrl.u32 %v17882_v4, 16  ;;  %v17909_v22 = vpack.c.bf16 %v17887_v12, %v17887_v12  ;;  %v5707_v15 = vpop.f32.mrf.mxu0 }
 0x380   : > { %v6028_v59 = vmul.f32 %v17301_v32, %v5952_v58  ;;  %7303 = vrot.lane.b32.xlu1 %v7156_v27, %s14671_s29  ;;  %v6423_v14 = vshll.u32 %v17882_v4, 16  ;;  %v6985_v47 = vrot.slane %v6416_v23, 1  ;;  %v6104_v7 = vadd.f32 %v17298_v56, %v6027_v54  ;;  %v22206_v27 = vld [vmem:[#allocation181_spill] sm:$0xff]  ;;  %v5902_v4 = vpop.f32.mrf.mxu1 }
 0x381   : > { %22204 = vst [vmem:[#allocation131_spill] sm:$0xff] %v17904_v41  ;;  %v6029_v31 = vmul.f32 %v17294_v43, %v5953_v29  ;;  %6760 = vrot.lane.b32.xlu0 %v6418_v62, %s14670_s18  ;;  %v6422_v17 = vrot.slane %v6420_v55, 7  ;;  %v5899_v44 = vadd.f32 %v5898_v16, %v5705_v3  ;;  %v6030_v36 = vmul.f32 %v17301_v32, %v5954_v38  ;;  %v22207_v41 = vld [vmem:[#allocation155_spill] sm:$0xff]  ;;  %v22209_v62 = vld [vmem:[#allocation122_spill] sm:$0xff]  ;;  %v22210_v3 = vld [vmem:[#allocation156_spill] sm:$0xff] }
 0x382   : > { %v5839_v20 = vadd.f32 %v22205_v6, %v17567_v8  ;;  %v6986_v58 = vor.u32 %v6985_v47, %v6413_v34  ;;  %v5901_v46 = vadd.f32 %v5900_v1, %v5707_v15  ;;  %v5841_v12 = vadd.f32 %v22206_v27, %v17587_v24  ;;  %v5709_v1 = vpop.f32.mrf.mxu0  ;;  %v22215_v27 = vld [vmem:[#allocation184_spill] sm:$0xff] }
 0x383   : > { %v6425_v23 = vor.u32 %v6423_v14, %v6422_v17  ;;  %v17923_v54 = vadd.f32 %v5899_v44, %v22207_v41  ;;  %v6987_v29 = vrot.slane %v6423_v14, 1  ;;  %v17926_v60 = vadd.f32 %v22209_v62, %v4726_v25 }
 0x384   : > { %v7157_v16 = vsel %vm15468_vm5, %v6986_v58, 0  ;;  %v17931_v38 = vadd.f32 %v5901_v46, %v22210_v3  ;;  %v6427_v8 = vshrl.u32 %v17909_v22, 16  ;;  %v17934_v34 = vpack.c.bf16 %v6167_v5, %v6167_v5  ;;  %v22212_v5 = vld [vmem:[#allocation106_spill] sm:$0xff] }
 0x385   : > { %22208 = vst [vmem:[#allocation103_spill] sm:$0xff] %v17923_v54  ;;  %v17936_v24 = vmax.f32 %v6104_v7, 0.0  ;;  %v6105_v41 = vadd.f32 %v17308_v30, %v6028_v59  ;;  %6762 = vrot.lane.b32.xlu1 %v6425_v23, %s14670_s18  ;;  %7305 = vrot.lane.b32.xlu0 %v7157_v16, %s14671_s29  ;;  %v6988_v25 = vor.u32 %v6987_v29, %v6420_v55  ;;  %v6430_v17 = vshll.u32 %v17909_v22, 16  ;;  %v22213_v7 = vld [vmem:[#allocation135_spill] sm:$0xff]  ;;  %v22216_v29 = vld [vmem:[#allocation157_spill] sm:$0xff]  ;;  %v22219_v16 = vld [vmem:[#allocation128_spill] sm:$0xff] }
 0x386   : > { %v6106_v14 = vadd.f32 %v17298_v56, %v6029_v31  ;;  %v6429_v47 = vrot.slane %v6427_v8, 7  ;;  %v5903_v44 = vadd.f32 %v5902_v4, %v5709_v1  ;;  %v6107_v15 = vadd.f32 %v17308_v30, %v6030_v36  ;;  %v22214_v59 = vld [vmem:[#allocation183_spill] sm:$0xff]  ;;  %v22218_v4 = vld [vmem:[#allocation129_spill] sm:$0xff] }
 0x387   : > { %22211 = vst [vmem:[#allocation147_spill] sm:$0xff] %v17936_v24  ;;  %v5955_v6 = vadd.f32 %v5839_v20, %v22212_v5  ;;  %v5956_v58 = vadd.f32 %v5841_v12, %v22213_v7  ;;  %v5843_v46 = vadd.f32 %v22214_v59, %v17594_v61  ;;  %v5845_v23 = vadd.f32 %v22215_v27, %v17609_v63  ;;  %v22222_v7 = vld [vmem:[#allocation136_spill] sm:$0xff] }
 0x388   : > { %v7158_v55 = vsel %vm15468_vm5, %v6988_v25, 0  ;;  %v6432_v31 = vor.u32 %v6430_v17, %v6429_v47  ;;  %v17953_v62 = vadd.f32 %v5903_v44, %v22216_v29  ;;  %v17957_v36 = vadd.f32 %v22219_v16, %v22218_v4 }
 0x389   : > { %v5849_v12 = vadd.f32 %v17561_v13, %v17616_v45  ;;  %7307 = vrot.lane.b32.xlu1 %v7158_v55, %s14671_s29  ;;  %v6434_v61 = vshrl.u32 %v17934_v34, 16  ;;  %v6437_v63 = vshll.u32 %v17934_v34, 16  ;;  %v17966_v20 = vpack.c.bf16 %v17936_v24, %v17936_v24 }
 0x38a   : > { %22217 = vst [vmem:[#allocation112_spill] sm:$0xff] %v17953_v62  ;;  %v6169_v3 = vmax.f32 %v6105_v41, 0.0  ;;  %v17968_v25 = vmax.f32 %v6106_v14, 0.0  ;;  %6764 = vrot.lane.b32.xlu0 %v6432_v31, %s14670_s18  ;;  %v6989_v1 = vrot.slane %v6430_v17, 1  ;;  %v6171_v47 = vmax.f32 %v6107_v15, 0.0  ;;  %v22223_v41 = vld [vmem:[#allocation110_spill] sm:$0xff] }
 0x38b   : > { %22220 = vst [vmem:[#allocation111_spill] sm:$0xff] %v17966_v20  ;;  %v6031_v44 = vmul.f32 %v17294_v43, %v5955_v6  ;;  %v5851_v13 = vadd.f32 %v17569_v33, %v17626_v11  ;;  %v6436_v45 = vrot.slane %v6434_v61, 7  ;;  %v6032_v5 = vmul.f32 %v17301_v32, %v5956_v58  ;;  %v22225_v6 = vld [vmem:[#allocation189_spill] sm:$0xff] }
 0x38c   : > { %22221 = vst [vmem:[#allocation100_spill] sm:$0xff] %v17968_v25  ;;  %v5957_v59 = vadd.f32 %v5843_v46, %v22222_v7  ;;  %v5958_v27 = vadd.f32 %v5845_v23, %v17789_v37  ;;  %v6990_v55 = vor.u32 %v6989_v1, %v6427_v8  ;;  %v5959_v14 = vadd.f32 %v5849_v12, %v22223_v41  ;;  %v22227_v8 = vld [vmem:[#allocation138_spill] sm:$0xff] }
 0x38d   : > { %v5853_v31 = vadd.f32 %v17589_v50, %v17638_v52  ;;  %v6439_v17 = vor.u32 %v6437_v63, %v6436_v45  ;;  %v6991_v15 = vrot.slane %v6437_v63, 1  ;;  %v17980_v29 = vpack.c.bf16 %v6169_v3, %v6169_v3 }
 0x38e   : > { %v5855_v33 = vadd.f32 %v22225_v6, %v17646_v51  ;;  %v7159_v11 = vsel %vm15468_vm5, %v6990_v55, 0  ;;  %v6441_v58 = vshrl.u32 %v17966_v20, 16  ;;  %v17989_v37 = vpack.c.bf16 %v17968_v25, %v17968_v25  ;;  %v22230_v55 = vld [vmem:[#allocation191_spill] sm:$0xff]  ;;  %v22247_v25 = vld [vmem:[#allocation196_spill] sm:$0xff] }
 0x38f   : > { %22224 = vst [vmem:[#allocation117_spill] sm:$0xff] %v17980_v29  ;;  %v5960_v46 = vadd.f32 %v5851_v13, %v22227_v8  ;;  %6766 = vrot.lane.b32.xlu1 %v6439_v17, %s14670_s18  ;;  %7309 = vrot.lane.b32.xlu0 %v7159_v11, %s14671_s29  ;;  %v6992_v50 = vor.u32 %v6991_v15, %v6434_v61  ;;  %v6444_v52 = vshll.u32 %v17966_v20, 16  ;;  %v22229_v13 = vld [vmem:[#allocation139_spill] sm:$0xff]  ;;  %v22232_v8 = vld [vmem:[#allocation192_spill] sm:$0xff] }
 0x390   : > { %22226 = vst [vmem:[#allocation149_spill] sm:$0xff] %v17989_v37  ;;  %v6108_v51 = vadd.f32 %v17298_v56, %v6031_v44  ;;  %v6033_v23 = vmul.f32 %v17294_v43, %v5957_v59  ;;  %v6034_v4 = vmul.f32 %v17301_v32, %v5958_v27  ;;  %v6443_v16 = vrot.slane %v6441_v58, 7 }
 0x391   : > { %v18000_v63 = vpack.c.bf16 %v6171_v47, %v6171_v47  ;;  %v6109_v3 = vadd.f32 %v17308_v30, %v6032_v5  ;;  %v6035_v1 = vmul.f32 %v17294_v43, %v5959_v14  ;;  %v5961_v45 = vadd.f32 %v5853_v31, %v22229_v13 }
 0x392   : > { %v5962_v61 = vadd.f32 %v5855_v33, %v17837_v26  ;;  %v7160_v44 = vsel %vm15468_vm5, %v6992_v50, 0  ;;  %v6446_v7 = vor.u32 %v6444_v52, %v6443_v16  ;;  %v6448_v59 = vshrl.u32 %v17980_v29, 16  ;;  %v22233_v16 = vld [vmem:[#allocation140_spill] sm:$0xff] }
 0x393   : > { %22228 = vst [vmem:[#allocation107_spill] sm:$0xff] %v18000_v63  ;;  %v6036_v27 = vmul.f32 %v17301_v32, %v5960_v46  ;;  %v5859_v47 = vadd.f32 %v22230_v55, %v17660_v18  ;;  %7311 = vrot.lane.b32.xlu1 %v7160_v44, %s14671_s29  ;;  %v6451_v5 = vshll.u32 %v17980_v29, 16  ;;  %v6993_v41 = vrot.slane %v6444_v52, 1 }
 0x394   : > { %v18014_v14 = vmax.f32 %v6108_v51, 0.0  ;;  %v6110_v26 = vadd.f32 %v17298_v56, %v6033_v23  ;;  %v6111_v31 = vadd.f32 %v17308_v30, %v6034_v4  ;;  %6768 = vrot.lane.b32.xlu0 %v6446_v7, %s14670_s18  ;;  %v6450_v17 = vrot.slane %v6448_v59, 7 }
 0x395   : > { %v6173_v15 = vmax.f32 %v6109_v3, 0.0  ;;  %v6112_v6 = vadd.f32 %v17298_v56, %v6035_v1  ;;  %v6037_v33 = vmul.f32 %v17294_v43, %v5961_v45  ;;  %v6994_v18 = vor.u32 %v6993_v41, %v6441_v58 }
 0x396   : > { %22231 = vst [vmem:[#allocation114_spill] sm:$0xff] %v18014_v14  ;;  %v6038_v11 = vmul.f32 %v17301_v32, %v5962_v61  ;;  %v5861_v46 = vadd.f32 %v22232_v8, %v17666_v53  ;;  %v6453_v50 = vor.u32 %v6451_v5, %v6450_v17  ;;  %v6995_v52 = vrot.slane %v6451_v5, 1 }
 0x397   : > { %v6113_v4 = vadd.f32 %v17308_v30, %v6036_v27  ;;  %v5963_v3 = vadd.f32 %v5859_v47, %v22233_v16  ;;  %v7161_v1 = vsel %vm15468_vm5, %v6994_v18, 0  ;;  %v6455_v58 = vshrl.u32 %v17989_v37, 16  ;;  %v22237_v47 = vld [vmem:[#allocation125_spill] sm:$0xff] }
 0x398   : > { %v17998_v12 = vpop.permute.xlu0 %6720  ;;  %v18035_v13 = vpack.c.bf16 %v18014_v14, %v18014_v14  ;;  %v18037_v53 = vmax.f32 %v6110_v26, 0.0  ;;  %v6175_v45 = vmax.f32 %v6111_v31, 0.0  ;;  %6770 = vrot.lane.b32.xlu1 %v6453_v50, %s14670_s18  ;;  %7313 = vrot.lane.b32.xlu0 %v7161_v1, %s14671_s29  ;;  %v6996_v61 = vor.u32 %v6995_v52, %v6448_v59  ;;  %v22239_v31 = vld [vmem:[#allocation142_spill] sm:$0xff] }
 0x399   : > { %v18041_v44 = vmax.f32 %v6112_v6, 0.0  ;;  %v6114_v7 = vadd.f32 %v17298_v56, %v6037_v33  ;;  %v6457_v27 = vrot.slane %v6455_v58, 7  ;;  %v6458_v55 = vshll.u32 %v17989_v37, 16 }
 0x39a   : > { %22234 = vst [vmem:[#allocation113_spill] sm:$0xff] %v18035_v13  ;;  %22235 = vst [vmem:[#allocation150_spill] sm:$0xff] %v18037_v53  ;;  %v18047_v5 = vadd.f32 %v22237_v47, %v17957_v36  ;;  %v18049_v41 = vpack.c.bf16 %v6173_v15, %v6173_v15  ;;  %v6115_v26 = vadd.f32 %v17308_v30, %v6038_v11  ;;  %v6177_v18 = vmax.f32 %v6113_v4, 0.0 }
 0x39b   : > { %v18024_v51 = vpop.permute.xlu1 %7267  ;;  %22236 = vst [vmem:[#allocation137_spill] sm:$0xff] %v18041_v44  ;;  %v5964_v17 = vadd.f32 %v5861_v46, %v22239_v31  ;;  %v6039_v59 = vmul.f32 %v17294_v43, %v5963_v3  ;;  %v7162_v6 = vsel %vm15468_vm5, %v6996_v61, 0  ;;  %v6460_v33 = vor.u32 %v6458_v55, %v6457_v27 }
 0x39c   : > { %v18026_v23 = vpop.permute.xlu0 %7265  ;;  %22238 = vst [vmem:[#allocation175_spill] sm:$0xff] %v18049_v41  ;;  %v18060_v50 = vpack.c.bf16 %v18037_v53, %v18037_v53  ;;  %v18062_v36 = vpack.c.bf16 %v6175_v45, %v6175_v45  ;;  %7315 = vrot.lane.b32.xlu1 %v7162_v6, %s14671_s29  ;;  %v6462_v15 = vshrl.u32 %v18000_v63, 16  ;;  %v6465_v11 = vshll.u32 %v18000_v63, 16  ;;  %v22244_v6 = vld [vmem:[#allocation199_spill] sm:$0xff]  ;;  %v22245_v53 = vld [vmem:[#allocation193_spill] sm:$0xff] }
 0x39d   : > { %v18071_v52 = vpack.c.bf16 %v18041_v44, %v18041_v44  ;;  %v18073_v4 = vmax.f32 %v6114_v7, 0.0  ;;  %6772 = vrot.lane.b32.xlu0 %v6460_v33, %s14670_s18  ;;  %v6997_v16 = vrot.slane %v6458_v55, 1  ;;  %v6469_v3 = vshrl.u32 %v18035_v13, 16  ;;  %v22246_v7 = vld [vmem:[#allocation201_spill] sm:$0xff] }
 0x39e   : > { %22240 = vst [vmem:[#allocation102_spill] sm:$0xff] %v18060_v50  ;;  %22241 = vst [vmem:[#allocation176_spill] sm:$0xff] %v18062_v36  ;;  %v6179_v1 = vmax.f32 %v6115_v26, 0.0  ;;  %v6040_v45 = vmul.f32 %v17301_v32, %v5964_v17  ;;  %v6464_v61 = vrot.slane %v6462_v15, 7  ;;  %v6999_v27 = vrot.slane %v6465_v11, 1 }
 0x39f   : > { %v18056_v8 = vpop.permute.xlu1 %6724  ;;  %22242 = vst [vmem:[#allocation151_spill] sm:$0xff] %v18071_v52  ;;  %22243 = vst [vmem:[#allocation186_spill] sm:$0xff] %v18073_v4  ;;  %v18078_v47 = vpack.c.bf16 %v6177_v18, %v6177_v18  ;;  %v6116_v31 = vadd.f32 %v17298_v56, %v6039_v59  ;;  %v5863_v44 = vadd.f32 %v22245_v53, %v22244_v6  ;;  %v6471_v55 = vrot.slane %v6469_v3, 7 }
 0x3a0   : > { %v18067_v46 = vpop.permute.xlu0 %6722  ;;  %v6998_v14 = vor.u32 %v6997_v16, %v6455_v58  ;;  %v5865_v24 = vadd.f32 %v22247_v25, %v22246_v7  ;;  %v6467_v33 = vor.u32 %v6465_v11, %v6464_v61  ;;  %v6472_v63 = vshll.u32 %v18035_v13, 16  ;;  %v22249_v11 = vld [vmem:[#allocation143_spill] sm:$0xff] }
 0x3a1   : > { %v7000_v17 = vor.u32 %v6999_v27, %v6462_v15  ;;  %v6476_v18 = vshrl.u32 %v18049_v41, 16  ;;  %v6479_v37 = vshll.u32 %v18049_v41, 16  ;;  %v18092_v53 = vpack.c.bf16 %v18073_v4, %v18073_v4 }
 0x3a2   : > { %v7163_v26 = vsel %vm15468_vm5, %v6998_v14, 0  ;;  %v18094_v58 = vpack.c.bf16 %v6179_v1, %v6179_v1  ;;  %v18097_v25 = vadd.f32 %v17308_v30, %v6040_v45  ;;  %6774 = vrot.lane.b32.xlu1 %v6467_v33, %s14670_s18  ;;  %v7001_v14 = vrot.slane %v6472_v63, 1  ;;  %v18109_v45 = vpop.f32.mrf.mxu1  ;;  %v14539_v33 = vld [vmem:[#allocation2] sm:$0xff] }
 0x3a3   : > { %v6727_v59 = vpop.permute.xlu1 %6726  ;;  %7317 = vrot.lane.b32.xlu0 %v7163_v26, %s14671_s29  ;;  %v5965_v16 = vadd.f32 %v5863_v44, %v22249_v11  ;;  %v6478_v61 = vrot.slane %v6476_v18, 7  ;;  %v12762_v27 = vcombine.low %v18024_v51, %v18024_v51  ;;  %v18106_v6 = vmax.f32 %v6116_v31, 0.0  ;;  %7846 = vst.msk [vmem:[#allocation3 + $0x8] sm:$0xf] %vm7845_vm6, %v14539_v33  ;;  %7864 = vst.msk [vmem:[#allocation3 + $0x74] sm:$0xf] %vm7845_vm6, %v14539_v33  ;;  %v18123_v31 = vpop.f32.mrf.mxu0 }
 0x3a4   : > { %22248 = vst [vmem:[#allocation178_spill] sm:$0xff] %v18094_v58  ;;  %v18101_v15 = vpop.permute.xlu0 %7269  ;;  %v5966_v1 = vadd.f32 %v5865_v24, %v17851_v42  ;;  %v6474_v7 = vor.u32 %v6472_v63, %v6471_v55  ;;  %7866 = vst.msk [vmem:[#allocation3 + $0x80] sm:$0xf] %vm7845_vm6, %v14539_v33  ;;  %v7164_v42 = vsel %vm15468_vm5, %v7000_v17, 0  ;;  %v7002_v24 = vor.u32 %v7001_v14, %v6469_v3 }
 0x3a5   : > { %22250 = vst [vmem:[#allocation153_spill] sm:$0xff] %v18106_v6  ;;  %7884 = vst.msk [vmem:[#allocation3 + $0xec] sm:$0xf] %vm7845_vm6, %v14539_v33  ;;  %v7003_v63 = vrot.slane %v6479_v37, 1  ;;  %v6483_v44 = vshrl.u32 %v18060_v50, 16  ;;  %v7394_v55 = vsel %vm7393_vm7, %v18026_v23, %v18024_v51  ;;  %v6486_v26 = vshll.u32 %v18060_v50, 16  ;;  %v5715_v62 = vpop.f32.mrf.mxu0 }
 0x3a6   : > { %7886 = vst.msk [vmem:[#allocation3 + $0xf8] sm:$0xf] %vm7845_vm6, %v14539_v33  ;;  %7904 = vst.msk [vmem:[#allocation3 + $0x164] sm:$0xf] %vm7845_vm6, %v14539_v33  ;;  %7319 = vrot.lane.b32.xlu1 %v7164_v42, %s14671_s29  ;;  %v6481_v17 = vor.u32 %v6479_v37, %v6478_v61  ;;  %v6849_v11 = vsel %vm6848_vm9, %v17998_v12, %v18067_v46  ;;  %v5908_v42 = vpop.f32.mrf.mxu1  ;;  %v6493_v41 = vshll.u32 %v18062_v36, 16  ;;  %v7165_v37 = vsel %vm15468_vm5, %v7002_v24, 0 }
 0x3a7   : > { %7906 = vst.msk [vmem:[#allocation3 + $0x170] sm:$0xf] %vm7845_vm6, %v14539_v33  ;;  %7924 = vst.msk [vmem:[#allocation3 + $0x1dc] sm:$0xf] %vm7845_vm6, %v14539_v33  ;;  %6776 = vrot.lane.b32.xlu0 %v6474_v7, %s14670_s18  ;;  %v7272_v3 = vpop.permute.xlu1 %7271  ;;  %v6485_v14 = vrot.slane %v6483_v44, 7  ;;  %v6913_v4 = vsel %vm15460_vm4, 0, %v6849_v11  ;;  %v6850_v23 = vsel %vm6848_vm9, %v18056_v8, %v6727_v59  ;;  %v7004_v12 = vor.u32 %v7003_v63, %v6476_v18 }
 0x3a8   : > { %7848 = vst.msk [vmem:[#allocation3 + $0x14] sm:$0xf] %vm7845_vm6, %v12762_v27  ;;  %v6490_v27 = vshrl.u32 %v18062_v36, 16  ;;  %v6729_v33 = vpop.permute.xlu0 %6728  ;;  %v7005_v51 = vrot.slane %v6486_v26, 1  ;;  %v22252_v61 = vld [vmem:[#allocation167_spill] sm:$0xff]  ;;  %v22253_v46 = vld [vmem:[#allocation166_spill] sm:$0xff]  ;;  %v18152_v11 = vpack.c.bf16 %v18106_v6, %v18106_v6  ;;  %v6041_v36 = vmul.f32 %v17294_v43, %v5965_v16 }
 0x3a9   : > { %v18144_v50 = vsel %vm7491_vm8, %v22252_v61, %v7394_v55  ;;  %v18148_v13 = vsel %vm7393_vm7, %v6913_v4, %v22253_v46  ;;  %v6914_v18 = vsel %vm15460_vm4, 0, %v6850_v23  ;;  %v6042_v4 = vmul.f32 %v17301_v32, %v5966_v1  ;;  %v5910_v61 = vpop.f32.mrf.mxu1  ;;  %v22255_v23 = vld [vmem:[#allocation169_spill] sm:$0xff] }
 0x3aa   : > { %22254 = vst [vmem:[#allocation116_spill] sm:$0xff] %v18152_v11  ;;  %6778 = vrot.lane.b32.xlu1 %v6481_v17, %s14670_s18  ;;  %v12761_v8 = vcombine.low %v18148_v13, %v18144_v50  ;;  %v6488_v24 = vor.u32 %v6486_v26, %v6485_v14  ;;  %v6492_v63 = vrot.slane %v6490_v27, 7  ;;  %v7006_v55 = vor.u32 %v7005_v51, %v6483_v44  ;;  %v22256_v44 = vld [vmem:[#allocation18_spill] sm:$0xff]  ;;  %v5717_v51 = vpop.f32.mrf.mxu0 }
 0x3ab   : > { %7321 = vrot.lane.b32.xlu0 %v7165_v37, %s14671_s29  ;;  %v7007_v16 = vrot.slane %v6493_v41, 1  ;;  %v6497_v46 = vshrl.u32 %v18071_v52, 16  ;;  %v7395_v17 = vsel %vm7393_vm7, %v18101_v15, %v7272_v3  ;;  %v12764_v37 = vcombine.low %v7272_v3, %v7272_v3 }
 0x3ac   : > { %7847 = vst [vmem:[#allocation3 + $0xc] sm:$0xff] %v12761_v8  ;;  %v7274_v6 = vpop.permute.xlu0 %7273  ;;  %v7166_v29 = vsel %vm15468_vm5, %v7004_v12, 0  ;;  %v18169_v20 = vsel %vm7393_vm7, %v6914_v18, %v22255_v23  ;;  %v6500_v1 = vshll.u32 %v18071_v52, 16  ;;  %v7495_v26 = vsel %vm7491_vm8, %v22256_v44, %v7395_v17 }
 0x3ad   : > { %v6118_v14 = vadd.f32 %v17298_v56, %v6041_v36  ;;  %v12763_v15 = vcombine.low %v18169_v20, %v7495_v26  ;;  %7850 = vst.msk [vmem:[#allocation3 + $0x20] sm:$0xf] %vm7845_vm6, %v12764_v37  ;;  %v5909_v8 = vadd.f32 %v5908_v42, %v5715_v62  ;;  %v5911_v18 = vadd.f32 %v5910_v61, %v5717_v51  ;;  %v22259_v61 = vld [vmem:[#allocation158_spill] sm:$0xff] }
 0x3ae   : > { %7323 = vrot.lane.b32.xlu1 %v7166_v29, %s14671_s29  ;;  %v6504_v23 = vshrl.u32 %v18078_v47, 16  ;;  %v6495_v36 = vor.u32 %v6493_v41, %v6492_v63  ;;  %v7167_v29 = vsel %vm15468_vm5, %v7006_v55, 0  ;;  %v7008_v44 = vor.u32 %v7007_v16, %v6490_v27  ;;  %v22257_v41 = vld [vmem:[#allocation172_spill] sm:$0xff]  ;;  %v22258_v63 = vld [vmem:[#allocation173_spill] sm:$0xff]  ;;  %v22260_v16 = vld [vmem:[#allocation159_spill] sm:$0xff] }
 0x3af   : > { %6780 = vrot.lane.b32.xlu0 %v6488_v24, %s14670_s18  ;;  %v6499_v24 = vrot.slane %v6497_v46, 7  ;;  %7849 = vst [vmem:[#allocation3 + $0x18] sm:$0xff] %v12763_v15  ;;  %v6507_v37 = vshll.u32 %v18078_v47, 16  ;;  %v7009_v54 = vrot.slane %v6500_v1, 1  ;;  %v6181_v42 = vmax.f32 %v18097_v25, 0.0  ;;  %v5912_v25 = vpop.f32.mrf.mxu1 }
 0x3b0   : > { %v5984_v51 = vadd.f32 %v5911_v18, %v22260_v16  ;;  %v6506_v15 = vrot.slane %v6504_v23, 7  ;;  %v18215_v16 = vmax.f32 %v6118_v14, 0.0  ;;  %v6518_v14 = vshrl.u32 %v18094_v58, 16 }
 0x3b2   : > { %v6731_v59 = vpop.permute.xlu1 %6730  ;;  %6782 = vrot.lane.b32.xlu1 %v6495_v36, %s14670_s18  ;;  %v6511_v36 = vshrl.u32 %v18092_v53, 16  ;;  %22261 = vst [vmem:[#allocation146_spill] sm:$0xff] %v18215_v16 }
 0x3b3   : > { %v6851_v3 = vsel %vm6848_vm9, %v6729_v33, %v6731_v59  ;;  %v18189_v59 = vadd.f32 %v17308_v30, %v6042_v4  ;;  %7325 = vrot.lane.b32.xlu0 %v7167_v29, %s14671_s29  ;;  %v6514_v29 = vshll.u32 %v18092_v53, 16 }
 0x3b4   : > { %v6915_v17 = vsel %vm15460_vm4, 0, %v6851_v3  ;;  %v5719_v3 = vpop.f32.mrf.mxu0 }
 0x3b5   : > { %v18195_v27 = vsel %vm7393_vm7, %v6915_v17, %v22257_v41  ;;  %v6502_v17 = vor.u32 %v6500_v1, %v6499_v24  ;;  %v18223_v1 = vmul.f32 %v17294_v43, %v17758_v21  ;;  %v7013_v24 = vrot.slane %v6514_v29, 1 }
 0x3b6   : > { %v7276_v12 = vpop.permute.xlu1 %7275  ;;  %v6733_v52 = vpop.permute.xlu0 %6732 }
 0x3b7   : > { %v7396_v33 = vsel %vm7393_vm7, %v7274_v6, %v7276_v12  ;;  %v12766_v62 = vcombine.low %v7276_v12, %v7276_v12  ;;  %v5983_v6 = vadd.f32 %v5909_v8, %v22259_v61  ;;  %v7168_v12 = vsel %vm15468_vm5, %v7008_v44, 0  ;;  %6784 = vrot.lane.b32.xlu0 %v6502_v17, %s14670_s18 }
 0x3b8   : > { %v18199_v55 = vsel %vm7491_vm8, %v22258_v63, %v7396_v33  ;;  %v7010_v33 = vor.u32 %v7009_v54, %v6497_v46  ;;  %v7011_v8 = vrot.slane %v6507_v37, 1  ;;  %v14575_v63 = vcombine.low %v18148_v13, %v18169_v20  ;;  %7327 = vrot.lane.b32.xlu1 %v7168_v12, %s14671_s29  ;;  %v5914_v13 = vpop.f32.mrf.mxu1 }
 0x3b9   : > { %v12765_v4 = vcombine.low %v18195_v27, %v18199_v55  ;;  %7852 = vst.msk [vmem:[#allocation3 + $0x2c] sm:$0xf] %vm7845_vm6, %v12766_v62  ;;  %v14576_v61 = vcombine.low %v18144_v50, %v7495_v26  ;;  %v18213_v62 = vpack.c.bf16 %v6181_v42, %v6181_v42  ;;  %v5913_v44 = vadd.f32 %v5912_v25, %v5719_v3 }
 0x3ba   : > { %v7278_v41 = vpop.permute.xlu0 %7277  ;;  %v6183_v46 = vmax.f32 %v18189_v59, 0.0  ;;  %v6059_v20 = vmul.f32 %v17294_v43, %v5983_v6  ;;  %v6509_v50 = vor.u32 %v6507_v37, %v6506_v15  ;;  %v6513_v26 = vrot.slane %v6511_v36, 7  ;;  %v5721_v59 = vpop.f32.mrf.mxu0  ;;  %v22262_v37 = vld [vmem:[#allocation160_spill] sm:$0xff] }
 0x3bb   : > { %7851 = vst [vmem:[#allocation3 + $0x24] sm:$0xff] %v12765_v4  ;;  %8556 = vmatprep.mubr.bf16.mxu0 %v14576_v61  ;;  %v7169_v21 = vsel %vm15468_vm5, %v7010_v33, 0  ;;  %v7012_v25 = vor.u32 %v7011_v8, %v6504_v23  ;;  %v6521_v6 = vshll.u32 %v18094_v58, 16  ;;  %v5985_v15 = vadd.f32 %v5913_v44, %v22262_v37  ;;  %v5918_v33 = vpop.f32.mrf.mxu1  ;;  %v22263_v23 = vld [vmem:[#allocation177_spill] sm:$0xff]  ;;  %v22264_v61 = vld [vmem:[#allocation180_spill] sm:$0xff] }
 0x3bc   : > { %v6735_v18 = vpop.permute.xlu1 %6734  ;;  %8557 = vmatmul.mubr.bf16.vlgmr.msra.gmra.mxu0 %v14575_v63  ;;  %6786 = vrot.lane.b32.xlu1 %v6509_v50, %s14670_s18  ;;  %v6525_v3 = vshrl.u32 %v18152_v11, 16  ;;  %v5915_v63 = vadd.f32 %v5914_v13, %v5721_v59  ;;  %v6520_v50 = vrot.slane %v6518_v14, 7  ;;  %v7014_v37 = vor.u32 %v7013_v24, %v6511_v36 }
 0x3bd   : > { %v6852_v54 = vsel %vm6848_vm9, %v6733_v52, %v6735_v18  ;;  %v6060_v52 = vmul.f32 %v17301_v32, %v5984_v51  ;;  %7329 = vrot.lane.b32.xlu0 %v7169_v21, %s14671_s29  ;;  %v6136_v18 = vadd.f32 %v17298_v56, %v6059_v20  ;;  %v7170_v20 = vsel %vm15468_vm5, %v7012_v25, 0 }
 0x3be   : > { %v6916_v42 = vsel %vm15460_vm4, 0, %v6852_v54  ;;  %v6737_v51 = vpop.permute.xlu0 %6736  ;;  %v6516_v54 = vor.u32 %v6514_v29, %v6513_v26  ;;  %v7015_v13 = vrot.slane %v6521_v6, 1  ;;  %v18251_v59 = vpack.c.bf16 %v6183_v46, %v6183_v46 }
 0x3bf   : > { %v7434_v8 = vsel %vm7393_vm7, %v6916_v42, %v22263_v23  ;;  %v6528_v42 = vshll.u32 %v18152_v11, 16  ;;  %v18254_v29 = vadd.f32 %v17308_v30, %v6060_v52  ;;  %v6061_v36 = vmul.f32 %v17294_v43, %v5985_v15 }
 0x3c0   : > { %v7280_v4 = vpop.permute.xlu1 %7279  ;;  %7331 = vrot.lane.b32.xlu1 %v7170_v20, %s14671_s29  ;;  %v6527_v26 = vrot.slane %v6525_v3, 7  ;;  %v6532_v25 = vshrl.u32 %v18213_v62, 16  ;;  %v14577_v46 = vcombine.low %v18195_v27, %v7434_v8  ;;  %v5986_v15 = vadd.f32 %v5915_v63, %v17926_v60 }
 0x3c1   : > { %v7397_v12 = vsel %vm7393_vm7, %v7278_v41, %v7280_v4  ;;  %v12768_v17 = vcombine.low %v7280_v4, %v7280_v4  ;;  %v18246_v41 = vpack.c.bf16 %v18215_v16, %v18215_v16  ;;  %v5725_v4 = vpop.f32.mrf.mxu0  ;;  %6788 = vrot.lane.b32.xlu0 %v6516_v54, %s14670_s18  ;;  %v6523_v20 = vor.u32 %v6521_v6, %v6520_v50 }
 0x3c2   : > { %v7499_v44 = vsel %vm7491_vm8, %v22264_v61, %v7397_v12  ;;  %v7282_v12 = vpop.permute.xlu0 %7281  ;;  %v18263_v61 = vmax.f32 %v6136_v18, 0.0  ;;  %v7171_v54 = vsel %vm15468_vm5, %v7014_v37, 0  ;;  %v7016_v16 = vor.u32 %v7015_v13, %v6518_v14  ;;  %v22266_v37 = vld [vmem:[#allocation185_spill] sm:$0xff] }
 0x3c3   : > { %v12767_v21 = vcombine.low %v7434_v8, %v7499_v44  ;;  %7854 = vst.msk [vmem:[#allocation3 + $0x38] sm:$0xf] %vm7845_vm6, %v12768_v17  ;;  %v5920_v17 = vpop.f32.mrf.mxu1  ;;  %v14578_v52 = vcombine.low %v18199_v55, %v7499_v44  ;;  %v6535_v11 = vshll.u32 %v18213_v62, 16  ;;  %v7017_v58 = vrot.slane %v6528_v42, 1 }
 0x3c4   : > { %v6739_v24 = vpop.permute.xlu1 %6738  ;;  %22265 = vst [vmem:[#allocation133_spill] sm:$0xff] %v18263_v61  ;;  %v6201_v27 = vmax.f32 %v18254_v29, 0.0  ;;  %v6138_v55 = vadd.f32 %v17298_v56, %v6061_v36  ;;  %v5919_v18 = vadd.f32 %v5918_v33, %v5725_v4  ;;  %6790 = vrot.lane.b32.xlu1 %v6523_v20, %s14670_s18  ;;  %v6530_v6 = vor.u32 %v6528_v42, %v6527_v26  ;;  %v22267_v4 = vld [vmem:[#allocation187_spill] sm:$0xff] }
 0x3c5   : > { %7853 = vst [vmem:[#allocation3 + $0x30] sm:$0xff] %v12767_v21  ;;  %v6853_v23 = vsel %vm6848_vm9, %v6737_v51, %v6739_v24  ;;  %v5727_v21 = vpop.f32.mrf.mxu0  ;;  %8564 = vmatprep.mubr.bf16.mxu0 %v14578_v52  ;;  %7333 = vrot.lane.b32.xlu0 %v7171_v54, %s14671_s29  ;;  %v6534_v14 = vrot.slane %v6532_v25, 7  ;;  %v6539_v29 = vshrl.u32 %v18246_v41, 16  ;;  %v6542_v33 = vshll.u32 %v18246_v41, 16  ;;  %v22269_v52 = vld [vmem:[#allocation162_spill] sm:$0xff]  ;;  %v5922_v54 = vpop.f32.mrf.mxu1 }
 0x3c6   : > { %v6917_v51 = vsel %vm15460_vm4, 0, %v6853_v23  ;;  %v5921_v8 = vadd.f32 %v5920_v17, %v5727_v21  ;;  %v6741_v50 = vpop.permute.xlu0 %6740  ;;  %8565 = vmatmul.mubr.bf16.gmra.mxu0 %v14577_v46  ;;  %v7172_v42 = vsel %vm15468_vm5, %v7016_v16, 0  ;;  %v7018_v26 = vor.u32 %v7017_v58, %v6525_v3  ;;  %v22268_v23 = vld [vmem:[#allocation161_spill] sm:$0xff] }
 0x3c7   : > { %v18278_v13 = vsel %vm7393_vm7, %v6917_v51, %v22266_v37  ;;  %v7019_v24 = vrot.slane %v6535_v11, 1  ;;  %v6062_v17 = vmul.f32 %v17301_v32, %v5986_v15  ;;  %v5987_v46 = vadd.f32 %v5919_v18, %v22268_v23 }
 0x3c8   : > { %v7284_v60 = vpop.permute.xlu1 %7283  ;;  %v5988_v20 = vadd.f32 %v5921_v8, %v22269_v52  ;;  %7335 = vrot.lane.b32.xlu1 %v7172_v42, %s14671_s29  ;;  %v18298_v16 = vmul.f32 %v17301_v32, %v17762_v19  ;;  %v18302_v58 = vpack.c.bf16 %v18263_v61, %v18263_v61  ;;  %v18304_v3 = vmax.f32 %v6138_v55, 0.0  ;;  %v5729_v19 = vpop.f32.mrf.mxu0 }
 0x3c9   : > { %v7398_v63 = vsel %vm7393_vm7, %v7282_v12, %v7284_v60  ;;  %v12770_v44 = vcombine.low %v7284_v60, %v7284_v60  ;;  %6792 = vrot.lane.b32.xlu0 %v6530_v6, %s14670_s18  ;;  %v6546_v15 = vshrl.u32 %v18251_v59, 16  ;;  %v6537_v21 = vor.u32 %v6535_v11, %v6534_v14 }
 0x3ca   : > { %v18284_v36 = vsel %vm7491_vm8, %v22267_v4, %v7398_v63  ;;  %22270 = vst [vmem:[#allocation134_spill] sm:$0xff] %v18302_v58  ;;  %22271 = vst [vmem:[#allocation141_spill] sm:$0xff] %v18304_v3  ;;  %v6541_v51 = vrot.slane %v6539_v29, 7  ;;  %v6549_v18 = vshll.u32 %v18251_v59, 16  ;;  %v7021_v8 = vrot.slane %v6542_v33, 1  ;;  %v5731_v52 = vpop.f32.mrf.mxu0 }
 0x3cb   : > { %v12769_v12 = vcombine.low %v18278_v13, %v18284_v36  ;;  %7856 = vst.msk [vmem:[#allocation3 + $0x44] sm:$0xf] %vm7845_vm6, %v12770_v44  ;;  %v18308_v63 = vpack.c.bf16 %v6201_v27, %v6201_v27  ;;  %v7173_v44 = vsel %vm15468_vm5, %v7018_v26, 0  ;;  %v7020_v37 = vor.u32 %v7019_v24, %v6532_v25 }
 0x3cc   : > { %v6743_v60 = vpop.permute.xlu1 %6742  ;;  %v6139_v4 = vadd.f32 %v17308_v30, %v6062_v17  ;;  %v6063_v42 = vmul.f32 %v17294_v43, %v5987_v46  ;;  %v6064_v11 = vmul.f32 %v17301_v32, %v5988_v20  ;;  %6794 = vrot.lane.b32.xlu1 %v6537_v21, %s14670_s18  ;;  %v18320_v27 = vpack.c.bf16 %v18304_v3, %v18304_v3 }
 0x3cd   : > { %7855 = vst [vmem:[#allocation3 + $0x3c] sm:$0xff] %v12769_v12  ;;  %v7286_v6 = vpop.permute.xlu0 %7285  ;;  %v6854_v55 = vsel %vm6848_vm9, %v6741_v50, %v6743_v60  ;;  %7337 = vrot.lane.b32.xlu0 %v7173_v44, %s14671_s29  ;;  %v5923_v14 = vadd.f32 %v5922_v54, %v5729_v19  ;;  %v5924_v12 = vpop.f32.mrf.mxu1  ;;  %v6548_v26 = vrot.slane %v6546_v15, 7  ;;  %v6544_v50 = vor.u32 %v6542_v33, %v6541_v51  ;;  %v22273_v51 = vld [vmem:[#allocation194_spill] sm:$0xff] }
 0x3ce   : > { %v6918_v25 = vsel %vm15460_vm4, 0, %v6854_v55  ;;  %v7022_v24 = vor.u32 %v7021_v8, %v6539_v29  ;;  %v7023_v17 = vrot.slane %v6549_v18, 1  ;;  %v6665_v23 = vshrl.u32 %v18302_v58, 16  ;;  %v22272_v29 = vld [vmem:[#allocation190_spill] sm:$0xff]  ;;  %v22274_v55 = vld [vmem:[#allocation163_spill] sm:$0xff] }
 0x3cf   : > { %v7174_v20 = vsel %vm15468_vm5, %v7020_v37, 0  ;;  %v6668_v21 = vshll.u32 %v18302_v58, 16  ;;  %v6203_v44 = vmax.f32 %v6139_v4, 0.0  ;;  %v5925_v3 = vadd.f32 %v5924_v12, %v5731_v52  ;;  %v14384_v4 = vld [vmem:[%s21739_s5 + $0x88] sm:$0xff]  }
 0x3d0   : > { %v7288_v46 = vpop.permute.xlu1 %7287  ;;  %7339 = vrot.lane.b32.xlu1 %v7174_v20, %s14671_s29  ;;  %v7438_v33 = vsel %vm7393_vm7, %v6918_v25, %v22272_v29  ;;  %v6140_v37 = vadd.f32 %v17298_v56, %v6063_v42  ;;  %v5989_v61 = vadd.f32 %v5923_v14, %v22274_v55  ;;  %v6551_v58 = vor.u32 %v6549_v18, %v6548_v26 }
 0x3d1   : > { %v7399_v60 = vsel %vm7393_vm7, %v7286_v6, %v7288_v46  ;;  %v12772_v54 = vcombine.low %v7288_v46, %v7288_v46  ;;  %v6745_v19 = vpop.permute.xlu0 %6744  ;;  %6796 = vrot.lane.b32.xlu0 %v6544_v50, %s14670_s18  ;;  %v7175_v12 = vsel %vm15468_vm5, %v7022_v24, 0  ;;  %v7024_v50 = vor.u32 %v7023_v17, %v6546_v15  ;;  %13760 = vmatprep.subr.bf16.mxu0 %v14384_v4 }
 0x3d2   : > { %v7503_v8 = vsel %vm7491_vm8, %v22273_v51, %v7399_v60  ;;  %v6667_v25 = vrot.slane %v6665_v23, 7  ;;  %v6672_v46 = vshrl.u32 %v18308_v63, 16  ;;  %v6675_v42 = vshll.u32 %v18308_v63, 16  ;;  %13761 = vmatpush3.bf16.msra.mxu0 %v14384_v4 }
 0x3d3   : > { %v12771_v6 = vcombine.low %v7438_v33, %v7503_v8  ;;  %7858 = vst.msk [vmem:[#allocation3 + $0x50] sm:$0xf] %vm7845_vm6, %v12772_v54  ;;  %v7057_v52 = vrot.slane %v6668_v21, 1  ;;  %v14579_v26 = vcombine.low %v18278_v13, %v7438_v33  ;;  %v14580_v20 = vcombine.low %v18284_v36, %v7503_v8 }
 0x3d4   : > { %v6141_v60 = vadd.f32 %v17308_v30, %v6064_v11  ;;  %v5990_v54 = vadd.f32 %v5925_v3, %v18047_v5  ;;  %6798 = vrot.lane.b32.xlu1 %v6551_v58, %s14670_s18  ;;  %v6120_v24 = vadd.f32 %v17298_v56, %v18223_v1  ;;  %v18354_v17 = vpack.c.bf16 %v6203_v44, %v6203_v44 }
 0x3d5   : > { %7857 = vst [vmem:[#allocation3 + $0x48] sm:$0xff] %v12771_v6  ;;  %v7290_v18 = vpop.permute.xlu0 %7289  ;;  %7341 = vrot.lane.b32.xlu0 %v7175_v12, %s14671_s29  ;;  %v18356_v29 = vmax.f32 %v6140_v37, 0.0  ;;  %v6065_v13 = vmul.f32 %v17294_v43, %v5989_v61  ;;  %8572 = vmatprep.mubr.bf16.mxu0 %v14580_v20  ;;  %v6670_v36 = vor.u32 %v6668_v21, %v6667_v25  ;;  %v6674_v11 = vrot.slane %v6672_v46, 7  ;;  %v22276_v6 = vld [vmem:[#allocation197_spill] sm:$0xff]  ;;  %v22277_v12 = vld [vmem:[#allocation198_spill] sm:$0xff] }
 0x3d6   : > { %v6747_v14 = vpop.permute.xlu1 %6746  ;;  %v6679_v58 = vshrl.u32 %v18320_v27, 16  ;;  %8573 = vmatmul.mubr.bf16.gmra.mxu0 %v14579_v26  ;;  %v7176_v3 = vsel %vm15468_vm5, %v7024_v50, 0  ;;  %v7058_v1 = vor.u32 %v7057_v52, %v6665_v23  ;;  %v6682_v44 = vshll.u32 %v18320_v27, 16 }
 0x3d7   : > { %v6855_v15 = vsel %vm6848_vm9, %v6745_v19, %v6747_v14  ;;  %22275 = vst [vmem:[#allocation127_spill] sm:$0xff] %v18356_v29  ;;  %v7059_v19 = vrot.slane %v6675_v42, 1  ;;  %v6205_v51 = vmax.f32 %v6141_v60, 0.0  ;;  %v6066_v61 = vmul.f32 %v17301_v32, %v5990_v54 }
 0x3d8   : > { %v6919_v5 = vsel %vm15460_vm4, 0, %v6855_v15  ;;  %7343 = vrot.lane.b32.xlu1 %v7176_v3, %s14671_s29  ;;  %v18371_v55 = vpack.c.bf16 %v18356_v29, %v18356_v29  ;;  %v6142_v23 = vadd.f32 %v17298_v56, %v6065_v13  ;;  %v6677_v25 = vor.u32 %v6675_v42, %v6674_v11  ;;  %v22278_v15 = vld [vmem:[#allocation119_spill] sm:$0xff]  ;;  %v22279_v13 = vld [vmem:[#allocation118_spill] sm:$0xff] }
 0x3d9   : > { %6832 = vrot.lane.b32.xlu0 %v6670_v36, %s14670_s18  ;;  %v6749_v37 = vpop.permute.xlu0 %6748  ;;  %v18376_v4 = vsel %vm7393_vm7, %v6919_v5, %v22276_v6  ;;  %v6681_v52 = vrot.slane %v6679_v58, 7  ;;  %v7193_v26 = vsel %vm15468_vm5, %v7058_v1, 0  ;;  %v7060_v20 = vor.u32 %v7059_v19, %v6672_v46  ;;  %v22280_v5 = vld [vmem:[#allocation204_spill] sm:$0xff]  ;;  %v22281_v42 = vld [vmem:[#allocation202_spill] sm:$0xff] }
 0x3da   : > { %v7292_v33 = vpop.permute.xlu1 %7291  ;;  %v6689_v60 = vshll.u32 %v18354_v17, 16  ;;  %v7061_v54 = vrot.slane %v6682_v44, 1  ;;  %v4696_v36 = vadd.f32 %v22279_v13, %v22278_v15  ;;  %v5875_v11 = vadd.f32 %v22281_v42, %v22280_v5 }
 0x3db   : > { %v7400_v21 = vsel %vm7393_vm7, %v7290_v18, %v7292_v33  ;;  %v12774_v8 = vcombine.low %v7292_v33, %v7292_v33  ;;  %v6686_v18 = vshrl.u32 %v18354_v17, 16  ;;  %v6143_v3 = vadd.f32 %v17308_v30, %v6066_v61 }
 0x3dc   : > { %v18380_v50 = vsel %vm7491_vm8, %v22277_v12, %v7400_v21  ;;  %6834 = vrot.lane.b32.xlu1 %v6677_v25, %s14670_s18  ;;  %v6121_v1 = vadd.f32 %v17308_v30, %v18298_v16  ;;  %v18398_v46 = vpack.c.bf16 %v6205_v51, %v6205_v51  ;;  %v18400_v19 = vmax.f32 %v6142_v23, 0.0 }
 0x3dd   : > { %v12773_v14 = vcombine.low %v18376_v4, %v18380_v50  ;;  %7860 = vst.msk [vmem:[#allocation3 + $0x5c] sm:$0xf] %vm7845_vm6, %v12774_v8  ;;  %7377 = vrot.lane.b32.xlu0 %v7193_v26, %s14671_s29  ;;  %v7294_v21 = vpop.permute.xlu0 %7293  ;;  %v6693_v8 = vshrl.u32 %v18371_v55, 16  ;;  %v6684_v6 = vor.u32 %v6682_v44, %v6681_v52  ;;  %v6688_v12 = vrot.slane %v6686_v18, 7 }
 0x3de   : > { %22282 = vst [vmem:[#allocation126_spill] sm:$0xff] %v18400_v19  ;;  %v6751_v33 = vpop.permute.xlu1 %6750  ;;  %v6696_v25 = vshll.u32 %v18371_v55, 16  ;;  %v18405_v15 = vmax.f32 %v6120_v24, 0.0  ;;  %v7062_v16 = vor.u32 %v7061_v54, %v6679_v58  ;;  %v7063_v51 = vrot.slane %v6689_v60, 1 }
 0x3df   : > { %7859 = vst [vmem:[#allocation3 + $0x54] sm:$0xff] %v12773_v14  ;;  %v6856_v61 = vsel %vm6848_vm9, %v6749_v37, %v6751_v33  ;;  %v7194_v14 = vsel %vm15468_vm5, %v7060_v20, 0  ;;  %v6045_v23 = vmul.f32 %v17294_v43, %v17797_v9  ;;  %v5970_v26 = vadd.f32 %v5875_v11, %v17896_v28 }
 0x3e0   : > { %22283 = vst [vmem:[#allocation154_spill] sm:$0xff] %v18405_v15  ;;  %v6207_v13 = vmax.f32 %v6143_v3, 0.0  ;;  %7379 = vrot.lane.b32.xlu1 %v7194_v14, %s14671_s29  ;;  %v6920_v44 = vsel %vm15460_vm4, 0, %v6856_v61  ;;  %v18418_v24 = vpack.c.bf16 %v18400_v19, %v18400_v19  ;;  %v6695_v37 = vrot.slane %v6693_v8, 7  ;;  %v22284_v3 = vld [vmem:[#allocation203_spill] sm:$0xff] }
 0x3e1   : > { %6836 = vrot.lane.b32.xlu0 %v6684_v6, %s14670_s18  ;;  %v6700_v52 = vshrl.u32 %v18398_v46, 16  ;;  %v6703_v9 = vshll.u32 %v18398_v46, 16  ;;  %v6691_v20 = vor.u32 %v6689_v60, %v6688_v12  ;;  %v6753_v5 = vpop.permute.xlu0 %6752  ;;  %v7065_v42 = vrot.slane %v6696_v25, 1  ;;  %v22285_v61 = vld [vmem:[#allocation99_spill] sm:$0xff] }
 0x3e2   : > { %v7296_v58 = vpop.permute.xlu1 %7295  ;;  %v7195_v11 = vsel %vm15468_vm5, %v7062_v16, 0  ;;  %v7442_v33 = vsel %vm7393_vm7, %v6920_v44, %v22284_v3  ;;  %v7064_v6 = vor.u32 %v7063_v51, %v6686_v18  ;;  %v6185_v19 = vmax.f32 %v6121_v1, 0.0 }
 0x3e3   : > { %v7401_v28 = vsel %vm7393_vm7, %v7294_v21, %v7296_v58  ;;  %v12776_v54 = vcombine.low %v7296_v58, %v7296_v58  ;;  %v6122_v29 = vadd.f32 %v17298_v56, %v6045_v23  ;;  %v6046_v60 = vmul.f32 %v17301_v32, %v5970_v26 }
 0x3e4   : > { %v7507_v14 = vsel %vm7491_vm8, %v22285_v61, %v7401_v28  ;;  %6838 = vrot.lane.b32.xlu1 %v6691_v20, %s14670_s18  ;;  %v18434_v12 = vpack.c.bf16 %v6207_v13, %v6207_v13  ;;  %v6698_v16 = vor.u32 %v6696_v25, %v6695_v37  ;;  %v6702_v44 = vrot.slane %v6700_v52, 7  ;;  %v22286_v28 = vld [vmem:[#allocation144_spill] sm:$0xff] }
 0x3e5   : > { %7381 = vrot.lane.b32.xlu0 %v7195_v11, %s14671_s29  ;;  %v12775_v21 = vcombine.low %v7442_v33, %v7507_v14  ;;  %7862 = vst.msk [vmem:[#allocation3 + $0x68] sm:$0xf] %vm7845_vm6, %v12776_v54  ;;  %v7067_v18 = vrot.slane %v6703_v9, 1  ;;  %v7066_v51 = vor.u32 %v7065_v42, %v6693_v8  ;;  %v7298_v1 = vpop.permute.xlu0 %7297  ;;  %v6707_v23 = vshrl.u32 %v18418_v24, 16 }
 0x3e6   : > { %v6755_v58 = vpop.permute.xlu1 %6754  ;;  %v14581_v26 = vcombine.low %v18376_v4, %v7442_v33  ;;  %v14582_v20 = vcombine.low %v18380_v50, %v7507_v14  ;;  %v4889_v11 = vadd.f32 %v22286_v28, %v4696_v36  ;;  %v7196_v54 = vsel %vm15468_vm5, %v7064_v6, 0 }
 0x3e7   : > { %7861 = vst [vmem:[#allocation3 + $0x60] sm:$0xff] %v12775_v21  ;;  %v6857_v13 = vsel %vm6848_vm9, %v6753_v5, %v6755_v58  ;;  %v6710_v25 = vshll.u32 %v18418_v24, 16  ;;  %v18446_v8 = vpack.c.bf16 %v18405_v15, %v18405_v15  ;;  %v18448_v37 = vpack.c.bf16 %v6185_v19, %v6185_v19  ;;  %v22288_v21 = vld [vmem:[#allocation171_spill] sm:$0xff] }
 0x3e8   : > { %v18450_v42 = vmax.f32 %v6122_v29, 0.0  ;;  %v6123_v4 = vadd.f32 %v17308_v30, %v6046_v60  ;;  %7383 = vrot.lane.b32.xlu1 %v7196_v54, %s14671_s29  ;;  %v6047_v50 = vmul.f32 %v17294_v43, %v17818_v40  ;;  %v6048_v36 = vmul.f32 %v17301_v32, %v17823_v35  ;;  %8580 = vmatprep.mubr.bf16.mxu0 %v14582_v20 }
 0x3e9   : > { %6840 = vrot.lane.b32.xlu0 %v6698_v16, %s14670_s18  ;;  %v6705_v5 = vor.u32 %v6703_v9, %v6702_v44  ;;  %v6921_v3 = vsel %vm15460_vm4, 0, %v6857_v13  ;;  %v7197_v29 = vsel %vm15468_vm5, %v7066_v51, 0  ;;  %v7068_v19 = vor.u32 %v7067_v18, %v6700_v52  ;;  %8581 = vmatmul.mubr.bf16.gmra.mxu0 %v14581_v26  ;;  %v6757_v60 = vpop.permute.xlu0 %6756  ;;  %v22289_v52 = vld [vmem:[#allocation101_spill] sm:$0xff]  ;;  %v22290_v18 = vld [vmem:[#allocation115_spill] sm:$0xff] }
 0x3ea   : > { %22287 = vst [vmem:[#allocation179_spill] sm:$0xff] %v18450_v42  ;;  %v6709_v33 = vrot.slane %v6707_v23, 7  ;;  %v7300_v6 = vpop.permute.xlu1 %7299  ;;  %v6714_v61 = vshrl.u32 %v18434_v12, 16  ;;  %v6717_v35 = vshll.u32 %v18434_v12, 16  ;;  %v7069_v9 = vrot.slane %v6710_v25, 1 }
 0x3eb   : > { %v7402_v14 = vsel %vm7393_vm7, %v7298_v1, %v7300_v6  ;;  %v12778_v40 = vcombine.low %v7300_v6, %v7300_v6  ;;  %v5885_v16 = vadd.f32 %v22288_v21, %v17780_v49  ;;  %v18472_v44 = vsel %vm7393_vm7, %v6921_v3, %v22289_v52  ;;  %v22292_v3 = vld [vmem:[#allocation120_spill] sm:$0xff] }
 0x3ec   : > { %6842 = vrot.lane.b32.xlu1 %v6705_v5, %s14670_s18  ;;  %v18476_v51 = vsel %vm7491_vm8, %v22290_v18, %v7402_v14  ;;  %v18480_v58 = vpack.c.bf16 %v18450_v42, %v18450_v42  ;;  %v6187_v1 = vmax.f32 %v6123_v4, 0.0  ;;  %v21814_v26 = vshrl.u32 %v18446_v8, 16  ;;  %v22291_v5 = vld [vmem:[#allocation121_spill] sm:$0xff] }
 0x3ed   : > { %7385 = vrot.lane.b32.xlu0 %v7197_v29, %s14671_s29  ;;  %v12777_v49 = vcombine.low %v18472_v44, %v18476_v51  ;;  %7868 = vst.msk [vmem:[#allocation3 + $0x8c] sm:$0xf] %vm7845_vm6, %v12778_v40  ;;  %v6124_v20 = vadd.f32 %v17298_v56, %v6047_v50  ;;  %v18488_v28 = vadd.f32 %v17308_v30, %v6048_v36  ;;  %v6716_v13 = vrot.slane %v6714_v61, 7 }
 0x3ee   : > { %v6712_v54 = vor.u32 %v6710_v25, %v6709_v33  ;;  %v4706_v29 = vadd.f32 %v22292_v3, %v22291_v5  ;;  %v7198_v4 = vsel %vm15468_vm5, %v7068_v19, 0  ;;  %v7070_v6 = vor.u32 %v7069_v9, %v6707_v23  ;;  %v6759_v50 = vpop.permute.xlu1 %6758  ;;  %v7302_v25 = vpop.permute.xlu0 %7301  ;;  %v22293_v33 = vld [vmem:[#allocation148_spill] sm:$0xff] }
 0x3ef   : > { %7867 = vst [vmem:[#allocation3 + $0x84] sm:$0xff] %v12777_v49  ;;  %v7071_v14 = vrot.slane %v6717_v35, 1  ;;  %v6049_v40 = vmul.f32 %v17294_v43, %v17848_v0  ;;  %v5974_v21 = vadd.f32 %v5885_v16, %v4889_v11  ;;  %v21813_v36 = vshrl.u32 %v18448_v37, 16 }
 0x3f0   : > { %7387 = vrot.lane.b32.xlu1 %v7198_v4, %s14671_s29  ;;  %v18500_v52 = vadd.f32 %v22293_v33, %v4706_v29  ;;  %v18502_v18 = vpack.c.bf16 %v6187_v1, %v6187_v1  ;;  %v6858_v23 = vsel %vm6848_vm9, %v6757_v60, %v6759_v50  ;;  %v6555_v19 = vrot.slane %v21814_v26, 7 }
 0x3f1   : > { %6844 = vrot.lane.b32.xlu0 %v6712_v54, %s14670_s18  ;;  %v18507_v0 = vmax.f32 %v6124_v20, 0.0  ;;  %v6189_v11 = vmax.f32 %v18488_v28, 0.0  ;;  %v6719_v9 = vor.u32 %v6717_v35, %v6716_v13  ;;  %v6567_v16 = vshrl.u32 %v18480_v58, 16 }
 0x3f2   : > { %v7199_v49 = vsel %vm15468_vm5, %v7070_v6, 0  ;;  %v6922_v54 = vsel %vm15460_vm4, 0, %v6858_v23  ;;  %v7072_v1 = vor.u32 %v7071_v14, %v6714_v61  ;;  %v6556_v5 = vshll.u32 %v18446_v8, 16  ;;  %v7304_v35 = vpop.permute.xlu1 %7303  ;;  %v14385_v14 = vld [vmem:[%s21739_s5 + $0x118] sm:$0xff]  }
 0x3f3   : > { %22294 = vst [vmem:[#allocation181_spill] sm:$0xff] %v18507_v0  ;;  %v6126_v60 = vadd.f32 %v17298_v56, %v6049_v40  ;;  %v6050_v3 = vmul.f32 %v17301_v32, %v5974_v21  ;;  %v6562_v20 = vrot.slane %v21813_v36, 7  ;;  %v6563_v28 = vshll.u32 %v18448_v37, 16  ;;  %v6761_v4 = vpop.permute.xlu0 %6760  ;;  %13724 = vmatprep.subr.bf16.mxu1 %v14385_v14 }
 0x3f4   : > { %6846 = vrot.lane.b32.xlu1 %v6719_v9, %s14670_s18  ;;  %v6558_v13 = vor.u32 %v6556_v5, %v6555_v19  ;;  %v7403_v29 = vsel %vm7393_vm7, %v7302_v25, %v7304_v35  ;;  %v12780_v61 = vcombine.low %v7304_v35, %v7304_v35  ;;  %v6570_v6 = vshll.u32 %v18480_v58, 16 }
 0x3f5   : > { %7389 = vrot.lane.b32.xlu0 %v7199_v49, %s14671_s29  ;;  %v7446_v40 = vsel %vm7393_vm7, %v6922_v54, %v17802_v48  ;;  %v7511_v21 = vsel %vm7491_vm8, %v17826_v57, %v7403_v29  ;;  %v6569_v50 = vrot.slane %v6567_v16, 7  ;;  %v6574_v33 = vshrl.u32 %v18502_v18, 16  ;;  %v22296_v54 = vld [vmem:[#allocation104_spill] sm:$0xff] }
 0x3f6   : > { %v18535_v25 = vpack.c.bf16 %v18507_v0, %v18507_v0  ;;  %v7200_v23 = vsel %vm15468_vm5, %v7072_v1, 0  ;;  %v12779_v19 = vcombine.low %v7446_v40, %v7511_v21  ;;  %7870 = vst.msk [vmem:[#allocation3 + $0x98] sm:$0xf] %vm7845_vm6, %v12780_v61  ;;  %v7025_v9 = vrot.slane %v6556_v5, 1 }
 0x3f7   : > { %v18540_v49 = vmax.f32 %v6126_v60, 0.0  ;;  %v6127_v48 = vadd.f32 %v17308_v30, %v6050_v3  ;;  %v6051_v57 = vmul.f32 %v17294_v43, %v17871_v10  ;;  %v5895_v35 = vadd.f32 %v22296_v54, %v17873_v2  ;;  %v6763_v1 = vpop.permute.xlu1 %6762  ;;  %v7306_v29 = vpop.permute.xlu0 %7305  ;;  %v22297_v54 = vld [vmem:[#allocation124_spill] sm:$0xff] }
 0x3f8   : > { %7391 = vrot.lane.b32.xlu1 %v7200_v23, %s14671_s29  ;;  %7869 = vst [vmem:[#allocation3 + $0x90] sm:$0xff] %v12779_v19  ;;  %v7027_v61 = vrot.slane %v6563_v28, 1  ;;  %v7029_v5 = vrot.slane %v6570_v6, 1  ;;  %v14583_v60 = vcombine.low %v18472_v44, %v7446_v40  ;;  %v14584_v14 = vcombine.low %v18476_v51, %v7511_v21  ;;  %v22298_v23 = vld [vmem:[#allocation123_spill] sm:$0xff] }
 0x3f9   : > { %22295 = vst [vmem:[#allocation155_spill] sm:$0xff] %v18540_v49  ;;  %6800 = vrot.lane.b32.xlu0 %v6558_v13, %s14670_s18  ;;  %v6565_v3 = vor.u32 %v6563_v28, %v6562_v20  ;;  %v6572_v36 = vor.u32 %v6570_v6, %v6569_v50  ;;  %v6859_v10 = vsel %vm6848_vm9, %v6761_v4, %v6763_v1  ;;  %v6576_v2 = vrot.slane %v6574_v33, 7  ;;  %v22300_v20 = vld [vmem:[#allocation109_spill] sm:$0xff] }
 0x3fa   : > { %v4716_v26 = vadd.f32 %v22298_v23, %v22297_v54  ;;  %v18556_v13 = vpack.c.bf16 %v6189_v11, %v6189_v11  ;;  %v6577_v19 = vshll.u32 %v18502_v18, 16  ;;  %v22299_v0 = vshrl.u32 %v18446_v8, 16  ;;  %8588 = vmatprep.mubr.bf16.mxu0 %v14584_v14  ;;  %v22302_v14 = vld [vmem:[#allocation105_spill] sm:$0xff] }
 0x3fb   : > { %v6191_v44 = vmax.f32 %v6127_v48, 0.0  ;;  %v6128_v51 = vadd.f32 %v17298_v56, %v6051_v57  ;;  %v6052_v28 = vmul.f32 %v17301_v32, %v22300_v20  ;;  %v6923_v11 = vsel %vm15460_vm4, 0, %v6859_v10  ;;  %v7308_v6 = vpop.permute.xlu1 %7307  ;;  %8589 = vmatmul.mubr.bf16.gmra.mxu0 %v14583_v60 }
 0x3fc   : > { %v7026_v42 = vor.u32 %v7025_v9, %v22299_v0  ;;  %6802 = vrot.lane.b32.xlu1 %v6565_v3, %s14670_s18  ;;  %v18570_v4 = vpack.c.bf16 %v18540_v49, %v18540_v49  ;;  %v5978_v0 = vadd.f32 %v5895_v35, %v18500_v52  ;;  %v22301_v40 = vshrl.u32 %v18448_v37, 16  ;;  %v22303_v35 = vld [vmem:[#allocation108_spill] sm:$0xff] }
 0x3fd   : > { %6804 = vrot.lane.b32.xlu0 %v6572_v36, %s14670_s18  ;;  %v7030_v50 = vor.u32 %v7029_v5, %v6567_v16  ;;  %v6579_v9 = vor.u32 %v6577_v19, %v6576_v2  ;;  %v7404_v48 = vsel %vm7393_vm7, %v7306_v29, %v7308_v6  ;;  %v12782_v57 = vcombine.low %v7308_v6, %v7308_v6  ;;  %v6765_v36 = vpop.permute.xlu0 %6764  ;;  %v22305_v5 = vld [vmem:[#allocation152_spill] sm:$0xff] }
 0x3fe   : > { %v7028_v21 = vor.u32 %v7027_v61, %v22301_v40  ;;  %v6581_v1 = vshrl.u32 %v18535_v25, 16  ;;  %v18579_v3 = vsel %vm7393_vm7, %v6923_v11, %v22302_v14  ;;  %v7177_v52 = vsel %vm15468_vm5, %v7026_v42, 0  ;;  %v22306_v42 = vld [vmem:[#allocation131_spill] sm:$0xff] }
 0x3ff   : > { %v18585_v10 = vsel %vm7491_vm8, %v22303_v35, %v7404_v48  ;;  %v7031_v16 = vrot.slane %v6577_v19, 1  ;;  %v18587_v61 = vmax.f32 %v6128_v51, 0.0  ;;  %7872 = vst.msk [vmem:[#allocation3 + $0xa4] sm:$0xf] %vm7845_vm6, %v12782_v57  ;;  %v4909_v60 = vadd.f32 %v22305_v5, %v4716_v26 }
 0x400   : > { %6806 = vrot.lane.b32.xlu1 %v6579_v9, %s14670_s18  ;;  %v12781_v29 = vcombine.low %v18579_v3, %v18585_v10  ;;  %v18595_v2 = vpack.c.bf16 %v6191_v44, %v6191_v44  ;;  %v6053_v54 = vmul.f32 %v17294_v43, %v22306_v42  ;;  %v6588_v23 = vshrl.u32 %v18556_v13, 16 }
 0x401   : > { %22304 = vst [vmem:[#allocation122_spill] sm:$0xff] %v18587_v61  ;;  %7345 = vrot.lane.b32.xlu0 %v7177_v52, %s14671_s29  ;;  %v6129_v19 = vadd.f32 %v17308_v30, %v6052_v28  ;;  %v6054_v51 = vmul.f32 %v17301_v32, %v5978_v0  ;;  %v6583_v20 = vrot.slane %v6581_v1, 7  ;;  %v6595_v11 = vshrl.u32 %v18570_v4, 16  ;;  %v6767_v44 = vpop.permute.xlu1 %6766  ;;  %v7310_v40 = vpop.permute.xlu0 %7309 }
 0x402   : > { %7871 = vst [vmem:[#allocation3 + $0x9c] sm:$0xff] %v12781_v29  ;;  %v7178_v6 = vsel %vm15468_vm5, %v7028_v21, 0  ;;  %v7179_v26 = vsel %vm15468_vm5, %v7030_v50, 0  ;;  %v7032_v9 = vor.u32 %v7031_v16, %v6574_v33  ;;  %v6584_v48 = vshll.u32 %v18535_v25, 16 }
 0x403   : > { %v18612_v28 = vpack.c.bf16 %v18587_v61, %v18587_v61  ;;  %v5905_v0 = vadd.f32 %v18109_v45, %v18123_v31  ;;  %v6860_v21 = vsel %vm6848_vm9, %v6765_v36, %v6767_v44  ;;  %v6130_v50 = vadd.f32 %v17298_v56, %v6053_v54 }
 0x404   : > { %7347 = vrot.lane.b32.xlu1 %v7178_v6, %s14671_s29  ;;  %v6590_v33 = vrot.slane %v6588_v23, 7  ;;  %v6591_v57 = vshll.u32 %v18556_v13, 16  ;;  %v6598_v14 = vshll.u32 %v18570_v4, 16  ;;  %v6924_v52 = vsel %vm15460_vm4, 0, %v6860_v21 }
 0x405   : > { %7349 = vrot.lane.b32.xlu0 %v7179_v26, %s14671_s29  ;;  %v6586_v35 = vor.u32 %v6584_v48, %v6583_v20  ;;  %v6597_v45 = vrot.slane %v6595_v11, 7  ;;  %v6602_v31 = vshrl.u32 %v18595_v2, 16  ;;  %v6131_v36 = vadd.f32 %v17308_v30, %v6054_v51  ;;  %v7312_v5 = vpop.permute.xlu1 %7311 }
 0x406   : > { %v6056_v16 = vmul.f32 %v17301_v32, %v17931_v38  ;;  %v7180_v29 = vsel %vm15468_vm5, %v7032_v9, 0  ;;  %v7033_v42 = vrot.slane %v6584_v48, 1  ;;  %v6193_v54 = vmax.f32 %v6129_v19, 0.0  ;;  %v6769_v44 = vpop.permute.xlu0 %6768 }
 0x407   : > { %v5982_v6 = vadd.f32 %v5905_v0, %v4909_v60  ;;  %v7405_v20 = vsel %vm7393_vm7, %v7310_v40, %v7312_v5  ;;  %v12784_v26 = vcombine.low %v7312_v5, %v7312_v5  ;;  %v18637_v21 = vmax.f32 %v6130_v50, 0.0 }
 0x408   : > { %7351 = vrot.lane.b32.xlu1 %v7180_v29, %s14671_s29  ;;  %v7450_v38 = vsel %vm7393_vm7, %v6924_v52, %v17909_v22  ;;  %v7515_v51 = vsel %vm7491_vm8, %v17934_v34, %v7405_v20  ;;  %v6605_v9 = vshll.u32 %v18595_v2, 16  ;;  %v6593_v60 = vor.u32 %v6591_v57, %v6590_v33  ;;  %v14392_v22 = vld [vmem:[%s21739_s5 + $0x80] sm:$0xff]  }
 0x409   : > { %6808 = vrot.lane.b32.xlu0 %v6586_v35, %s14670_s18  ;;  %22307 = vst [vmem:[#allocation156_spill] sm:$0xff] %v18637_v21  ;;  %v12783_v19 = vcombine.low %v7450_v38, %v7515_v51  ;;  %7874 = vst.msk [vmem:[#allocation3 + $0xb0] sm:$0xf] %vm7845_vm6, %v12784_v26  ;;  %v6600_v48 = vor.u32 %v6598_v14, %v6597_v45  ;;  %v6604_v40 = vrot.slane %v6602_v31, 7  ;;  %v7035_v35 = vrot.slane %v6591_v57, 1  ;;  %v22308_v26 = vld [vmem:[#allocation103_spill] sm:$0xff] }
 0x40a   : > { %v18648_v0 = vadd.f32 %v17308_v30, %v6056_v16  ;;  %v7034_v50 = vor.u32 %v7033_v42, %v6581_v1  ;;  %v7037_v29 = vrot.slane %v6598_v14, 1  ;;  %v6195_v34 = vmax.f32 %v6131_v36, 0.0  ;;  %v6771_v33 = vpop.permute.xlu1 %6770  ;;  %v7314_v45 = vpop.permute.xlu0 %7313  ;;  %13762 = vmatprep.subr.bf16.mxu0 %v14392_v22 }
 0x40b   : > { %v6058_v52 = vmul.f32 %v17301_v32, %v5982_v6  ;;  %7873 = vst [vmem:[#allocation3 + $0xa8] sm:$0xff] %v12783_v19  ;;  %v14585_v16 = vcombine.low %v18579_v3, %v7450_v38  ;;  %v14586_v1 = vcombine.low %v18585_v10, %v7515_v51  ;;  %v18658_v57 = vpack.c.bf16 %v6193_v54, %v6193_v54 }
 0x40c   : > { %6810 = vrot.lane.b32.xlu1 %v6593_v60, %s14670_s18  ;;  %v6861_v14 = vsel %vm6848_vm9, %v6769_v44, %v6771_v33  ;;  %v18663_v36 = vpack.c.bf16 %v18637_v21, %v18637_v21  ;;  %v6607_v32 = vor.u32 %v6605_v9, %v6604_v40  ;;  %v7039_v5 = vrot.slane %v6605_v9, 1  ;;  %13763 = vmatpush3.bf16.msra.mxu0 %v14392_v22  ;;  %v22309_v40 = vld [vmem:[#allocation111_spill] sm:$0xff] }
 0x40d   : > { %6812 = vrot.lane.b32.xlu0 %v6600_v48, %s14670_s18  ;;  %v6609_v42 = vshrl.u32 %v18612_v28, 16  ;;  %8596 = vmatprep.mubr.bf16.mxu0 %v14586_v1  ;;  %v6925_v3 = vsel %vm15460_vm4, 0, %v6861_v14  ;;  %v7181_v10 = vsel %vm15468_vm5, %v7034_v50, 0  ;;  %v7036_v54 = vor.u32 %v7035_v35, %v6588_v23  ;;  %v22323_v21 = vld [vmem:[#allocation7_spill] sm:$0xff] }
 0x40e   : > { %v7038_v6 = vor.u32 %v7037_v29, %v6595_v11  ;;  %8597 = vmatmul.mubr.bf16.gmra.mxu0 %v14585_v16  ;;  %v18674_v20 = vpack.c.bf16 %v6195_v34, %v6195_v34  ;;  %v6055_v44 = vmul.f32 %v17294_v43, %v22308_v26  ;;  %v6197_v38 = vmax.f32 %v18648_v0, 0.0  ;;  %v7316_v9 = vpop.permute.xlu1 %7315  ;;  %v22310_v0 = vld [vmem:[#allocation117_spill] sm:$0xff]  ;;  %v22311_v16 = vld [vmem:[#allocation112_spill] sm:$0xff] }
 0x40f   : > { %v6135_v51 = vadd.f32 %v17308_v30, %v6058_v52  ;;  %v7406_v23 = vsel %vm7393_vm7, %v7314_v45, %v7316_v9  ;;  %v12786_v19 = vcombine.low %v7316_v9, %v7316_v9  ;;  %v6773_v60 = vpop.permute.xlu0 %6772  ;;  %v6612_v11 = vshll.u32 %v18612_v28, 16 }
 0x410   : > { %6814 = vrot.lane.b32.xlu1 %v6607_v32, %s14670_s18  ;;  %v6616_v48 = vshrl.u32 %v18658_v57, 16  ;;  %v18687_v50 = vsel %vm7393_vm7, %v6925_v3, %v22309_v40  ;;  %v18691_v30 = vsel %vm7491_vm8, %v22310_v0, %v7406_v23  ;;  %v6611_v35 = vrot.slane %v6609_v42, 7 }
 0x411   : > { %7353 = vrot.lane.b32.xlu0 %v7181_v10, %s14671_s29  ;;  %v6623_v29 = vshrl.u32 %v18663_v36, 16  ;;  %v12785_v22 = vcombine.low %v18687_v50, %v18691_v30  ;;  %7876 = vst.msk [vmem:[#allocation3 + $0xbc] sm:$0xf] %vm7845_vm6, %v12786_v19  ;;  %v7182_v34 = vsel %vm15468_vm5, %v7036_v54, 0  ;;  %v7183_v52 = vsel %vm15468_vm5, %v7038_v6, 0 }
 0x412   : > { %v7040_v33 = vor.u32 %v7039_v5, %v6602_v31  ;;  %v6132_v45 = vadd.f32 %v17298_v56, %v6055_v44  ;;  %v6057_v1 = vmul.f32 %v17294_v43, %v22311_v16  ;;  %v6199_v14 = vmax.f32 %v6135_v51, 0.0 }
 0x413   : > { %7875 = vst [vmem:[#allocation3 + $0xb4] sm:$0xff] %v12785_v22  ;;  %v6618_v32 = vrot.slane %v6616_v48, 7  ;;  %v6619_v3 = vshll.u32 %v18658_v57, 16  ;;  %v6630_v10 = vshrl.u32 %v18674_v20, 16  ;;  %v6614_v26 = vor.u32 %v6612_v11, %v6611_v35 }
 0x414   : > { %7355 = vrot.lane.b32.xlu1 %v7182_v34, %s14671_s29  ;;  %v6775_v54 = vpop.permute.xlu1 %6774  ;;  %v6625_v31 = vrot.slane %v6623_v29, 7  ;;  %v6626_v5 = vshll.u32 %v18663_v36, 16  ;;  %v7041_v44 = vrot.slane %v6612_v11, 1  ;;  %v18711_v9 = vpack.c.bf16 %v6197_v38, %v6197_v38 }
 0x415   : > { %7357 = vrot.lane.b32.xlu0 %v7183_v52, %s14671_s29  ;;  %v7318_v6 = vpop.permute.xlu0 %7317  ;;  %v6862_v43 = vsel %vm6848_vm9, %v6773_v60, %v6775_v54  ;;  %v7184_v51 = vsel %vm15468_vm5, %v7040_v33, 0  ;;  %v18716_v23 = vmax.f32 %v6132_v45, 0.0  ;;  %v6134_v19 = vadd.f32 %v17298_v56, %v6057_v1  ;;  %v22313_v54 = vld [vmem:[#allocation149_spill] sm:$0xff] }
 0x416   : > { %v18719_v40 = vpack.c.bf16 %v6199_v14, %v6199_v14  ;;  %v6926_v11 = vsel %vm15460_vm4, 0, %v6862_v43  ;;  %v6621_v38 = vor.u32 %v6619_v3, %v6618_v32  ;;  %v6632_v0 = vrot.slane %v6630_v10, 7 }
 0x417   : > { %22312 = vst [vmem:[#allocation106_spill] sm:$0xff] %v18716_v23  ;;  %v6633_v60 = vshll.u32 %v18674_v20, 16  ;;  %v6628_v34 = vor.u32 %v6626_v5, %v6625_v31  ;;  %v7042_v52 = vor.u32 %v7041_v44, %v6609_v42  ;;  %v7043_v33 = vrot.slane %v6619_v3, 1 }
 0x418   : > { %7359 = vrot.lane.b32.xlu1 %v7184_v51, %s14671_s29  ;;  %v7320_v35 = vpop.permute.xlu1 %7319  ;;  %v7045_v45 = vrot.slane %v6626_v5, 1  ;;  %v6647_v1 = vshll.u32 %v18711_v9, 16  ;;  %v18730_v14 = vpack.c.bf16 %v18716_v23, %v18716_v23  ;;  %v7454_v32 = vsel %vm7393_vm7, %v6926_v11, %v22313_v54 }
 0x419   : > { %6816 = vrot.lane.b32.xlu0 %v6614_v26, %s14670_s18  ;;  %v6777_v22 = vpop.permute.xlu0 %6776  ;;  %v7407_v56 = vsel %vm7393_vm7, %v7318_v6, %v7320_v35  ;;  %v12788_v16 = vcombine.low %v7320_v35, %v7320_v35  ;;  %v22314_v26 = vld [vmem:[#allocation107_spill] sm:$0xff]  ;;  %v18738_v42 = vmax.f32 %v6134_v19, 0.0  ;;  %v6635_v6 = vor.u32 %v6633_v60, %v6632_v0 }
 0x41a   : > { %v7519_v43 = vsel %vm7491_vm8, %v22314_v26, %v7407_v56  ;;  %v7047_v31 = vrot.slane %v6633_v60, 1  ;;  %v7185_v51 = vsel %vm15468_vm5, %v7042_v52, 0  ;;  %v7044_v11 = vor.u32 %v7043_v33, %v6616_v48 }
 0x41b   : > { %22315 = vst [vmem:[#allocation135_spill] sm:$0xff] %v18738_v42  ;;  %v12787_v3 = vcombine.low %v7454_v32, %v7519_v43  ;;  %7878 = vst.msk [vmem:[#allocation3 + $0xc8] sm:$0xf] %vm7845_vm6, %v12788_v16  ;;  %v7046_v35 = vor.u32 %v7045_v45, %v6623_v29  ;;  %v21817_v56 = vshll.u32 %v18719_v40, 16  ;;  %v7051_v19 = vrot.slane %v6647_v1, 1 }
 0x41c   : > { %6818 = vrot.lane.b32.xlu1 %v6621_v38, %s14670_s18  ;;  %v6779_v5 = vpop.permute.xlu1 %6778  ;;  %v14588_v0 = vcombine.low %v18691_v30, %v7519_v43  ;;  %v18753_v48 = vpack.c.bf16 %v18738_v42, %v18738_v42  ;;  %v6644_v60 = vshrl.u32 %v18711_v9, 16  ;;  %v7048_v33 = vor.u32 %v7047_v31, %v6630_v10  ;;  %v22316_v43 = vld [vmem:[#allocation113_spill] sm:$0xff]  ;;  %v22321_v42 = vld [vmem:[#allocation10_spill] sm:$0xff] }
 0x41d   : > { %6820 = vrot.lane.b32.xlu0 %v6628_v34, %s14670_s18  ;;  %v7322_v44 = vpop.permute.xlu0 %7321  ;;  %7877 = vst [vmem:[#allocation3 + $0xc0] sm:$0xff] %v12787_v3  ;;  %v6863_v38 = vsel %vm6848_vm9, %v6777_v22, %v6779_v5  ;;  %v14587_v34 = vcombine.low %v18687_v50, %v7454_v32  ;;  %v7186_v50 = vsel %vm15468_vm5, %v7044_v11, 0  ;;  %v7187_v30 = vsel %vm15468_vm5, %v7046_v35, 0 }
 0x41e   : > { %v6927_v29 = vsel %vm15460_vm4, 0, %v6863_v38  ;;  %8604 = vmatprep.mubr.bf16.mxu0 %v14588_v0  ;;  %v6637_v45 = vshrl.u32 %v18730_v14, 16  ;;  %v7052_v32 = vor.u32 %v7051_v19, %v6644_v60  ;;  %v7055_v26 = vrot.slane %v21817_v56, 1 }
 0x41f   : > { %8605 = vmatmul.mubr.bf16.gmra.mxu0 %v14587_v34  ;;  %v7456_v3 = vsel %vm7393_vm7, %v6927_v29, %v22316_v43  ;;  %v6658_v31 = vshrl.u32 %v18719_v40, 16  ;;  %v7188_v11 = vsel %vm15468_vm5, %v7048_v33, 0  ;;  %v6651_v38 = vshrl.u32 %v18753_v48, 16 }
 0x420   : > { %6822 = vrot.lane.b32.xlu1 %v6635_v6, %s14670_s18  ;;  %v7324_v22 = vpop.permute.xlu1 %7323  ;;  %v22317_v6 = vld [vmem:[#allocation175_spill] sm:$0xff]  ;;  %v6639_v35 = vrot.slane %v6637_v45, 7  ;;  %v7190_v34 = vsel %vm15468_vm5, %v7052_v32, 0  ;;  %v6640_v29 = vshll.u32 %v18730_v14, 16  ;;  %v18806_v23 = vsub.s32 2, %v22321_v42 }
 0x421   : > { %7361 = vrot.lane.b32.xlu0 %v7185_v51, %s14671_s29  ;;  %v6781_v52 = vpop.permute.xlu0 %6780  ;;  %v7408_v16 = vsel %vm7393_vm7, %v7322_v44, %v7324_v22  ;;  %v12790_v54 = vcombine.low %v7324_v22, %v7324_v22  ;;  %v7056_v0 = vor.u32 %v7055_v26, %v6658_v31  ;;  %vm11393_vm10 = vcmp.lt.s32.totalorder %v22321_v42, 1 }
 0x422   : > { %v7521_v5 = vsel %vm7491_vm8, %v22317_v6, %v7408_v16  ;;  %v6642_v33 = vor.u32 %v6640_v29, %v6639_v35  ;;  %v6646_v16 = vrot.slane %v6644_v60, 7  ;;  %v7049_v6 = vrot.slane %v6640_v29, 1  ;;  %v14540_v60 = vld [vmem:[%s21736_s2] ss:$2 sm:$0x7] }
 0x423   : > { %v12789_v10 = vcombine.low %v7456_v3, %v7521_v5  ;;  %7880 = vst.msk [vmem:[#allocation3 + $0xd4] sm:$0xf] %vm7845_vm6, %v12790_v54  ;;  %v6653_v54 = vrot.slane %v6651_v38, 7  ;;  %v7192_v26 = vsel %vm15468_vm5, %v7056_v0, 0 }
 0x424   : > { %7363 = vrot.lane.b32.xlu1 %v7186_v50, %s14671_s29  ;;  %v6783_v44 = vpop.permute.xlu1 %6782 }
 0x425   : > { %7365 = vrot.lane.b32.xlu0 %v7187_v30, %s14671_s29  ;;  %v7326_v51 = vpop.permute.xlu0 %7325  ;;  %7879 = vst [vmem:[#allocation3 + $0xcc] sm:$0xff] %v12789_v10  ;;  %v6864_v19 = vsel %vm6848_vm9, %v6781_v52, %v6783_v44  ;;  %v6654_v52 = vshll.u32 %v18753_v48, 16  ;;  %v22318_v10 = vld [vmem:[#allocation102_spill] sm:$0xff] }
 0x426   : > { %v6928_v22 = vsel %vm15460_vm4, 0, %v6864_v19 }
 0x427   : > { %v7458_v44 = vsel %vm7393_vm7, %v6928_v22, %v22318_v10  ;;  %v6649_v22 = vor.u32 %v6647_v1, %v6646_v16  ;;  %v7050_v10 = vor.u32 %v7049_v6, %v6637_v45  ;;  %v14541_v45 = vld [vmem:[%s21736_s2 + $0x1] ss:$2 sm:$0x7] }
 0x428   : > { %7367 = vrot.lane.b32.xlu1 %v7188_v11, %s14671_s29  ;;  %v22319_v11 = vld [vmem:[#allocation176_spill] sm:$0xff] }
 0x429   : > { %7371 = vrot.lane.b32.xlu0 %v7190_v34, %s14671_s29  ;;  %v6785_v30 = vpop.permute.xlu0 %6784 }
 0x42a   : > { %v7328_v50 = vpop.permute.xlu1 %7327 }
 0x42b   : > { %v7409_v43 = vsel %vm7393_vm7, %v7326_v51, %v7328_v50  ;;  %v12792_v32 = vcombine.low %v7328_v50, %v7328_v50  ;;  %v22320_v51 = vld [vmem:[#allocation164_spill] sm:$0xff]  ;;  %v6656_v50 = vor.u32 %v6654_v52, %v6653_v54  ;;  %v22325_v54 = vshll.u32 %v18719_v40, 16 }
 0x42c   : > { %v7523_v19 = vsel %vm7491_vm8, %v22319_v11, %v7409_v43  ;;  %7375 = vrot.lane.b32.xlu1 %v7192_v26, %s14671_s29  ;;  %v18799_v35 = vrot.slane %v14540_v60, %v22320_v51  ;;  %v6660_v43 = vrot.slane %v6658_v31, 7  ;;  %v7053_v26 = vrot.slane %v6654_v52, 1  ;;  %v22324_v31 = vld [vmem:[#allocation13_spill] sm:$0xff] }
 0x42d   : > { %6824 = vrot.lane.b32.xlu0 %v6642_v33, %s14670_s18  ;;  %v12791_v34 = vcombine.low %v7458_v44, %v7523_v19  ;;  %7882 = vst.msk [vmem:[#allocation3 + $0xe0] sm:$0xf] %vm7845_vm6, %v12792_v32  ;;  %v14589_v11 = vcombine.low %v7456_v3, %v7458_v44  ;;  %v14590_v56 = vcombine.low %v7521_v5, %v7523_v19  ;;  %v22322_v32 = vld [vmem:[#allocation14_spill] sm:$0xff] }
 0x42e   : > { %v6787_v0 = vpop.permute.xlu1 %6786  ;;  %v1318_v61 = vadd.f32 %v22323_v21, %v22322_v32  ;;  %v18820_v3 = vrot.slane %v14541_v45, %v22320_v51  ;;  %v6663_v52 = vor.u32 %v22325_v54, %v6660_v43  ;;  %v7054_v44 = vor.u32 %v7053_v26, %v6651_v38  ;;  %v22329_v26 = vld [vmem:[#allocation62_spill] sm:$0xff]  ;;  %v22333_v54 = vld [vmem:[#allocation19_spill] sm:$0xff] }
 0x42f   : > { %v7330_v29 = vpop.permute.xlu0 %7329  ;;  %7881 = vst [vmem:[#allocation3 + $0xd8] sm:$0xff] %v12791_v34  ;;  %v6865_v33 = vsel %vm6848_vm9, %v6785_v30, %v6787_v0  ;;  %8612 = vmatprep.mubr.bf16.mxu0 %v14590_v56  ;;  %v1810_v30 = vmul.f32 %v18799_v35, %v22324_v31  ;;  %v7189_v56 = vsel %vm15468_vm5, %v7050_v10, 0  ;;  %v18828_v19 = vrot.slane %v14540_v60, %v18806_v23  ;;  %v22326_v34 = vld [vmem:[#allocation151_spill] sm:$0xff] }
 0x430   : > { %6826 = vrot.lane.b32.xlu1 %v6649_v22, %s14670_s18  ;;  %v6929_v1 = vsel %vm15460_vm4, 0, %v6865_v33  ;;  %8613 = vmatmul.mubr.bf16.gmra.mxu0 %v14589_v11  ;;  %v22328_v60 = vld [vmem:[#allocation67_spill] sm:$0xff]  ;;  %v22330_v33 = vld [vmem:[#allocation56_spill] sm:$0xff] }
 0x431   : > { %6828 = vrot.lane.b32.xlu0 %v6656_v50, %s14670_s18  ;;  %v7460_v0 = vsel %vm7393_vm7, %v6929_v1, %v22326_v34  ;;  %v18839_v38 = vadd.f32 %v18820_v3, %v1810_v30  ;;  %v1811_v43 = vmul.f32 %v18828_v19, %v22328_v60  ;;  %v1669_v10 = vadd.f32 %v22330_v33, %v22329_v26 }
 0x432   : > { %v7332_v5 = vpop.permute.xlu1 %7331  ;;  %v18849_v1 = vrot.slane %v14541_v45, %v18806_v23 }
 0x433   : > { %v6789_v16 = vpop.permute.xlu0 %6788  ;;  %v7410_v21 = vsel %vm7393_vm7, %v7330_v29, %v7332_v5  ;;  %v12794_v6 = vcombine.low %v7332_v5, %v7332_v5  ;;  %v1813_v29 = vmul.f32 %v18799_v35, %v1318_v61  ;;  %22327 = vst [vmem:[#allocation183_spill] sm:$0xff] %v18839_v38  ;;  %v7191_v61 = vsel %vm15468_vm5, %v7054_v44, 0  ;;  %v22332_v5 = vld [vmem:[#allocation16_spill] sm:$0xff] }
 0x434   : > { %v7525_v22 = vsel %vm7491_vm8, %v18078_v47, %v7410_v21  ;;  %6830 = vrot.lane.b32.xlu1 %v6663_v52, %s14670_s18  ;;  %v1328_v52 = vadd.f32 %v22334_v39, %v22333_v54  ;;  %v1925_v45 = vadd.f32 %v18849_v1, %v1811_v43  ;;  %v1814_v21 = vmul.f32 %v18828_v19, %v1669_v10  ;;  %v22337_v10 = vld [vmem:[#allocation66_spill] sm:$0xff]  ;;  %v22339_v54 = vld [vmem:[#allocation9_spill] sm:$0xff] }
 0x435   : > { %7369 = vrot.lane.b32.xlu0 %v7189_v56, %s14671_s29  ;;  %v12793_v50 = vcombine.low %v7460_v0, %v7525_v22  ;;  %7888 = vst.msk [vmem:[#allocation3 + $0x104] sm:$0xf] %vm7845_vm6, %v12794_v6  ;;  %v18855_v31 = vadd.f32 %v18820_v3, %v1813_v29 }
 0x436   : > { %v6791_v11 = vpop.permute.xlu1 %6790  ;;  %v1819_v33 = vmul.f32 %v18799_v35, %v1328_v52 }
 0x437   : > { %v7334_v47 = vpop.permute.xlu0 %7333  ;;  %7887 = vst [vmem:[#allocation3 + $0xfc] sm:$0xff] %v12793_v50  ;;  %v6866_v32 = vsel %vm6848_vm9, %v6789_v16, %v6791_v11  ;;  %22331 = vst [vmem:[#allocation184_spill] sm:$0xff] %v18855_v31  ;;  %v1816_v16 = vmul.f32 %v18799_v35, %v22332_v5  ;;  %v22335_v50 = vld [vmem:[#allocation178_spill] sm:$0xff]  ;;  %v1817_v11 = vmul.f32 %v18828_v19, %v22337_v10 }
 0x438   : > { %7373 = vrot.lane.b32.xlu1 %v7191_v61, %s14671_s29  ;;  %v6930_v30 = vsel %vm15460_vm4, 0, %v6866_v32 }
 0x439   : > { %10586 = vrot.lane.b32.xlu0 %v18839_v38, %s14670_s18  ;;  %v7462_v29 = vsel %vm7393_vm7, %v6930_v30, %v18092_v53  ;;  %v18875_v43 = vadd.f32 %v18820_v3, %v1816_v16  ;;  %v1928_v53 = vadd.f32 %v18849_v1, %v1814_v21  ;;  %v22338_v16 = vld [vmem:[#allocation22_spill] sm:$0xff]  ;;  %v22341_v21 = vld [vmem:[#allocation21_spill] sm:$0xff] }
 0x43a   : > { %v7336_v6 = vpop.permute.xlu1 %7335  ;;  %v14591_v30 = vcombine.low %v7460_v0, %v7462_v29  ;;  %v1338_v39 = vadd.f32 %v22339_v54, %v22338_v16  ;;  %v1931_v0 = vadd.f32 %v18849_v1, %v1817_v11 }
 0x43b   : > { %v6793_v56 = vpop.permute.xlu0 %6792  ;;  %v7411_v44 = vsel %vm7393_vm7, %v7334_v47, %v7336_v6  ;;  %v12796_v34 = vcombine.low %v7336_v6, %v7336_v6  ;;  %22336 = vst [vmem:[#allocation157_spill] sm:$0xff] %v18875_v43  ;;  %v1822_v6 = vmul.f32 %v18799_v35, %v22341_v21 }
 0x43c   : > { %v7527_v60 = vsel %vm7491_vm8, %v22335_v50, %v7411_v44  ;;  %10588 = vrot.lane.b32.xlu1 %v1925_v45, %s14670_s18  ;;  %v18890_v45 = vadd.f32 %v18820_v3, %v1819_v33  ;;  %v1825_v10 = vmul.f32 %v18799_v35, %v1338_v39  ;;  %v14424_v39 = vld [vmem:[%s21739_s5 + $0x198] sm:$0xff]  }
 0x43d   : > { %10590 = vrot.lane.b32.xlu0 %v18855_v31, %s14670_s18  ;;  %v12795_v26 = vcombine.low %v7462_v29, %v7527_v60  ;;  %7890 = vst.msk [vmem:[#allocation3 + $0x110] sm:$0xf] %vm7845_vm6, %v12796_v34  ;;  %v14592_v5 = vcombine.low %v7525_v22, %v7527_v60  ;;  %v22342_v22 = vld [vmem:[#allocation69_spill] sm:$0xff]  ;;  %v22343_v60 = vld [vmem:[#allocation116_spill] sm:$0xff]  ;;  %13546 = vmatprep.subr.bf16.mxu0 %v14424_v39 }
 0x43e   : > { %v6795_v47 = vpop.permute.xlu1 %6794  ;;  %22340 = vst [vmem:[#allocation129_spill] sm:$0xff] %v18890_v45  ;;  %v18923_v21 = vadd.f32 %v18820_v3, %v1825_v10 }
 0x43f   : > { %v7338_v32 = vpop.permute.xlu0 %7337  ;;  %7889 = vst [vmem:[#allocation3 + $0x108] sm:$0xff] %v12795_v26  ;;  %v6867_v61 = vsel %vm6848_vm9, %v6793_v56, %v6795_v47  ;;  %8620 = vmatprep.mubr.bf16.mxu0 %v14592_v5  ;;  %v1820_v56 = vmul.f32 %v18828_v19, %v22342_v22 }
 0x440   : > { %10592 = vrot.lane.b32.xlu1 %v1928_v53, %s14670_s18  ;;  %v6931_v52 = vsel %vm15460_vm4, 0, %v6867_v61  ;;  %8621 = vmatmul.mubr.bf16.gmra.mxu0 %v14591_v30  ;;  %v18908_v53 = vadd.f32 %v18820_v3, %v1822_v6  ;;  %v22346_v30 = vld [vmem:[#allocation64_spill] sm:$0xff]  ;;  %22348 = vst [vmem:[#allocation136_spill] sm:$0xff] %v18923_v21 }
 0x441   : > { %10594 = vrot.lane.b32.xlu0 %v18875_v43, %s14670_s18  ;;  %v7464_v26 = vsel %vm7393_vm7, %v6931_v52, %v22343_v60  ;;  %v1934_v47 = vadd.f32 %v18849_v1, %v1820_v56  ;;  %v22350_v56 = vld [vmem:[#allocation25_spill] sm:$0xff] }
 0x442   : > { %v7340_v44 = vpop.permute.xlu1 %7339  ;;  %22344 = vst [vmem:[#allocation128_spill] sm:$0xff] %v18908_v53 }
 0x443   : > { %v6797_v34 = vpop.permute.xlu0 %6796  ;;  %v7412_v29 = vsel %vm7393_vm7, %v7338_v32, %v7340_v44  ;;  %v12798_v50 = vcombine.low %v7340_v44, %v7340_v44  ;;  %v22345_v32 = vld [vmem:[#allocation71_spill] sm:$0xff]  ;;  %v22351_v44 = vld [vmem:[#allocation12_spill] sm:$0xff] }
 0x444   : > { %v7529_v33 = vsel %vm7491_vm8, %v18213_v62, %v7412_v29  ;;  %10596 = vrot.lane.b32.xlu1 %v1931_v0, %s14670_s18  ;;  %v1823_v61 = vmul.f32 %v18828_v19, %v22345_v32  ;;  %v22347_v62 = vld [vmem:[#allocation63_spill] sm:$0xff]  ;;  %v22349_v0 = vld [vmem:[#allocation24_spill] sm:$0xff] }
 0x445   : > { %10598 = vrot.lane.b32.xlu0 %v18890_v45, %s14670_s18  ;;  %v12797_v11 = vcombine.low %v7464_v26, %v7529_v33  ;;  %7892 = vst.msk [vmem:[#allocation3 + $0x11c] sm:$0xf] %vm7845_vm6, %v12798_v50  ;;  %v1685_v5 = vadd.f32 %v22347_v62, %v22346_v30  ;;  %v1828_v22 = vmul.f32 %v18799_v35, %v22349_v0  ;;  %v19817_v45 = vld [vmem:[#allocation3 + $0xa8] ss:$12 sps:$4 sm:$0xff]  }
 0x446   : > { %v6799_v16 = vpop.permute.xlu1 %6798  ;;  %v1937_v29 = vadd.f32 %v18849_v1, %v1823_v61 }
 0x447   : > { %v7342_v54 = vpop.permute.xlu0 %7341  ;;  %7891 = vst [vmem:[#allocation3 + $0x114] sm:$0xff] %v12797_v11  ;;  %v6868_v52 = vsel %vm6848_vm9, %v6797_v34, %v6799_v16  ;;  %v1348_v34 = vadd.f32 %v22351_v44, %v22350_v56  ;;  %v1826_v50 = vmul.f32 %v18828_v19, %v1685_v5  ;;  %v18943_v62 = vadd.f32 %v18820_v3, %v1828_v22  ;;  %v22353_v16 = vld [vmem:[#allocation70_spill] sm:$0xff]  ;;  %v22354_v22 = vld [vmem:[#allocation27_spill] sm:$0xff] }
 0x448   : > { %10600 = vrot.lane.b32.xlu1 %v1934_v47, %s14670_s18  ;;  %v6932_v6 = vsel %vm15460_vm4, 0, %v6868_v52  ;;  %v22355_v56 = vld [vmem:[#allocation15_spill] sm:$0xff] }
 0x449   : > { %10602 = vrot.lane.b32.xlu0 %v18908_v53, %s14670_s18  ;;  %v7466_v32 = vsel %vm7393_vm7, %v6932_v6, %v18246_v41  ;;  %22352 = vst [vmem:[#allocation110_spill] sm:$0xff] %v18943_v62  ;;  %v1831_v5 = vmul.f32 %v18799_v35, %v1348_v34  ;;  %v1940_v41 = vadd.f32 %v18849_v1, %v1826_v50  ;;  %v22357_v50 = vld [vmem:[#allocation29_spill] sm:$0xff] }
 0x44a   : > { %v7344_v60 = vpop.permute.xlu1 %7343  ;;  %v14593_v6 = vcombine.low %v7464_v26, %v7466_v32  ;;  %v1358_v44 = vadd.f32 %v22355_v56, %v22354_v22  ;;  %v22479_v53 = vld [vmem:[#allocation137_spill] sm:$0xff] }
 0x44b   : > { %v6833_v11 = vpop.permute.xlu0 %6832  ;;  %v7413_v47 = vsel %vm7393_vm7, %v7342_v54, %v7344_v60  ;;  %v12800_v10 = vcombine.low %v7344_v60, %v7344_v60  ;;  %v1829_v54 = vmul.f32 %v18828_v19, %v22353_v16  ;;  %v1834_v60 = vmul.f32 %v18799_v35, %v22357_v50 }
 0x44c   : > { %v7531_v30 = vsel %vm7491_vm8, %v18251_v59, %v7413_v47  ;;  %10604 = vrot.lane.b32.xlu1 %v1937_v29, %s14670_s18  ;;  %v18958_v29 = vadd.f32 %v18820_v3, %v1831_v5 }
 0x44d   : > { %10606 = vrot.lane.b32.xlu0 %v18923_v21, %s14670_s18  ;;  %v12799_v61 = vcombine.low %v7466_v32, %v7531_v30  ;;  %7894 = vst.msk [vmem:[#allocation3 + $0x128] sm:$0xf] %vm7845_vm6, %v12800_v10  ;;  %v14594_v0 = vcombine.low %v7529_v33, %v7531_v30  ;;  %v1943_v26 = vadd.f32 %v18849_v1, %v1829_v54  ;;  %v22358_v33 = vld [vmem:[#allocation59_spill] sm:$0xff] }
 0x44e   : > { %v6835_v52 = vpop.permute.xlu1 %6834  ;;  %22356 = vst [vmem:[#allocation189_spill] sm:$0xff] %v18958_v29  ;;  %v1837_v54 = vmul.f32 %v18799_v35, %v1358_v44 }
 0x44f   : > { %v7378_v59 = vpop.permute.xlu0 %7377  ;;  %7893 = vst [vmem:[#allocation3 + $0x120] sm:$0xff] %v12799_v61  ;;  %v6877_v39 = vsel %vm6848_vm9, %v6833_v11, %v6835_v52  ;;  %8628 = vmatprep.mubr.bf16.mxu0 %v14594_v0  ;;  %v1832_v11 = vmul.f32 %v18828_v19, %v22358_v33  ;;  %v22359_v61 = vld [vmem:[#allocation134_spill] sm:$0xff]  ;;  %v18976_v52 = vadd.f32 %v18820_v3, %v1834_v60  ;;  %v22362_v0 = vld [vmem:[#allocation47_spill] sm:$0xff] }
 0x450   : > { %10608 = vrot.lane.b32.xlu1 %v1940_v41, %s14670_s18  ;;  %v6941_v34 = vsel %vm15460_vm4, 0, %v6877_v39  ;;  %8629 = vmatmul.mubr.bf16.gmra.mxu0 %v14593_v6  ;;  %v22361_v39 = vld [vmem:[#allocation73_spill] sm:$0xff]  ;;  %v18988_v44 = vadd.f32 %v18820_v3, %v1837_v54 }
 0x451   : > { %10610 = vrot.lane.b32.xlu0 %v18943_v62, %s14670_s18  ;;  %v7484_v16 = vsel %vm7393_vm7, %v6941_v34, %v22359_v61  ;;  %22360 = vst [vmem:[#allocation138_spill] sm:$0xff] %v18976_v52  ;;  %v1835_v6 = vmul.f32 %v18828_v19, %v22361_v39 }
 0x452   : > { %v7380_v47 = vpop.permute.xlu1 %7379  ;;  %22364 = vst [vmem:[#allocation139_spill] sm:$0xff] %v18988_v44 }
 0x453   : > { %v6837_v10 = vpop.permute.xlu0 %6836  ;;  %v7422_v32 = vsel %vm7393_vm7, %v7378_v59, %v7380_v47  ;;  %v12818_v30 = vcombine.low %v7380_v47, %v7380_v47  ;;  %v1946_v59 = vadd.f32 %v18849_v1, %v1832_v11  ;;  %v22366_v11 = vld [vmem:[#allocation30_spill] sm:$0xff]  ;;  %v22367_v47 = vld [vmem:[#allocation20_spill] sm:$0xff] }
 0x454   : > { %v7549_v5 = vsel %vm7491_vm8, %v18308_v63, %v7422_v32  ;;  %10612 = vrot.lane.b32.xlu1 %v1943_v26, %s14670_s18  ;;  %v22363_v63 = vld [vmem:[#allocation60_spill] sm:$0xff]  ;;  %v1368_v32 = vadd.f32 %v22367_v47, %v22366_v11  ;;  %v22371_v47 = vld [vmem:[#allocation23_spill] sm:$0xff] }
 0x455   : > { %10614 = vrot.lane.b32.xlu0 %v18958_v29, %s14670_s18  ;;  %v12817_v41 = vcombine.low %v7484_v16, %v7549_v5  ;;  %7916 = vst.msk [vmem:[#allocation3 + $0x1ac] sm:$0xf] %vm7845_vm6, %v12818_v30  ;;  %v1701_v22 = vadd.f32 %v22363_v63, %v22362_v0  ;;  %v22365_v26 = vld [vmem:[#allocation32_spill] sm:$0xff]  ;;  %v1949_v30 = vadd.f32 %v18849_v1, %v1835_v6 }
 0x456   : > { %v6839_v56 = vpop.permute.xlu1 %6838  ;;  %v1840_v33 = vmul.f32 %v18799_v35, %v22365_v26 }
 0x457   : > { %v7382_v34 = vpop.permute.xlu0 %7381  ;;  %7915 = vst [vmem:[#allocation3 + $0x1a4] sm:$0xff] %v12817_v41  ;;  %v6878_v50 = vsel %vm6848_vm9, %v6837_v10, %v6839_v56  ;;  %v1838_v10 = vmul.f32 %v18828_v19, %v1701_v22  ;;  %v1843_v22 = vmul.f32 %v18799_v35, %v1368_v32  ;;  %v22369_v56 = vld [vmem:[#allocation72_spill] sm:$0xff] }
 0x458   : > { %10616 = vrot.lane.b32.xlu1 %v1946_v59, %s14670_s18  ;;  %v6942_v60 = vsel %vm15460_vm4, 0, %v6878_v50  ;;  %v19008_v6 = vadd.f32 %v18820_v3, %v1840_v33  ;;  %v22370_v33 = vld [vmem:[#allocation33_spill] sm:$0xff] }
 0x459   : > { %10618 = vrot.lane.b32.xlu0 %v18976_v52, %s14670_s18  ;;  %v7486_v54 = vsel %vm7393_vm7, %v6942_v60, %v18320_v27  ;;  %v1952_v27 = vadd.f32 %v18849_v1, %v1838_v10  ;;  %v1378_v32 = vadd.f32 %v22371_v47, %v22370_v33  ;;  %v14387_v10 = vld [vmem:[%s21739_s5 + $0x110] sm:$0xff]   ;;  %v22377_v33 = vld [vmem:[#allocation68_spill] sm:$0xff]  ;;  %v22378_v47 = vld [vmem:[#allocation75_spill] sm:$0xff] }
 0x45a   : > { %v7384_v61 = vpop.permute.xlu1 %7383  ;;  %22368 = vst [vmem:[#allocation191_spill] sm:$0xff] %v19008_v6  ;;  %v14595_v26 = vcombine.low %v7484_v16, %v7486_v54  ;;  %v22373_v16 = vld [vmem:[#allocation35_spill] sm:$0xff]  ;;  %v19762_v52 = vld [vmem:[#allocation3 + $0xac] ss:$12 sps:$4 sm:$0xff]  }
 0x45b   : > { %v6841_v41 = vpop.permute.xlu0 %6840  ;;  %v7423_v59 = vsel %vm7393_vm7, %v7382_v34, %v7384_v61  ;;  %v12820_v39 = vcombine.low %v7384_v61, %v7384_v61  ;;  %v1841_v34 = vmul.f32 %v18828_v19, %v22369_v56  ;;  %v19026_v61 = vadd.f32 %v18820_v3, %v1843_v22 }
 0x45c   : > { %v7551_v0 = vsel %vm7491_vm8, %v18354_v17, %v7423_v59  ;;  %10620 = vrot.lane.b32.xlu1 %v1949_v30, %s14670_s18  ;;  %v22374_v59 = vld [vmem:[#allocation74_spill] sm:$0xff] }
 0x45d   : > { %10622 = vrot.lane.b32.xlu0 %v18988_v44, %s14670_s18  ;;  %v12819_v63 = vcombine.low %v7486_v54, %v7551_v0  ;;  %7918 = vst.msk [vmem:[#allocation3 + $0x1b8] sm:$0xf] %vm7845_vm6, %v12820_v39  ;;  %v14596_v11 = vcombine.low %v7549_v5, %v7551_v0  ;;  %22372 = vst [vmem:[#allocation192_spill] sm:$0xff] %v19026_v61  ;;  %v1846_v5 = vmul.f32 %v18799_v35, %v22373_v16  ;;  %v22470_v44 = vld [vmem:[#allocation132_spill] sm:$0xff] }
 0x45e   : > { %v6843_v50 = vpop.permute.xlu1 %6842  ;;  %v1844_v39 = vmul.f32 %v18828_v19, %v22374_v59 }
 0x45f   : > { %v7386_v17 = vpop.permute.xlu0 %7385  ;;  %7917 = vst [vmem:[#allocation3 + $0x1b0] sm:$0xff] %v12819_v63  ;;  %v6879_v60 = vsel %vm6848_vm9, %v6841_v41, %v6843_v50  ;;  %8668 = vmatprep.mubr.bf16.mxu1 %v14596_v11  ;;  %v1955_v41 = vadd.f32 %v18849_v1, %v1841_v34  ;;  %v1849_v50 = vmul.f32 %v18799_v35, %v1378_v32 }
 0x460   : > { %10624 = vrot.lane.b32.xlu1 %v1952_v27, %s14670_s18  ;;  %v6943_v30 = vsel %vm15460_vm4, 0, %v6879_v60  ;;  %8669 = vmatmul.mubr.bf16.vlgmr.msra.gmra.mxu1 %v14595_v26  ;;  %v14542_v27 = vld [vmem:[%s21739_s5 + $0x118] sm:$0xff]   ;;  %v22376_v26 = vld [vmem:[#allocation76_spill] sm:$0xff] }
 0x461   : > { %10626 = vrot.lane.b32.xlu0 %v19008_v6, %s14670_s18  ;;  %13725 = vmatpush3.bf16.msra.mxu1 %v14542_v27  ;;  %v7488_v22 = vsel %vm7393_vm7, %v6943_v30, %v18371_v55  ;;  %v14390_v60 = vld [vmem:[%s21739_s5 + $0x78] sm:$0xff]   ;;  %v19050_v55 = vadd.f32 %v18820_v3, %v1846_v5  ;;  %v1847_v11 = vmul.f32 %v18828_v19, %v22376_v26 }
 0x462   : > { %v7388_v54 = vpop.permute.xlu1 %7387  ;;  %13726 = vmatprep.subr.bf16.mxu1 %v14387_v10  ;;  %v1717_v30 = vadd.f32 %v22378_v47, %v22377_v33  ;;  %v19062_v5 = vadd.f32 %v18820_v3, %v1849_v50 }
 0x463   : > { %v6845_v0 = vpop.permute.xlu0 %6844  ;;  %v7424_v63 = vsel %vm7393_vm7, %v7386_v17, %v7388_v54  ;;  %v12822_v56 = vcombine.low %v7388_v54, %v7388_v54  ;;  %22375 = vst [vmem:[#allocation140_spill] sm:$0xff] %v19050_v55 }
 0x464   : > { %v7553_v34 = vsel %vm7491_vm8, %v18398_v46, %v7424_v63  ;;  %10628 = vrot.lane.b32.xlu1 %v1955_v41, %s14670_s18  ;;  %v1958_v46 = vadd.f32 %v18849_v1, %v1844_v39  ;;  %22379 = vst [vmem:[#allocation125_spill] sm:$0xff] %v19062_v5  ;;  %v22380_v39 = vld [vmem:[#allocation38_spill] sm:$0xff]  ;;  %v22381_v63 = vld [vmem:[#allocation36_spill] sm:$0xff] }
 0x465   : > { %10630 = vrot.lane.b32.xlu0 %v19026_v61, %s14670_s18  ;;  %v12821_v17 = vcombine.low %v7488_v22, %v7553_v34  ;;  %7920 = vst.msk [vmem:[#allocation3 + $0x1c4] sm:$0xf] %vm7845_vm6, %v12822_v56  ;;  %13727 = vmatpush3.bf16.msra.mxu1 %v14387_v10  ;;  %v1852_v54 = vmul.f32 %v18799_v35, %v22380_v39  ;;  %v22382_v56 = vld [vmem:[#allocation26_spill] sm:$0xff] }
 0x466   : > { %v6847_v32 = vpop.permute.xlu1 %6846  ;;  %13416 = vmatprep.subr.bf16.mxu1 %v14390_v60  ;;  %v1388_v27 = vadd.f32 %v22382_v56, %v22381_v63  ;;  %v1961_v10 = vadd.f32 %v18849_v1, %v1847_v11  ;;  %v22385_v63 = vld [vmem:[#allocation41_spill] sm:$0xff]  ;;  %v22386_v56 = vld [vmem:[#allocation39_spill] sm:$0xff] }
 0x467   : > { %v7390_v16 = vpop.permute.xlu0 %7389  ;;  %7919 = vst [vmem:[#allocation3 + $0x1bc] sm:$0xff] %v12821_v17  ;;  %v6880_v41 = vsel %vm6848_vm9, %v6845_v0, %v6847_v32  ;;  %v1850_v0 = vmul.f32 %v18828_v19, %v1717_v30  ;;  %v19082_v11 = vadd.f32 %v18820_v3, %v1852_v54  ;;  %v22384_v32 = vld [vmem:[#allocation78_spill] sm:$0xff]  ;;  %v1858_v54 = vmul.f32 %v18799_v35, %v22385_v63 }
 0x468   : > { %10632 = vrot.lane.b32.xlu1 %v1958_v46, %s14670_s18  ;;  %v6944_v59 = vsel %vm15460_vm4, 0, %v6880_v41  ;;  %v1855_v30 = vmul.f32 %v18799_v35, %v1388_v27  ;;  %v22387_v27 = vld [vmem:[#allocation28_spill] sm:$0xff] }
 0x469   : > { %10634 = vrot.lane.b32.xlu0 %v19050_v55, %s14670_s18  ;;  %v7490_v33 = vsel %vm7393_vm7, %v6944_v59, %v18418_v24  ;;  %22383 = vst [vmem:[#allocation142_spill] sm:$0xff] %v19082_v11  ;;  %v1964_v24 = vadd.f32 %v18849_v1, %v1850_v0 }
 0x46a   : > { %v7392_v17 = vpop.permute.xlu1 %7391  ;;  %v14597_v59 = vcombine.low %v7488_v22, %v7490_v33  ;;  %v19096_v0 = vadd.f32 %v18820_v3, %v1855_v30  ;;  %v22389_v22 = vld [vmem:[#allocation80_spill] sm:$0xff] }
 0x46b   : > { %v6801_v46 = vpop.permute.xlu0 %6800  ;;  %v7425_v26 = vsel %vm7393_vm7, %v7390_v16, %v7392_v17  ;;  %v12824_v50 = vcombine.low %v7392_v17, %v7392_v17  ;;  %v1853_v16 = vmul.f32 %v18828_v19, %v22384_v32  ;;  %v14386_v17 = vld [vmem:[#allocation3 + $0x14] ss:$12 sps:$4 sm:$0xff]  }
 0x46c   : > { %v7555_v60 = vsel %vm7491_vm8, %v18434_v12, %v7425_v26  ;;  %10636 = vrot.lane.b32.xlu1 %v1961_v10, %s14670_s18  ;;  %v1398_v10 = vadd.f32 %v22387_v27, %v22386_v56  ;;  %22388 = vst [vmem:[#allocation199_spill] sm:$0xff] %v19096_v0 }
 0x46d   : > { %10638 = vrot.lane.b32.xlu0 %v19062_v5, %s14670_s18  ;;  %v12823_v47 = vcombine.low %v7490_v33, %v7555_v60  ;;  %7922 = vst.msk [vmem:[#allocation3 + $0x1d0] sm:$0xf] %vm7845_vm6, %v12824_v50  ;;  %v14598_v39 = vcombine.low %v7553_v34, %v7555_v60  ;;  %v1967_v26 = vadd.f32 %v18849_v1, %v1853_v16  ;;  %v22391_v16 = vld [vmem:[#allocation81_spill] sm:$0xff] }
 0x46e   : > { %v6803_v41 = vpop.permute.xlu1 %6802  ;;  %v1856_v34 = vmul.f32 %v18828_v19, %v22389_v22  ;;  %v1861_v30 = vmul.f32 %v18799_v35, %v1398_v10  ;;  %v14391_v10 = vld [vmem:[%s21739_s5 + $0x38] sm:$0xff]  }
 0x46f   : > { %v6805_v12 = vpop.permute.xlu0 %6804  ;;  %7921 = vst [vmem:[#allocation3 + $0x1c8] sm:$0xff] %v12823_v47  ;;  %8676 = vmatprep.mubr.bf16.mxu1 %v14598_v39  ;;  %v6869_v50 = vsel %vm6848_vm9, %v6801_v46, %v6803_v41  ;;  %v19107_v47 = vadd.f32 %v18820_v3, %v1858_v54  ;;  %v1859_v46 = vmul.f32 %v18828_v19, %v22391_v16  ;;  %v22393_v41 = vld [vmem:[#allocation79_spill] sm:$0xff]  ;;  %v19736_v5 = vld [vmem:[#allocation3 + $0x90] ss:$12 sps:$4 sm:$0xff]  }
 0x470   : > { %10640 = vrot.lane.b32.xlu1 %v1964_v24, %s14670_s18  ;;  %8677 = vmatmul.mubr.bf16.gmra.mxu1 %v14597_v59  ;;  %v6933_v32 = vsel %vm15460_vm4, 0, %v6869_v50  ;;  %v22392_v24 = vld [vmem:[#allocation77_spill] sm:$0xff]  ;;  %v1970_v27 = vadd.f32 %v18849_v1, %v1856_v34  ;;  %v22394_v34 = vld [vmem:[#allocation42_spill] sm:$0xff]  ;;  %v22395_v50 = vld [vmem:[#allocation31_spill] sm:$0xff] }
 0x471   : > { %10642 = vrot.lane.b32.xlu0 %v19082_v11, %s14670_s18  ;;  %13728 = vmatprep.mubr.msk.bf16.mxu1 %vm6848_vm9, %v14386_v17  ;;  %22390 = vst [vmem:[#allocation193_spill] sm:$0xff] %v19107_v47  ;;  %v1733_v59 = vadd.f32 %v22393_v41, %v22392_v24  ;;  %v14389_v24 = vld [vmem:[#allocation3 + $0x44] ss:$12 sps:$4 sm:$0xff]  }
 0x472   : > { %v6807_v33 = vpop.permute.xlu1 %6806 }
 0x473   : > { %v7346_v60 = vpop.permute.xlu0 %7345  ;;  %v6870_v39 = vsel %vm6848_vm9, %v6805_v12, %v6807_v33  ;;  %v14388_v12 = vld [vmem:[#allocation3 + $0x2c] ss:$12 sps:$4 sm:$0xff]   ;;  %v1408_v33 = vadd.f32 %v22395_v50, %v22394_v34  ;;  %v14396_v50 = vld [vmem:[%s21739_s5 + $0x30] sm:$0xff]  }
 0x474   : > { %10644 = vrot.lane.b32.xlu1 %v1967_v26, %s14670_s18  ;;  %v7468_v26 = vsel %vm7393_vm7, %v6933_v32, %v18446_v8  ;;  %v14395_v8 = vld [vmem:[%s21739_s5 + $0x70] sm:$0xff]   ;;  %v22397_v32 = vld [vmem:[#allocation44_spill] sm:$0xff] }
 0x475   : > { %10646 = vrot.lane.b32.xlu0 %v19096_v0, %s14670_s18  ;;  %v1864_v41 = vmul.f32 %v18799_v35, %v22397_v32 }
 0x476   : > { %v7348_v63 = vpop.permute.xlu1 %7347 }
 0x477   : > { %v7350_v56 = vpop.permute.xlu0 %7349  ;;  %v7414_v54 = vsel %vm7393_vm7, %v7346_v60, %v7348_v63  ;;  %v12802_v17 = vcombine.low %v7348_v63, %v7348_v63  ;;  %v6934_v60 = vsel %vm15460_vm4, 0, %v6870_v39  ;;  %v1973_v63 = vadd.f32 %v18849_v1, %v1859_v46 }
 0x478   : > { %v7533_v22 = vsel %vm7491_vm8, %v18448_v37, %v7414_v54  ;;  %10648 = vrot.lane.b32.xlu1 %v1970_v27, %s14670_s18  ;;  %v19138_v37 = vadd.f32 %v18820_v3, %v1861_v30  ;;  %v1862_v27 = vmul.f32 %v18828_v19, %v1733_v59  ;;  %13729 = vmatmul.mubr.msk.bf16.vlgmr.msra.gmra.mxu1 %vm6848_vm9, %v14388_v12 }
 0x479   : > { %10650 = vrot.lane.b32.xlu0 %v19107_v47, %s14670_s18  ;;  %v12801_v16 = vcombine.low %v7468_v26, %v7533_v22  ;;  %7896 = vst.msk [vmem:[#allocation3 + $0x134] sm:$0xf] %vm7845_vm6, %v12802_v17  ;;  %13732 = vmatprep.mubr.msk.bf16.mxu1 %vm6848_vm9, %v14389_v24  ;;  %v7470_v46 = vsel %vm7393_vm7, %v6934_v60, %v18480_v58  ;;  %v22399_v60 = vld [vmem:[#allocation82_spill] sm:$0xff] }
 0x47a   : > { %22396 = vst [vmem:[#allocation201_spill] sm:$0xff] %v19138_v37  ;;  %v7352_v54 = vpop.permute.xlu1 %7351  ;;  %13417 = vmatpush3.bf16.msra.mxu1 %v14391_v10  ;;  %v19163_v58 = vadd.f32 %v18820_v3, %v1864_v41  ;;  %v1865_v24 = vmul.f32 %v18828_v19, %v22399_v60  ;;  %v14400_v41 = vld [vmem:[%s21739_s5 + $0x28] sm:$0xff]  }
 0x47b   : > { %v6809_v39 = vpop.permute.xlu0 %6808  ;;  %7895 = vst [vmem:[#allocation3 + $0x12c] sm:$0xff] %v12801_v16  ;;  %v7415_v17 = vsel %vm7393_vm7, %v7350_v56, %v7352_v54  ;;  %v12804_v34 = vcombine.low %v7352_v54, %v7352_v54  ;;  %v1867_v56 = vmul.f32 %v18799_v35, %v1408_v33  ;;  %13418 = vmatprep.subr.bf16.mxu1 %v14395_v8  ;;  %v14399_v16 = vld [vmem:[%s21739_s5 + $0x68] sm:$0xff]  }
 0x47c   : > { %v13302_v30 = vpop.f32.mrf.mxu0  ;;  %v7535_v59 = vsel %vm7491_vm8, %v18502_v18, %v7415_v17  ;;  %10652 = vrot.lane.b32.xlu1 %v1973_v63, %s14670_s18  ;;  %22398 = vst [vmem:[#allocation196_spill] sm:$0xff] %v19163_v58  ;;  %v1976_v18 = vadd.f32 %v18849_v1, %v1862_v27  ;;  %v14599_v54 = vcombine.low %v7468_v26, %v7470_v46  ;;  %v14393_v27 = vld [vmem:[#allocation3 + $0x5c] ss:$12 sps:$4 sm:$0xff]  }
 0x47d   : > { %10654 = vrot.lane.b32.xlu0 %v19138_v37, %s14670_s18  ;;  %v12803_v12 = vcombine.low %v7470_v46, %v7535_v59  ;;  %7898 = vst.msk [vmem:[#allocation3 + $0x140] sm:$0xf] %vm7845_vm6, %v12804_v34  ;;  %v14600_v17 = vcombine.low %v7533_v22, %v7535_v59  ;;  %v19179_v34 = vadd.f32 %v18820_v3, %v1867_v56  ;;  %v22403_v22 = vld [vmem:[#allocation45_spill] sm:$0xff]  ;;  %v22404_v46 = vld [vmem:[#allocation34_spill] sm:$0xff]  ;;  %v22411_v37 = vld [vmem:[#allocation51_spill] sm:$0xff] }
 0x47e   : > { %v13303_v10 = vpop.f32.mrf.mxu0  ;;  %v6811_v32 = vpop.permute.xlu1 %6810  ;;  %13419 = vmatpush3.bf16.msra.mxu1 %v14396_v50  ;;  %v1418_v59 = vadd.f32 %v22404_v46, %v22403_v22  ;;  %v14394_v50 = vld [vmem:[#allocation3 + $0x8c] ss:$12 sps:$4 sm:$0xff]   ;;  %v22409_v46 = vld [vmem:[#allocation85_spill] sm:$0xff] }
 0x47f   : > { %v6813_v63 = vpop.permute.xlu0 %6812  ;;  %v19168_v33 = vadd.f32 %v13303_v10, %v13302_v30  ;;  %7897 = vst [vmem:[#allocation3 + $0x138] sm:$0xff] %v12803_v12  ;;  %22401 = vst [vmem:[#allocation17_spill] sm:$0xff] %v19179_v34  ;;  %v22402_v30 = vld [vmem:[#allocation48_spill] sm:$0xff]  ;;  %8636 = vmatprep.mubr.bf16.mxu0 %v14600_v17  ;;  %13420 = vmatprep.subr.bf16.mxu1 %v14399_v16  ;;  %v14403_v12 = vld [vmem:[%s21739_s5 + $0x60] sm:$0xff]   ;;  %v1979_v10 = vadd.f32 %v18849_v1, %v1865_v24 }
 0x480   : > { %v19170_v8 = vpop.f32.mrf.mxu0  ;;  %10656 = vrot.lane.b32.xlu1 %v1976_v18, %s14670_s18  ;;  %v1870_v26 = vmul.f32 %v18799_v35, %v22402_v30  ;;  %v22405_v18 = vld [vmem:[#allocation83_spill] sm:$0xff]  ;;  %v6871_v56 = vsel %vm6848_vm9, %v6809_v39, %v6811_v32  ;;  %8637 = vmatmul.mubr.bf16.gmra.mxu0 %v14599_v54  ;;  %v1873_v24 = vmul.f32 %v18799_v35, %v1418_v59  ;;  %v22407_v32 = vld [vmem:[#allocation84_spill] sm:$0xff]  ;;  %v14407_v30 = vld [vmem:[%s21739_s5 + $0x58] sm:$0xff]  }
 0x481   : > { %22400 = vst [vmem:[#allocation143_spill] sm:$0xff] %v19168_v33  ;;  %10658 = vrot.lane.b32.xlu0 %v19163_v58, %s14670_s18  ;;  %v1868_v60 = vmul.f32 %v18828_v19, %v22405_v18  ;;  %13733 = vmatmul.mubr.msk.bf16.gmra.mxu1 %vm6848_vm9, %v14393_v27  ;;  %v14404_v16 = vld [vmem:[%s21739_s5 + $0x20] sm:$0xff]   ;;  %v1871_v54 = vmul.f32 %v18828_v19, %v22407_v32  ;;  %v22408_v22 = vld [vmem:[#allocation86_spill] sm:$0xff] }
 0x482   : > { %v6815_v33 = vpop.permute.xlu1 %6814  ;;  %13736 = vmatprep.mubr.msk.bf16.mxu1 %vm6848_vm9, %v14394_v50  ;;  %v19194_v17 = vpop.f32.mrf.mxu0  ;;  %13421 = vmatpush3.bf16.msra.mxu1 %v14400_v41  ;;  %v19203_v39 = vadd.f32 %v18820_v3, %v1870_v26  ;;  %v6935_v41 = vsel %vm15460_vm4, 0, %v6871_v56  ;;  %v1749_v50 = vadd.f32 %v22409_v46, %v22408_v22  ;;  %v1876_v56 = vmul.f32 %v18799_v35, %v22411_v37  ;;  %v14408_v22 = vld [vmem:[%s21739_s5 + $0x18] sm:$0xff]   ;;  %v14397_v37 = vld [vmem:[#allocation3 + $0xa4] ss:$12 sps:$4 sm:$0xff]  }
 0x483   : > { %v7354_v58 = vpop.permute.xlu0 %7353  ;;  %13422 = vmatprep.subr.bf16.mxu1 %v14403_v12  ;;  %v6872_v26 = vsel %vm6848_vm9, %v6813_v63, %v6815_v33  ;;  %v1982_v59 = vadd.f32 %v18849_v1, %v1868_v60  ;;  %v19228_v63 = vsel %vm7393_vm7, %v6935_v41, %v18535_v25  ;;  %v22414_v60 = vld [vmem:[#allocation37_spill] sm:$0xff]  ;;  %v14398_v41 = vld [vmem:[#allocation3 + $0xbc] ss:$12 sps:$4 sm:$0xff]  }
 0x484   : > { %10660 = vrot.lane.b32.xlu1 %v1979_v10, %s14670_s18  ;;  %22406 = vst [vmem:[#allocation167_spill] sm:$0xff] %v19203_v39  ;;  %v6936_v46 = vsel %vm15460_vm4, 0, %v6872_v26  ;;  %v1874_v26 = vmul.f32 %v18828_v19, %v1749_v50 }
 0x485   : > { %10662 = vrot.lane.b32.xlu0 %v19179_v34, %s14670_s18  ;;  %v22410_v34 = vlaneseq }
 0x486   : > { %v13308_v27 = vpop.f32.mrf.mxu0  ;;  %v7356_v10 = vpop.permute.xlu1 %7355  ;;  %13423 = vmatpush3.bf16.msra.mxu1 %v14404_v16 }
 0x487   : > { %v7358_v18 = vpop.permute.xlu0 %7357  ;;  %v19218_v32 = vand.u32 127, %v22410_v34  ;;  %v7416_v12 = vsel %vm7393_vm7, %v7354_v58, %v7356_v10  ;;  %v12806_v49 = vcombine.low %v7356_v10, %v7356_v10  ;;  %v22413_v34 = vld [vmem:[#allocation49_spill] sm:$0xff]  ;;  %13424 = vmatprep.subr.bf16.mxu1 %v14407_v30  ;;  %v19247_v10 = vsub.s32 7, %v22321_v42 }
 0x488   : > { %v13309_v15 = vpop.f32.mrf.mxu0  ;;  %v7537_v33 = vsel %vm7491_vm8, %v18556_v13, %v7416_v12  ;;  %10664 = vrot.lane.b32.xlu1 %v1982_v59, %s14670_s18  ;;  %v1428_v16 = vadd.f32 %v22414_v60, %v22413_v34  ;;  %v14411_v13 = vld [vmem:[%s21739_s5 + $0x50] sm:$0xff]   ;;  %v22417_v60 = vld [vmem:[#allocation87_spill] sm:$0xff] }
 0x489   : > { %10666 = vrot.lane.b32.xlu0 %v19203_v39, %s14670_s18  ;;  %v19235_v58 = vadd.f32 %v13309_v15, %v13308_v27  ;;  %v12805_v25 = vcombine.low %v19228_v63, %v7537_v33  ;;  %7900 = vst.msk [vmem:[#allocation3 + $0x14c] sm:$0xf] %vm7845_vm6, %v12806_v49  ;;  %v19250_v15 = vadd.f32 %v18820_v3, %v1873_v24  ;;  %v11402_v49 = vsub.s32 7, %v19218_v32  ;;  %v14412_v24 = vld [vmem:[%s21739_s5 + $0x10] sm:$0xff]  }
 0x48a   : > { %v1985_v27 = vadd.f32 %v18849_v1, %v1871_v54  ;;  %v7360_v59 = vpop.permute.xlu1 %7359  ;;  %13737 = vmatmul.mubr.msk.bf16.gmra.mxu1 %vm6848_vm9, %v14397_v37  ;;  %v7474_v54 = vsel %vm7393_vm7, %v6936_v46, %v18570_v4  ;;  %v14415_v4 = vld [vmem:[%s21739_s5 + $0x48] sm:$0xff]   ;;  %vm11396_vm11 = vcmp.lt.s32.totalorder %v19247_v10, 1  ;;  %vm11400_vm12 = vcmp.lt.s32.totalorder %v19218_v32, 1 }
 0x48b   : > { %22412 = vst [vmem:[#allocation166_spill] sm:$0xff] %v19235_v58  ;;  %22415 = vst [vmem:[#allocation169_spill] sm:$0xff] %v19250_v15  ;;  %v6817_v12 = vpop.permute.xlu0 %6816  ;;  %v7417_v30 = vsel %vm7393_vm7, %v7358_v18, %v7360_v59  ;;  %v12808_v34 = vcombine.low %v7360_v59, %v7360_v59  ;;  %13740 = vmatprep.mubr.msk.bf16.mxu1 %vm6848_vm9, %v14398_v41  ;;  %13425 = vmatpush3.bf16.msra.mxu1 %v14408_v22  ;;  %vm19282_vm13 = vcmp.lt.s32.totalorder %v11402_v49, 1  ;;  %v14401_v59 = vld [vmem:[#allocation3 + $0xd4] ss:$12 sps:$4 sm:$0xff]  }
 0x48c   : > { %7899 = vst [vmem:[#allocation3 + $0x144] sm:$0xff] %v12805_v25  ;;  %v7539_v50 = vsel %vm7491_vm8, %v18595_v2, %v7417_v30  ;;  %10668 = vrot.lane.b32.xlu1 %v1985_v27, %s14670_s18  ;;  %v1879_v18 = vmul.f32 %v18799_v35, %v1428_v16  ;;  %13426 = vmatprep.subr.bf16.mxu1 %v14411_v13 }
 0x48d   : > { %10670 = vrot.lane.b32.xlu0 %v19250_v15, %s14670_s18  ;;  %v12807_v22 = vcombine.low %v7474_v54, %v7539_v50  ;;  %7902 = vst.msk [vmem:[#allocation3 + $0x158] sm:$0xf] %vm7845_vm6, %v12808_v34  ;;  %v19277_v2 = vadd.f32 %v18820_v3, %v1876_v56  ;;  %v1988_v37 = vadd.f32 %v18849_v1, %v1874_v26  ;;  %v14416_v56 = vld [vmem:[%s21739_s5 + $0x8] sm:$0xff]   ;;  %v11394_v26 = vsel %vm11393_vm10, %v22321_v42, 1  ;;  %v22421_v34 = vld [vmem:[#allocation54_spill] sm:$0xff] }
 0x48e   : > { %v1877_v16 = vmul.f32 %v18828_v19, %v22417_v60  ;;  %v6819_v46 = vpop.permute.xlu1 %6818  ;;  %v14601_v13 = vcombine.low %v19228_v63, %v7474_v54  ;;  %v14602_v27 = vcombine.low %v7537_v33, %v7539_v50  ;;  %v11397_v63 = vsel %vm11396_vm11, %v19247_v10, 1  ;;  %v22422_v54 = vld [vmem:[#allocation52_spill] sm:$0xff]  ;;  %v19309_v60 = vpop.f32.mrf.mxu0 }
 0x48f   : > { %22416 = vst [vmem:[#allocation18_spill] sm:$0xff] %v19277_v2  ;;  %v6821_v25 = vpop.permute.xlu0 %6820  ;;  %7901 = vst [vmem:[#allocation3 + $0x150] sm:$0xff] %v12807_v22  ;;  %13427 = vmatpush3.bf16.msra.mxu1 %v14412_v24  ;;  %v11401_v33 = vsel %vm11400_vm12, %v19218_v32, 1  ;;  %v19303_v30 = vadd.f32 %v18820_v3, %v1879_v18  ;;  %v1882_v24 = vmul.f32 %v18799_v35, %v22421_v34  ;;  %v22423_v50 = vld [vmem:[#allocation40_spill] sm:$0xff]  ;;  %v14422_v32 = vld [vmem:[%s21739_s5 + $0x40] sm:$0xff]  }
 0x490   : > { %10672 = vrot.lane.b32.xlu1 %v1988_v37, %s14670_s18  ;;  %v1438_v22 = vadd.f32 %v22423_v50, %v22422_v54  ;;  %8644 = vmatprep.mubr.bf16.mxu0 %v14602_v27  ;;  %v14402_v37 = vld [vmem:[#allocation3 + $0x104] ss:$12 sps:$4 sm:$0xff]   ;;  %v1991_v18 = vadd.f32 %v18849_v1, %v1877_v16  ;;  %v22424_v15 = vld [vmem:[#allocation88_spill] sm:$0xff]  ;;  %v6873_v39 = vsel %vm6848_vm9, %v6817_v12, %v6819_v46  ;;  %v19334_v41 = vpop.f32.mrf.mxu0 }
 0x491   : > { %10674 = vrot.lane.b32.xlu0 %v19277_v2, %s14670_s18  ;;  %22420 = vst [vmem:[#allocation172_spill] sm:$0xff] %v19303_v30  ;;  %13428 = vmatprep.subr.bf16.mxu1 %v14415_v4  ;;  %v11404_v2 = vsel %vm19282_vm13, %v11402_v49, 1  ;;  %v1880_v34 = vmul.f32 %v18828_v19, %v22424_v15  ;;  %v14423_v49 = vld [vmem:[%s21739_s5] sm:$0xff]   ;;  %v11398_v15 = vadd.s32 %v11397_v63, %v11394_v26  ;;  %v6937_v46 = vsel %vm15460_vm4, 0, %v6873_v39  ;;  %v22428_v26 = vld [vmem:[#allocation90_spill] sm:$0xff] }
 0x492   : > { %v6823_v54 = vpop.permute.xlu1 %6822  ;;  %8645 = vmatmul.mubr.bf16.gmra.mxu0 %v14601_v13  ;;  %13741 = vmatmul.mubr.msk.bf16.gmra.mxu1 %vm6848_vm9, %v14401_v59  ;;  %v11405_v4 = vadd.s32 %v11404_v2, %v11401_v33  ;;  %v19329_v12 = vadd.f32 %v18820_v3, %v1882_v24  ;;  %v1885_v16 = vmul.f32 %v18799_v35, %v1438_v22  ;;  %v19339_v13 = vld [vmem:[%s21739_s5 + $0x1a8] sm:$0xff]   ;;  %v22426_v59 = vld [vmem:[#allocation89_spill] sm:$0xff]  ;;  %v22427_v2 = vld [vmem:[#allocation91_spill] sm:$0xff] }
 0x493   : > { %v7362_v27 = vpop.permute.xlu0 %7361  ;;  %13744 = vmatprep.mubr.msk.bf16.mxu1 %vm6848_vm9, %v14402_v37  ;;  %13429 = vmatpush3.bf16.msra.mxu1 %v14416_v56  ;;  %v1883_v56 = vmul.f32 %v18828_v19, %v22426_v59  ;;  %v1765_v63 = vadd.f32 %v22428_v26, %v22427_v2  ;;  %v6874_v33 = vsel %vm6848_vm9, %v6821_v25, %v6823_v54  ;;  %v14405_v25 = vld [vmem:[#allocation3 + $0x11c] ss:$12 sps:$4 sm:$0xff]   ;;  %v11399_v54 = vadd.s32 1, %v11398_v15  ;;  %v22430_v26 = vld [vmem:[#allocation53_spill] sm:$0xff] }
 0x494   : > { %10676 = vrot.lane.b32.xlu1 %v1991_v18, %s14670_s18  ;;  %22425 = vst [vmem:[#allocation173_spill] sm:$0xff] %v19329_v12  ;;  %13430 = vmatprep.subr.bf16.mxu1 %v14422_v32  ;;  %v1994_v39 = vadd.f32 %v18849_v1, %v1880_v34  ;;  %v7476_v18 = vsel %vm7393_vm7, %v6937_v46, %v18612_v28  ;;  %v11406_v2 = vadd.s32 1, %v11405_v4  ;;  %v22429_v34 = vld [vmem:[#allocation57_spill] sm:$0xff]  ;;  %v6938_v28 = vsel %vm15460_vm4, 0, %v6874_v33 }
 0x495   : > { %10678 = vrot.lane.b32.xlu0 %v19303_v30, %s14670_s18  ;;  %v1997_v15 = vadd.f32 %v18849_v1, %v1883_v56  ;;  %v1886_v4 = vmul.f32 %v18828_v19, %v1765_v63  ;;  %v14451_v30 = vld [vmem:[#allocation3 + $0x7c] ss:$12 sps:$4 sm:$0xff]  }
 0x496   : > { %v7364_v24 = vpop.permute.xlu1 %7363  ;;  %v13314_v32 = vpop.f32.mrf.mxu0  ;;  %v11407_v63 = vmul.u32 %v11406_v2, %v11399_v54 }
 0x497   : > { %v7366_v50 = vpop.permute.xlu0 %7365  ;;  %v7418_v22 = vsel %vm7393_vm7, %v7362_v27, %v7364_v24  ;;  %v12810_v37 = vcombine.low %v7364_v24, %v7364_v24  ;;  %13431 = vmatpush3.bf16.msra.mxu1 %v14423_v49  ;;  %v1888_v27 = vmul.f32 %v18799_v35, %v22429_v34  ;;  %v22431_v24 = vld [vmem:[#allocation43_spill] sm:$0xff] }
 0x498   : > { %v7541_v59 = vsel %vm7491_vm8, %v18658_v57, %v7418_v22  ;;  %10680 = vrot.lane.b32.xlu1 %v1994_v39, %s14670_s18  ;;  %v1448_v49 = vadd.f32 %v22431_v24, %v22430_v26  ;;  %v14406_v57 = vld [vmem:[#allocation3 + $0x134] ss:$12 sps:$4 sm:$0xff]   ;;  %v13315_v39 = vpop.f32.mrf.mxu0  ;;  %13796 = vmatprep.subr.bf16.mxu1 %v19339_v13  ;;  %v19364_v22 = vadd.f32 %v18820_v3, %v1885_v16 }
 0x499   : > { %10682 = vrot.lane.b32.xlu0 %v19329_v12, %s14670_s18  ;;  %v12809_v46 = vcombine.low %v7476_v18, %v7541_v59  ;;  %7908 = vst.msk [vmem:[#allocation3 + $0x17c] sm:$0xf] %vm7845_vm6, %v12810_v37  ;;  %v19369_v26 = vadd.f32 %v13315_v39, %v13314_v32  ;;  %v7478_v16 = vsel %vm7393_vm7, %v6938_v28, %v18663_v36  ;;  %v22435_v28 = vld [vmem:[#allocation92_spill] sm:$0xff] }
 0x49a   : > { %22432 = vst [vmem:[#allocation158_spill] sm:$0xff] %v19364_v22  ;;  %v7368_v34 = vpop.permute.xlu1 %7367  ;;  %13745 = vmatmul.mubr.msk.bf16.gmra.mxu1 %vm6848_vm9, %v14405_v25  ;;  %v1891_v32 = vmul.f32 %v18799_v35, %v1448_v49  ;;  %v2000_v36 = vadd.f32 %v18849_v1, %v1886_v4  ;;  %v14603_v54 = vcombine.low %v7476_v18, %v7478_v16  ;;  %v14409_v49 = vld [vmem:[#allocation3 + $0x14c] ss:$12 sps:$4 sm:$0xff]   ;;  %v22437_v4 = vld [vmem:[#allocation61_spill] sm:$0xff] }
 0x49b   : > { %v7372_v12 = vpop.permute.xlu0 %7371  ;;  %22433 = vst [vmem:[#allocation159_spill] sm:$0xff] %v19369_v26  ;;  %7907 = vst [vmem:[#allocation3 + $0x174] sm:$0xff] %v12809_v46  ;;  %v7419_v33 = vsel %vm7393_vm7, %v7366_v50, %v7368_v34  ;;  %v12812_v37 = vcombine.low %v7368_v34, %v7368_v34  ;;  %13748 = vmatprep.mubr.msk.bf16.mxu1 %vm6848_vm9, %v14406_v57  ;;  %v19384_v50 = vadd.f32 %v18820_v3, %v1888_v27  ;;  %v22462_v26 = vld [vmem:[#allocation188_spill] sm:$0xff] }
 0x49c   : > { %v12814_v24 = vcombine.low %v7372_v12, %v7372_v12  ;;  %v7543_v56 = vsel %vm7491_vm8, %v18674_v20, %v7419_v33  ;;  %10684 = vrot.lane.b32.xlu1 %v1997_v15, %s14670_s18  ;;  %v1889_v20 = vmul.f32 %v18828_v19, %v22435_v28  ;;  %v11408_v15 = vcvt.s32.f32 %v11407_v63  ;;  %v22438_v33 = vld [vmem:[#allocation55_spill] sm:$0xff] }
 0x49d   : > { %10686 = vrot.lane.b32.xlu0 %v19364_v22, %s14670_s18  ;;  %v12811_v25 = vcombine.low %v7478_v16, %v7543_v56  ;;  %7910 = vst.msk [vmem:[#allocation3 + $0x188] sm:$0xf] %vm7845_vm6, %v12812_v37  ;;  %22434 = vst [vmem:[#allocation160_spill] sm:$0xff] %v19384_v50  ;;  %v14604_v2 = vcombine.low %v7541_v59, %v7543_v56  ;;  %v19393_v27 = vadd.f32 %v18820_v3, %v1891_v32  ;;  %v22439_v37 = vld [vmem:[#allocation46_spill] sm:$0xff]  ;;  %v14447_v22 = vld [vmem:[#allocation3 + $0xc8] ss:$12 sps:$4 sm:$0xff]  }
 0x49e   : > { %7912 = vst.msk [vmem:[#allocation3 + $0x194] sm:$0xf] %vm7845_vm6, %v12814_v24  ;;  %v7376_v46 = vpop.permute.xlu1 %7375  ;;  %v1894_v34 = vmul.f32 %v18799_v35, %v22437_v4  ;;  %v1458_v18 = vadd.f32 %v22439_v37, %v22438_v33  ;;  %v2003_v59 = vadd.f32 %v18849_v1, %v1889_v20  ;;  %v22440_v24 = vld [vmem:[#allocation93_spill] sm:$0xff]  ;;  %14530 = vrcp.f32 %v11408_v15  ;;  %v19413_v20 = vpop.f32.mrf.mxu0 }
 0x49f   : > { %v6825_v57 = vpop.permute.xlu0 %6824  ;;  %7909 = vst [vmem:[#allocation3 + $0x180] sm:$0xff] %v12811_v25  ;;  %v12816_v39 = vcombine.low %v7376_v46, %v7376_v46  ;;  %22436 = vst [vmem:[#allocation177_spill] sm:$0xff] %v19393_v27  ;;  %8652 = vmatprep.mubr.bf16.mxu0 %v14604_v2  ;;  %v1892_v16 = vmul.f32 %v18828_v19, %v22440_v24  ;;  %v22443_v2 = vld [vmem:[#allocation98_spill] sm:$0xff] }
 0x4a0   : > { %10688 = vrot.lane.b32.xlu1 %v2000_v36, %s14670_s18  ;;  %8653 = vmatmul.mubr.bf16.gmra.mxu0 %v14603_v54  ;;  %v19411_v28 = vadd.f32 %v18820_v3, %v1894_v34  ;;  %v22442_v54 = vld [vmem:[#allocation94_spill] sm:$0xff] }
 0x4a1   : > { %10690 = vrot.lane.b32.xlu0 %v19384_v50, %s14670_s18  ;;  %7914 = vst.msk [vmem:[#allocation3 + $0x1a0] sm:$0xf] %vm7845_vm6, %v12816_v39  ;;  %v1897_v39 = vmul.f32 %v18799_v35, %v1458_v18 }
 0x4a2   : > { %v6827_v56 = vpop.permute.xlu1 %6826  ;;  %13749 = vmatmul.mubr.msk.bf16.gmra.mxu1 %vm6848_vm9, %v14409_v49  ;;  %22441 = vst [vmem:[#allocation180_spill] sm:$0xff] %v19411_v28  ;;  %v22444_v49 = vld [vmem:[#allocation95_spill] sm:$0xff] }
 0x4a3   : > { %v6829_v25 = vpop.permute.xlu0 %6828  ;;  %v6875_v63 = vsel %vm6848_vm9, %v6825_v57, %v6827_v56  ;;  %v1895_v57 = vmul.f32 %v18828_v19, %v22442_v54  ;;  %v1781_v4 = vadd.f32 %v22444_v49, %v22443_v2  ;;  %v19435_v54 = vpop.f32.mrf.mxu0 }
 0x4a4   : > { %v6939_v32 = vsel %vm15460_vm4, 0, %v6875_v63  ;;  %10692 = vrot.lane.b32.xlu1 %v2003_v59, %s14670_s18  ;;  %v14410_v36 = vld [vmem:[#allocation3 + $0x17c] ss:$12 sps:$4 sm:$0xff]   ;;  %v2006_v59 = vadd.f32 %v18849_v1, %v1892_v16  ;;  %v14414_v63 = vld [vmem:[#allocation3 + $0x1ac] ss:$12 sps:$4 sm:$0xff]   ;;  %v22445_v16 = vld [vmem:[#allocation65_spill] sm:$0xff] }
 0x4a5   : > { %10694 = vrot.lane.b32.xlu0 %v19393_v27, %s14670_s18  ;;  %13752 = vmatprep.mubr.msk.bf16.mxu1 %vm6848_vm9, %v14410_v36  ;;  %v7480_v24 = vsel %vm7393_vm7, %v6939_v32, %v18730_v14  ;;  %v1900_v36 = vmul.f32 %v18799_v35, %v22445_v16  ;;  %v19438_v14 = vadd.f32 %v18820_v3, %v1897_v39  ;;  %v22448_v32 = vld [vmem:[#allocation50_spill] sm:$0xff]  ;;  %v22450_v16 = vld [vmem:[#allocation96_spill] sm:$0xff] }
 0x4a6   : > { %v6831_v33 = vpop.permute.xlu1 %6830  ;;  %v2009_v49 = vadd.f32 %v18849_v1, %v1895_v57 }
 0x4a7   : > { %v7370_v37 = vpop.permute.xlu0 %7369  ;;  %v6876_v15 = vsel %vm6848_vm9, %v6829_v25, %v6831_v33  ;;  %22446 = vst [vmem:[#allocation185_spill] sm:$0xff] %v19438_v14  ;;  %v1898_v33 = vmul.f32 %v18828_v19, %v1781_v4  ;;  %v19457_v57 = vadd.f32 %v18820_v3, %v1900_v36 }
 0x4a8   : > { %v7420_v34 = vsel %vm7393_vm7, %v7370_v37, %v7372_v12  ;;  %10696 = vrot.lane.b32.xlu1 %v2006_v59, %s14670_s18  ;;  %v14413_v56 = vld [vmem:[#allocation3 + $0x194] ss:$12 sps:$4 sm:$0xff]   ;;  %v6940_v25 = vsel %vm15460_vm4, 0, %v6876_v15 }
 0x4a9   : > { %v7545_v18 = vsel %vm7491_vm8, %v18711_v9, %v7420_v34  ;;  %10698 = vrot.lane.b32.xlu0 %v19411_v28, %s14670_s18  ;;  %v22447_v9 = vld [vmem:[#allocation58_spill] sm:$0xff]  ;;  %v13320_v15 = vpop.f32.mrf.mxu0  ;;  %v7482_v39 = vsel %vm7393_vm7, %v6940_v25, %v18753_v48  ;;  %22449 = vst [vmem:[#allocation187_spill] sm:$0xff] %v19457_v57  ;;  %v1901_v48 = vmul.f32 %v18828_v19, %v22450_v16 }
 0x4aa   : > { %v12813_v12 = vcombine.low %v7480_v24, %v7545_v18  ;;  %v1468_v2 = vadd.f32 %v22448_v32, %v22447_v9  ;;  %v7374_v37 = vpop.permute.xlu1 %7373  ;;  %13753 = vmatmul.mubr.msk.bf16.gmra.mxu1 %vm6848_vm9, %v14413_v56  ;;  %v14605_v9 = vcombine.low %v7480_v24, %v7482_v39 }
 0x4ab   : > { %v19444_v59 = vpop.permute.xlu0 %10586  ;;  %v7421_v7 = vsel %vm7393_vm7, %v7374_v37, %v7376_v46  ;;  %13756 = vmatprep.mubr.msk.bf16.mxu1 %vm6848_vm9, %v14414_v63  ;;  %v13321_v56 = vpop.f32.mrf.mxu0  ;;  %v2012_v63 = vadd.f32 %v18849_v1, %v1898_v33  ;;  %v2015_v37 = vadd.f32 %v18849_v1, %v1901_v48 }
 0x4ac   : > { %7911 = vst [vmem:[#allocation3 + $0x18c] sm:$0xff] %v12813_v12  ;;  %v7547_v34 = vsel %vm7491_vm8, %v18719_v40, %v7421_v7  ;;  %10700 = vrot.lane.b32.xlu1 %v2009_v49, %s14670_s18  ;;  %v1903_v46 = vmul.f32 %v18799_v35, %v1468_v2  ;;  %v19467_v12 = vadd.f32 %v13321_v56, %v13320_v15  ;;  %v14417_v35 = vld [vmem:[#allocation3 + $0x1c4] ss:$12 sps:$4 sm:$0xff]   ;;  %v19472_v36 = vpop.eup %14530  ;;  %v14421_v49 = vld [vmem:[#allocation3 + $0x8] ss:$12 sps:$4 sm:$0xff]  }
 0x4ad   : > { %10702 = vrot.lane.b32.xlu0 %v19438_v14, %s14670_s18  ;;  %v12815_v4 = vcombine.low %v7482_v39, %v7547_v34  ;;  %v14606_v32 = vcombine.low %v7545_v18, %v7547_v34  ;;  %v14420_v2 = vld [vmem:[#allocation3 + $0x4] ss:$12 sps:$4 sm:$0xff]   ;;  %v14418_v56 = vld [vmem:[#allocation3] ss:$12 sps:$4 sm:$0xff]   ;;  %v11421_v16 = vrot.slane %v19472_v36, %v22320_v51  ;;  %v11428_v48 = vrot.slane %v19472_v36, %v18806_v23 }
 0x4ae   : > { %v19463_v25 = vpop.permute.xlu1 %10588  ;;  %22451 = vst [vmem:[#allocation161_spill] sm:$0xff] %v19467_v12  ;;  %v19475_v33 = vadd.f32 %v18820_v3, %v1903_v46  ;;  %v22453_v7 = vld [vmem:[#allocation97_spill] sm:$0xff]  ;;  %v22454_v3 = vld [vmem:[#allocation11_spill] sm:$0xff]  ;;  %v19496_v46 = vpop.f32.mrf.mxu0 }
 0x4af   : > { %v19465_v40 = vpop.permute.xlu0 %10590  ;;  %7913 = vst [vmem:[#allocation3 + $0x198] sm:$0xff] %v12815_v4  ;;  %8660 = vmatprep.mubr.bf16.mxu0 %v14606_v32  ;;  %v1904_v24 = vmul.f32 %v18828_v19, %v22453_v7  ;;  %v11414_v39 = vrot.slane %v19472_v36, %v22454_v3  ;;  %v14425_v32 = vld [vmem:[#allocation3 + $0x20] ss:$12 sps:$4 sm:$0xff]   ;;  %v14432_v51 = vld [vmem:[%s21739_s5 + $0x190] sm:$0xff]   ;;  %v14430_v7 = vld [vmem:[#allocation3 + $0x38] ss:$12 sps:$4 sm:$0xff]  }
 0x4b0   : > { %10704 = vrot.lane.b32.xlu1 %v2012_v63, %s14670_s18  ;;  %22452 = vst [vmem:[#allocation162_spill] sm:$0xff] %v19475_v33  ;;  %8661 = vmatmul.mubr.bf16.gmra.mxu0 %v14605_v9  ;;  %v14426_v63 = vld [vmem:[%s21739_s5 + $0x158] sm:$0xff]   ;;  %v11434_v9 = vsub.s32 3, %v22321_v42  ;;  %v14483_v23 = vld [vmem:[%s21739_s5 + $0x1a0] sm:$0xff]  }
 0x4b1   : > { %10706 = vrot.lane.b32.xlu0 %v19457_v57, %s14670_s18  ;;  %13764 = vmatprep.mubr.msk.bf16.mxu0 %vm6848_vm9, %v14421_v49  ;;  %v2018_v4 = vadd.f32 %v18849_v1, %v1904_v24  ;;  %v11441_v1 = vsub.s32 4, %v22321_v42  ;;  %v14434_v24 = vld [vmem:[%s21739_s5 + $0x150] sm:$0xff]   ;;  %v14438_v57 = vld [vmem:[#allocation3 + $0x80] ss:$12 sps:$4 sm:$0xff]  }
 0x4b2   : > { %v19480_v18 = vpop.permute.xlu1 %10592  ;;  %13757 = vmatmul.mubr.msk.bf16.gmra.mxu1 %vm6848_vm9, %v14417_v35  ;;  %v19508_v35 = vld [vmem:[#allocation3 + $0x1c] ss:$12 sps:$4 sm:$0xff]   ;;  %v11435_v3 = vrot.slane %v19472_v36, %v11434_v9 }
 0x4b3   : > { %v19482_v15 = vpop.permute.xlu0 %10594  ;;  %9274 = vmatprep.mubr.bf16.mxu1 %v14420_v2 }
 0x4b4   : > { %10708 = vrot.lane.b32.xlu1 %v2015_v37, %s14670_s18  ;;  %v19521_v37 = vpop.f32.mrf.mxu0 }
 0x4b5   : > { %10710 = vrot.lane.b32.xlu0 %v19475_v33, %s14670_s18 }
 0x4b6   : > { %v19491_v34 = vpop.permute.xlu1 %10596 }
 0x4b7   : > { %v19493_v19 = vpop.permute.xlu0 %10598 }
 0x4b8   : > { %10712 = vrot.lane.b32.xlu1 %v2018_v4, %s14670_s18  ;;  %13765 = vmatmul.mubr.msk.bf16.vlgmr.msra.gmra.mxu0 %vm6848_vm9, %v14425_v32  ;;  %v11448_v4 = vsub.s32 5, %v22321_v42  ;;  %v14439_v32 = vld [vmem:[%s21739_s5 + $0x188] sm:$0xff]  }
 0x4b9   : > { %11416 = vbcast.lane.b32.xlu0 %v11414_v39, 256  ;;  %13547 = vmatpush3.bf16.msra.mxu0 %v14426_v63  ;;  %v11442_v39 = vrot.slane %v19472_v36, %v11441_v1  ;;  %v14433_v1 = vld [vmem:[#allocation3 + $0x50] ss:$12 sps:$4 sm:$0xff]  }
 0x4ba   : > { %v19510_v2 = vpop.permute.xlu1 %10600  ;;  %9275 = vmatmul.mubr.bf16.vlgmr.msra.gmra.mxu1 %v14418_v56  ;;  %v11455_v56 = vsub.s32 6, %v22321_v42  ;;  %13768 = vmatprep.mubr.msk.bf16.mxu0 %vm6848_vm9, %v14430_v7  ;;  %v19540_v42 = vld [vmem:[#allocation3 + $0x18] ss:$12 sps:$4 sm:$0xff]   ;;  %v11449_v9 = vrot.slane %v19472_v36, %v11448_v4  ;;  %v19544_v7 = vld [vmem:[#allocation3 + $0x34] ss:$12 sps:$4 sm:$0xff]  }
 0x4bb   : > { %v19512_v49 = vpop.permute.xlu0 %10602  ;;  %9282 = vmatprep.mubr.bf16.mxu1 %v19508_v35  ;;  %13797 = vmatpush3.bf16.msra.mxu1 %v19339_v13  ;;  %v13326_v63 = vpop.f32.mrf.mxu0  ;;  %v14448_v4 = vld [vmem:[%s21739_s5 + $0x140] sm:$0xff]  }
 0x4bc   : > { %11423 = vbcast.lane.b32.xlu1 %v11421_v16, 256  ;;  %13548 = vmatprep.subr.bf16.mxu0 %v14432_v51  ;;  %v11456_v13 = vrot.slane %v19472_v36, %v11455_v56  ;;  %v14441_v51 = vld [vmem:[%s21739_s5 + $0x148] sm:$0xff]  }
 0x4bd   : > { %11430 = vbcast.lane.b32.xlu0 %v11428_v48, 256  ;;  %13798 = vmatprep.subr.bf16.mxu1 %v14483_v23  ;;  %v13327_v48 = vpop.f32.mrf.mxu0 }
 0x4be   : > { %v19536_v33 = vpop.permute.xlu1 %10604  ;;  %13549 = vmatpush3.bf16.msra.mxu0 %v14434_v24  ;;  %v19546_v14 = vadd.f32 %v13327_v48, %v13326_v63  ;;  %v14440_v48 = vld [vmem:[#allocation3 + $0x98] ss:$12 sps:$4 sm:$0xff]  }
 0x4bf   : > { %v19538_v16 = vpop.permute.xlu0 %10606  ;;  %13550 = vmatprep.subr.bf16.mxu0 %v14439_v32  ;;  %13799 = vmatpush3.bf16.msra.mxu1 %v14483_v23  ;;  %v11463_v23 = vrot.slane %v19472_v36, %v19247_v10  ;;  %v22456_v32 = vld [vmem:[#allocation165_spill] sm:$0xff]  ;;  %v19577_v10 = vld [vmem:[#allocation3 + $0x4c] ss:$12 sps:$4 sm:$0xff]   ;;  %v19655_v12 = vsel %vm6848_vm9, %v19512_v49, %v19536_v33 }
 0x4c0   : > { %11437 = vbcast.lane.b32.xlu1 %v11435_v3, 256  ;;  %22455 = vst [vmem:[#allocation190_spill] sm:$0xff] %v19546_v14  ;;  %13769 = vmatmul.mubr.msk.bf16.gmra.mxu0 %vm6848_vm9, %v14433_v1  ;;  %v14445_v36 = vld [vmem:[#allocation3 + $0xb0] ss:$12 sps:$4 sm:$0xff]   ;;  %v14449_v49 = vld [vmem:[#allocation3 + $0x78] ss:$12 sps:$4 sm:$0xff]  }
 0x4c1   : > { %11444 = vbcast.lane.b32.xlu0 %v11442_v39, 256  ;;  %v14446_v39 = vld [vmem:[%s21739_s5 + $0x180] sm:$0xff]   ;;  %13772 = vmatprep.mubr.msk.bf16.mxu0 %vm6848_vm9, %v14438_v57  ;;  %v19573_v57 = vld [vmem:[#allocation3 + $0x30] ss:$12 sps:$4 sm:$0xff]  }
 0x4c2   : > { %v19551_v24 = vpop.permute.xlu1 %10608  ;;  %9283 = vmatmul.mubr.bf16.gmra.mxu1 %v19540_v42  ;;  %13551 = vmatpush3.bf16.msra.mxu0 %v14441_v51  ;;  %v22466_v33 = vld [vmem:[#allocation205_spill] sm:$0xff] }
 0x4c3   : > { %v19553_v3 = vpop.permute.xlu0 %10610  ;;  %9290 = vmatprep.mubr.bf16.mxu1 %v19544_v7  ;;  %13552 = vmatprep.subr.bf16.mxu0 %v14446_v39  ;;  %v14455_v39 = vld [vmem:[%s21739_s5 + $0x138] sm:$0xff]  }
 0x4c4   : > { %11451 = vbcast.lane.b32.xlu1 %v11449_v9, 256  ;;  %v19575_v9 = vpop.f32.mrf.mxu0 }
 0x4c5   : > { %11458 = vbcast.lane.b32.xlu0 %v11456_v13, 256  ;;  %v14453_v13 = vld [vmem:[%s21739_s5 + $0x178] sm:$0xff]  }
 0x4c6   : > { %v19567_v56 = vpop.permute.xlu1 %10612  ;;  %13553 = vmatpush3.bf16.msra.mxu0 %v14448_v4  ;;  %v22457_v4 = vld [vmem:[#allocation168_spill] sm:$0xff]  ;;  %v19600_v28 = vpop.f32.mrf.mxu0 }
 0x4c7   : > { %v19569_v63 = vpop.permute.xlu0 %10614  ;;  %13554 = vmatprep.subr.bf16.mxu0 %v14453_v13  ;;  %v22459_v13 = vld [vmem:[#allocation174_spill] sm:$0xff] }
 0x4c8   : > { %11465 = vbcast.lane.b32.xlu1 %v11463_v23, 256  ;;  %13773 = vmatmul.mubr.msk.bf16.gmra.mxu0 %vm6848_vm9, %v14440_v48  ;;  %v14460_v23 = vld [vmem:[%s21739_s5 + $0x170] sm:$0xff]   ;;  %v10715_v48 = vsel %vm6848_vm9, %v19465_v40, %v19480_v18  ;;  %v22460_v40 = vld [vmem:[#allocation182_spill] sm:$0xff] }
 0x4c9   : > { %11563 = vrot.lane.b32.xlu0 %v22456_v32, %s14671_s29  ;;  %13776 = vmatprep.mubr.msk.bf16.mxu0 %vm6848_vm9, %v14445_v36  ;;  %v22458_v32 = vld [vmem:[#allocation170_spill] sm:$0xff]  ;;  %v19619_v18 = vld [vmem:[#allocation3 + $0x48] ss:$12 sps:$4 sm:$0xff]  }
 0x4ca   : > { %v19582_v1 = vpop.permute.xlu1 %10616  ;;  %9291 = vmatmul.mubr.bf16.gmra.mxu1 %v19573_v57  ;;  %13555 = vmatpush3.bf16.msra.mxu0 %v14455_v39  ;;  %22461 = vst [vmem:[#allocation194_spill] sm:$0xff] %v19619_v18 }
 0x4cb   : > { %v19584_v51 = vpop.permute.xlu0 %10618  ;;  %9298 = vmatprep.mubr.bf16.mxu1 %v19577_v10  ;;  %13556 = vmatprep.subr.bf16.mxu0 %v14460_v23  ;;  %v14452_v23 = vld [vmem:[#allocation3 + $0xf8] ss:$12 sps:$4 sm:$0xff]  }
 0x4cc   : > { %11565 = vrot.lane.b32.xlu1 %v22457_v4, %s14671_s29  ;;  %v10714_v4 = vsel %vm6848_vm9, %v19444_v59, %v19463_v25  ;;  %v14462_v59 = vld [vmem:[%s21739_s5 + $0x130] sm:$0xff]   ;;  %v10717_v25 = vsel %vm6848_vm9, %v19493_v19, %v19510_v2  ;;  %v22463_v19 = vld [vmem:[#allocation195_spill] sm:$0xff] }
 0x4cd   : > { %11567 = vrot.lane.b32.xlu0 %v22458_v32, %s14671_s29  ;;  %v10716_v32 = vsel %vm6848_vm9, %v19482_v15, %v19491_v34  ;;  %v10779_v39 = vadd.f32 %v10715_v48, %v10714_v4  ;;  %v14467_v4 = vld [vmem:[%s21739_s5 + $0x168] sm:$0xff]   ;;  %v14454_v2 = vld [vmem:[#allocation3 + $0x110] ss:$12 sps:$4 sm:$0xff]  }
 0x4ce   : > { %v19605_v27 = vpop.permute.xlu1 %10620  ;;  %v13332_v50 = vpop.f32.mrf.mxu0  ;;  %13557 = vmatpush3.bf16.msra.mxu0 %v14462_v59  ;;  %v10781_v58 = vadd.f32 %v10717_v25, %v10716_v32 }
 0x4cf   : > { %v19607_v36 = vpop.permute.xlu0 %10622  ;;  %13558 = vmatprep.subr.bf16.mxu0 %v14467_v4 }
 0x4d0   : > { %11569 = vrot.lane.b32.xlu1 %v22459_v13, %s14671_s29  ;;  %v13333_v14 = vpop.f32.mrf.mxu0  ;;  %13777 = vmatmul.mubr.msk.bf16.gmra.mxu0 %vm6848_vm9, %v14447_v22  ;;  %v10780_v13 = vadd.f32 %v10716_v32, %v10715_v48 }
 0x4d1   : > { %11571 = vrot.lane.b32.xlu0 %v22460_v40, %s14671_s29  ;;  %v10811_v40 = vadd.f32 %v10779_v39, %v10716_v32  ;;  %13780 = vmatprep.mubr.msk.bf16.mxu0 %vm6848_vm9, %v14452_v23  ;;  %v19645_v48 = vadd.f32 %v13333_v14, %v13332_v50  ;;  %v22465_v23 = vld [vmem:[#allocation200_spill] sm:$0xff]  ;;  %v19672_v32 = vld [vmem:[#allocation3 + $0x94] ss:$12 sps:$4 sm:$0xff]  }
 0x4d2   : > { %v19627_v15 = vpop.permute.xlu1 %10624  ;;  %9299 = vmatmul.mubr.bf16.gmra.mxu1 %v19619_v18  ;;  %v10812_v18 = vadd.f32 %v10780_v13, %v10717_v25  ;;  %v22468_v50 = vld [vmem:[#allocation145_spill] sm:$0xff] }
 0x4d3   : > { %v19629_v34 = vpop.permute.xlu0 %10626  ;;  %9306 = vmatprep.mubr.bf16.mxu1 %v14451_v30  ;;  %22464 = vst [vmem:[#allocation163_spill] sm:$0xff] %v19645_v48  ;;  %v14469_v30 = vld [vmem:[%s21739_s5 + $0x128] sm:$0xff]   ;;  %v10875_v59 = vrot.slane %v10811_v40, 7  ;;  %v10813_v40 = vadd.f32 %v10781_v58, %v19655_v12  ;;  %v14476_v58 = vld [vmem:[%s21739_s5 + $0x120] sm:$0xff]  }
 0x4d4   : > { %11573 = vrot.lane.b32.xlu1 %v22462_v26, %s14671_s29  ;;  %v10876_v48 = vrot.slane %v10812_v18, 7  ;;  %v14459_v26 = vld [vmem:[#allocation3 + $0x128] ss:$12 sps:$4 sm:$0xff]   ;;  %13559 = vmatpush3.bf16.msra.mxu0 %v14469_v30 }
 0x4d5   : > { %11575 = vrot.lane.b32.xlu0 %v22463_v19, %s14671_s29  ;;  %v10874_v19 = vrot.slane %v10779_v39, 7  ;;  %v19693_v61 = vsel %vm2371_vm0, 0.0, %v10875_v59  ;;  %v19696_v6 = vsel %vm2371_vm0, %v10875_v59, 0.0  ;;  %v10877_v18 = vrot.slane %v10813_v40, 7 }
 0x4d6   : > { %v19657_v22 = vpop.permute.xlu1 %10628  ;;  %v11071_v11 = vrot.slane %v19693_v61, 1 }
 0x4d7   : > { %v19659_v13 = vpop.permute.xlu0 %10630  ;;  %v19678_v39 = vsel %vm2371_vm0, 0.0, %v10874_v19  ;;  %v10971_v4 = vsel %vm2371_vm0, %v10874_v19, 0.0  ;;  %v22467_v19 = vld [vmem:[#allocation130_spill] sm:$0xff] }
 0x4d8   : > { %11577 = vrot.lane.b32.xlu1 %v22465_v23, %s14671_s29  ;;  %v14474_v23 = vld [vmem:[%s21739_s5 + $0x160] sm:$0xff]   ;;  %13781 = vmatmul.mubr.msk.bf16.gmra.mxu0 %vm6848_vm9, %v14454_v2  ;;  %v19701_v2 = vsel %vm6848_vm9, %v19538_v16, %v19551_v24  ;;  %v11068_v16 = vrot.slane %v19678_v39, 1  ;;  %v19714_v24 = vsel %vm2371_vm0, 0.0, %v10876_v48  ;;  %v11229_v40 = vrot.slane %v19678_v39, 2 }
 0x4d9   : > { %11579 = vrot.lane.b32.xlu0 %v22466_v33, %s14671_s29  ;;  %13784 = vmatprep.mubr.msk.bf16.mxu0 %vm6848_vm9, %v14459_v26  ;;  %v19717_v26 = vsel %vm2371_vm0, %v10876_v48, 0.0  ;;  %v19730_v48 = vadd.f32 %v19194_v17, %v19170_v8  ;;  %v11230_v0 = vrot.slane %v10971_v4, 2  ;;  %v22471_v8 = vld [vmem:[#allocation147_spill] sm:$0xff] }
 0x4da   : > { %v19680_v33 = vpop.permute.xlu1 %10632  ;;  %9307 = vmatmul.mubr.bf16.gmra.mxu1 %v14449_v49  ;;  %v10782_v49 = vadd.f32 %v19655_v12, %v10717_v25  ;;  %v19719_v25 = vpop.f32.mrf.mxu0  ;;  %13560 = vmatprep.subr.bf16.mxu0 %v14474_v23  ;;  %v10720_v23 = vsel %vm6848_vm9, %v19553_v3, %v19567_v56  ;;  %v11075_v55 = vrot.slane %v19717_v26, 1  ;;  %v14461_v17 = vld [vmem:[#allocation3 + $0x140] ss:$12 sps:$4 sm:$0xff]   ;;  %v19748_v3 = vadd.f32 %v19334_v41, %v19309_v60 }
 0x4db   : > { %v19682_v14 = vpop.permute.xlu0 %10634  ;;  %9314 = vmatprep.mubr.bf16.mxu1 %v19672_v32  ;;  %13561 = vmatpush3.bf16.msra.mxu0 %v14476_v58  ;;  %22469 = vst [vmem:[#allocation197_spill] sm:$0xff] %v19730_v48  ;;  %v10783_v58 = vadd.f32 %v19701_v2, %v19655_v12  ;;  %v19752_v56 = vadd.f32 %v19435_v54, %v19413_v20  ;;  %v19758_v12 = vsel %vm2371_vm0, %v10877_v18, 0.0  ;;  %v11232_v54 = vrot.slane %v19693_v61, 2  ;;  %v22485_v48 = vld [vmem:[#allocation179_spill] sm:$0xff] }
 0x4dc   : > { %11581 = vrot.lane.b32.xlu1 %v22467_v19, %s14671_s29  ;;  %v11069_v19 = vrot.slane %v10971_v4, 1  ;;  %v10814_v59 = vadd.f32 %v10782_v49, %v19701_v2  ;;  %v11074_v49 = vrot.slane %v19714_v24, 1  ;;  %22472 = vst [vmem:[#allocation198_spill] sm:$0xff] %v19748_v3  ;;  %v19755_v4 = vsel %vm2371_vm0, 0.0, %v10877_v18 }
 0x4dd   : > { %11583 = vrot.lane.b32.xlu0 %v22468_v50, %s14671_s29  ;;  %v11072_v50 = vrot.slane %v19696_v6, 1  ;;  %22473 = vst [vmem:[#allocation119_spill] sm:$0xff] %v19752_v56  ;;  %v10815_v62 = vadd.f32 %v10783_v58, %v10720_v23  ;;  %v11233_v18 = vrot.slane %v19696_v6, 2  ;;  %v19776_v56 = vadd.f32 %v19521_v37, %v19496_v46  ;;  %v22475_v46 = vld [vmem:[#allocation100_spill] sm:$0xff]  ;;  %v22476_v37 = vld [vmem:[#allocation114_spill] sm:$0xff] }
 0x4de   : > { %v19724_v30 = vpop.permute.xlu1 %10636  ;;  %v11070_v29 = vsel %vm11067_vm14, %v11068_v16, %v11069_v19  ;;  %v10878_v41 = vrot.slane %v10814_v59, 7  ;;  %v11076_v59 = vsel %vm11067_vm14, %v11074_v49, %v11075_v55  ;;  %v11077_v19 = vrot.slane %v19755_v4, 1 }
 0x4df   : > { %v19726_v47 = vpop.permute.xlu0 %10638  ;;  %v11073_v60 = vsel %vm11067_vm14, %v11071_v11, %v11072_v50  ;;  %22474 = vst [vmem:[#allocation118_spill] sm:$0xff] %v19776_v56  ;;  %v11231_v11 = vsel %vm11228_vm15, %v11229_v40, %v11230_v0  ;;  %v11078_v50 = vrot.slane %v19758_v12, 1  ;;  %v10721_v6 = vsel %vm6848_vm9, %v19569_v63, %v19582_v1 }
 0x4e0   : > { %11585 = vrot.lane.b32.xlu1 %v22470_v44, %s14671_s29  ;;  %v19760_v44 = vpop.f32.mrf.mxu0  ;;  %13785 = vmatmul.mubr.msk.bf16.gmra.mxu0 %vm6848_vm9, %v14461_v17  ;;  %v11196_v58 = vadd.f32 %v11070_v29, %v19678_v39  ;;  %v11197_v0 = vadd.f32 %v11073_v60, %v19693_v61  ;;  %v11235_v55 = vrot.slane %v19714_v24, 2  ;;  %v10784_v40 = vadd.f32 %v10720_v23, %v19701_v2 }
 0x4e1   : > { %11587 = vrot.lane.b32.xlu0 %v22471_v8, %s14671_s29  ;;  %v14466_v8 = vld [vmem:[#allocation3 + $0x170] ss:$12 sps:$4 sm:$0xff]   ;;  %v11236_v17 = vrot.slane %v19717_v26, 2  ;;  %v19800_v63 = vsel %vm2371_vm0, %v10878_v41, 0.0  ;;  %v10879_v1 = vrot.slane %v10815_v62, 7  ;;  %v11198_v29 = vadd.f32 %v11076_v59, %v19714_v24 }
 0x4e2   : > { %v19766_v21 = vpop.permute.xlu1 %10640  ;;  %9315 = vmatmul.mubr.bf16.gmra.mxu1 %v19736_v5  ;;  %v13338_v16 = vpop.f32.mrf.mxu0  ;;  %13788 = vmatprep.mubr.msk.bf16.mxu0 %vm6848_vm9, %v14466_v8  ;;  %v19797_v8 = vsel %vm2371_vm0, 0.0, %v10878_v41  ;;  %v10816_v61 = vadd.f32 %v10784_v40, %v10721_v6  ;;  %v11234_v2 = vsel %vm11228_vm15, %v11232_v54, %v11233_v18  ;;  %v11079_v26 = vsel %vm11067_vm14, %v11077_v19, %v11078_v50  ;;  %v22478_v62 = vld [vmem:[#allocation150_spill] sm:$0xff]  ;;  %v14468_v24 = vld [vmem:[#allocation3 + $0x188] ss:$12 sps:$4 sm:$0xff]   ;;  %v19821_v18 = vld [vmem:[#allocation3 + $0xc4] ss:$12 sps:$4 sm:$0xff]  }
 0x4e3   : > { %v19768_v20 = vpop.permute.xlu0 %10642  ;;  %9322 = vmatprep.mubr.bf16.mxu1 %v19762_v52  ;;  %v11238_v60 = vrot.slane %v19755_v4, 2  ;;  %v11239_v56 = vrot.slane %v19758_v12, 2  ;;  %v10785_v41 = vadd.f32 %v10721_v6, %v10720_v23  ;;  %v11081_v54 = vrot.slane %v19800_v63, 1  ;;  %v14473_v59 = vld [vmem:[#allocation3 + $0x1a0] ss:$12 sps:$4 sm:$0xff]  }
 0x4e4   : > { %11589 = vrot.lane.b32.xlu1 %v22475_v46, %s14671_s29  ;;  %v13339_v49 = vpop.f32.mrf.mxu0  ;;  %v19823_v19 = vadd.f32 %v11231_v11, %v11196_v58  ;;  %v19825_v12 = vadd.f32 %v11234_v2, %v11197_v0  ;;  %v19828_v23 = vsel %vm2371_vm0, 0.0, %v10879_v1  ;;  %v19831_v50 = vsel %vm2371_vm0, %v10879_v1, 0.0 }
 0x4e5   : > { %11591 = vrot.lane.b32.xlu0 %v22476_v37, %s14671_s29  ;;  %v19807_v39 = vadd.f32 %v13339_v49, %v13338_v16  ;;  %v11080_v16 = vrot.slane %v19797_v8, 1  ;;  %v11237_v11 = vsel %vm11228_vm15, %v11235_v55, %v11236_v17  ;;  %v11199_v58 = vadd.f32 %v11079_v26, %v19755_v4  ;;  %v22481_v55 = vld [vmem:[#allocation186_spill] sm:$0xff] }
 0x4e6   : > { %v19802_v46 = vpop.permute.xlu1 %10644  ;;  %v10880_v0 = vrot.slane %v10816_v61, 7  ;;  %v19846_v49 = vadd.f32 %v19600_v28, %v19575_v9  ;;  %v10722_v1 = vsel %vm6848_vm9, %v19584_v51, %v19605_v27  ;;  %v10724_v4 = vsel %vm6848_vm9, %v19629_v34, %v19657_v22  ;;  %v22482_v28 = vld [vmem:[#allocation153_spill] sm:$0xff]  ;;  %v19866_v27 = vpop.f32.mrf.mxu0 }
 0x4e7   : > { %v19804_v37 = vpop.permute.xlu0 %10646  ;;  %22477 = vst [vmem:[#allocation204_spill] sm:$0xff] %v19807_v39  ;;  %v11240_v9 = vsel %vm11228_vm15, %v11238_v60, %v11239_v56  ;;  %v11082_v17 = vsel %vm11067_vm14, %v11080_v16, %v11081_v54  ;;  %v11084_v61 = vrot.slane %v19831_v50, 1  ;;  %v11241_v51 = vrot.slane %v19797_v8, 2  ;;  %v19884_v54 = vld [vmem:[#allocation3 + $0xc0] ss:$12 sps:$4 sm:$0xff]  }
 0x4e8   : > { %11593 = vrot.lane.b32.xlu1 %v22478_v62, %s14671_s29  ;;  %13789 = vmatmul.mubr.msk.bf16.gmra.mxu0 %vm6848_vm9, %v14468_v24  ;;  %22480 = vst [vmem:[#allocation202_spill] sm:$0xff] %v19846_v49  ;;  %v11242_v34 = vrot.slane %v19800_v63, 2  ;;  %v11244_v22 = vrot.slane %v19828_v23, 2  ;;  %v10725_v26 = vsel %vm6848_vm9, %v19659_v13, %v19680_v33  ;;  %v19882_v62 = vsel %vm2371_vm0, %v10880_v0, 0.0 }
 0x4e9   : > { %11595 = vrot.lane.b32.xlu0 %v22479_v53, %s14671_s29  ;;  %v10723_v53 = vsel %vm6848_vm9, %v19607_v36, %v19627_v15  ;;  %13792 = vmatprep.mubr.msk.bf16.mxu0 %vm6848_vm9, %v14473_v59  ;;  %v19850_v36 = vadd.f32 %v11237_v11, %v11198_v29  ;;  %v10881_v15 = vrot.slane %v10785_v41, 7  ;;  %v11083_v29 = vrot.slane %v19828_v23, 1  ;;  %v22483_v11 = vld [vmem:[#allocation146_spill] sm:$0xff] }
 0x4ea   : > { %v19836_v6 = vpop.permute.xlu1 %10648  ;;  %9323 = vmatmul.mubr.bf16.gmra.mxu1 %v19817_v45  ;;  %v10787_v2 = vadd.f32 %v10723_v53, %v10722_v1  ;;  %v19879_v41 = vsel %vm2371_vm0, 0.0, %v10880_v0  ;;  %v10788_v24 = vadd.f32 %v10724_v4, %v10723_v53  ;;  %v11200_v63 = vadd.f32 %v11082_v17, %v19797_v8  ;;  %v22484_v0 = vld [vmem:[#allocation154_spill] sm:$0xff]  ;;  %v19899_v8 = vpop.f32.mrf.mxu0 }
 0x4eb   : > { %v19838_v40 = vpop.permute.xlu0 %10650  ;;  %9330 = vmatprep.mubr.bf16.mxu1 %v19821_v18  ;;  %v11245_v59 = vrot.slane %v19831_v50, 2  ;;  %v19889_v13 = vsel %vm2371_vm0, 0.0, %v10881_v15  ;;  %v19892_v33 = vsel %vm2371_vm0, %v10881_v15, 0.0  ;;  %v14475_v53 = vld [vmem:[#allocation3 + $0x1b8] ss:$12 sps:$4 sm:$0xff]   ;;  %v11085_v1 = vsel %vm11067_vm14, %v11083_v29, %v11084_v61 }
 0x4ec   : > { %11597 = vrot.lane.b32.xlu1 %v22481_v55, %s14671_s29  ;;  %v10819_v16 = vadd.f32 %v10787_v2, %v10724_v4  ;;  %v10882_v55 = vrot.slane %v10787_v2, 7  ;;  %v14479_v50 = vld [vmem:[#allocation3 + $0xf4] ss:$12 sps:$4 sm:$0xff]   ;;  %v19901_v17 = vadd.f32 %v11240_v9, %v11199_v58  ;;  %v11086_v39 = vrot.slane %v19879_v41, 1 }
 0x4ed   : > { %11599 = vrot.lane.b32.xlu0 %v22482_v28, %s14671_s29  ;;  %v10820_v28 = vadd.f32 %v10788_v24, %v10725_v26  ;;  %v11087_v15 = vrot.slane %v19882_v62, 1  ;;  %v11243_v58 = vsel %vm11228_vm15, %v11241_v51, %v11242_v34  ;;  %v11089_v9 = vrot.slane %v19889_v13, 1  ;;  %v22486_v51 = vld [vmem:[#allocation181_spill] sm:$0xff] }
 0x4ee   : > { %v19874_v56 = vpop.permute.xlu1 %10652  ;;  %v11090_v29 = vrot.slane %v19892_v33, 1  ;;  %v10883_v61 = vrot.slane %v10819_v16, 7  ;;  %v10789_v2 = vadd.f32 %v10725_v26, %v10724_v4  ;;  %v19928_v34 = vadd.f32 %v11243_v58, %v11200_v63 }
 0x4ef   : > { %v19876_v60 = vpop.permute.xlu0 %10654  ;;  %v11246_v16 = vsel %vm11228_vm15, %v11244_v22, %v11245_v59  ;;  %v19932_v4 = vsel %vm2371_vm0, 0.0, %v10882_v55  ;;  %v10727_v63 = vsel %vm6848_vm9, %v19726_v47, %v19766_v21  ;;  %v11251_v21 = vrot.slane %v19892_v33, 2  ;;  %v19971_v33 = vld [vmem:[#allocation3 + $0x10c] ss:$12 sps:$4 sm:$0xff]  }
 0x4f0   : > { %11601 = vrot.lane.b32.xlu1 %v22483_v11, %s14671_s29  ;;  %v19908_v11 = vsel %vm6848_vm9, %v19682_v14, %v19724_v30  ;;  %13793 = vmatmul.mubr.msk.bf16.gmra.mxu0 %vm6848_vm9, %v14475_v53  ;;  %v13344_v24 = vpop.f32.mrf.mxu0  ;;  %v19921_v14 = vadd.f32 %v11085_v1, %v19828_v23  ;;  %v11247_v30 = vrot.slane %v19879_v41, 2  ;;  %v10884_v23 = vrot.slane %v10820_v28, 7 }
 0x4f1   : > { %11603 = vrot.lane.b32.xlu0 %v22484_v0, %s14671_s29  ;;  %10094 = vmatprep.mubr.bf16.mxu0 %v19508_v35  ;;  %v19935_v35 = vsel %vm2371_vm0, %v10882_v55, 0.0  ;;  %v10821_v53 = vadd.f32 %v10789_v2, %v19908_v11  ;;  %v11091_v55 = vsel %vm11067_vm14, %v11089_v9, %v11090_v29  ;;  %v19951_v28 = vsel %vm2371_vm0, 0.0, %v10883_v61  ;;  %v22489_v9 = vld [vmem:[#allocation122_spill] sm:$0xff] }
 0x4f2   : > { %v19910_v0 = vpop.permute.xlu1 %10656  ;;  %9331 = vmatmul.mubr.bf16.gmra.mxu1 %v19884_v54  ;;  %v13345_v1 = vpop.f32.mrf.mxu0  ;;  %v19954_v2 = vsel %vm2371_vm0, %v10883_v61, 0.0  ;;  %v11092_v47 = vrot.slane %v19932_v4, 1  ;;  %v14477_v29 = vld [vmem:[#allocation3 + $0xf0] ss:$12 sps:$4 sm:$0xff]   ;;  %v19966_v61 = vsel %vm2371_vm0, 0.0, %v10884_v23  ;;  %v19977_v3 = vadd.f32 %v11091_v55, %v19889_v13 }
 0x4f3   : > { %v19912_v49 = vpop.permute.xlu0 %10658  ;;  %9338 = vmatprep.mubr.bf16.mxu1 %v14479_v50  ;;  %v11088_v50 = vsel %vm11067_vm14, %v11086_v39, %v11087_v15  ;;  %v19947_v59 = vadd.f32 %v13345_v1, %v13344_v24  ;;  %v10790_v39 = vadd.f32 %v19908_v11, %v10725_v26  ;;  %v11093_v15 = vrot.slane %v19935_v35, 1  ;;  %v22488_v24 = vld [vmem:[#allocation155_spill] sm:$0xff] }
 0x4f4   : > { %11605 = vrot.lane.b32.xlu1 %v22485_v48, %s14671_s29  ;;  %v11248_v48 = vrot.slane %v19882_v62, 2  ;;  %v11250_v62 = vrot.slane %v19889_v13, 2  ;;  %v19969_v26 = vsel %vm2371_vm0, %v10884_v23, 0.0  ;;  %v11253_v23 = vrot.slane %v19932_v4, 2 }
 0x4f5   : > { %11607 = vrot.lane.b32.xlu0 %v22486_v51, %s14671_s29  ;;  %22487 = vst [vmem:[#allocation203_spill] sm:$0xff] %v19947_v59  ;;  %v10885_v51 = vrot.slane %v10821_v53, 7  ;;  %v10822_v1 = vadd.f32 %v10790_v39, %v10727_v63  ;;  %v19974_v59 = vadd.f32 %v11088_v50, %v19879_v41  ;;  %v19989_v41 = vadd.f32 %v19760_v44, %v19719_v25  ;;  %v22491_v25 = vld [vmem:[#allocation156_spill] sm:$0xff]  ;;  %v22492_v44 = vld [vmem:[#allocation106_spill] sm:$0xff] }
 0x4f6   : > { %v19943_v58 = vpop.permute.xlu1 %10660  ;;  %v10728_v13 = vsel %vm6848_vm9, %v19768_v20, %v19802_v46  ;;  %v11249_v53 = vsel %vm11228_vm15, %v11247_v30, %v11248_v48  ;;  %v11094_v50 = vsel %vm11067_vm14, %v11092_v47, %v11093_v15  ;;  %v11099_v55 = vrot.slane %v19969_v26, 1  ;;  %v20012_v48 = vpop.f32.mrf.mxu0 }
 0x4f7   : > { %v19945_v22 = vpop.permute.xlu0 %10662  ;;  %22490 = vst [vmem:[#allocation99_spill] sm:$0xff] %v19989_v41  ;;  %v10791_v39 = vadd.f32 %v10727_v63, %v19908_v11  ;;  %v11254_v20 = vrot.slane %v19935_v35, 2  ;;  %v20010_v46 = vsel %vm2371_vm0, %v10885_v51, 0.0  ;;  %v10886_v30 = vrot.slane %v10822_v1, 7 }
 0x4f8   : > { %11609 = vrot.lane.b32.xlu1 %v22488_v24, %s14671_s29  ;;  %v11095_v24 = vrot.slane %v19951_v28, 1  ;;  %10095 = vmatmul.mubr.bf16.vlgmr.msra.gmra.mxu0 %v19540_v42  ;;  %v11098_v42 = vrot.slane %v19966_v61, 1  ;;  %v20021_v35 = vadd.f32 %v11246_v16, %v19921_v14  ;;  %v11257_v1 = vrot.slane %v19954_v2, 2  ;;  %v22493_v14 = vld [vmem:[#allocation135_spill] sm:$0xff]  ;;  %v22494_v16 = vld [vmem:[#allocation133_spill] sm:$0xff] }
 0x4f9   : > { %11611 = vrot.lane.b32.xlu0 %v22489_v9, %s14671_s29  ;;  %v11096_v9 = vrot.slane %v19954_v2, 1  ;;  %10102 = vmatprep.mubr.bf16.mxu0 %v19544_v7  ;;  %v20007_v7 = vsel %vm2371_vm0, 0.0, %v10885_v51  ;;  %v10823_v11 = vadd.f32 %v10791_v39, %v10728_v13  ;;  %v11256_v51 = vrot.slane %v19951_v28, 2 }
 0x4fa   : > { %v19981_v43 = vpop.permute.xlu1 %10664  ;;  %9339 = vmatmul.mubr.bf16.gmra.mxu1 %v14477_v29  ;;  %v11101_v39 = vrot.slane %v20007_v7, 1  ;;  %v11102_v41 = vrot.slane %v20010_v46, 1 }
 0x4fb   : > { %v19983_v31 = vpop.permute.xlu0 %10666  ;;  %9346 = vmatprep.mubr.bf16.mxu1 %v19971_v33  ;;  %v11097_v47 = vsel %vm11067_vm14, %v11095_v24, %v11096_v9  ;;  %v10729_v24 = vsel %vm6848_vm9, %v19804_v37, %v19836_v6  ;;  %v11100_v9 = vsel %vm11067_vm14, %v11098_v42, %v11099_v55  ;;  %v20043_v37 = vsel %vm2371_vm0, %v10886_v30, 0.0  ;;  %v20045_v6 = vpop.f32.mrf.mxu0 }
 0x4fc   : > { %11613 = vrot.lane.b32.xlu1 %v22491_v25, %s14671_s29  ;;  %v11252_v25 = vsel %vm11228_vm15, %v11250_v62, %v11251_v21  ;;  %v10792_v62 = vadd.f32 %v10728_v13, %v10727_v63  ;;  %v11205_v2 = vadd.f32 %v11097_v47, %v19951_v28  ;;  %v20040_v21 = vsel %vm2371_vm0, 0.0, %v10886_v30 }
 0x4fd   : > { %11615 = vrot.lane.b32.xlu0 %v22492_v44, %s14671_s29  ;;  %v11204_v44 = vadd.f32 %v11094_v50, %v19932_v4  ;;  %v20036_v4 = vld [vmem:[#allocation3 + $0x108] ss:$12 sps:$4 sm:$0xff]   ;;  %v20047_v50 = vld [vmem:[#allocation3 + $0x124] ss:$12 sps:$4 sm:$0xff]   ;;  %v11255_v63 = vsel %vm11228_vm15, %v11253_v23, %v11254_v20  ;;  %v11259_v42 = vrot.slane %v19966_v61, 2  ;;  %v11260_v55 = vrot.slane %v19969_v26, 2 }
 0x4fe   : > { %v20015_v15 = vpop.permute.xlu1 %10668  ;;  %22495 = vst [vmem:[#allocation144_spill] sm:$0xff] %v20036_v4  ;;  %22496 = vst [vmem:[#allocation171_spill] sm:$0xff] %v20047_v50  ;;  %v11206_v30 = vadd.f32 %v11100_v9, %v19966_v61  ;;  %v11262_v47 = vrot.slane %v20007_v7, 2  ;;  %v11263_v23 = vrot.slane %v20010_v46, 2  ;;  %v11258_v26 = vsel %vm11228_vm15, %v11256_v51, %v11257_v1  ;;  %v22497_v61 = vld [vmem:[#allocation141_spill] sm:$0xff]  ;;  %v22498_v9 = vld [vmem:[#allocation127_spill] sm:$0xff] }
 0x4ff   : > { %v20017_v29 = vpop.permute.xlu0 %10670  ;;  %v20077_v51 = vadd.f32 %v11255_v63, %v11204_v44  ;;  %v11265_v63 = vrot.slane %v20040_v21, 2 }
 0x500   : > { %11617 = vrot.lane.b32.xlu1 %v22493_v14, %s14671_s29  ;;  %v10887_v14 = vrot.slane %v10823_v11, 7  ;;  %10103 = vmatmul.mubr.bf16.gmra.mxu0 %v19573_v57  ;;  %v13350_v20 = vpop.f32.mrf.mxu0  ;;  %v11103_v11 = vsel %vm11067_vm14, %v11101_v39, %v11102_v41  ;;  %v10793_v57 = vadd.f32 %v10729_v24, %v10728_v13  ;;  %v20079_v41 = vadd.f32 %v11258_v26, %v11205_v2  ;;  %v20104_v26 = vld [vmem:[#allocation3 + $0x120] ss:$12 sps:$4 sm:$0xff]  }
 0x501   : > { %11619 = vrot.lane.b32.xlu0 %v22494_v16, %s14671_s29  ;;  %v10824_v16 = vadd.f32 %v10792_v62, %v10729_v24  ;;  %10110 = vmatprep.mubr.bf16.mxu0 %v19577_v10  ;;  %v11104_v62 = vrot.slane %v20040_v21, 1  ;;  %v20075_v10 = vadd.f32 %v11252_v25, %v19977_v3  ;;  %v11207_v3 = vadd.f32 %v11103_v11, %v20007_v7 }
 0x502   : > { %v20052_v38 = vpop.permute.xlu1 %10672  ;;  %9347 = vmatmul.mubr.bf16.gmra.mxu1 %v20036_v4  ;;  %v11105_v4 = vrot.slane %v20043_v37, 1  ;;  %v13351_v46 = vpop.f32.mrf.mxu0  ;;  %v20082_v1 = vsel %vm2371_vm0, 0.0, %v10887_v14  ;;  %v20085_v13 = vsel %vm2371_vm0, %v10887_v14, 0.0  ;;  %v10889_v14 = vrot.slane %v10793_v57, 7  ;;  %22502 = vst [vmem:[#allocation121_spill] sm:$0xff] %v20104_v26 }
 0x503   : > { %v20054_v28 = vpop.permute.xlu0 %10674  ;;  %9354 = vmatprep.mubr.bf16.mxu1 %v20047_v50  ;;  %v20072_v50 = vadd.f32 %v11249_v53, %v19974_v59  ;;  %v10888_v24 = vrot.slane %v10824_v16, 7  ;;  %v11261_v59 = vsel %vm11228_vm15, %v11259_v42, %v11260_v55  ;;  %v10731_v53 = vsel %vm6848_vm9, %v19876_v60, %v19910_v0  ;;  %v22501_v16 = vld [vmem:[#allocation126_spill] sm:$0xff] }
 0x504   : > { %11621 = vrot.lane.b32.xlu1 %v22497_v61, %s14671_s29  ;;  %v20096_v25 = vadd.f32 %v13351_v46, %v13350_v20  ;;  %v20098_v44 = vadd.f32 %v11261_v59, %v11206_v30  ;;  %v11106_v2 = vsel %vm11067_vm14, %v11104_v62, %v11105_v4  ;;  %v11264_v7 = vsel %vm11228_vm15, %v11262_v47, %v11263_v23  ;;  %v20115_v55 = vld [vmem:[#allocation3 + $0x13c] ss:$12 sps:$4 sm:$0xff]   ;;  %v14492_v30 = vld [vmem:[#allocation3 + $0x64] ss:$12 sps:$4 sm:$0xff]  }
 0x505   : > { %11623 = vrot.lane.b32.xlu0 %v22498_v9, %s14671_s29  ;;  %v11107_v42 = vrot.slane %v20082_v1, 1  ;;  %v11108_v60 = vrot.slane %v20085_v13, 1  ;;  %v10730_v0 = vsel %vm6848_vm9, %v19838_v40, %v19874_v56  ;;  %v10732_v4 = vsel %vm6848_vm9, %v19912_v49, %v19943_v58  ;;  %22503 = vst [vmem:[#allocation120_spill] sm:$0xff] %v20115_v55  ;;  %v22504_v40 = vld [vmem:[#allocation194_spill] sm:$0xff] }
 0x506   : > { %v20087_v39 = vpop.permute.xlu1 %10676  ;;  %22499 = vst [vmem:[#allocation101_spill] sm:$0xff] %v20096_v25  ;;  %22500 = vst [vmem:[#allocation115_spill] sm:$0xff] %v20098_v44  ;;  %v11266_v20 = vrot.slane %v20043_v37, 2  ;;  %v20119_v11 = vsel %vm2371_vm0, 0.0, %v10888_v24  ;;  %v20122_v47 = vsel %vm2371_vm0, %v10888_v24, 0.0  ;;  %v10795_v23 = vadd.f32 %v10731_v53, %v10730_v0 }
 0x507   : > { %v20089_v61 = vpop.permute.xlu0 %10678  ;;  %v11208_v49 = vadd.f32 %v11106_v2, %v20040_v21  ;;  %v11268_v56 = vrot.slane %v20082_v1, 2  ;;  %v11269_v58 = vrot.slane %v20085_v13, 2  ;;  %v10733_v37 = vsel %vm6848_vm9, %v19945_v22, %v19981_v43  ;;  %v20149_v22 = vpop.f32.mrf.mxu0 }
 0x508   : > { %11625 = vrot.lane.b32.xlu1 %v22501_v16, %s14671_s29  ;;  %10111 = vmatmul.mubr.bf16.gmra.mxu0 %v22504_v40  ;;  %v20138_v9 = vsel %vm2371_vm0, 0.0, %v10889_v14  ;;  %v20141_v46 = vsel %vm2371_vm0, %v10889_v14, 0.0  ;;  %v10796_v24 = vadd.f32 %v10732_v4, %v10731_v53  ;;  %v10827_v59 = vadd.f32 %v10795_v23, %v10732_v4  ;;  %s272_s29 = sand.u32 1, %s14659_s25  }
 0x509   : > { %10118 = vmatprep.mubr.bf16.mxu0 %v14492_v30  ;;  %v11109_v21 = vsel %vm11067_vm14, %v11107_v42, %v11108_v60  ;;  %v11110_v2 = vrot.slane %v20119_v11, 1  ;;  %v11111_v13 = vrot.slane %v20122_v47, 1  ;;  %v10734_v43 = vsel %vm6848_vm9, %v19983_v31, %v20015_v15  ;;  %s20443_s16 = smul.u32 768, %s272_s29 }
 0x50a   : > { %v20124_v62 = vpop.permute.xlu1 %10680  ;;  %9355 = vmatmul.mubr.bf16.gmra.mxu1 %v20104_v26  ;;  %v20153_v16 = vadd.f32 %v19899_v8, %v19866_v27  ;;  %v10890_v14 = vrot.slane %v10795_v23, 7  ;;  %v10797_v0 = vadd.f32 %v10733_v37, %v10732_v4  ;;  %v10828_v53 = vadd.f32 %v10796_v24, %v10733_v37  ;;  %v20165_v8 = vld [vmem:[#allocation3 + $0x138] ss:$12 sps:$4 sm:$0xff]   ;;  %v14490_v4 = vld [vmem:[#allocation3 + $0x60] ss:$12 sps:$4 sm:$0xff]  }
 0x50b   : > { %v20126_v57 = vpop.permute.xlu0 %10682  ;;  %9362 = vmatprep.mubr.bf16.mxu1 %v20115_v55  ;;  %v11113_v60 = vrot.slane %v20138_v9, 1  ;;  %v11114_v40 = vrot.slane %v20141_v46, 1  ;;  %v20161_v25 = vadd.f32 %v11264_v7, %v11207_v3  ;;  %v11267_v31 = vsel %vm11228_vm15, %v11265_v63, %v11266_v20  ;;  %22507 = vst [vmem:[#allocation124_spill] sm:$0xff] %v20165_v8  ;;  %v20176_v7 = vpop.f32.mrf.mxu0  ;;  %v14495_v63 = vld [vmem:[#allocation3 + $0x16c] ss:$12 sps:$4 sm:$0xff]   ;;  %s20504_s19 = scalar_lea.vmem [#allocation4], %s20443_s16 }
 0x50c   : > { %22505 = vst [vmem:[#allocation148_spill] sm:$0xff] %v20153_v16  ;;  %v11209_v15 = vadd.f32 %v11109_v21, %v20082_v1  ;;  %v10891_v55 = vrot.slane %v10827_v59, 7  ;;  %v10829_v27 = vadd.f32 %v10797_v0, %v10734_v43  ;;  %v20167_v23 = vadd.f32 %v11267_v31, %v11208_v49  ;;  %s12122_s9 = sshll.u32 %s20504_s19, 4  ;;  %s14673_s16 = smov [#allocation4]   ;;  %s21688_s9 = int_to_ptr.vmem [resolvable:$true] %s12122_s9 }
 0x50d   : > { %22506 = vst [vmem:[#allocation104_spill] sm:$0xff] %v20161_v25  ;;  %v11112_v24 = vsel %vm11067_vm14, %v11110_v2, %v11111_v13  ;;  %v11271_v16 = vrot.slane %v20119_v11, 2  ;;  %v20174_v3 = vsel %vm6848_vm9, %v20017_v29, %v20052_v38  ;;  %v11270_v1 = vsel %vm11228_vm15, %v11268_v56, %v11269_v58  ;;  %s14607_s15 = scalar_lea.vmem %s21688_s9, 12288  ;;  %s14611_s20 = sshll.u32 %s14673_s16, 4  ;;  %s14612_s20 = int_to_ptr.vmem [resolvable:$false] %s14611_s20 }
 0x50e   : > { %v20155_v30 = vpop.permute.xlu1 %10684  ;;  %22508 = vst [vmem:[#allocation123_spill] sm:$0xff] %v20167_v23  ;;  %v20180_v20 = vsel %vm2371_vm0, 0.0, %v10890_v14  ;;  %v20183_v49 = vsel %vm2371_vm0, %v10890_v14, 0.0  ;;  %v10892_v59 = vrot.slane %v10828_v53, 7  ;;  %v10798_v21 = vadd.f32 %v10734_v43, %v10733_v37  ;;  %v14493_v23 = vld [vmem:[#allocation3 + $0x168] ss:$12 sps:$4 sm:$0xff]   ;;  %p14608_p11 = scmp.ne.s32.totalorder %s21688_s9, %s14607_s15  ;;  %p14614_p0 = scmp.lt.s32.totalorder %s21688_s9, %s14612_s20 }
 0x50f   : > { %v20157_v42 = vpop.permute.xlu0 %10686  ;;  %v11115_v38 = vsel %vm11067_vm14, %v11113_v60, %v11114_v40  ;;  %v11272_v29 = vrot.slane %v20122_v47, 2  ;;  %v11274_v56 = vrot.slane %v20138_v9, 2  ;;  %v11275_v58 = vrot.slane %v20141_v46, 2  ;;  %s14613_s21 = scalar_lea.vmem %s14612_s20, 24576 }
 0x510   : > { %10119 = vmatmul.mubr.bf16.gmra.mxu0 %v14490_v4  ;;  %v13356_v0 = vpop.f32.mrf.mxu0  ;;  %v20196_v37 = vsel %vm2371_vm0, 0.0, %v10891_v55  ;;  %v20199_v14 = vsel %vm2371_vm0, %v10891_v55, 0.0  ;;  %v10893_v53 = vrot.slane %v10829_v27, 7  ;;  %v10830_v31 = vadd.f32 %v10798_v21, %v20174_v3  ;;  %p14609_p12 = pnand %p14608_p11, %p14754_p5  ;;  %p14615_p1 = scmp.lt.s32.totalorder %s14613_s21, %s14607_s15 }
 0x511   : > { %10126 = vmatprep.mubr.bf16.mxu0 %v19672_v32  ;;  %v11210_v60 = vadd.f32 %v11112_v24, %v20119_v11  ;;  %v11116_v47 = vrot.slane %v20180_v20, 1  ;;  %v11117_v40 = vrot.slane %v20183_v49, 1  ;;  %v20205_v4 = vadd.f32 %v11270_v1, %v11209_v15 }
 0x512   : > { %v20185_v2 = vpop.permute.xlu1 %10688  ;;  %9363 = vmatmul.mubr.bf16.gmra.mxu1 %v20165_v8  ;;  %v13357_v46 = vpop.f32.mrf.mxu0  ;;  %v20208_v32 = vsel %vm2371_vm0, 0.0, %v10892_v59  ;;  %v10736_v55 = vsel %vm6848_vm9, %v20054_v28, %v20087_v39  ;;  %v11211_v21 = vadd.f32 %v11115_v38, %v20138_v9  ;;  %v11119_v15 = vrot.slane %v20196_v37, 1  ;;  %p14610_p13 = pneg %p14609_p12  ;;  %p14616_p2 = por %p14615_p1, %p14614_p0 }
 0x513   : > { %v20187_v13 = vpop.permute.xlu0 %10690  ;;  %9370 = vmatprep.mubr.bf16.mxu1 %v14495_v63  ;;  %22509 = vst [vmem:[#allocation109_spill] sm:$0xff] %v20205_v4  ;;  %v20211_v63 = vsel %vm2371_vm0, %v10892_v59, 0.0  ;;  %v20220_v24 = vadd.f32 %v13357_v46, %v13356_v0  ;;  %v11120_v1 = vrot.slane %v20199_v14, 1  ;;  %v10799_v8 = vadd.f32 %v20174_v3, %v10734_v43 }
 0x514   : > { %v20227_v59 = vsel %vm2371_vm0, 0.0, %v10893_v53  ;;  %v10894_v4 = vrot.slane %v10830_v31, 7  ;;  %v11273_v28 = vsel %vm11228_vm15, %v11271_v16, %v11272_v29  ;;  %v11276_v39 = vsel %vm11228_vm15, %v11274_v56, %v11275_v58  ;;  %p14617_p3 = pnand %p14616_p2, %p14610_p13 }
 0x515   : > { %22510 = vst [vmem:[#allocation105_spill] sm:$0xff] %v20220_v24  ;;  %v11122_v0 = vrot.slane %v20208_v32, 1  ;;  %v11123_v46 = vrot.slane %v20211_v63, 1  ;;  %v20234_v9 = vsel %vm2371_vm0, %v10893_v53, 0.0  ;;  %v10831_v38 = vadd.f32 %v10799_v8, %v10736_v55  ;;  %v20236_v24 = vld [vmem:[#allocation3 + $0x184] ss:$12 sps:$4 sm:$0xff]  }
 0x516   : > { %v20216_v27 = vpop.permute.xlu1 %10692  ;;  %22511 = vst [vmem:[#allocation108_spill] sm:$0xff] %v20236_v24  ;;  %v11118_v43 = vsel %vm11067_vm14, %v11116_v47, %v11117_v40  ;;  %v11277_v25 = vrot.slane %v20180_v20, 2  ;;  %v11278_v31 = vrot.slane %v20183_v49, 2  ;;  %v11280_v16 = vrot.slane %v20196_v37, 2 }
 0x517   : > { %v20218_v11 = vpop.permute.xlu0 %10694  ;;  %v11121_v58 = vsel %vm11067_vm14, %v11119_v15, %v11120_v1  ;;  %v11281_v8 = vrot.slane %v20199_v14, 2  ;;  %v11125_v53 = vrot.slane %v20227_v59, 1  ;;  %v10737_v47 = vsel %vm6848_vm9, %v20089_v61, %v20124_v62 }
 0x518   : > { %10127 = vmatmul.mubr.bf16.gmra.mxu0 %v19736_v5  ;;  %v11126_v49 = vrot.slane %v20234_v9, 1  ;;  %v20260_v5 = vsel %vm2371_vm0, %v10894_v4, 0.0  ;;  %v10800_v14 = vadd.f32 %v10736_v55, %v20174_v3  ;;  %v11124_v40 = vsel %vm11067_vm14, %v11122_v0, %v11123_v46 }
 0x519   : > { %10134 = vmatprep.mubr.bf16.mxu0 %v19762_v52  ;;  %v10895_v15 = vrot.slane %v10831_v38, 7  ;;  %v20264_v1 = vadd.f32 %v11273_v28, %v11210_v60  ;;  %v20266_v61 = vadd.f32 %v11276_v39, %v11211_v21  ;;  %v11212_v62 = vadd.f32 %v11118_v43, %v20180_v20  ;;  %v20290_v43 = vld [vmem:[#allocation3 + $0x19c] ss:$12 sps:$4 sm:$0xff]  }
 0x51a   : > { %v20242_v29 = vpop.permute.xlu1 %10696  ;;  %9371 = vmatmul.mubr.bf16.gmra.mxu1 %v14493_v23  ;;  %v20257_v23 = vsel %vm2371_vm0, 0.0, %v10894_v4  ;;  %v11213_v52 = vadd.f32 %v11121_v58, %v20196_v37  ;;  %v11279_v4 = vsel %vm11228_vm15, %v11277_v25, %v11278_v31  ;;  %v11283_v44 = vrot.slane %v20208_v32, 2  ;;  %v20279_v37 = vld [vmem:[#allocation3 + $0x180] ss:$12 sps:$4 sm:$0xff]  }
 0x51b   : > { %v20244_v56 = vpop.permute.xlu0 %10698  ;;  %9378 = vmatprep.mubr.bf16.mxu1 %v20236_v24  ;;  %v10832_v24 = vadd.f32 %v10800_v14, %v10737_v47  ;;  %v11284_v3 = vrot.slane %v20211_v63, 2  ;;  %v11128_v0 = vrot.slane %v20257_v23, 1  ;;  %v11129_v60 = vrot.slane %v20260_v5, 1 }
 0x51c   : > { %22512 = vst [vmem:[#allocation152_spill] sm:$0xff] %v20244_v56  ;;  %v11214_v21 = vadd.f32 %v11124_v40, %v20208_v32  ;;  %v11127_v20 = vsel %vm11067_vm14, %v11125_v53, %v11126_v49  ;;  %v10801_v28 = vadd.f32 %v10737_v47, %v10736_v55  ;;  %v11282_v39 = vsel %vm11228_vm15, %v11280_v16, %v11281_v8 }
 0x51d   : > { %v11286_v46 = vrot.slane %v20227_v59, 2  ;;  %v11287_v25 = vrot.slane %v20234_v9, 2  ;;  %v20285_v38 = vsel %vm2371_vm0, 0.0, %v10895_v15  ;;  %v20288_v63 = vsel %vm2371_vm0, %v10895_v15, 0.0 }
 0x51e   : > { %v20270_v56 = vpop.permute.xlu1 %10700  ;;  %v20294_v32 = vadd.f32 %v20045_v6, %v20012_v48  ;;  %v10896_v55 = vrot.slane %v10832_v24, 7  ;;  %v20298_v9 = vadd.f32 %v11279_v4, %v11212_v62  ;;  %v20300_v16 = vadd.f32 %v11282_v39, %v11213_v52  ;;  %v22513_v6 = vld [vmem:[#allocation201_spill] sm:$0xff] }
 0x51f   : > { %v10703_v26 = vpop.permute.xlu0 %10702  ;;  %v11215_v8 = vadd.f32 %v11127_v20, %v20227_v59  ;;  %v11130_v53 = vsel %vm11067_vm14, %v11128_v0, %v11129_v60  ;;  %v11285_v48 = vsel %vm11228_vm15, %v11283_v44, %v11284_v3  ;;  %v11131_v49 = vrot.slane %v20285_v38, 1 }
 0x520   : > { %10135 = vmatmul.mubr.bf16.gmra.mxu0 %v19817_v45  ;;  %v13386_v47 = vpop.f32.mrf.mxu1  ;;  %v11132_v45 = vrot.slane %v20288_v63, 1  ;;  %v10897_v14 = vrot.slane %v10801_v28, 7  ;;  %v20310_v40 = vadd.f32 %v11285_v48, %v11214_v21  ;;  %v11289_v59 = vrot.slane %v20257_v23, 2 }
 0x521   : > { %10142 = vmatprep.mubr.bf16.mxu0 %v19821_v18  ;;  %v11290_v15 = vrot.slane %v20260_v5, 2  ;;  %v20316_v62 = vadd.f32 %v20176_v7, %v20149_v22  ;;  %v11288_v44 = vsel %vm11228_vm15, %v11286_v46, %v11287_v25  ;;  %v11216_v52 = vadd.f32 %v11130_v53, %v20257_v23  ;;  %v20352_v53 = vld [vmem:[#allocation3 + $0x1b4] ss:$12 sps:$4 sm:$0xff]  }
 0x522   : > { %v10705_v31 = vpop.permute.xlu1 %10704  ;;  %9379 = vmatmul.mubr.bf16.gmra.mxu1 %v20279_v37  ;;  %v13387_v18 = vpop.f32.mrf.mxu1  ;;  %v11292_v4 = vrot.slane %v20285_v38, 2  ;;  %v20322_v3 = vsel %vm2371_vm0, 0.0, %v10896_v55  ;;  %v20325_v0 = vsel %vm2371_vm0, %v10896_v55, 0.0  ;;  %v11293_v5 = vrot.slane %v20288_v63, 2  ;;  %v20345_v63 = vld [vmem:[#allocation3 + $0x198] ss:$12 sps:$4 sm:$0xff]  }
 0x523   : > { %v10707_v58 = vpop.permute.xlu0 %10706  ;;  %9386 = vmatprep.mubr.bf16.mxu1 %v20290_v43  ;;  %v20329_v22 = vsel %vm6848_vm9, %v10703_v26, %v10705_v31  ;;  %v20334_v20 = vadd.f32 %v13387_v18, %v13386_v47  ;;  %v11133_v28 = vsel %vm11067_vm14, %v11131_v49, %v11132_v45  ;;  %v20338_v39 = vsel %vm2371_vm0, 0.0, %v10897_v14  ;;  %22515 = vst [vmem:[#allocation103_spill] sm:$0xff] %v20352_v53  ;;  %v14507_v47 = vld [vmem:[#allocation3 + $0xdc] ss:$12 sps:$4 sm:$0xff]  }
 0x524   : > { %v13389_v23 = vpop.f32.mrf.mxu1  ;;  %v20341_v46 = vsel %vm2371_vm0, %v10897_v14, 0.0  ;;  %v11134_v26 = vrot.slane %v20322_v3, 1  ;;  %v11135_v55 = vrot.slane %v20325_v0, 1  ;;  %v10738_v31 = vsel %vm6848_vm9, %v20126_v57, %v20155_v30  ;;  %v22517_v30 = vld [vmem:[#allocation196_spill] sm:$0xff] }
 0x525   : > { %22514 = vst [vmem:[#allocation131_spill] sm:$0xff] %v20334_v20  ;;  %v20354_v48 = vadd.f32 %v11288_v44, %v11215_v8  ;;  %v20359_v49 = vsel %vm6848_vm9, %v20157_v42, %v20185_v2  ;;  %v11291_v57 = vsel %vm11228_vm15, %v11289_v59, %v11290_v15  ;;  %v11217_v8 = vadd.f32 %v11133_v28, %v20285_v38 }
 0x526   : > { %v10709_v60 = vpop.permute.xlu1 %10708  ;;  %v11137_v44 = vrot.slane %v20338_v39, 1  ;;  %v11138_v42 = vrot.slane %v20341_v46, 1  ;;  %v20373_v2 = vadd.f32 %v11291_v57, %v11216_v52  ;;  %v11294_v59 = vsel %vm11228_vm15, %v11292_v4, %v11293_v5  ;;  %v20405_v57 = vld [vmem:[#allocation3 + $0x1b0] ss:$12 sps:$4 sm:$0xff]  }
 0x527   : > { %v10711_v21 = vpop.permute.xlu0 %10710  ;;  %v20332_v7 = vsel %vm6848_vm9, %v10707_v58, %v10709_v60  ;;  %v13390_v58 = vpop.f32.mrf.mxu1  ;;  %v11136_v38 = vsel %vm11067_vm14, %v11134_v26, %v11135_v55  ;;  %v11296_v15 = vrot.slane %v20325_v0, 2  ;;  %v20384_v60 = vadd.f32 %v20359_v49, %v10738_v31  ;;  %22518 = vst [vmem:[#allocation117_spill] sm:$0xff] %v20405_v57 }
 0x528   : > { %v10808_v25 = vadd.f32 %v20332_v7, %v20329_v22  ;;  %v20363_v18 = vadd.f32 %v13390_v58, %v13389_v23  ;;  %10143 = vmatmul.mubr.bf16.gmra.mxu0 %v19884_v54  ;;  %v11295_v23 = vrot.slane %v20322_v3, 2  ;;  %v11139_v0 = vsel %vm11067_vm14, %v11137_v44, %v11138_v42 }
 0x529   : > { %10150 = vmatprep.mubr.bf16.mxu0 %v14507_v47  ;;  %v10898_v24 = vrot.slane %v20384_v60, 7 }
 0x52a   : > { %v10713_v45 = vpop.permute.xlu1 %10712  ;;  %22516 = vst [vmem:[#allocation111_spill] sm:$0xff] %v20363_v18  ;;  %9387 = vmatmul.mubr.bf16.gmra.mxu1 %v20345_v63 }
 0x52b   : > { %v20361_v14 = vpop.permute.xlu0 %11416  ;;  %9394 = vmatprep.mubr.bf16.mxu1 %v20352_v53  ;;  %v10745_v58 = vsel %vm6848_vm9, %v10711_v21, %v10713_v45  ;;  %v20390_v21 = vsel %vm6848_vm9, %v20187_v13, %v20216_v27  ;;  %v20403_v45 = vadd.f32 %v11136_v38, %v20322_v3 }
 0x52c   : > { %v11467_v54 = vmul.f32 %v20361_v14, %v19823_v19  ;;  %v10809_v19 = vadd.f32 %v10745_v58, %v20332_v7  ;;  %v10840_v47 = vadd.f32 %v10808_v25, %v10745_v58  ;;  %v14505_v25 = vld [vmem:[#allocation3 + $0xd8] ss:$12 sps:$4 sm:$0xff]   ;;  %v20407_v58 = vadd.f32 %v11294_v59, %v11217_v8 }
 0x52d   : > { %v20412_v44 = vadd.f32 %v20384_v60, %v20390_v21  ;;  %v14508_v60 = vld [vmem:[#allocation3 + $0x20] ss:$12 sps:$4 sm:$0xff]  }
 0x52e   : > { %v20393_v4 = vpop.permute.xlu1 %11423  ;;  %v11499_v26 = vmax.f32 %v11467_v54, 0.0  ;;  %v10904_v13 = vrot.slane %v10840_v47, 7  ;;  %v10905_v27 = vrot.slane %v10809_v19, 7 }
 0x52f   : > { %v20395_v5 = vpop.permute.xlu0 %11430  ;;  %v11468_v55 = vmul.f32 %v20393_v4, %v19825_v12 }
 0x530   : > { %v11469_v31 = vmul.f32 %v20395_v5, %v19850_v36  ;;  %11819 = vrot.lane.b32.xlu0 %v11499_v26, %s14670_s18  ;;  %v10969_v3 = vsel %vm2371_vm0, 0.0, %v10904_v13  ;;  %v10970_v42 = vsel %vm2371_vm0, 0.0, %v10905_v27  ;;  %v11001_v54 = vsel %vm2371_vm0, %v10904_v13, 0.0  ;;  %10151 = vmatmul.mubr.bf16.gmra.mxu0 %v14505_v25 }
 0x531   : > { %v11500_v12 = vmax.f32 %v11468_v55, 0.0  ;;  %v11002_v8 = vsel %vm2371_vm0, %v10905_v27, 0.0  ;;  %v11158_v19 = vrot.slane %v10969_v3, 1  ;;  %v11159_v47 = vrot.slane %v11001_v54, 1  ;;  %10158 = vmatprep.mubr.bf16.mxu0 %v19971_v33 }
 0x532   : > { %v11501_v36 = vmax.f32 %v11469_v31, 0.0  ;;  %v20419_v59 = vpop.permute.xlu1 %11437  ;;  %9395 = vmatmul.mubr.bf16.gmra.mxu1 %v20405_v57  ;;  %v11161_v26 = vrot.slane %v10970_v42, 1  ;;  %v11162_v55 = vrot.slane %v11002_v8, 1  ;;  %v13392_v31 = vpop.f32.mrf.mxu1  ;;  %v11319_v13 = vrot.slane %v10969_v3, 2 }
 0x533   : > { %v20421_v38 = vpop.permute.xlu0 %11444  ;;  %11821 = vrot.lane.b32.xlu1 %v11500_v12, %s14670_s18  ;;  %v11320_v27 = vrot.slane %v11001_v54, 2  ;;  %v11322_v28 = vrot.slane %v10970_v42, 2  ;;  %v11323_v52 = vrot.slane %v11002_v8, 2  ;;  %13800 = vmatprep.mubr.msk.bf16.mxu1 %vm6848_vm9, %v14508_v60  ;;  %v11160_v25 = vsel %vm11067_vm14, %v11158_v19, %v11159_v47 }
 0x534   : > { %v11163_v18 = vsel %vm11067_vm14, %v11161_v26, %v11162_v55  ;;  %11823 = vrot.lane.b32.xlu0 %v11501_v36, %s14670_s18  ;;  %v11470_v12 = vmul.f32 %v20419_v59, %v19901_v17  ;;  %v11471_v33 = vmul.f32 %v20421_v38, %v19928_v34  ;;  %v13393_v20 = vpop.f32.mrf.mxu1  ;;  %v11219_v54 = vadd.f32 %v11139_v0, %v20338_v39  ;;  %v13359_v55 = vpop.f32.mrf.mxu0 }
 0x535   : > { %v11226_v57 = vadd.f32 %v11160_v25, %v10969_v3  ;;  %v11227_v53 = vadd.f32 %v11163_v18, %v10970_v42  ;;  %v11297_v60 = vsel %vm11228_vm15, %v11295_v23, %v11296_v15  ;;  %v20446_v36 = vsel %vm2371_vm0, 0.0, %v10898_v24  ;;  %v14509_v25 = vld [vmem:[#allocation3 + $0x38] ss:$12 sps:$4 sm:$0xff]  }
 0x536   : > { %v20436_v8 = vpop.permute.xlu1 %11451  ;;  %v11502_v17 = vmax.f32 %v11470_v12, 0.0  ;;  %v11321_v34 = vsel %vm11228_vm15, %v11319_v13, %v11320_v27  ;;  %v13395_v3 = vpop.f32.mrf.mxu1  ;;  %v11503_v42 = vmax.f32 %v11471_v33, 0.0  ;;  %v11324_v47 = vsel %vm11228_vm15, %v11322_v28, %v11323_v52  ;;  %v22521_v12 = vld [vmem:[#allocation144_spill] sm:$0xff] }
 0x537   : > { %v20439_v19 = vpop.permute.xlu0 %11458  ;;  %v11387_v18 = vadd.f32 %v11321_v34, %v11226_v57  ;;  %v11472_v23 = vmul.f32 %v20436_v8, %v20021_v35  ;;  %v20455_v15 = vsel %vm2371_vm0, %v10898_v24, 0.0  ;;  %v10899_v26 = vrot.slane %v20412_v44, 7 }
 0x538   : > { %v11473_v0 = vmul.f32 %v20439_v19, %v20072_v50  ;;  %11825 = vrot.lane.b32.xlu1 %v11502_v17, %s14670_s18  ;;  %v11388_v13 = vadd.f32 %v11324_v47, %v11227_v53  ;;  %v20459_v27 = vadd.f32 %v13393_v20, %v13392_v31  ;;  %v13396_v50 = vpop.f32.mrf.mxu1  ;;  %11827 = vrot.lane.b32.xlu0 %v11503_v42, %s14670_s18  ;;  %v14510_v53 = vld [vmem:[#allocation3 + $0x50] ss:$12 sps:$4 sm:$0xff]   ;;  %v22522_v31 = vrot.slane %v20341_v46, 2 }
 0x539   : > { %v20462_v57 = vmul.f32 %v20439_v19, %v11387_v18  ;;  %v11504_v24 = vmax.f32 %v11472_v23, 0.0  ;;  %v20469_v44 = vadd.f32 %v13396_v50, %v13395_v3  ;;  %10159 = vmatmul.mubr.bf16.gmra.mxu0 %v22521_v12  ;;  %v10804_v20 = vadd.f32 %v20390_v21, %v20359_v49  ;;  %v22525_v18 = vld [vmem:[#allocation183_spill] sm:$0xff]  ;;  %v22527_v46 = vld [vmem:[#allocation166_spill] sm:$0xff]  ;;  %v13360_v12 = vpop.f32.mrf.mxu0 }
 0x53a   : > { %v11505_v28 = vmax.f32 %v11473_v0, 0.0  ;;  %v20465_v35 = vpop.permute.xlu1 %11465  ;;  %v22523_v33 = vrot.slane %v20338_v39, 2  ;;  %v13730_v3 = vpop.f32.mrf.mxu1  ;;  %13801 = vmatmul.mubr.msk.bf16.vlgmr.msra.gmra.mxu1 %vm6848_vm9, %v14509_v25  ;;  %v22526_v42 = vmax.f32 %v22525_v18, 0.0  ;;  %v11475_v39 = vmul.f32 %v20361_v14, %v20077_v51  ;;  %v22529_v23 = vld [vmem:[#allocation171_spill] sm:$0xff] }
 0x53b   : > { %22519 = vst [vmem:[#allocation112_spill] sm:$0xff] %v20462_v57  ;;  %v20467_v52 = vpop.permute.xlu0 %11563  ;;  %v11474_v34 = vmul.f32 %v20465_v35, %v20075_v10  ;;  %v20482_v0 = vmul.f32 %v20465_v35, %v11388_v13  ;;  %v20492_v47 = vadd.f32 %v13730_v3, %v22527_v46  ;;  %10166 = vmatprep.mubr.bf16.mxu0 %v22529_v23  ;;  %v22530_v10 = vld [vmem:[#allocation17_spill] sm:$0xff]  ;;  %v11140_v50 = vrot.slane %v20446_v36, 1  ;;  %v22549_v57 = vld [vmem:[#allocation104_spill] sm:$0xff] }
 0x53c   : > { %22520 = vst [vmem:[#allocation149_spill] sm:$0xff] %v20467_v52  ;;  %v11300_v17 = vsel %vm11228_vm15, %v22523_v33, %v22522_v31  ;;  %v11915_v49 = vsel %vm7393_vm7, %v22526_v42, %v20467_v52  ;;  %13804 = vmatprep.mubr.msk.bf16.mxu1 %vm6848_vm9, %v14510_v53  ;;  %v11141_v25 = vrot.slane %v20455_v15, 1  ;;  %v20500_v31 = vadd.f32 %v11297_v60, %v20403_v45  ;;  %v8719_v51 = vpop.f32.mrf.mxu1 }
 0x53d   : > { %22524 = vst [vmem:[#allocation107_spill] sm:$0xff] %v20482_v0  ;;  %22528 = vst [vmem:[#allocation113_spill] sm:$0xff] %v20492_v47  ;;  %v11506_v33 = vmax.f32 %v11474_v34, 0.0  ;;  %11829 = vrot.lane.b32.xlu1 %v11504_v24, %s14670_s18  ;;  %v20508_v53 = vsel %vm2371_vm0, 0.0, %v10899_v26  ;;  %v20513_v3 = vsel %vm6848_vm9, %v20218_v11, %v20242_v29  ;;  %v20515_v45 = vadd.f32 %v11300_v17, %v11219_v54  ;;  %v22533_v34 = vld [vmem:[#allocation143_spill] sm:$0xff]  ;;  %v22536_v29 = vld [vmem:[#allocation157_spill] sm:$0xff] }
 0x53e   : > { %12011 = vst [vmem:[%s20504_s19] sm:$0xff] %v11915_v49  ;;  %11831 = vrot.lane.b32.xlu0 %v11505_v28, %s14670_s18  ;;  %v20518_v60 = vpop.permute.xlu1 %11565  ;;  %v20523_v18 = vadd.f32 %v22533_v34, %v8719_v51  ;;  %v20526_v42 = vsel %vm2371_vm0, %v10899_v26, 0.0  ;;  %v22534_v49 = vld [vmem:[#allocation184_spill] sm:$0xff]  ;;  %v22537_v54 = vmax.f32 %v22536_v29, 0.0  ;;  %v11476_v17 = vmul.f32 %v20393_v4, %v20079_v41  ;;  %v13731_v23 = vpop.f32.mrf.mxu1  ;;  %v22538_v51 = vld [vmem:[#allocation115_spill] sm:$0xff] }
 0x53f   : > { %22531 = vst [vmem:[#allocation175_spill] sm:$0xff] %v20518_v60  ;;  %v20520_v24 = vpop.permute.xlu0 %11567  ;;  %v22535_v46 = vmax.f32 %v22534_v49, 0.0  ;;  %v20538_v13 = vadd.f32 %v13360_v12, %v13359_v55  ;;  %v11507_v26 = vmax.f32 %v11475_v39, 0.0  ;;  %v11477_v34 = vmul.f32 %v20395_v5, %v22538_v51  ;;  %v22539_v49 = vld [vmem:[#allocation198_spill] sm:$0xff]  ;;  %v14511_v12 = vld [vmem:[#allocation3 + $0x68] ss:$12 sps:$4 sm:$0xff]  }
 0x540   : > { %22532 = vst [vmem:[#allocation102_spill] sm:$0xff] %v20520_v24  ;;  %v11917_v28 = vsel %vm7393_vm7, %v22537_v54, %v20520_v24  ;;  %v20545_v52 = vadd.f32 %v13731_v23, %v22539_v49  ;;  %v11301_v29 = vrot.slane %v20446_v36, 2  ;;  %v11302_v54 = vrot.slane %v20455_v15, 2  ;;  %v8722_v55 = vpop.f32.mrf.mxu1  ;;  %v14512_v23 = vld [vmem:[#allocation3 + $0x98] ss:$12 sps:$4 sm:$0xff]   ;;  %v22545_v51 = vld [vmem:[#allocation129_spill] sm:$0xff]  ;;  %v13362_v47 = vpop.f32.mrf.mxu0 }
 0x541   : > { %v11916_v11 = vsel %vm7393_vm7, %v22535_v46, %v20518_v60  ;;  %12017 = vst [vmem:[%s20504_s19 + $0x30] sm:$0xff] %v11917_v28  ;;  %v11142_v46 = vsel %vm11067_vm14, %v11140_v50, %v11141_v25  ;;  %v20551_v41 = vadd.f32 %v10804_v20, %v20513_v3  ;;  %11833 = vrot.lane.b32.xlu1 %v11506_v33, %s14670_s18  ;;  %v11143_v39 = vrot.slane %v20508_v53, 1  ;;  %v22543_v20 = vld [vmem:[#allocation197_spill] sm:$0xff]  ;;  %v22547_v24 = vld [vmem:[#allocation128_spill] sm:$0xff] }
 0x542   : > { %12014 = vst [vmem:[%s20504_s19 + $0x18] sm:$0xff] %v11916_v11  ;;  %22540 = vst [vmem:[#allocation176_spill] sm:$0xff] %v20545_v52  ;;  %v11144_v11 = vrot.slane %v20526_v42, 1  ;;  %11835 = vrot.lane.b32.xlu0 %v11507_v26, %s14670_s18  ;;  %v20558_v50 = vpop.permute.xlu1 %11569  ;;  %v20563_v25 = vadd.f32 %v22543_v20, %v8722_v55  ;;  %v22544_v33 = vld [vmem:[#allocation121_spill] sm:$0xff]  ;;  %v22546_v49 = vmax.f32 %v22545_v51, 0.0  ;;  %v11508_v28 = vmax.f32 %v11476_v17, 0.0  ;;  %v13734_v55 = vpop.f32.mrf.mxu1  ;;  %13805 = vmatmul.mubr.msk.bf16.gmra.mxu1 %vm6848_vm9, %v14511_v12 }
 0x543   : > { %22541 = vst [vmem:[#allocation164_spill] sm:$0xff] %v20558_v50  ;;  %v20560_v15 = vpop.permute.xlu0 %11571  ;;  %10167 = vmatmul.mubr.bf16.gmra.mxu0 %v22544_v33  ;;  %v22548_v26 = vmax.f32 %v22547_v24, 0.0  ;;  %v11478_v52 = vmul.f32 %v20419_v59, %v22549_v57  ;;  %v22550_v20 = vld [vmem:[#allocation120_spill] sm:$0xff]  ;;  %v11220_v33 = vadd.f32 %v11142_v46, %v20446_v36  ;;  %v11509_v51 = vmax.f32 %v11477_v34, 0.0  ;;  %v22551_v17 = vld [vmem:[#allocation123_spill] sm:$0xff]  ;;  %v22552_v24 = vld [vmem:[#allocation161_spill] sm:$0xff]  ;;  %13808 = vmatprep.mubr.msk.bf16.mxu1 %vm6848_vm9, %v14512_v23 }
 0x544   : > { %22542 = vst [vmem:[#allocation10_spill] sm:$0xff] %v20560_v15  ;;  %v11918_v60 = vsel %vm7393_vm7, %v22546_v49, %v20558_v50  ;;  %10174 = vmatprep.mubr.bf16.mxu0 %v22550_v20  ;;  %v11479_v49 = vmul.f32 %v20421_v38, %v22551_v17  ;;  %v20584_v50 = vadd.f32 %v13734_v55, %v22552_v24  ;;  %v22554_v36 = vld [vmem:[#allocation152_spill] sm:$0xff]  ;;  %v8735_v34 = vpop.f32.mrf.mxu1  ;;  %v22562_v57 = vld [vmem:[#allocation109_spill] sm:$0xff] }
 0x545   : > { %v11919_v0 = vsel %vm7393_vm7, %v22548_v26, %v20560_v15  ;;  %12020 = vst [vmem:[%s20504_s19 + $0x48] sm:$0xff] %v11918_v60  ;;  %v10805_v12 = vadd.f32 %v20513_v3, %v20390_v21  ;;  %v10900_v26 = vrot.slane %v20551_v41, 7  ;;  %11837 = vrot.lane.b32.xlu1 %v11508_v28, %s14670_s18  ;;  %v13363_v60 = vpop.f32.mrf.mxu0  ;;  %v11145_v46 = vsel %vm11067_vm14, %v11143_v39, %v11144_v11  ;;  %v22557_v41 = vld [vmem:[#allocation159_spill] sm:$0xff]  ;;  %v22558_v28 = vld [vmem:[#allocation136_spill] sm:$0xff]  ;;  %v22560_v11 = vld [vmem:[#allocation110_spill] sm:$0xff] }
 0x546   : > { %12023 = vst [vmem:[%s20504_s19 + $0x60] sm:$0xff] %v11919_v0  ;;  %22553 = vst [vmem:[#allocation14_spill] sm:$0xff] %v20584_v50  ;;  %v10742_v0 = vsel %vm6848_vm9, %v22554_v36, %v20270_v56  ;;  %11839 = vrot.lane.b32.xlu0 %v11509_v51, %s14670_s18  ;;  %v20597_v23 = vpop.permute.xlu1 %11573  ;;  %v20601_v21 = vadd.f32 %v13363_v60, %v13362_v47  ;;  %v20604_v20 = vadd.f32 %v22557_v41, %v8735_v34  ;;  %v13735_v15 = vpop.f32.mrf.mxu1  ;;  %v22563_v41 = vld [vmem:[#allocation118_spill] sm:$0xff] }
 0x547   : > { %22555 = vst [vmem:[#allocation7_spill] sm:$0xff] %v20597_v23  ;;  %v20599_v55 = vpop.permute.xlu0 %11575  ;;  %v11303_v56 = vsel %vm11228_vm15, %v11301_v29, %v11302_v54  ;;  %v22559_v17 = vmax.f32 %v22558_v28, 0.0  ;;  %v11510_v39 = vmax.f32 %v11478_v52, 0.0  ;;  %v22561_v51 = vmax.f32 %v22560_v11, 0.0  ;;  %v13365_v60 = vpop.f32.mrf.mxu0 }
 0x548   : > { %22556 = vst [vmem:[#allocation13_spill] sm:$0xff] %v20599_v55  ;;  %v11480_v47 = vmul.f32 %v20436_v8, %v22562_v57  ;;  %v10806_v34 = vadd.f32 %v10742_v0, %v20513_v3  ;;  %v11481_v29 = vmul.f32 %v20439_v19, %v20264_v1  ;;  %v11511_v54 = vmax.f32 %v11479_v49, 0.0  ;;  %v14513_v3 = vld [vmem:[#allocation3 + $0xb0] ss:$12 sps:$4 sm:$0xff]  }
 0x549   : > { %v11920_v24 = vsel %vm7393_vm7, %v22559_v17, %v20597_v23  ;;  %v11921_v36 = vsel %vm7393_vm7, %v22561_v51, %v20599_v55  ;;  %v20623_v52 = vadd.f32 %v13735_v15, %v22563_v41  ;;  %v11221_v28 = vadd.f32 %v11145_v46, %v20508_v53  ;;  %11841 = vrot.lane.b32.xlu1 %v11510_v39, %s14670_s18  ;;  %v13366_v57 = vpop.f32.mrf.mxu0  ;;  %v8738_v51 = vpop.f32.mrf.mxu1  ;;  %v14516_v23 = vld [vmem:[#allocation3 + $0x154] ss:$12 sps:$4 sm:$0xff]  }
 0x54a   : > { %12026 = vst [vmem:[%s20504_s19 + $0x78] sm:$0xff] %v11920_v24  ;;  %12029 = vst [vmem:[%s20504_s19 + $0x90] sm:$0xff] %v11921_v36  ;;  %v20627_v17 = vsel %vm2371_vm0, 0.0, %v10900_v26  ;;  %v10837_v11 = vadd.f32 %v10805_v12, %v10742_v0  ;;  %v20630_v55 = vadd.f32 %v11303_v56, %v11220_v33  ;;  %v20633_v1 = vsel %vm2371_vm0, %v10900_v26, 0.0  ;;  %11843 = vrot.lane.b32.xlu0 %v11511_v54, %s14670_s18  ;;  %v20637_v49 = vpop.permute.xlu1 %11577  ;;  %v22567_v24 = vld [vmem:[#allocation119_spill] sm:$0xff]  ;;  %v22568_v33 = vld [vmem:[#allocation124_spill] sm:$0xff] }
 0x54b   : > { %22564 = vst [vmem:[#allocation151_spill] sm:$0xff] %v20623_v52  ;;  %v10838_v15 = vadd.f32 %v10806_v34, %v20329_v22  ;;  %22565 = vst [vmem:[#allocation67_spill] sm:$0xff] %v20637_v49  ;;  %v20639_v12 = vpop.permute.xlu0 %11579  ;;  %v20641_v46 = vadd.f32 %v13366_v57, %v13365_v60  ;;  %v20644_v39 = vadd.f32 %v22567_v24, %v8738_v51  ;;  %10175 = vmatmul.mubr.bf16.gmra.mxu0 %v22568_v33  ;;  %v14517_v56 = vld [vmem:[#allocation3 + $0xc8] ss:$12 sps:$4 sm:$0xff]   ;;  %v22571_v52 = vld [vmem:[#allocation138_spill] sm:$0xff]  ;;  %v13738_v57 = vpop.f32.mrf.mxu1 }
 0x54c   : > { %22566 = vst [vmem:[#allocation62_spill] sm:$0xff] %v20639_v12  ;;  %v11482_v26 = vmul.f32 %v20465_v35, %v20266_v61  ;;  %v22569_v36 = vld [vmem:[#allocation189_spill] sm:$0xff]  ;;  %v11512_v41 = vmax.f32 %v11480_v47, 0.0  ;;  %v22572_v50 = vmax.f32 %v22571_v52, 0.0  ;;  %13809 = vmatmul.mubr.msk.bf16.gmra.mxu1 %vm6848_vm9, %v14513_v3  ;;  %10182 = vmatprep.mubr.bf16.mxu0 %v14516_v23  ;;  %v10807_v51 = vadd.f32 %v20329_v22, %v10742_v0  ;;  %v22573_v33 = vld [vmem:[#allocation163_spill] sm:$0xff] }
 0x54d   : > { %v22570_v34 = vmax.f32 %v22569_v36, 0.0  ;;  %v11513_v24 = vmax.f32 %v11481_v29, 0.0  ;;  %v11483_v61 = vmul.f32 %v20361_v14, %v20298_v9  ;;  %v20664_v36 = vadd.f32 %v13738_v57, %v22573_v33  ;;  %13812 = vmatprep.mubr.msk.bf16.mxu1 %vm6848_vm9, %v14517_v56  ;;  %v8751_v22 = vpop.f32.mrf.mxu1 }
 0x54e   : > { %v11923_v60 = vsel %vm7393_vm7, %v22572_v50, %v20639_v12  ;;  %v11146_v47 = vrot.slane %v20627_v17, 1  ;;  %v11147_v50 = vrot.slane %v20633_v1, 1  ;;  %v10901_v52 = vrot.slane %v10837_v11, 7  ;;  %11845 = vrot.lane.b32.xlu1 %v11512_v41, %s14670_s18  ;;  %v20677_v56 = vpop.permute.xlu1 %11581  ;;  %v22579_v11 = vld [vmem:[#allocation190_spill] sm:$0xff] }
 0x54f   : > { %v11922_v54 = vsel %vm7393_vm7, %v22570_v34, %v20637_v49  ;;  %12035 = vst [vmem:[%s20504_s19 + $0xc0] sm:$0xff] %v11923_v60  ;;  %22574 = vst [vmem:[#allocation56_spill] sm:$0xff] %v20664_v36  ;;  %v22575_v0 = vrot.slane %v20526_v42, 2  ;;  %v22576_v23 = vrot.slane %v20508_v53, 2  ;;  %v10902_v29 = vrot.slane %v10838_v15, 7  ;;  %11847 = vrot.lane.b32.xlu0 %v11513_v24, %s14670_s18  ;;  %v20679_v34 = vpop.permute.xlu0 %11583  ;;  %v22580_v53 = vld [vmem:[#allocation139_spill] sm:$0xff]  ;;  %v13739_v33 = vpop.f32.mrf.mxu1 }
 0x550   : > { %12032 = vst [vmem:[%s20504_s19 + $0xa8] sm:$0xff] %v11922_v54  ;;  %v10839_v3 = vadd.f32 %v10807_v51, %v20332_v7  ;;  %22577 = vst [vmem:[#allocation16_spill] sm:$0xff] %v20677_v56  ;;  %v20682_v54 = vadd.f32 %v22579_v11, %v8751_v22  ;;  %v11514_v42 = vmax.f32 %v11482_v26, 0.0  ;;  %v22581_v60 = vmax.f32 %v22580_v53, 0.0  ;;  %v22582_v15 = vld [vmem:[#allocation191_spill] sm:$0xff] }
 0x551   : > { %v11306_v9 = vsel %vm11228_vm15, %v22576_v23, %v22575_v0  ;;  %22578 = vst [vmem:[#allocation19_spill] sm:$0xff] %v20679_v34  ;;  %v22583_v7 = vmax.f32 %v22582_v15, 0.0  ;;  %v11484_v24 = vmul.f32 %v20393_v4, %v20300_v16  ;;  %v14514_v26 = vld [vmem:[#allocation3 + $0x150] ss:$12 sps:$4 sm:$0xff]   ;;  %v11485_v0 = vmul.f32 %v20395_v5, %v20310_v40  ;;  %v22584_v23 = vld [vmem:[#allocation99_spill] sm:$0xff] }
 0x552   : > { %v20684_v41 = vadd.f32 %v11306_v9, %v11221_v28  ;;  %v11924_v57 = vsel %vm7393_vm7, %v22581_v60, %v20677_v56  ;;  %v11515_v28 = vmax.f32 %v11483_v61, 0.0  ;;  %v20702_v9 = vadd.f32 %v13739_v33, %v22584_v23  ;;  %11849 = vrot.lane.b32.xlu1 %v11514_v42, %s14670_s18  ;;  %v8754_v61 = vpop.f32.mrf.mxu1  ;;  %v14519_v42 = vld [vmem:[#allocation3 + $0x110] ss:$12 sps:$4 sm:$0xff]   ;;  %v22590_v33 = vld [vmem:[#allocation192_spill] sm:$0xff]  ;;  %v13368_v12 = vpop.f32.mrf.mxu0 }
 0x553   : > { %v11925_v51 = vsel %vm7393_vm7, %v22583_v7, %v20679_v34  ;;  %12038 = vst [vmem:[%s20504_s19 + $0xd8] sm:$0xff] %v11924_v57  ;;  %v11148_v11 = vsel %vm11067_vm14, %v11146_v47, %v11147_v50  ;;  %v20707_v60 = vsel %vm2371_vm0, 0.0, %v10901_v52  ;;  %v20710_v16 = vsel %vm2371_vm0, %v10901_v52, 0.0  ;;  %v14518_v57 = vld [vmem:[#allocation3 + $0xe0] ss:$12 sps:$4 sm:$0xff]   ;;  %v20720_v47 = vpop.permute.xlu1 %11585  ;;  %v20722_v50 = vpop.permute.xlu0 %11587  ;;  %v22588_v52 = vld [vmem:[#allocation202_spill] sm:$0xff]  ;;  %10183 = vmatmul.mubr.bf16.gmra.mxu0 %v14514_v26 }
 0x554   : > { %12041 = vst [vmem:[%s20504_s19 + $0xf0] sm:$0xff] %v11925_v51  ;;  %22585 = vst [vmem:[#allocation8_spill] sm:$0xff] %v20702_v9  ;;  %v20714_v15 = vsel %vm2371_vm0, 0.0, %v10902_v29  ;;  %v20717_v40 = vsel %vm2371_vm0, %v10902_v29, 0.0  ;;  %v10903_v7 = vrot.slane %v10839_v3, 7  ;;  %11851 = vrot.lane.b32.xlu0 %v11515_v28, %s14670_s18  ;;  %v20725_v51 = vadd.f32 %v22588_v52, %v8754_v61  ;;  %v22592_v3 = vld [vmem:[#allocation140_spill] sm:$0xff]  ;;  %v13742_v34 = vpop.f32.mrf.mxu1  ;;  %13813 = vmatmul.mubr.msk.bf16.gmra.mxu1 %vm6848_vm9, %v14518_v57 }
 0x555   : > { %22586 = vst [vmem:[#allocation178_spill] sm:$0xff] %v20720_v47  ;;  %22587 = vst [vmem:[#allocation66_spill] sm:$0xff] %v20722_v50  ;;  %v22591_v23 = vmax.f32 %v22590_v33, 0.0  ;;  %v11516_v22 = vmax.f32 %v11484_v24, 0.0  ;;  %v22593_v53 = vmax.f32 %v22592_v3, 0.0  ;;  %v11486_v56 = vmul.f32 %v20419_v59, %v20354_v48  ;;  %v22594_v26 = vld [vmem:[#allocation108_spill] sm:$0xff]  ;;  %13816 = vmatprep.mubr.msk.bf16.mxu1 %vm6848_vm9, %v14519_v42 }
 0x556   : > { %22589 = vst [vmem:[#allocation22_spill] sm:$0xff] %v20725_v51  ;;  %10190 = vmatprep.mubr.bf16.mxu0 %v22594_v26  ;;  %v11149_v61 = vrot.slane %v20707_v60, 1  ;;  %v11517_v52 = vmax.f32 %v11485_v0, 0.0  ;;  %v11487_v24 = vmul.f32 %v20421_v38, %v20373_v2  ;;  %v22595_v33 = vld [vmem:[#allocation203_spill] sm:$0xff]  ;;  %v11150_v48 = vrot.slane %v20710_v16, 1  ;;  %v8767_v0 = vpop.f32.mrf.mxu1 }
 0x557   : > { %v11926_v29 = vsel %vm7393_vm7, %v22591_v23, %v20720_v47  ;;  %v11927_v28 = vsel %vm7393_vm7, %v22593_v53, %v20722_v50  ;;  %v20745_v23 = vadd.f32 %v13742_v34, %v22595_v33  ;;  %v11310_v53 = vrot.slane %v20707_v60, 2  ;;  %11853 = vrot.lane.b32.xlu1 %v11516_v22, %s14670_s18  ;;  %v20760_v42 = vpop.permute.xlu1 %11589  ;;  %v22599_v33 = vld [vmem:[#allocation204_spill] sm:$0xff]  ;;  %v22600_v50 = vld [vmem:[#allocation125_spill] sm:$0xff] }
 0x558   : > { %12044 = vst [vmem:[%s20504_s19 + $0x108] sm:$0xff] %v11926_v29  ;;  %12047 = vst [vmem:[%s20504_s19 + $0x120] sm:$0xff] %v11927_v28  ;;  %v11152_v57 = vrot.slane %v20714_v15, 1  ;;  %v11153_v3 = vrot.slane %v20717_v40, 1  ;;  %v13369_v29 = vpop.f32.mrf.mxu0  ;;  %v20754_v2 = vsel %vm2371_vm0, 0.0, %v10903_v7  ;;  %v20757_v34 = vsel %vm2371_vm0, %v10903_v7, 0.0  ;;  %11855 = vrot.lane.b32.xlu0 %v11517_v52, %s14670_s18  ;;  %v20762_v28 = vpop.permute.xlu0 %11591 }
 0x559   : > { %22596 = vst [vmem:[#allocation9_spill] sm:$0xff] %v20745_v23  ;;  %22597 = vst [vmem:[#allocation21_spill] sm:$0xff] %v20760_v42  ;;  %v20764_v26 = vadd.f32 %v13369_v29, %v13368_v12  ;;  %v20767_v22 = vadd.f32 %v22599_v33, %v8767_v0  ;;  %v22601_v47 = vmax.f32 %v22600_v50, 0.0  ;;  %v11518_v23 = vmax.f32 %v11486_v56, 0.0  ;;  %v22602_v7 = vld [vmem:[#allocation142_spill] sm:$0xff]  ;;  %v13743_v12 = vpop.f32.mrf.mxu1 }
 0x55a   : > { %22598 = vst [vmem:[#allocation69_spill] sm:$0xff] %v20762_v28  ;;  %v22603_v9 = vmax.f32 %v22602_v7, 0.0  ;;  %v11488_v36 = vmul.f32 %v20436_v8, %v20407_v58  ;;  %v13371_v51 = vpop.f32.mrf.mxu0  ;;  %v11222_v29 = vadd.f32 %v11148_v11, %v20627_v17  ;;  %v11489_v0 = vmul.f32 %v20439_v19, %v20500_v31  ;;  %v14520_v11 = vld [vmem:[#allocation3 + $0x128] ss:$12 sps:$4 sm:$0xff]  }
 0x55b   : > { %v11928_v49 = vsel %vm7393_vm7, %v22601_v47, %v20760_v42  ;;  %v11519_v50 = vmax.f32 %v11487_v24, 0.0  ;;  %v20785_v56 = vadd.f32 %v13743_v12, %v20294_v32  ;;  %v11151_v47 = vsel %vm11067_vm14, %v11149_v61, %v11150_v48  ;;  %11857 = vrot.lane.b32.xlu1 %v11518_v23, %s14670_s18  ;;  %v8770_v7 = vpop.f32.mrf.mxu1  ;;  %v22608_v23 = vld [vmem:[#allocation148_spill] sm:$0xff]  ;;  %10191 = vmatmul.mubr.bf16.gmra.mxu0 %v20279_v37  ;;  %v22611_v12 = vld [vmem:[#allocation193_spill] sm:$0xff] }
 0x55c   : > { %v11929_v52 = vsel %vm7393_vm7, %v22603_v9, %v20762_v28  ;;  %12050 = vst [vmem:[%s20504_s19 + $0x138] sm:$0xff] %v11928_v49  ;;  %v11311_v9 = vrot.slane %v20710_v16, 2  ;;  %v11154_v33 = vsel %vm11067_vm14, %v11152_v57, %v11153_v3  ;;  %v13372_v58 = vpop.f32.mrf.mxu0  ;;  %v22604_v42 = vrot.slane %v20633_v1, 2  ;;  %v20799_v16 = vpop.permute.xlu1 %11593  ;;  %v22609_v57 = vld [vmem:[#allocation199_spill] sm:$0xff]  ;;  %13817 = vmatmul.mubr.msk.bf16.gmra.mxu1 %vm6848_vm9, %v14520_v11  ;;  %10198 = vmatprep.mubr.bf16.mxu0 %v20290_v43 }
 0x55d   : > { %12053 = vst [vmem:[%s20504_s19 + $0x150] sm:$0xff] %v11929_v52  ;;  %v22605_v19 = vrot.slane %v20627_v17, 2  ;;  %v11155_v32 = vrot.slane %v20754_v2, 1  ;;  %v11156_v49 = vrot.slane %v20757_v34, 1  ;;  %11859 = vrot.lane.b32.xlu0 %v11519_v50, %s14670_s18  ;;  %22606 = vst [vmem:[#allocation116_spill] sm:$0xff] %v20799_v16  ;;  %v20801_v61 = vpop.permute.xlu0 %11595  ;;  %v20803_v24 = vadd.f32 %v13372_v58, %v13371_v51  ;;  %v13746_v58 = vpop.f32.mrf.mxu1 }
 0x55e   : > { %22607 = vst [vmem:[#allocation71_spill] sm:$0xff] %v20801_v61  ;;  %v20806_v1 = vadd.f32 %v22608_v23, %v8770_v7  ;;  %v14521_v17 = vld [vmem:[#allocation3 + $0x140] ss:$12 sps:$4 sm:$0xff]   ;;  %v11490_v48 = vmul.f32 %v20465_v35, %v20515_v45  ;;  %v22610_v3 = vmax.f32 %v22609_v57, 0.0  ;;  %v11520_v52 = vmax.f32 %v11488_v36, 0.0  ;;  %v22613_v45 = vld [vmem:[#allocation105_spill] sm:$0xff] }
 0x55f   : > { %v11309_v31 = vsel %vm11228_vm15, %v22605_v19, %v22604_v42  ;;  %v22612_v50 = vmax.f32 %v22611_v12, 0.0  ;;  %v11223_v37 = vadd.f32 %v11151_v47, %v20707_v60  ;;  %v11521_v7 = vmax.f32 %v11489_v0, 0.0  ;;  %13820 = vmatprep.mubr.msk.bf16.mxu1 %vm6848_vm9, %v14521_v17  ;;  %v8783_v43 = vpop.f32.mrf.mxu1 }
 0x560   : > { %v11930_v42 = vsel %vm7393_vm7, %v22610_v3, %v20799_v16  ;;  %v11491_v35 = vmul.f32 %v20361_v14, %v20630_v55  ;;  %v20827_v36 = vadd.f32 %v13746_v58, %v22613_v45  ;;  %v11313_v19 = vrot.slane %v20714_v15, 2  ;;  %11861 = vrot.lane.b32.xlu1 %v11520_v52, %s14670_s18  ;;  %v20838_v11 = vpop.permute.xlu1 %11597 }
 0x561   : > { %v11931_v51 = vsel %vm7393_vm7, %v22612_v50, %v20801_v61  ;;  %12056 = vst [vmem:[%s20504_s19 + $0x168] sm:$0xff] %v11930_v42  ;;  %v11314_v23 = vrot.slane %v20717_v40, 2  ;;  %v11383_v60 = vadd.f32 %v11309_v31, %v11222_v29  ;;  %v11312_v0 = vsel %vm11228_vm15, %v11310_v53, %v11311_v9  ;;  %11863 = vrot.lane.b32.xlu0 %v11521_v7, %s14670_s18  ;;  %v20840_v17 = vpop.permute.xlu0 %11599  ;;  %v22616_v40 = vld [vmem:[#allocation101_spill] sm:$0xff]  ;;  %v13747_v31 = vpop.f32.mrf.mxu1 }
 0x562   : > { %12059 = vst [vmem:[%s20504_s19 + $0x180] sm:$0xff] %v11931_v51  ;;  %v11224_v47 = vadd.f32 %v11154_v33, %v20714_v15  ;;  %v11157_v14 = vsel %vm11067_vm14, %v11155_v32, %v11156_v49  ;;  %v11316_v55 = vrot.slane %v20754_v2, 2  ;;  %22614 = vst [vmem:[#allocation64_spill] sm:$0xff] %v20838_v11  ;;  %v20843_v57 = vadd.f32 %v22616_v40, %v8783_v43  ;;  %v14523_v51 = vld [vmem:[#allocation3 + $0x188] ss:$12 sps:$4 sm:$0xff]  }
 0x563   : > { %22615 = vst [vmem:[#allocation63_spill] sm:$0xff] %v20840_v17  ;;  %v11522_v3 = vmax.f32 %v11490_v48, 0.0  ;;  %v22617_v29 = vmax.f32 %v22513_v6, 0.0  ;;  %v22618_v15 = vmax.f32 %v22517_v30, 0.0  ;;  %v11492_v33 = vmul.f32 %v20393_v4, %v20684_v41  ;;  %v22619_v30 = vld [vmem:[#allocation167_spill] sm:$0xff]  ;;  %v8786_v50 = vpop.f32.mrf.mxu1  ;;  %10199 = vmatmul.mubr.bf16.gmra.mxu0 %v20345_v63 }
 0x564   : > { %v11317_v32 = vrot.slane %v20757_v34, 2  ;;  %v11523_v49 = vmax.f32 %v11491_v35, 0.0  ;;  %v11493_v48 = vmul.f32 %v20395_v5, %v11383_v60  ;;  %v20860_v6 = vadd.f32 %v13747_v31, %v20538_v13  ;;  %v14522_v41 = vld [vmem:[#allocation3 + $0x158] ss:$12 sps:$4 sm:$0xff]   ;;  %v20867_v34 = vpop.permute.xlu1 %11601 }
 0x565   : > { %v11932_v53 = vsel %vm7393_vm7, %v22617_v29, %v20838_v11  ;;  %v11933_v9 = vsel %vm7393_vm7, %v22618_v15, %v20840_v17  ;;  %v11225_v42 = vadd.f32 %v11157_v14, %v20754_v2  ;;  %11865 = vrot.lane.b32.xlu1 %v11522_v3, %s14670_s18  ;;  %v2060_v52 = vmax.f32 %v22619_v30, 0.0  ;;  %22620 = vst [vmem:[#allocation24_spill] sm:$0xff] %v20867_v34  ;;  %v20869_v5 = vpop.permute.xlu0 %11603 }
 0x566   : > { %12062 = vst [vmem:[%s20504_s19 + $0x198] sm:$0xff] %v11932_v53  ;;  %12065 = vst [vmem:[%s20504_s19 + $0x1b0] sm:$0xff] %v11933_v9  ;;  %v11384_v12 = vadd.f32 %v11312_v0, %v11223_v37  ;;  %v11315_v4 = vsel %vm11228_vm15, %v11313_v19, %v11314_v23  ;;  %11867 = vrot.lane.b32.xlu0 %v11523_v49, %s14670_s18  ;;  %v20872_v13 = vadd.f32 %v20316_v62, %v8786_v50  ;;  %v13374_v19 = vpop.f32.mrf.mxu0  ;;  %v13750_v23 = vpop.f32.mrf.mxu1  ;;  %v22623_v62 = vld [vmem:[#allocation103_spill] sm:$0xff] }
 0x567   : > { %22621 = vst [vmem:[#allocation25_spill] sm:$0xff] %v20869_v5  ;;  %v11385_v2 = vadd.f32 %v11315_v4, %v11224_v47  ;;  %v22622_v58 = vmax.f32 %v22530_v10, 0.0  ;;  %v11524_v7 = vmax.f32 %v11492_v33, 0.0  ;;  %v11935_v35 = vsel %vm7393_vm7, %v2060_v52, %v20869_v5  ;;  %13821 = vmatmul.mubr.msk.bf16.gmra.mxu1 %vm6848_vm9, %v14522_v41  ;;  %10206 = vmatprep.mubr.bf16.mxu0 %v22623_v62  ;;  %v22625_v47 = vld [vmem:[#allocation18_spill] sm:$0xff]  ;;  %v22629_v52 = vld [vmem:[#allocation173_spill] sm:$0xff]  ;;  %v22654_v5 = vld [vmem:[#allocation56_spill] sm:$0xff] }
 0x568   : > { %v11494_v45 = vmul.f32 %v20419_v59, %v11384_v12  ;;  %12071 = vst [vmem:[%s20504_s19 + $0x1e0] sm:$0xff] %v11935_v35  ;;  %v11525_v63 = vmax.f32 %v11493_v48, 0.0  ;;  %v20888_v10 = vadd.f32 %v13750_v23, %v20764_v26  ;;  %13824 = vmatprep.mubr.msk.bf16.mxu1 %vm6848_vm9, %v14523_v51  ;;  %v11318_v60 = vsel %vm11228_vm15, %v11316_v55, %v11317_v32  ;;  %v22624_v59 = vld [vmem:[#allocation169_spill] sm:$0xff]  ;;  %v13375_v3 = vpop.f32.mrf.mxu0  ;;  %v8799_v29 = vpop.f32.mrf.mxu1  ;;  %v14524_v41 = vld [vmem:[#allocation3 + $0x1a0] ss:$12 sps:$4 sm:$0xff]  }
 0x569   : > { %v11934_v37 = vsel %vm7393_vm7, %v22622_v58, %v20867_v34  ;;  %v11495_v43 = vmul.f32 %v20421_v38, %v11385_v2  ;;  %11869 = vrot.lane.b32.xlu1 %v11524_v7, %s14670_s18  ;;  %v2062_v0 = vmax.f32 %v22624_v59, 0.0  ;;  %v2064_v14 = vmax.f32 %v22625_v47, 0.0  ;;  %v20896_v38 = vpop.permute.xlu1 %11605  ;;  %v20898_v26 = vpop.permute.xlu0 %11607  ;;  %v14528_v7 = vld [vmem:[#allocation3 + $0x1b8] ss:$12 sps:$4 sm:$0xff]  }
 0x56a   : > { %12068 = vst [vmem:[%s20504_s19 + $0x1c8] sm:$0xff] %v11934_v37  ;;  %v11386_v40 = vadd.f32 %v11318_v60, %v11225_v42  ;;  %11871 = vrot.lane.b32.xlu0 %v11525_v63, %s14670_s18  ;;  %22626 = vst [vmem:[#allocation12_spill] sm:$0xff] %v20896_v38  ;;  %v13376_v53 = vadd.f32 %v13375_v3, %v13374_v19  ;;  %v20901_v55 = vadd.f32 %v20601_v21, %v8799_v29  ;;  %v13377_v32 = vpop.f32.mrf.mxu0  ;;  %v13751_v49 = vpop.f32.mrf.mxu1  ;;  %v22628_v21 = vld [vmem:[#allocation172_spill] sm:$0xff]  ;;  %v22632_v37 = vld [vmem:[#allocation117_spill] sm:$0xff] }
 0x56b   : > { %22627 = vst [vmem:[#allocation70_spill] sm:$0xff] %v20898_v26  ;;  %v11936_v15 = vsel %vm7393_vm7, %v2062_v0, %v20896_v38  ;;  %v11526_v9 = vmax.f32 %v11494_v45, 0.0  ;;  %v11937_v33 = vsel %vm7393_vm7, %v2064_v14, %v20898_v26  ;;  %v11527_v48 = vmax.f32 %v11495_v43, 0.0  ;;  %10207 = vmatmul.mubr.bf16.gmra.mxu0 %v22632_v37  ;;  %v22634_v63 = vld [vmem:[#allocation160_spill] sm:$0xff] }
 0x56c   : > { %v11496_v31 = vmul.f32 %v20436_v8, %v11386_v40  ;;  %12074 = vst [vmem:[%s20504_s19 + $0x1f8] sm:$0xff] %v11936_v15  ;;  %12077 = vst [vmem:[%s20504_s19 + $0x210] sm:$0xff] %v11937_v33  ;;  %v20911_v42 = vadd.f32 %v13751_v49, %v20803_v24  ;;  %v2066_v30 = vmax.f32 %v22628_v21, 0.0  ;;  %v2068_v12 = vmax.f32 %v22629_v52, 0.0  ;;  %v13378_v50 = vpop.f32.mrf.mxu0  ;;  %v8802_v4 = vpop.f32.mrf.mxu1  ;;  %v14527_v8 = vld [vmem:[#allocation3 + $0x1cc] ss:$12 sps:$4 sm:$0xff]  }
 0x56d   : > { %11873 = vrot.lane.b32.xlu1 %v11526_v9, %s14670_s18  ;;  %v20917_v2 = vpop.permute.xlu1 %11609  ;;  %v20919_v51 = vpop.permute.xlu0 %11611  ;;  %v13379_v24 = vadd.f32 %v13378_v50, %v13377_v32  ;;  %v20922_v58 = vadd.f32 %v20641_v46, %v8802_v4  ;;  %10214 = vmatprep.mubr.bf16.mxu0 %v14527_v8  ;;  %v22633_v46 = vld [vmem:[#allocation158_spill] sm:$0xff]  ;;  %v2072_v43 = vmax.f32 %v22634_v63, 0.0  ;;  %v14525_v29 = vld [vmem:[#allocation3 + $0x1c8] ss:$12 sps:$4 sm:$0xff]  }
 0x56e   : > { %11875 = vrot.lane.b32.xlu0 %v11527_v48, %s14670_s18  ;;  %22630 = vst [vmem:[#allocation27_spill] sm:$0xff] %v20917_v2  ;;  %22631 = vst [vmem:[#allocation15_spill] sm:$0xff] %v20919_v51  ;;  %v11938_v35 = vsel %vm7393_vm7, %v2066_v30, %v20917_v2  ;;  %v11528_v45 = vmax.f32 %v11496_v31, 0.0  ;;  %v11939_v19 = vsel %vm7393_vm7, %v2068_v12, %v20919_v51  ;;  %v13754_v23 = vpop.f32.mrf.mxu1  ;;  %v2070_v62 = vmax.f32 %v22633_v46, 0.0  ;;  %v22637_v15 = vld [vmem:[#allocation177_spill] sm:$0xff]  ;;  %v22638_v33 = vld [vmem:[#allocation180_spill] sm:$0xff] }
 0x56f   : > { %13825 = vmatmul.mubr.msk.bf16.gmra.mxu1 %vm6848_vm9, %v14524_v41  ;;  %12080 = vst [vmem:[%s20504_s19 + $0x228] sm:$0xff] %v11938_v35  ;;  %12083 = vst [vmem:[%s20504_s19 + $0x240] sm:$0xff] %v11939_v19  ;;  %v2074_v9 = vmax.f32 %v22637_v15, 0.0  ;;  %v2076_v31 = vmax.f32 %v22638_v33, 0.0  ;;  %v14529_v49 = vld [vmem:[#allocation3 + $0x1d0] ss:$12 sps:$4 sm:$0xff]  }
 0x570   : > { %13828 = vmatprep.mubr.msk.bf16.mxu1 %vm6848_vm9, %v14528_v7  ;;  %v8815_v60 = vpop.f32.mrf.mxu1  ;;  %v13380_v12 = vpop.f32.mrf.mxu0  ;;  %v22641_v41 = vld [vmem:[#allocation185_spill] sm:$0xff]  ;;  %v22646_v15 = vld [vmem:[#allocation162_spill] sm:$0xff]  ;;  %v22652_v51 = vld [vmem:[#allocation151_spill] sm:$0xff] }
 0x571   : > { %11877 = vrot.lane.b32.xlu1 %v11528_v45, %s14670_s18  ;;  %v20936_v59 = vpop.permute.xlu1 %11613  ;;  %v20938_v0 = vpop.permute.xlu0 %11615  ;;  %v20940_v47 = vadd.f32 %v13376_v53, %v8815_v60  ;;  %v2078_v8 = vmax.f32 %v22641_v41, 0.0 }
 0x572   : > { %22635 = vst [vmem:[#allocation29_spill] sm:$0xff] %v20936_v59  ;;  %22636 = vst [vmem:[#allocation59_spill] sm:$0xff] %v20938_v0  ;;  %v11940_v14 = vsel %vm7393_vm7, %v2070_v62, %v20936_v59  ;;  %v11941_v40 = vsel %vm7393_vm7, %v2072_v43, %v20938_v0  ;;  %v13755_v3 = vpop.f32.mrf.mxu1  ;;  %v13381_v7 = vpop.f32.mrf.mxu0  ;;  %v22645_v62 = vld [vmem:[#allocation131_spill] sm:$0xff]  ;;  %v22653_v0 = vld [vmem:[#allocation22_spill] sm:$0xff] }
 0x573   : > { %12086 = vst [vmem:[%s20504_s19 + $0x258] sm:$0xff] %v11940_v14  ;;  %12089 = vst [vmem:[%s20504_s19 + $0x270] sm:$0xff] %v11941_v40  ;;  %10215 = vmatmul.mubr.bf16.gmra.mxu0 %v14525_v29  ;;  %v13382_v46 = vadd.f32 %v13381_v7, %v13380_v12 }
 0x574   : > { %v8818_v32 = vpop.f32.mrf.mxu1  ;;  %v13383_v60 = vpop.f32.mrf.mxu0 }
 0x575   : > { %v20950_v53 = vpop.permute.xlu1 %11617  ;;  %v20952_v48 = vpop.permute.xlu0 %11619  ;;  %v20954_v21 = vadd.f32 %v13379_v24, %v8818_v32  ;;  %v22642_v24 = vld [vmem:[#allocation187_spill] sm:$0xff]  ;;  %v20981_v40 = vadd.f32 %v13754_v23, %v13382_v46 }
 0x576   : > { %22639 = vst [vmem:[#allocation134_spill] sm:$0xff] %v20950_v53  ;;  %22640 = vst [vmem:[#allocation73_spill] sm:$0xff] %v20952_v48  ;;  %v11942_v30 = vsel %vm7393_vm7, %v2074_v9, %v20950_v53  ;;  %v11943_v52 = vsel %vm7393_vm7, %v2076_v31, %v20952_v48  ;;  %v13758_v50 = vpop.f32.mrf.mxu1  ;;  %v2080_v37 = vmax.f32 %v22642_v24, 0.0  ;;  %v2082_v9 = vmax.f32 %v22646_v15, 0.0  ;;  %v13384_v33 = vpop.f32.mrf.mxu0 }
 0x577   : > { %13829 = vmatmul.mubr.msk.bf16.gmra.mxu1 %vm6848_vm9, %v14529_v49  ;;  %12092 = vst [vmem:[%s20504_s19 + $0x288] sm:$0xff] %v11942_v30  ;;  %12095 = vst [vmem:[%s20504_s19 + $0x2a0] sm:$0xff] %v11943_v52  ;;  %v20964_v4 = vadd.f32 %v13758_v50, %v20459_v27  ;;  %v13385_v49 = vadd.f32 %v13384_v33, %v13383_v60  ;;  %v22648_v30 = vld [vmem:[#allocation111_spill] sm:$0xff] }
 0x578   : > { %v8831_v35 = vpop.f32.mrf.mxu1  ;;  %v13766_v41 = vpop.f32.mrf.mxu0 }
 0x579   : > { %v20968_v45 = vpop.permute.xlu1 %11621  ;;  %v20970_v19 = vpop.permute.xlu0 %11623  ;;  %v20973_v63 = vadd.f32 %v22645_v62, %v8831_v35  ;;  %v20995_v23 = vadd.f32 %v13755_v3, %v13385_v49 }
 0x57a   : > { %22643 = vst [vmem:[#allocation47_spill] sm:$0xff] %v20968_v45  ;;  %22644 = vst [vmem:[#allocation60_spill] sm:$0xff] %v20970_v19  ;;  %v11944_v43 = vsel %vm7393_vm7, %v2078_v8, %v20968_v45  ;;  %v11945_v27 = vsel %vm7393_vm7, %v2080_v37, %v20970_v19  ;;  %v13759_v14 = vpop.f32.mrf.mxu1  ;;  %v9437_v8 = vpop.f32.mrf.mxu0 }
 0x57b   : > { %12098 = vst [vmem:[%s20504_s19 + $0x2b8] sm:$0xff] %v11944_v43  ;;  %12101 = vst [vmem:[%s20504_s19 + $0x2d0] sm:$0xff] %v11945_v27  ;;  %v20984_v29 = vadd.f32 %v13759_v14, %v20469_v44 }
 0x57c   : > { %v8834_v31 = vpop.f32.mrf.mxu1  ;;  %v13767_v7 = vpop.f32.mrf.mxu0 }
 0x57d   : > { %v20987_v32 = vpop.permute.xlu1 %11625  ;;  %v20990_v52 = vadd.f32 %v22648_v30, %v8834_v31 }
 0x57e   : > { %22647 = vst [vmem:[#allocation32_spill] sm:$0xff] %v20987_v32  ;;  %v11946_v12 = vsel %vm7393_vm7, %v2082_v9, %v20987_v32  ;;  %v13432_v50 = vpop.f32.mrf.mxu1  ;;  %v9440_v62 = vpop.f32.mrf.mxu0 }
 0x57f   : > { %12104 = vst [vmem:[%s20504_s19 + $0x2e8] sm:$0xff] %v11946_v12  ;;  %v22649_v12 = vld [vmem:[#allocation113_spill] sm:$0xff] }
 0x580   : > { %v13433_v44 = vpop.f32.mrf.mxu1  ;;  %v13770_v14 = vpop.f32.mrf.mxu0 }
 0x581   : > { %v13434_v24 = vadd.f32 %v13433_v44, %v13432_v50 }
 0x582   : > { %v13435_v37 = vpop.f32.mrf.mxu1  ;;  %v9453_v33 = vpop.f32.mrf.mxu0 }
 0x583   : > { %v9277_v35 = vadd.f32 %v13434_v24, %v20523_v18 }
 0x584   : > { %v13436_v46 = vpop.f32.mrf.mxu1  ;;  %v13771_v30 = vpop.f32.mrf.mxu0 }
 0x585   : > { %v20998_v43 = vadd.f32 %v9437_v8, %v9277_v35  ;;  %v13437_v27 = vadd.f32 %v13436_v46, %v13435_v37  ;;  %v22650_v35 = vld [vmem:[#allocation176_spill] sm:$0xff] }
 0x586   : > { %v13438_v60 = vpop.f32.mrf.mxu1  ;;  %v9456_v18 = vpop.f32.mrf.mxu0 }
 0x587   : > { %v9280_v15 = vadd.f32 %v13437_v27, %v20563_v25 }
 0x588   : > { %v13439_v9 = vpop.f32.mrf.mxu1  ;;  %v13774_v37 = vpop.f32.mrf.mxu0 }
 0x589   : > { %v21001_v3 = vadd.f32 %v9440_v62, %v9280_v15  ;;  %v13440_v31 = vadd.f32 %v13439_v9, %v13438_v60 }
 0x58a   : > { %v13441_v49 = vpop.f32.mrf.mxu1  ;;  %v9469_v25 = vpop.f32.mrf.mxu0 }
 0x58b   : > { %v9285_v50 = vadd.f32 %v13440_v31, %v22649_v12 }
 0x58c   : > { %v13442_v44 = vpop.f32.mrf.mxu1  ;;  %v13775_v60 = vpop.f32.mrf.mxu0 }
 0x58d   : > { %v13443_v24 = vadd.f32 %v13442_v44, %v13441_v49  ;;  %v21004_v45 = vadd.f32 %v13766_v41, %v9285_v50 }
 0x58e   : > { %v13444_v8 = vpop.f32.mrf.mxu1  ;;  %v9472_v31 = vpop.f32.mrf.mxu0 }
 0x58f   : > { %v9288_v46 = vadd.f32 %v13443_v24, %v22650_v35 }
 0x590   : > { %v13445_v48 = vpop.f32.mrf.mxu1  ;;  %v21012_v49 = vpop.f32.mrf.mxu0 }
 0x591   : > { %v13446_v27 = vadd.f32 %v13445_v48, %v13444_v8  ;;  %v21007_v32 = vadd.f32 %v13767_v7, %v9288_v46  ;;  %v22651_v46 = vld [vmem:[#allocation14_spill] sm:$0xff] }
 0x592   : > { %v13447_v62 = vpop.f32.mrf.mxu1  ;;  %v9485_v24 = vpop.f32.mrf.mxu0 }
 0x593   : > { %v9293_v15 = vadd.f32 %v13446_v27, %v20604_v20 }
 0x594   : > { %v13448_v9 = vpop.f32.mrf.mxu1  ;;  %v21017_v8 = vpop.f32.mrf.mxu0 }
 0x595   : > { %v13449_v12 = vadd.f32 %v13448_v9, %v13447_v62  ;;  %v21010_v19 = vadd.f32 %v9453_v33, %v9293_v15 }
 0x596   : > { %v13450_v41 = vpop.f32.mrf.mxu1  ;;  %v9488_v59 = vpop.f32.mrf.mxu0 }
 0x597   : > { %v9296_v50 = vadd.f32 %v13449_v12, %v20644_v39 }
 0x598   : > { %v13451_v44 = vpop.f32.mrf.mxu1  ;;  %v21022_v9 = vpop.f32.mrf.mxu0 }
 0x599   : > { %v13452_v35 = vadd.f32 %v13451_v44, %v13450_v41  ;;  %v21015_v48 = vadd.f32 %v9456_v18, %v9296_v50 }
 0x59a   : > { %v13453_v7 = vpop.f32.mrf.mxu1  ;;  %v21025_v53 = vpop.f32.mrf.mxu0 }
 0x59b   : > { %v9301_v20 = vadd.f32 %v13452_v35, %v22651_v46 }
 0x59c   : > { %v13454_v27 = vpop.f32.mrf.mxu1  ;;  %v21029_v44 = vpop.f32.mrf.mxu0 }
 0x59d   : > { %v13455_v62 = vadd.f32 %v13454_v27, %v13453_v7  ;;  %v21020_v33 = vadd.f32 %v13770_v14, %v9301_v20 }
 0x59e   : > { %v13456_v15 = vpop.f32.mrf.mxu1  ;;  %v21032_v7 = vpop.f32.mrf.mxu0 }
 0x59f   : > { %v9304_v39 = vadd.f32 %v13455_v62, %v22652_v51 }
 0x5a0   : > { %v13457_v12 = vpop.f32.mrf.mxu1  ;;  %v21037_v62 = vpop.f32.mrf.mxu0 }
 0x5a1   : > { %v13458_v18 = vadd.f32 %v13457_v12, %v13456_v15  ;;  %v21027_v41 = vadd.f32 %v13771_v30, %v9304_v39 }
 0x5a2   : > { %v13459_v50 = vpop.f32.mrf.mxu1  ;;  %v21039_v30 = vpop.f32.mrf.mxu0 }
 0x5a3   : > { %v9309_v35 = vadd.f32 %v13458_v18, %v20682_v54 }
 0x5a4   : > { %v13460_v46 = vpop.f32.mrf.mxu1  ;;  %v21044_v18 = vpop.f32.mrf.mxu0 }
 0x5a5   : > { %v13461_v14 = vadd.f32 %v13460_v46, %v13459_v50  ;;  %v21034_v20 = vadd.f32 %v9469_v25, %v9309_v35  ;;  %v22655_v46 = vld [vmem:[#allocation8_spill] sm:$0xff] }
 0x5a6   : > { %v13462_v27 = vpop.f32.mrf.mxu1  ;;  %v21046_v25 = vpop.f32.mrf.mxu0 }
 0x5a7   : > { %v9312_v51 = vadd.f32 %v13461_v14, %v22653_v0 }
 0x5a8   : > { %v13463_v38 = vpop.f32.mrf.mxu1  ;;  %v21051_v26 = vpop.f32.mrf.mxu0 }
 0x5a9   : > { %v13464_v15 = vadd.f32 %v13463_v38, %v13462_v27  ;;  %v21041_v39 = vadd.f32 %v9472_v31, %v9312_v51 }
 0x5aa   : > { %v13465_v12 = vpop.f32.mrf.mxu1  ;;  %v21053_v31 = vpop.f32.mrf.mxu0 }
 0x5ab   : > { %v9317_v54 = vadd.f32 %v13464_v15, %v22654_v5 }
 0x5ac   : > { %v13466_v2 = vpop.f32.mrf.mxu1  ;;  %v21058_v11 = vpop.f32.mrf.mxu0 }
 0x5ad   : > { %v13467_v50 = vadd.f32 %v13466_v2, %v13465_v12  ;;  %v21048_v35 = vadd.f32 %v13774_v37, %v9317_v54 }
 0x5ae   : > { %v13468_v0 = vpop.f32.mrf.mxu1  ;;  %v21060_v37 = vpop.f32.mrf.mxu0 }
 0x5af   : > { %v9320_v14 = vadd.f32 %v13467_v50, %v22655_v46 }
 0x5b0   : > { %v13469_v38 = vpop.f32.mrf.mxu1  ;;  %v21065_v61 = vpop.f32.mrf.mxu0 }
 0x5b1   : > { %v13470_v27 = vadd.f32 %v13469_v38, %v13468_v0  ;;  %v21055_v51 = vadd.f32 %v13775_v60, %v9320_v14  ;;  %22656 = vst [vmem:[#allocation30_spill] sm:$0xff] %v21065_v61 }
 0x5b2   : > { %v13471_v5 = vpop.f32.mrf.mxu1  ;;  %v21067_v60 = vpop.f32.mrf.mxu0 }
 0x5b3   : > { %v9325_v15 = vadd.f32 %v13470_v27, %v20767_v22  ;;  %v22657_v27 = vld [vmem:[#allocation9_spill] sm:$0xff] }
 0x5b4   : > { %v13472_v2 = vpop.f32.mrf.mxu1  ;;  %v21072_v17 = vpop.f32.mrf.mxu0 }
 0x5b5   : > { %v13473_v12 = vadd.f32 %v13472_v2, %v13471_v5  ;;  %v21062_v54 = vadd.f32 %v9485_v24, %v9325_v15  ;;  %22658 = vst [vmem:[#allocation20_spill] sm:$0xff] %v21072_v17 }
 0x5b6   : > { %v13474_v50 = vpop.f32.mrf.mxu1  ;;  %v21074_v24 = vpop.f32.mrf.mxu0 }
 0x5b7   : > { %v9328_v46 = vadd.f32 %v13473_v12, %v20806_v1 }
 0x5b8   : > { %v13475_v0 = vpop.f32.mrf.mxu1 }
 0x5b9   : > { %v13476_v38 = vadd.f32 %v13475_v0, %v13474_v50  ;;  %v21069_v14 = vadd.f32 %v9488_v59, %v9328_v46  ;;  %v21080_v50 = vpop.f32.mrf.mxu0 }
 0x5ba   : > { %v13477_v22 = vpop.f32.mrf.mxu1 }
 0x5bb   : > { %v9333_v34 = vadd.f32 %v13476_v38, %v22657_v27  ;;  %v21082_v46 = vpop.f32.mrf.mxu0 }
 0x5bc   : > { %v13478_v5 = vpop.f32.mrf.mxu1 }
 0x5bd   : > { %v13479_v2 = vadd.f32 %v13478_v5, %v13477_v22  ;;  %v21077_v15 = vadd.f32 %v21012_v49, %v9333_v34  ;;  %v21088_v5 = vpop.f32.mrf.mxu0 }
 0x5be   : > { %v13480_v1 = vpop.f32.mrf.mxu1 }
 0x5bf   : > { %v9336_v12 = vadd.f32 %v13479_v2, %v20785_v56  ;;  %v21090_v49 = vpop.f32.mrf.mxu0 }
 0x5c0   : > { %v13481_v0 = vpop.f32.mrf.mxu1 }
 0x5c1   : > { %v13482_v59 = vadd.f32 %v13481_v0, %v13480_v1  ;;  %v21085_v38 = vadd.f32 %v21017_v8, %v9336_v12  ;;  %v21096_v0 = vpop.f32.mrf.mxu0 }
 0x5c2   : > { %v13483_v27 = vpop.f32.mrf.mxu1 }
 0x5c3   : > { %v9341_v22 = vadd.f32 %v13482_v59, %v20843_v57  ;;  %v21098_v12 = vpop.f32.mrf.mxu0 }
 0x5c4   : > { %v13484_v16 = vpop.f32.mrf.mxu1 }
 0x5c5   : > { %v13485_v34 = vadd.f32 %v13484_v16, %v13483_v27  ;;  %v21093_v56 = vadd.f32 %v21025_v53, %v9341_v22  ;;  %v21104_v27 = vpop.f32.mrf.mxu0 }
 0x5c6   : > { %v13486_v2 = vpop.f32.mrf.mxu1 }
 0x5c7   : > { %22659 = vst [vmem:[#allocation72_spill] sm:$0xff] %v21093_v56  ;;  %v9344_v1 = vadd.f32 %v13485_v34, %v20872_v13  ;;  %v21106_v22 = vpop.f32.mrf.mxu0 }
 0x5c8   : > { %v13487_v28 = vpop.f32.mrf.mxu1 }
 0x5c9   : > { %v13488_v8 = vadd.f32 %v13487_v28, %v13486_v2  ;;  %v21101_v57 = vadd.f32 %v21032_v7, %v9344_v1  ;;  %v21112_v2 = vpop.f32.mrf.mxu0 }
 0x5ca   : > { %v13489_v59 = vpop.f32.mrf.mxu1 }
 0x5cb   : > { %22660 = vst [vmem:[#allocation33_spill] sm:$0xff] %v21101_v57  ;;  %v9349_v16 = vadd.f32 %v13488_v8, %v20827_v36  ;;  %v21114_v1 = vpop.f32.mrf.mxu0 }
 0x5cc   : > { %v13490_v17 = vpop.f32.mrf.mxu1 }
 0x5cd   : > { %v13491_v53 = vadd.f32 %v13490_v17, %v13489_v59  ;;  %v21109_v13 = vadd.f32 %v21022_v9, %v9349_v16  ;;  %v21120_v59 = vpop.f32.mrf.mxu0 }
 0x5ce   : > { %v13492_v34 = vpop.f32.mrf.mxu1 }
 0x5cf   : > { %v9352_v28 = vadd.f32 %v13491_v53, %v20860_v6  ;;  %v21122_v16 = vpop.f32.mrf.mxu0 }
 0x5d0   : > { %v13493_v61 = vpop.f32.mrf.mxu1 }
 0x5d1   : > { %v13494_v7 = vadd.f32 %v13493_v61, %v13492_v34  ;;  %v21117_v36 = vadd.f32 %v21029_v44, %v9352_v28  ;;  %v21128_v34 = vpop.f32.mrf.mxu0 }
 0x5d2   : > { %v13495_v8 = vpop.f32.mrf.mxu1 }
 0x5d3   : > { %22661 = vst [vmem:[#allocation23_spill] sm:$0xff] %v21117_v36  ;;  %v9357_v17 = vadd.f32 %v13494_v7, %v20901_v55  ;;  %v21130_v28 = vpop.f32.mrf.mxu0 }
 0x5d4   : > { %v13496_v57 = vpop.f32.mrf.mxu1 }
 0x5d5   : > { %v13497_v9 = vadd.f32 %v13496_v57, %v13495_v8  ;;  %v21125_v6 = vadd.f32 %v21039_v30, %v9357_v17  ;;  %v21136_v8 = vpop.f32.mrf.mxu0 }
 0x5d6   : > { %v13498_v53 = vpop.f32.mrf.mxu1 }
 0x5d7   : > { %22662 = vst [vmem:[#allocation35_spill] sm:$0xff] %v21125_v6  ;;  %v9360_v61 = vadd.f32 %v13497_v9, %v20922_v58  ;;  %v21138_v17 = vpop.f32.mrf.mxu0 }
 0x5d8   : > { %v13499_v56 = vpop.f32.mrf.mxu1 }
 0x5d9   : > { %v13500_v44 = vadd.f32 %v13499_v56, %v13498_v53  ;;  %v21133_v55 = vadd.f32 %v21046_v25, %v9360_v61  ;;  %v21144_v53 = vpop.f32.mrf.mxu0 }
 0x5da   : > { %v13501_v7 = vpop.f32.mrf.mxu1 }
 0x5db   : > { %22663 = vst [vmem:[#allocation74_spill] sm:$0xff] %v21133_v55  ;;  %v9365_v57 = vadd.f32 %v13500_v44, %v20888_v10  ;;  %v21146_v61 = vpop.f32.mrf.mxu0 }
 0x5dc   : > { %v13502_v36 = vpop.f32.mrf.mxu1 }
 0x5dd   : > { %v13503_v30 = vadd.f32 %v13502_v36, %v13501_v7  ;;  %v21141_v58 = vadd.f32 %v21037_v62, %v9365_v57  ;;  %v21152_v7 = vpop.f32.mrf.mxu0 }
 0x5de   : > { %v13504_v9 = vpop.f32.mrf.mxu1 }
 0x5df   : > { %22664 = vst [vmem:[#allocation76_spill] sm:$0xff] %v21141_v58  ;;  %v9368_v56 = vadd.f32 %v13503_v30, %v20911_v42  ;;  %v21154_v57 = vpop.f32.mrf.mxu0 }
 0x5e0   : > { %v13505_v6 = vpop.f32.mrf.mxu1 }
 0x5e1   : > { %v13506_v25 = vadd.f32 %v13505_v6, %v13504_v9  ;;  %v21149_v10 = vadd.f32 %v21044_v18, %v9368_v56  ;;  %v21160_v9 = vpop.f32.mrf.mxu0 }
 0x5e2   : > { %v13507_v44 = vpop.f32.mrf.mxu1 }
 0x5e3   : > { %22665 = vst [vmem:[#allocation68_spill] sm:$0xff] %v21149_v10  ;;  %v9373_v36 = vadd.f32 %v13506_v25, %v20940_v47  ;;  %v21162_v56 = vpop.f32.mrf.mxu0 }
 0x5e4   : > { %v13508_v55 = vpop.f32.mrf.mxu1 }
 0x5e5   : > { %v13509_v62 = vadd.f32 %v13508_v55, %v13507_v44  ;;  %v21157_v42 = vadd.f32 %v21053_v31, %v9373_v36  ;;  %v21168_v44 = vpop.f32.mrf.mxu0 }
 0x5e6   : > { %v13510_v30 = vpop.f32.mrf.mxu1 }
 0x5e7   : > { %22666 = vst [vmem:[#allocation75_spill] sm:$0xff] %v21157_v42  ;;  %v9376_v6 = vadd.f32 %v13509_v62, %v20954_v21  ;;  %v21170_v36 = vpop.f32.mrf.mxu0 }
 0x5e8   : > { %v13511_v58 = vpop.f32.mrf.mxu1 }
 0x5e9   : > { %v13512_v18 = vadd.f32 %v13511_v58, %v13510_v30  ;;  %v21165_v47 = vadd.f32 %v21060_v37, %v9376_v6  ;;  %v21176_v30 = vpop.f32.mrf.mxu0 }
 0x5ea   : > { %v13513_v25 = vpop.f32.mrf.mxu1 }
 0x5eb   : > { %22667 = vst [vmem:[#allocation38_spill] sm:$0xff] %v21165_v47  ;;  %v9381_v55 = vadd.f32 %v13512_v18, %v20981_v40  ;;  %v21178_v6 = vpop.f32.mrf.mxu0 }
 0x5ec   : > { %v13514_v10 = vpop.f32.mrf.mxu1 }
 0x5ed   : > { %v13515_v31 = vadd.f32 %v13514_v10, %v13513_v25  ;;  %v21173_v21 = vadd.f32 %v21051_v26, %v9381_v55  ;;  %v21184_v25 = vpop.f32.mrf.mxu0 }
 0x5ee   : > { %v13516_v62 = vpop.f32.mrf.mxu1 }
 0x5ef   : > { %22668 = vst [vmem:[#allocation36_spill] sm:$0xff] %v21173_v21  ;;  %v9384_v58 = vadd.f32 %v13515_v31, %v20995_v23  ;;  %v21186_v55 = vpop.f32.mrf.mxu0 }
 0x5f0   : > { %v13517_v42 = vpop.f32.mrf.mxu1 }
 0x5f1   : > { %v13518_v37 = vadd.f32 %v13517_v42, %v13516_v62  ;;  %v21181_v40 = vadd.f32 %v21058_v11, %v9384_v58  ;;  %v21192_v62 = vpop.f32.mrf.mxu0 }
 0x5f2   : > { %v13519_v18 = vpop.f32.mrf.mxu1 }
 0x5f3   : > { %v9389_v10 = vadd.f32 %v13518_v37, %v20973_v63  ;;  %v21194_v58 = vpop.f32.mrf.mxu0 }
 0x5f4   : > { %v13520_v47 = vpop.f32.mrf.mxu1 }
 0x5f5   : > { %v13521_v26 = vadd.f32 %v13520_v47, %v13519_v18  ;;  %v21189_v23 = vadd.f32 %v21067_v60, %v9389_v10  ;;  %v21202_v18 = vpop.f32.mrf.mxu0  ;;  %v13570_v10 = vadd.f32 %v21098_v12, %v21096_v0  ;;  %v13573_v0 = vadd.f32 %v21106_v22, %v21104_v27 }
 0x5f6   : > { %v13522_v31 = vpop.f32.mrf.mxu1 }
 0x5f7   : > { %22669 = vst [vmem:[#allocation26_spill] sm:$0xff] %v21189_v23  ;;  %v9392_v42 = vadd.f32 %v13521_v26, %v20990_v52  ;;  %v21206_v26 = vpop.f32.mrf.mxu0 }
 0x5f8   : > { %v13523_v21 = vpop.f32.mrf.mxu1 }
 0x5f9   : > { %v13524_v11 = vadd.f32 %v13523_v21, %v13522_v31  ;;  %v21197_v63 = vadd.f32 %v21074_v24, %v9392_v42  ;;  %v13564_v21 = vadd.f32 %v21082_v46, %v21080_v50  ;;  %v21213_v31 = vpop.f32.mrf.mxu0  ;;  %v21218_v42 = vld [vmem:[%s21740_s6] ss:$0 sm:$0xff] }
 0x5fa   : > { %v13525_v37 = vpop.f32.mrf.mxu1 }
 0x5fb   : > { %22670 = vst [vmem:[#allocation78_spill] sm:$0xff] %v21197_v63  ;;  %v21200_v47 = vadd.f32 %v13524_v11, %v20964_v4 }
 0x5fc   : > { %v13526_v60 = vpop.f32.mrf.mxu1 }
 0x5fd   : > { %v13527_v52 = vadd.f32 %v13526_v60, %v13525_v37  ;;  %v21223_v37 = vpop.f32.mrf.mxu0 }
 0x5fe   : > { %v13802_v23 = vpop.f32.mrf.mxu1 }
 0x5ff   : > { %v21211_v24 = vadd.f32 %v13527_v52, %v20984_v29  ;;  %v10266_v4 = vadd.f32 %v13802_v23, %v13570_v10  ;;  %v21228_v29 = vld [vmem:[%s21740_s6 + $0x1] ss:$0 sm:$0xff]  ;;  %v13567_v23 = vadd.f32 %v21090_v49, %v21088_v5  ;;  %v21234_v52 = vpop.f32.mrf.mxu0  ;;  %v13576_v5 = vadd.f32 %v21114_v1, %v21112_v2 }
 0x600   : > { %v10257_v11 = vpop.f32.mrf.mxu1  ;;  %v13582_v49 = vadd.f32 %v21130_v28, %v21128_v34 }
 0x601   : > { %v10386_v12 = vadd.f32 %v10266_v4, %v21004_v45  ;;  %v10258_v50 = vadd.f32 %v13564_v21, %v10257_v11  ;;  %v21239_v11 = vpop.f32.mrf.mxu0 }
 0x602   : > { %v13803_v46 = vpop.f32.mrf.mxu1 }
 0x603   : > { %v10423_v60 = vmul.f32 %v21218_v42, %v10386_v12  ;;  %v10384_v10 = vadd.f32 %v10258_v50, %v20998_v43  ;;  %v10269_v27 = vadd.f32 %v13803_v46, %v13573_v0 }
 0x604   : > { %v10260_v45 = vpop.f32.mrf.mxu1 }
 0x605   : > { %v10460_v22 = vadd.f32 %v21228_v29, %v10423_v60  ;;  %v10421_v21 = vmul.f32 %v21218_v42, %v10384_v10  ;;  %v10387_v4 = vadd.f32 %v10269_v27, %v21007_v32  ;;  %v10261_v63 = vadd.f32 %v13567_v23, %v10260_v45  ;;  %v21248_v60 = vpop.f32.mrf.mxu0 }
 0x606   : > { %v13806_v43 = vpop.f32.mrf.mxu1  ;;  %v13585_v23 = vadd.f32 %v21138_v17, %v21136_v8 }
 0x607   : > { %v10492_v12 = vmax.f32 %v10460_v22, 0.0  ;;  %v10458_v0 = vadd.f32 %v21228_v29, %v10421_v21  ;;  %v10424_v50 = vmul.f32 %v21218_v42, %v10387_v4  ;;  %v10385_v46 = vadd.f32 %v10261_v63, %v21001_v3  ;;  %v21254_v34 = vpop.f32.mrf.mxu0 }
 0x608   : > { %v10282_v32 = vadd.f32 %v13806_v43, %v13582_v49  ;;  %v10273_v10 = vpop.f32.mrf.mxu1  ;;  %v13579_v3 = vadd.f32 %v21122_v16, %v21120_v59 }
 0x609   : > { %v10461_v2 = vadd.f32 %v21228_v29, %v10424_v50  ;;  %v10422_v1 = vmul.f32 %v21218_v42, %v10385_v46  ;;  %v10274_v28 = vadd.f32 %v13576_v5, %v10273_v10  ;;  %11695 = vrot.lane.b32.xlu0 %v10492_v12, %s14672_s8  ;;  %v10490_v63 = vmax.f32 %v10458_v0, 0.0  ;;  %v21262_v21 = vpop.f32.mrf.mxu0 }
 0x60a   : > { %v10390_v27 = vadd.f32 %v10282_v32, %v21020_v33  ;;  %v13807_v45 = vpop.f32.mrf.mxu1  ;;  %v13594_v5 = vadd.f32 %v21162_v56, %v21160_v9 }
 0x60b   : > { %v10493_v22 = vmax.f32 %v10461_v2, 0.0  ;;  %v10459_v8 = vadd.f32 %v21228_v29, %v10422_v1  ;;  %v10388_v17 = vadd.f32 %v10274_v28, %v21010_v19  ;;  %v10285_v4 = vadd.f32 %v13807_v45, %v13585_v23  ;;  %v21269_v33 = vpop.f32.mrf.mxu0 }
 0x60c   : > { %v10427_v49 = vmul.f32 %v21218_v42, %v10390_v27  ;;  %v10276_v43 = vpop.f32.mrf.mxu1  ;;  %v13597_v1 = vadd.f32 %v21170_v36, %v21168_v44 }
 0x60d   : > { %v10425_v59 = vmul.f32 %v21218_v42, %v10388_v17  ;;  %v10391_v16 = vadd.f32 %v10285_v4, %v21027_v41  ;;  %v10277_v12 = vadd.f32 %v13579_v3, %v10276_v43  ;;  %11697 = vrot.lane.b32.xlu1 %v10493_v22, %s14672_s8  ;;  %11691 = vrot.lane.b32.xlu0 %v10490_v63, %s14672_s8  ;;  %v10491_v50 = vmax.f32 %v10459_v8, 0.0  ;;  %v21276_v46 = vpop.f32.mrf.mxu0 }
 0x60e   : > { %v10464_v19 = vadd.f32 %v21228_v29, %v10427_v49  ;;  %v13810_v0 = vpop.f32.mrf.mxu1  ;;  %v13588_v41 = vadd.f32 %v21146_v61, %v21144_v53  ;;  %v13591_v53 = vadd.f32 %v21154_v57, %v21152_v7 }
 0x60f   : > { %v10428_v9 = vmul.f32 %v21218_v42, %v10391_v16  ;;  %v10389_v56 = vadd.f32 %v10277_v12, %v21015_v48  ;;  %v10298_v32 = vadd.f32 %v13810_v0, %v13594_v5  ;;  %v10462_v23 = vadd.f32 %v21228_v29, %v10425_v59  ;;  %v21286_v48 = vpop.f32.mrf.mxu0 }
 0x610   : > { %v10496_v10 = vmax.f32 %v10464_v19, 0.0  ;;  %v10289_v2 = vpop.f32.mrf.mxu1  ;;  %v13606_v5 = vadd.f32 %v21194_v58, %v21192_v62  ;;  %v13600_v59 = vadd.f32 %v21178_v6, %v21176_v30 }
 0x611   : > { %v10465_v28 = vadd.f32 %v21228_v29, %v10428_v9  ;;  %v10426_v3 = vmul.f32 %v21218_v42, %v10389_v56  ;;  %v10394_v63 = vadd.f32 %v10298_v32, %v21048_v35  ;;  %11693 = vrot.lane.b32.xlu1 %v10491_v50, %s14672_s8  ;;  %v10290_v61 = vadd.f32 %v13588_v41, %v10289_v2  ;;  %v21294_v22 = vpop.f32.mrf.mxu0 }
 0x612   : > { %11703 = vrot.lane.b32.xlu0 %v10496_v10, %s14672_s8  ;;  %v13811_v27 = vpop.f32.mrf.mxu1  ;;  %v10494_v35 = vmax.f32 %v10462_v23, 0.0  ;;  %v13603_v10 = vadd.f32 %v21186_v55, %v21184_v25  ;;  %v13618_v25 = vadd.f32 %v21254_v34, %v21248_v60 }
 0x613   : > { %v10497_v45 = vmax.f32 %v10465_v28, 0.0  ;;  %v10463_v44 = vadd.f32 %v21228_v29, %v10426_v3  ;;  %v10431_v36 = vmul.f32 %v21218_v42, %v10394_v63  ;;  %v10301_v8 = vadd.f32 %v13811_v27, %v13597_v1  ;;  %v21301_v49 = vpop.f32.mrf.mxu0 }
 0x614   : > { %v10392_v17 = vadd.f32 %v10290_v61, %v21034_v20  ;;  %v10292_v4 = vpop.f32.mrf.mxu1 }
 0x615   : > { %v10468_v7 = vadd.f32 %v21228_v29, %v10431_v36  ;;  %v10395_v57 = vadd.f32 %v10301_v8, %v21055_v51  ;;  %v10293_v43 = vadd.f32 %v13591_v53, %v10292_v4  ;;  %11705 = vrot.lane.b32.xlu1 %v10497_v45, %s14672_s8  ;;  %v10495_v16 = vmax.f32 %v10463_v44, 0.0  ;;  %v13628_v51 = vpop.f32.mrf.mxu0 }
 0x616   : > { %v10429_v12 = vmul.f32 %v21218_v42, %v10392_v17  ;;  %11699 = vrot.lane.b32.xlu0 %v10494_v35, %s14672_s8  ;;  %v13814_v20 = vpop.f32.mrf.mxu1  ;;  %v13612_v45 = vadd.f32 %v21223_v37, %v21213_v31  ;;  %v13621_v31 = vadd.f32 %v21269_v33, %v21262_v21 }
 0x617   : > { %v10500_v19 = vmax.f32 %v10468_v7, 0.0  ;;  %v10432_v62 = vmul.f32 %v21218_v42, %v10395_v57  ;;  %v10393_v58 = vadd.f32 %v10293_v43, %v21041_v39  ;;  %v10314_v0 = vadd.f32 %v13814_v20, %v13606_v5  ;;  %v13629_v32 = vpop.f32.mrf.mxu0 }
 0x618   : > { %v10466_v50 = vadd.f32 %v21228_v29, %v10429_v12  ;;  %v10305_v9 = vpop.f32.mrf.mxu1  ;;  %v13609_v39 = vadd.f32 %v21206_v26, %v21202_v18  ;;  %v22671_v12 = vld [vmem:[#allocation72_spill] sm:$0xff] }
 0x619   : > { %v10469_v56 = vadd.f32 %v21228_v29, %v10432_v62  ;;  %v10430_v30 = vmul.f32 %v21218_v42, %v10393_v58  ;;  %v10398_v6 = vadd.f32 %v10314_v0, %v21077_v15  ;;  %v10306_v41 = vadd.f32 %v13600_v59, %v10305_v9  ;;  %11701 = vrot.lane.b32.xlu1 %v10495_v16, %s14672_s8  ;;  %v13631_v3 = vpop.f32.mrf.mxu0  ;;  %v21346_v59 = vpop.permute.xlu0 %11819 }
 0x61a   : > { %11711 = vrot.lane.b32.xlu0 %v10500_v19, %s14672_s8  ;;  %v13815_v23 = vpop.f32.mrf.mxu1  ;;  %v10498_v63 = vmax.f32 %v10466_v50, 0.0  ;;  %v13630_v50 = vadd.f32 %v13629_v32, %v13628_v51 }
 0x61b   : > { %v10501_v2 = vmax.f32 %v10469_v56, 0.0  ;;  %v10467_v1 = vadd.f32 %v21228_v29, %v10430_v30  ;;  %v10435_v28 = vmul.f32 %v21218_v42, %v10398_v6  ;;  %v10396_v15 = vadd.f32 %v10306_v41, %v21062_v54  ;;  %v13632_v26 = vpop.f32.mrf.mxu0  ;;  %v22672_v30 = vld [vmem:[#allocation23_spill] sm:$0xff] }
 0x61c   : > { %v10317_v53 = vadd.f32 %v13815_v23, %v13609_v39  ;;  %v10308_v61 = vpop.f32.mrf.mxu1  ;;  %v13624_v39 = vadd.f32 %v21286_v48, %v21276_v46  ;;  %v13627_v48 = vadd.f32 %v21301_v49, %v21294_v22 }
 0x61d   : > { %v10472_v55 = vadd.f32 %v21228_v29, %v10435_v28  ;;  %v10433_v18 = vmul.f32 %v21218_v42, %v10396_v15  ;;  %v10309_v27 = vadd.f32 %v13603_v10, %v10308_v61  ;;  %11713 = vrot.lane.b32.xlu1 %v10501_v2, %s14672_s8  ;;  %v10499_v36 = vmax.f32 %v10467_v1, 0.0  ;;  %v21333_v34 = vpop.f32.mrf.mxu0  ;;  %v22673_v15 = vld [vmem:[#allocation33_spill] sm:$0xff]  ;;  %v21369_v61 = vpop.permute.xlu0 %11823 }
 0x61e   : > { %v10399_v54 = vadd.f32 %v10317_v53, %v21085_v38  ;;  %11707 = vrot.lane.b32.xlu0 %v10498_v63, %s14672_s8  ;;  %v13818_v44 = vpop.f32.mrf.mxu1 }
 0x61f   : > { %v10504_v8 = vmax.f32 %v10472_v55, 0.0  ;;  %v10397_v60 = vadd.f32 %v10309_v27, %v21069_v14  ;;  %v10330_v35 = vadd.f32 %v13818_v44, %v13618_v25  ;;  %v10470_v17 = vadd.f32 %v21228_v29, %v10433_v18  ;;  %v21341_v7 = vpop.f32.mrf.mxu0  ;;  %v22674_v18 = vld [vmem:[#allocation76_spill] sm:$0xff] }
 0x620   : > { %v10436_v4 = vmul.f32 %v21218_v42, %v10399_v54  ;;  %v10321_v5 = vpop.f32.mrf.mxu1  ;;  %v13633_v25 = vadd.f32 %v13632_v26, %v13631_v3  ;;  %v22675_v3 = vld [vmem:[#allocation35_spill] sm:$0xff] }
 0x621   : > { %v10434_v38 = vmul.f32 %v21218_v42, %v10397_v60  ;;  %v10402_v37 = vadd.f32 %v10330_v35, %v21109_v13  ;;  %v10322_v57 = vadd.f32 %v13612_v45, %v10321_v5  ;;  %11709 = vrot.lane.b32.xlu1 %v10499_v36, %s14672_s8  ;;  %v21350_v33 = vpop.f32.mrf.mxu0  ;;  %v13615_v13 = vadd.f32 %v21239_v11, %v21234_v52  ;;  %v21362_v11 = vpop.permute.xlu1 %11821 }
 0x622   : > { %v10473_v14 = vadd.f32 %v21228_v29, %v10436_v4  ;;  %11719 = vrot.lane.b32.xlu0 %v10504_v8, %s14672_s8  ;;  %v13819_v43 = vpop.f32.mrf.mxu1  ;;  %v10502_v19 = vmax.f32 %v10470_v17, 0.0 }
 0x623   : > { %v10439_v16 = vmul.f32 %v21218_v42, %v10402_v37  ;;  %v10400_v21 = vadd.f32 %v10322_v57, %v22671_v12  ;;  %v10333_v20 = vadd.f32 %v13819_v43, %v13621_v31  ;;  %v10471_v58 = vadd.f32 %v21228_v29, %v10434_v38  ;;  %v21358_v41 = vpop.f32.mrf.mxu0  ;;  %v22676_v38 = vld [vmem:[#allocation68_spill] sm:$0xff]  ;;  %v21388_v12 = vpop.permute.xlu0 %11827 }
 0x624   : > { %v10505_v62 = vmax.f32 %v10473_v14, 0.0  ;;  %v10324_v0 = vpop.f32.mrf.mxu1 }
 0x625   : > { %v10476_v9 = vadd.f32 %v21228_v29, %v10439_v16  ;;  %v10437_v56 = vmul.f32 %v21218_v42, %v10400_v21  ;;  %v10403_v6 = vadd.f32 %v10333_v20, %v22672_v30  ;;  %v10325_v10 = vadd.f32 %v13615_v13, %v10324_v0  ;;  %v13640_v23 = vpop.f32.mrf.mxu0  ;;  %v21381_v31 = vpop.permute.xlu1 %11825 }
 0x626   : > { %11721 = vrot.lane.b32.xlu1 %v10505_v62, %s14672_s8  ;;  %11715 = vrot.lane.b32.xlu0 %v10502_v19, %s14672_s8  ;;  %v10503_v1 = vmax.f32 %v10471_v58, 0.0  ;;  %v13636_v21 = vadd.f32 %v21341_v7, %v21333_v34  ;;  %v22677_v19 = vld [vmem:[#allocation74_spill] sm:$0xff] }
 0x627   : > { %v13822_v52 = vpop.f32.mrf.mxu1  ;;  %v10508_v51 = vmax.f32 %v10476_v9, 0.0  ;;  %v10440_v32 = vmul.f32 %v21218_v42, %v10403_v6  ;;  %v10474_v28 = vadd.f32 %v21228_v29, %v10437_v56  ;;  %v10401_v63 = vadd.f32 %v10325_v10, %v22673_v15  ;;  %v13641_v45 = vpop.f32.mrf.mxu0 }
 0x628   : > { %v10346_v2 = vadd.f32 %v13822_v52, %v13630_v50  ;;  %v13642_v43 = vadd.f32 %v13641_v45, %v13640_v23  ;;  %v13639_v23 = vadd.f32 %v21358_v41, %v21350_v33 }
 0x629   : > { %v10337_v53 = vpop.f32.mrf.mxu1  ;;  %v10477_v55 = vadd.f32 %v21228_v29, %v10440_v32  ;;  %v10438_v54 = vmul.f32 %v21218_v42, %v10401_v63  ;;  %v13643_v60 = vpop.f32.mrf.mxu0  ;;  %v10506_v17 = vmax.f32 %v10474_v28, 0.0 }
 0x62a   : > { %v10406_v27 = vadd.f32 %v10346_v2, %v22674_v18  ;;  %v10338_v46 = vadd.f32 %v13624_v39, %v10337_v53  ;;  %11717 = vrot.lane.b32.xlu1 %v10503_v1, %s14672_s8  ;;  %11727 = vrot.lane.b32.xlu0 %v10508_v51, %s14672_s8  ;;  %v22678_v51 = vld [vmem:[#allocation36_spill] sm:$0xff]  ;;  %v21400_v32 = vpop.permute.xlu1 %11829  ;;  %v22679_v1 = vld [vmem:[#allocation75_spill] sm:$0xff] }
 0x62b   : > { %v13823_v44 = vpop.f32.mrf.mxu1  ;;  %v10509_v36 = vmax.f32 %v10477_v55, 0.0  ;;  %v10475_v4 = vadd.f32 %v21228_v29, %v10438_v54  ;;  %v13644_v57 = vpop.f32.mrf.mxu0 }
 0x62c   : > { %v10443_v8 = vmul.f32 %v21218_v42, %v10406_v27  ;;  %v10404_v26 = vadd.f32 %v10338_v46, %v22675_v3  ;;  %v10349_v35 = vadd.f32 %v13823_v44, %v13633_v25  ;;  %v13645_v6 = vadd.f32 %v13644_v57, %v13643_v60  ;;  %v21407_v27 = vpop.permute.xlu0 %11831 }
 0x62d   : > { %v10340_v5 = vpop.f32.mrf.mxu1  ;;  %v13646_v58 = vpop.f32.mrf.mxu0  ;;  %v10507_v0 = vmax.f32 %v10475_v4, 0.0 }
 0x62e   : > { %v10480_v22 = vadd.f32 %v21228_v29, %v10443_v8  ;;  %v10441_v49 = vmul.f32 %v21218_v42, %v10404_v26  ;;  %v10407_v37 = vadd.f32 %v10349_v35, %v22676_v38  ;;  %v10341_v14 = vadd.f32 %v13627_v48, %v10340_v5  ;;  %11729 = vrot.lane.b32.xlu1 %v10509_v36, %s14672_s8  ;;  %v22680_v8 = vld [vmem:[#allocation38_spill] sm:$0xff]  ;;  %v21417_v4 = vpop.permute.xlu1 %11833 }
 0x62f   : > { %11723 = vrot.lane.b32.xlu0 %v10506_v17, %s14672_s8  ;;  %v13826_v16 = vpop.f32.mrf.mxu1  ;;  %v13647_v52 = vpop.f32.mrf.mxu0 }
 0x630   : > { %v10512_v20 = vmax.f32 %v10480_v22, 0.0  ;;  %v10444_v13 = vmul.f32 %v21218_v42, %v10407_v37  ;;  %v10405_v62 = vadd.f32 %v10341_v14, %v22677_v19  ;;  %v10478_v50 = vadd.f32 %v21228_v29, %v10441_v49  ;;  %v21423_v14 = vpop.permute.xlu0 %11835 }
 0x631   : > { %v10362_v9 = vadd.f32 %v13826_v16, %v13642_v43  ;;  %v10353_v56 = vpop.f32.mrf.mxu1  ;;  %v13649_v15 = vpop.f32.mrf.mxu0  ;;  %v13648_v44 = vadd.f32 %v13647_v52, %v13646_v58 }
 0x632   : > { %v10481_v30 = vadd.f32 %v21228_v29, %v10444_v13  ;;  %v10442_v10 = vmul.f32 %v21218_v42, %v10405_v62  ;;  %v10354_v39 = vadd.f32 %v13636_v21, %v10353_v56  ;;  %11725 = vrot.lane.b32.xlu1 %v10507_v0, %s14672_s8  ;;  %v10510_v53 = vmax.f32 %v10478_v50, 0.0  ;;  %v22681_v13 = vld [vmem:[#allocation30_spill] sm:$0xff]  ;;  %v21431_v52 = vpop.permute.xlu1 %11837 }
 0x633   : > { %v10410_v34 = vadd.f32 %v10362_v9, %v22678_v51  ;;  %11735 = vrot.lane.b32.xlu0 %v10512_v20, %s14672_s8  ;;  %v13827_v7 = vpop.f32.mrf.mxu1  ;;  %v13650_v48 = vpop.f32.mrf.mxu0  ;;  %v9558_v19 = vadd.f32 %v22681_v13, %v21200_v47  ;;  %v22682_v0 = vld [vmem:[#allocation26_spill] sm:$0xff] }
 0x634   : > { %v10513_v2 = vmax.f32 %v10481_v30, 0.0  ;;  %v10408_v28 = vadd.f32 %v10354_v39, %v22679_v1  ;;  %v10365_v63 = vadd.f32 %v13827_v7, %v13645_v6  ;;  %v10479_v25 = vadd.f32 %v21228_v29, %v10442_v10  ;;  %v22683_v39 = vld [vmem:[#allocation20_spill] sm:$0xff] }
 0x635   : > { %v10447_v55 = vmul.f32 %v21218_v42, %v10410_v34  ;;  %v10356_v18 = vpop.f32.mrf.mxu1  ;;  %v13652_v26 = vpop.f32.mrf.mxu0  ;;  %v13651_v16 = vadd.f32 %v13650_v48, %v13649_v15  ;;  %v9561_v51 = vadd.f32 %v22683_v39, %v21211_v24 }
 0x636   : > { %v10445_v45 = vmul.f32 %v21218_v42, %v10408_v28  ;;  %v10411_v46 = vadd.f32 %v10365_v63, %v21181_v40  ;;  %v10357_v54 = vadd.f32 %v13639_v23, %v10356_v18  ;;  %11737 = vrot.lane.b32.xlu1 %v10513_v2, %s14672_s8  ;;  %v10511_v60 = vmax.f32 %v10479_v25, 0.0  ;;  %v22684_v2 = vld [vmem:[#allocation78_spill] sm:$0xff]  ;;  %v21438_v28 = vpop.permute.xlu0 %11839  ;;  %v21445_v18 = vpop.permute.xlu1 %11841 }
 0x637   : > { %v10484_v33 = vadd.f32 %v21228_v29, %v10447_v55  ;;  %11731 = vrot.lane.b32.xlu0 %v10510_v53, %s14672_s8  ;;  %v13830_v41 = vpop.f32.mrf.mxu1  ;;  %v13653_v49 = vpop.f32.mrf.mxu0 }
 0x638   : > { %v10448_v36 = vmul.f32 %v21218_v42, %v10411_v46  ;;  %v10409_v3 = vadd.f32 %v10357_v54, %v22680_v8  ;;  %v10482_v17 = vadd.f32 %v21228_v29, %v10445_v45  ;;  %v13654_v37 = vadd.f32 %v13653_v49, %v13652_v26 }
 0x639   : > { %v10516_v35 = vmax.f32 %v10484_v33, 0.0  ;;  %v10369_v40 = vpop.f32.mrf.mxu1  ;;  %v13655_v20 = vpop.f32.mrf.mxu0 }
 0x63a   : > { %v10485_v5 = vadd.f32 %v21228_v29, %v10448_v36  ;;  %v10446_v22 = vmul.f32 %v21218_v42, %v10409_v3  ;;  %v10370_v38 = vadd.f32 %v13648_v44, %v10369_v40  ;;  %11733 = vrot.lane.b32.xlu1 %v10511_v60, %s14672_s8  ;;  %v10514_v62 = vmax.f32 %v10482_v17, 0.0  ;;  %v21449_v46 = vpop.permute.xlu0 %11843  ;;  %v22686_v3 = vld [vmem:[#allocation107_spill] sm:$0xff] }
 0x63b   : > { %11743 = vrot.lane.b32.xlu0 %v10516_v35, %s14672_s8  ;;  %v13831_v57 = vpop.f32.mrf.mxu1  ;;  %v10378_v58 = vadd.f32 %v13830_v41, %v13654_v37  ;;  %v13656_v56 = vpop.f32.mrf.mxu0  ;;  %v11530_v26 = vmax.f32 %v22686_v3, 0.0 }
 0x63c   : > { %v10517_v43 = vmax.f32 %v10485_v5, 0.0  ;;  %v10483_v21 = vadd.f32 %v21228_v29, %v10446_v22  ;;  %v10412_v50 = vadd.f32 %v10370_v38, %v22682_v0  ;;  %v13657_v10 = vadd.f32 %v13656_v56, %v13655_v20  ;;  %v21454_v41 = vpop.permute.xlu1 %11845 }
 0x63d   : > { %v10372_v9 = vpop.f32.mrf.mxu1  ;;  %v10414_v6 = vadd.f32 %v10378_v58, %v9558_v19  ;;  %v22687_v19 = vld [vmem:[#allocation102_spill] sm:$0xff] }
 0x63e   : > { %v10373_v30 = vadd.f32 %v13651_v16, %v10372_v9  ;;  %11745 = vrot.lane.b32.xlu1 %v10517_v43, %s14672_s8  ;;  %v10515_v34 = vmax.f32 %v10483_v21, 0.0  ;;  %v10449_v7 = vmul.f32 %v21218_v42, %v10412_v50  ;;  %v10381_v23 = vadd.f32 %v13831_v57, %v13657_v10  ;;  %v21457_v8 = vpop.permute.xlu0 %11847  ;;  %v22688_v9 = vld [vmem:[#allocation164_spill] sm:$0xff] }
 0x63f   : > { %11739 = vrot.lane.b32.xlu0 %v10514_v62, %s14672_s8  ;;  %v10451_v47 = vmul.f32 %v21218_v42, %v10414_v6  ;;  %v22689_v6 = vld [vmem:[#allocation149_spill] sm:$0xff] }
 0x640   : > { %v10413_v1 = vadd.f32 %v10373_v30, %v22684_v2  ;;  %v10415_v15 = vadd.f32 %v10381_v23, %v9561_v51  ;;  %v10486_v53 = vadd.f32 %v21228_v29, %v10449_v7  ;;  %v21462_v60 = vpop.permute.xlu1 %11849  ;;  %v22690_v51 = vld [vmem:[#allocation175_spill] sm:$0xff]  ;;  %v22691_v7 = vld [vmem:[#allocation13_spill] sm:$0xff] }
 0x641   : > { %v10488_v63 = vadd.f32 %v21228_v29, %v10451_v47 }
 0x642   : > { %11741 = vrot.lane.b32.xlu1 %v10515_v34, %s14672_s8  ;;  %v10452_v25 = vmul.f32 %v21218_v42, %v10415_v15  ;;  %v10450_v24 = vmul.f32 %v21218_v42, %v10413_v1  ;;  %v10518_v48 = vmax.f32 %v10486_v53, 0.0  ;;  %v22685_v42 = vld [vmem:[#allocation112_spill] sm:$0xff]  ;;  %v22692_v1 = vld [vmem:[#allocation67_spill] sm:$0xff]  ;;  %v22693_v53 = vld [vmem:[#allocation10_spill] sm:$0xff] }
 0x643   : > { %v10520_v55 = vmax.f32 %v10488_v63, 0.0  ;;  %v11529_v44 = vmax.f32 %v22685_v42, 0.0 }
 0x644   : > { %v10489_v45 = vadd.f32 %v21228_v29, %v10452_v25  ;;  %v10487_v54 = vadd.f32 %v21228_v29, %v10450_v24  ;;  %v21465_v29 = vpop.permute.xlu0 %11851  ;;  %v21467_v35 = vpop.permute.xlu1 %11853 }
 0x645   : > { %11751 = vrot.lane.b32.xlu0 %v10520_v55, %s14672_s8  ;;  %v22694_v55 = vld [vmem:[#allocation7_spill] sm:$0xff] }
 0x646   : > { %v10521_v33 = vmax.f32 %v10489_v45, 0.0  ;;  %v10519_v36 = vmax.f32 %v10487_v54, 0.0  ;;  %v22695_v54 = vld [vmem:[#allocation19_spill] sm:$0xff] }
 0x648   : > { %11753 = vrot.lane.b32.xlu1 %v10521_v33, %s14672_s8  ;;  %v21469_v17 = vpop.permute.xlu0 %11855  ;;  %v21471_v40 = vpop.permute.xlu1 %11857 }
 0x649   : > { %11747 = vrot.lane.b32.xlu0 %v10518_v48, %s14672_s8 }
 0x64c   : > { %11749 = vrot.lane.b32.xlu1 %v10519_v36, %s14672_s8  ;;  %v21473_v5 = vpop.permute.xlu0 %11859  ;;  %v21475_v22 = vpop.permute.xlu1 %11861 }
 0x64d   : > { %11879 = vrot.lane.b32.xlu0 %v11529_v44, %s14670_s18  ;;  %v22696_v44 = vld [vmem:[#allocation178_spill] sm:$0xff] }
 0x650   : > { %11881 = vrot.lane.b32.xlu1 %v11530_v26, %s14670_s18  ;;  %v21477_v49 = vpop.permute.xlu0 %11863  ;;  %v21479_v38 = vpop.permute.xlu1 %11865  ;;  %v22697_v26 = vld [vmem:[#allocation62_spill] sm:$0xff]  ;;  %s13850_s18 = smul.u32 12288, %s14737_s28  ;;  %s21694_s28 = scalar_lea.sflag [#allocation5], %s272_s29 }
 0x652   : > { %s21686_s13 = scalar_lea.hbm %s21741_s7, %s13850_s18 }
 0x654   : > { %v21481_v37 = vpop.permute.xlu0 %11867  ;;  %v21483_v57 = vpop.permute.xlu1 %11869 }
 0x658   : > { %v21485_v43 = vpop.permute.xlu0 %11871  ;;  %v21487_v16 = vpop.permute.xlu1 %11873 }
 0x65c   : > { %v21489_v21 = vpop.permute.xlu0 %11875  ;;  %v21491_v20 = vpop.permute.xlu1 %11877 }
 0x67b   : > { %v11696_v13 = vpop.permute.xlu0 %11695 }
 0x67c   : > { %v11949_v62 = vsel %vm7491_vm8, %v22687_v19, %v11696_v13  ;;  %v11981_v58 = vsel %vm6848_vm9, %v11696_v13, %v21369_v61 }
 0x67d   : > { %12018 = vst [vmem:[%s20504_s19 + $0x38] sm:$0xff] %v11949_v62  ;;  %12019 = vst [vmem:[%s20504_s19 + $0x40] sm:$0xff] %v11981_v58  ;;  %v22698_v62 = vld [vmem:[#allocation16_spill] sm:$0xff] }
 0x67f   : > { %v11698_v0 = vpop.permute.xlu1 %11697  ;;  %v11692_v50 = vpop.permute.xlu0 %11691 }
 0x680   : > { %v11950_v56 = vsel %vm7491_vm8, %v22688_v9, %v11698_v0  ;;  %v11982_v30 = vsel %vm6848_vm9, %v11698_v0, %v21381_v31  ;;  %v11947_v10 = vsel %vm7491_vm8, %v22689_v6, %v11692_v50  ;;  %v11979_v61 = vsel %vm6848_vm9, %v11692_v50, %v21346_v59  ;;  %v22699_v50 = vld [vmem:[#allocation69_spill] sm:$0xff]  ;;  %v22700_v6 = vld [vmem:[#allocation116_spill] sm:$0xff] }
 0x681   : > { %12021 = vst [vmem:[%s20504_s19 + $0x50] sm:$0xff] %v11950_v56  ;;  %12022 = vst [vmem:[%s20504_s19 + $0x58] sm:$0xff] %v11982_v30 }
 0x682   : > { %12012 = vst [vmem:[%s20504_s19 + $0x8] sm:$0xff] %v11947_v10  ;;  %12013 = vst [vmem:[%s20504_s19 + $0x10] sm:$0xff] %v11979_v61  ;;  %v22701_v61 = vld [vmem:[#allocation66_spill] sm:$0xff] }
 0x683   : > { %v11694_v39 = vpop.permute.xlu1 %11693 }
 0x684   : > { %v11948_v34 = vsel %vm7491_vm8, %v22690_v51, %v11694_v39  ;;  %v11980_v31 = vsel %vm6848_vm9, %v11694_v39, %v21362_v11  ;;  %v11704_v47 = vpop.permute.xlu0 %11703 }
 0x685   : > { %12015 = vst [vmem:[%s20504_s19 + $0x20] sm:$0xff] %v11948_v34  ;;  %12016 = vst [vmem:[%s20504_s19 + $0x28] sm:$0xff] %v11980_v31  ;;  %v11953_v59 = vsel %vm7491_vm8, %v22691_v7, %v11704_v47  ;;  %v11985_v23 = vsel %vm6848_vm9, %v11704_v47, %v21407_v27  ;;  %v22702_v31 = vld [vmem:[#allocation21_spill] sm:$0xff]  ;;  %v22703_v7 = vld [vmem:[#allocation63_spill] sm:$0xff] }
 0x686   : > { %12030 = vst [vmem:[%s20504_s19 + $0x98] sm:$0xff] %v11953_v59  ;;  %12031 = vst [vmem:[%s20504_s19 + $0xa0] sm:$0xff] %v11985_v23 }
 0x687   : > { %v11706_v2 = vpop.permute.xlu1 %11705 }
 0x688   : > { %v11954_v15 = vsel %vm7491_vm8, %v22692_v1, %v11706_v2  ;;  %v11986_v11 = vsel %vm6848_vm9, %v11706_v2, %v21417_v4  ;;  %v11700_v63 = vpop.permute.xlu0 %11699  ;;  %v22704_v1 = vld [vmem:[#allocation24_spill] sm:$0xff] }
 0x689   : > { %12033 = vst [vmem:[%s20504_s19 + $0xb0] sm:$0xff] %v11954_v15  ;;  %12034 = vst [vmem:[%s20504_s19 + $0xb8] sm:$0xff] %v11986_v11  ;;  %v11951_v25 = vsel %vm7491_vm8, %v22693_v53, %v11700_v63  ;;  %v11983_v27 = vsel %vm6848_vm9, %v11700_v63, %v21388_v12  ;;  %v22705_v11 = vld [vmem:[#allocation71_spill] sm:$0xff] }
 0x68a   : > { %12024 = vst [vmem:[%s20504_s19 + $0x68] sm:$0xff] %v11951_v25  ;;  %12025 = vst [vmem:[%s20504_s19 + $0x70] sm:$0xff] %v11983_v27  ;;  %v22706_v27 = vld [vmem:[#allocation64_spill] sm:$0xff] }
 0x68b   : > { %v11702_v24 = vpop.permute.xlu1 %11701 }
 0x68c   : > { %v11952_v45 = vsel %vm7491_vm8, %v22694_v55, %v11702_v24  ;;  %v11984_v4 = vsel %vm6848_vm9, %v11702_v24, %v21400_v32  ;;  %v11712_v48 = vpop.permute.xlu0 %11711  ;;  %v22707_v55 = vld [vmem:[#allocation70_spill] sm:$0xff] }
 0x68d   : > { %12027 = vst [vmem:[%s20504_s19 + $0x80] sm:$0xff] %v11952_v45  ;;  %12028 = vst [vmem:[%s20504_s19 + $0x88] sm:$0xff] %v11984_v4  ;;  %v11957_v33 = vsel %vm7491_vm8, %v22695_v54, %v11712_v48  ;;  %v11989_v12 = vsel %vm6848_vm9, %v11712_v48, %v21438_v28  ;;  %v22708_v54 = vld [vmem:[#allocation27_spill] sm:$0xff] }
 0x68e   : > { %12042 = vst [vmem:[%s20504_s19 + $0xf8] sm:$0xff] %v11957_v33  ;;  %12043 = vst [vmem:[%s20504_s19 + $0x100] sm:$0xff] %v11989_v12  ;;  %v22709_v12 = vld [vmem:[#allocation25_spill] sm:$0xff] }
 0x68f   : > { %v11714_v42 = vpop.permute.xlu1 %11713 }
 0x690   : > { %v11958_v36 = vsel %vm7491_vm8, %v22696_v44, %v11714_v42  ;;  %v11990_v32 = vsel %vm6848_vm9, %v11714_v42, %v21445_v18  ;;  %v11708_v3 = vpop.permute.xlu0 %11707 }
 0x691   : > { %12045 = vst [vmem:[%s20504_s19 + $0x110] sm:$0xff] %v11958_v36  ;;  %12046 = vst [vmem:[%s20504_s19 + $0x118] sm:$0xff] %v11990_v32  ;;  %v11955_v13 = vsel %vm7491_vm8, %v22697_v26, %v11708_v3  ;;  %v11987_v28 = vsel %vm6848_vm9, %v11708_v3, %v21423_v14  ;;  %v22710_v32 = vld [vmem:[#allocation12_spill] sm:$0xff]  ;;  %v22711_v26 = vld [vmem:[#allocation59_spill] sm:$0xff] }
 0x692   : > { %12036 = vst [vmem:[%s20504_s19 + $0xc8] sm:$0xff] %v11955_v13  ;;  %12037 = vst [vmem:[%s20504_s19 + $0xd0] sm:$0xff] %v11987_v28 }
 0x693   : > { %v11710_v19 = vpop.permute.xlu1 %11709 }
 0x694   : > { %v11956_v58 = vsel %vm7491_vm8, %v22698_v62, %v11710_v19  ;;  %v11988_v18 = vsel %vm6848_vm9, %v11710_v19, %v21431_v52  ;;  %v11720_v0 = vpop.permute.xlu0 %11719  ;;  %v22712_v62 = vld [vmem:[#allocation134_spill] sm:$0xff] }
 0x695   : > { %12039 = vst [vmem:[%s20504_s19 + $0xe0] sm:$0xff] %v11956_v58  ;;  %12040 = vst [vmem:[%s20504_s19 + $0xe8] sm:$0xff] %v11988_v18  ;;  %v11961_v9 = vsel %vm7491_vm8, %v22699_v50, %v11720_v0  ;;  %v11993_v14 = vsel %vm6848_vm9, %v11720_v0, %v21457_v8  ;;  %v22713_v18 = vld [vmem:[#allocation15_spill] sm:$0xff] }
 0x696   : > { %12054 = vst [vmem:[%s20504_s19 + $0x158] sm:$0xff] %v11961_v9  ;;  %12055 = vst [vmem:[%s20504_s19 + $0x160] sm:$0xff] %v11993_v14  ;;  %v22714_v9 = vld [vmem:[#allocation29_spill] sm:$0xff] }
 0x698   : > { %v11722_v56 = vpop.permute.xlu1 %11721  ;;  %v11716_v30 = vpop.permute.xlu0 %11715 }
 0x699   : > { %v11962_v52 = vsel %vm7491_vm8, %v22700_v6, %v11722_v56  ;;  %v11994_v10 = vsel %vm6848_vm9, %v11722_v56, %v21462_v60  ;;  %v11959_v39 = vsel %vm7491_vm8, %v22701_v61, %v11716_v30  ;;  %v11991_v8 = vsel %vm6848_vm9, %v11716_v30, %v21449_v46  ;;  %v22715_v30 = vld [vmem:[#allocation60_spill] sm:$0xff] }
 0x69a   : > { %12057 = vst [vmem:[%s20504_s19 + $0x170] sm:$0xff] %v11962_v52  ;;  %12058 = vst [vmem:[%s20504_s19 + $0x178] sm:$0xff] %v11994_v10  ;;  %v22716_v10 = vld [vmem:[#allocation32_spill] sm:$0xff] }
 0x69b   : > { %12048 = vst [vmem:[%s20504_s19 + $0x128] sm:$0xff] %v11959_v39  ;;  %12049 = vst [vmem:[%s20504_s19 + $0x130] sm:$0xff] %v11991_v8  ;;  %v22717_v39 = vld [vmem:[#allocation73_spill] sm:$0xff] }
 0x69c   : > { %v11718_v51 = vpop.permute.xlu1 %11717  ;;  %v11728_v34 = vpop.permute.xlu0 %11727 }
 0x69d   : > { %v11960_v47 = vsel %vm7491_vm8, %v22702_v31, %v11718_v51  ;;  %v11992_v60 = vsel %vm6848_vm9, %v11718_v51, %v21454_v41  ;;  %v11965_v59 = vsel %vm7491_vm8, %v22703_v7, %v11728_v34  ;;  %v11997_v46 = vsel %vm6848_vm9, %v11728_v34, %v21469_v17  ;;  %v22718_v31 = vld [vmem:[#allocation47_spill] sm:$0xff] }
 0x69e   : > { %12051 = vst [vmem:[%s20504_s19 + $0x140] sm:$0xff] %v11960_v47  ;;  %12052 = vst [vmem:[%s20504_s19 + $0x148] sm:$0xff] %v11992_v60 }
 0x69f   : > { %12066 = vst [vmem:[%s20504_s19 + $0x1b8] sm:$0xff] %v11965_v59  ;;  %12067 = vst [vmem:[%s20504_s19 + $0x1c0] sm:$0xff] %v11997_v46 }
 0x6a0   : > { %v11730_v23 = vpop.permute.xlu1 %11729 }
 0x6a1   : > { %v11724_v2 = vpop.permute.xlu0 %11723  ;;  %v11966_v15 = vsel %vm7491_vm8, %v22704_v1, %v11730_v23  ;;  %v11998_v41 = vsel %vm6848_vm9, %v11730_v23, %v21471_v40 }
 0x6a2   : > { %v11963_v63 = vsel %vm7491_vm8, %v22705_v11, %v11724_v2  ;;  %v11995_v17 = vsel %vm6848_vm9, %v11724_v2, %v21465_v29  ;;  %12069 = vst [vmem:[%s20504_s19 + $0x1d0] sm:$0xff] %v11966_v15  ;;  %12070 = vst [vmem:[%s20504_s19 + $0x1d8] sm:$0xff] %v11998_v41 }
 0x6a3   : > { %12060 = vst [vmem:[%s20504_s19 + $0x188] sm:$0xff] %v11963_v63  ;;  %12061 = vst [vmem:[%s20504_s19 + $0x190] sm:$0xff] %v11995_v17 }
 0x6a4   : > { %v11726_v53 = vpop.permute.xlu1 %11725 }
 0x6a5   : > { %v11736_v25 = vpop.permute.xlu0 %11735  ;;  %v11964_v24 = vsel %vm7491_vm8, %v22706_v27, %v11726_v53  ;;  %v11996_v40 = vsel %vm6848_vm9, %v11726_v53, %v21467_v35 }
 0x6a6   : > { %v11969_v45 = vsel %vm7491_vm8, %v22707_v55, %v11736_v25  ;;  %v12001_v29 = vsel %vm6848_vm9, %v11736_v25, %v21477_v49  ;;  %12063 = vst [vmem:[%s20504_s19 + $0x1a0] sm:$0xff] %v11964_v24  ;;  %12064 = vst [vmem:[%s20504_s19 + $0x1a8] sm:$0xff] %v11996_v40 }
 0x6a7   : > { %12078 = vst [vmem:[%s20504_s19 + $0x218] sm:$0xff] %v11969_v45  ;;  %12079 = vst [vmem:[%s20504_s19 + $0x220] sm:$0xff] %v12001_v29 }
 0x6a8   : > { %v11738_v4 = vpop.permute.xlu1 %11737 }
 0x6a9   : > { %v11732_v48 = vpop.permute.xlu0 %11731  ;;  %v11970_v33 = vsel %vm7491_vm8, %v22708_v54, %v11738_v4  ;;  %v12002_v35 = vsel %vm6848_vm9, %v11738_v4, %v21479_v38 }
 0x6aa   : > { %v11967_v42 = vsel %vm7491_vm8, %v22709_v12, %v11732_v48  ;;  %v11999_v49 = vsel %vm6848_vm9, %v11732_v48, %v21473_v5  ;;  %12081 = vst [vmem:[%s20504_s19 + $0x230] sm:$0xff] %v11970_v33  ;;  %12082 = vst [vmem:[%s20504_s19 + $0x238] sm:$0xff] %v12002_v35 }
 0x6ab   : > { %12072 = vst [vmem:[%s20504_s19 + $0x1e8] sm:$0xff] %v11967_v42  ;;  %12073 = vst [vmem:[%s20504_s19 + $0x1f0] sm:$0xff] %v11999_v49 }
 0x6ac   : > { %v11734_v44 = vpop.permute.xlu1 %11733 }
 0x6ad   : > { %v11744_v36 = vpop.permute.xlu0 %11743  ;;  %v11968_v3 = vsel %vm7491_vm8, %v22710_v32, %v11734_v44  ;;  %v12000_v38 = vsel %vm6848_vm9, %v11734_v44, %v21475_v22 }
 0x6ae   : > { %v11973_v13 = vsel %vm7491_vm8, %v22711_v26, %v11744_v36  ;;  %v12005_v5 = vsel %vm6848_vm9, %v11744_v36, %v21485_v43  ;;  %12075 = vst [vmem:[%s20504_s19 + $0x200] sm:$0xff] %v11968_v3  ;;  %12076 = vst [vmem:[%s20504_s19 + $0x208] sm:$0xff] %v12000_v38 }
 0x6af   : > { %12090 = vst [vmem:[%s20504_s19 + $0x278] sm:$0xff] %v11973_v13  ;;  %12091 = vst [vmem:[%s20504_s19 + $0x280] sm:$0xff] %v12005_v5 }
 0x6b0   : > { %v11746_v28 = vpop.permute.xlu1 %11745 }
 0x6b1   : > { %v11740_v19 = vpop.permute.xlu0 %11739  ;;  %v11974_v58 = vsel %vm7491_vm8, %v22712_v62, %v11746_v28  ;;  %v12006_v22 = vsel %vm6848_vm9, %v11746_v28, %v21487_v16 }
 0x6b2   : > { %v11971_v0 = vsel %vm7491_vm8, %v22713_v18, %v11740_v19  ;;  %v12003_v43 = vsel %vm6848_vm9, %v11740_v19, %v21481_v37  ;;  %12093 = vst [vmem:[%s20504_s19 + $0x290] sm:$0xff] %v11974_v58  ;;  %12094 = vst [vmem:[%s20504_s19 + $0x298] sm:$0xff] %v12006_v22 }
 0x6b3   : > { %12084 = vst [vmem:[%s20504_s19 + $0x248] sm:$0xff] %v11971_v0  ;;  %12085 = vst [vmem:[%s20504_s19 + $0x250] sm:$0xff] %v12003_v43 }
 0x6b4   : > { %v11742_v50 = vpop.permute.xlu1 %11741 }
 0x6b5   : > { %v11972_v14 = vsel %vm7491_vm8, %v22714_v9, %v11742_v50  ;;  %v12004_v16 = vsel %vm6848_vm9, %v11742_v50, %v21483_v57 }
 0x6b6   : > { %12087 = vst [vmem:[%s20504_s19 + $0x260] sm:$0xff] %v11972_v14  ;;  %12088 = vst [vmem:[%s20504_s19 + $0x268] sm:$0xff] %v12004_v16 }
 0x6b7   : > { %v11752_v56 = vpop.permute.xlu0 %11751 }
 0x6b8   : > { %v11977_v37 = vsel %vm7491_vm8, %v22715_v30, %v11752_v56 }
 0x6b9   : > { %12102 = vst [vmem:[%s20504_s19 + $0x2d8] sm:$0xff] %v11977_v37 }
 0x6ba   : > { %v11754_v6 = vpop.permute.xlu1 %11753 }
 0x6bb   : > { %v11748_v52 = vpop.permute.xlu0 %11747  ;;  %v11978_v61 = vsel %vm7491_vm8, %v22716_v10, %v11754_v6 }
 0x6bc   : > { %v11975_v8 = vsel %vm7491_vm8, %v22717_v39, %v11748_v52  ;;  %v12007_v57 = vsel %vm6848_vm9, %v11748_v52, %v21489_v21  ;;  %12105 = vst [vmem:[%s20504_s19 + $0x2f0] sm:$0xff] %v11978_v61 }
 0x6bd   : > { %12096 = vst [vmem:[%s20504_s19 + $0x2a8] sm:$0xff] %v11975_v8  ;;  %12097 = vst [vmem:[%s20504_s19 + $0x2b0] sm:$0xff] %v12007_v57 }
 0x6be   : > { %v11750_v51 = vpop.permute.xlu1 %11749 }
 0x6bf   : > { %v11880_v34 = vpop.permute.xlu0 %11879  ;;  %v11976_v47 = vsel %vm7491_vm8, %v22718_v31, %v11750_v51  ;;  %v12008_v60 = vsel %vm6848_vm9, %v11750_v51, %v21491_v20 }
 0x6c0   : > { %v12009_v7 = vsel %vm6848_vm9, %v11752_v56, %v11880_v34  ;;  %12099 = vst [vmem:[%s20504_s19 + $0x2c0] sm:$0xff] %v11976_v47  ;;  %12100 = vst [vmem:[%s20504_s19 + $0x2c8] sm:$0xff] %v12008_v60 }
 0x6c1   : > { %12103 = vst [vmem:[%s20504_s19 + $0x2e0] sm:$0xff] %v12009_v7 }
 0x6c2   : > { %v11882_v21 = vpop.permute.xlu1 %11881 }
 0x6c3   : > { %v12010_v59 = vsel %vm6848_vm9, %v11754_v6, %v11882_v21 }
 0x6c4   : > { %12106 = vst [vmem:[%s20504_s19 + $0x2f8] sm:$0xff] %v12010_v59 }
 0x6c5   : > { %14620 = shalt.err (!%p14617_p3)
}
 0x6c6   : > { %s14621_s29 = scalar_lea.hbm %s21686_s13, 12288  ;;  %s14625_s23 = scalar_lea.hbm %s21741_s7, 24576 }
 0x6c7   : > { %p14622_p4 = scmp.ne.s32.totalorder %s21686_s13, %s14621_s29  ;;  %p14626_p9 = scmp.lt.s32.totalorder %s21686_s13, %s21741_s7 }
 0x6c8   : > { %p14627_p10 = scmp.lt.s32.totalorder %s14625_s23, %s14621_s29 }
 0x6c9   : > { %p14623_p7 = pnand %p14622_p4, %p14754_p5 }
 0x6ca   : > { %p14628_p11 = por %p14627_p10, %p14626_p9 }
 0x6cb   : > { %p14624_p8 = pneg %p14623_p7 }
 0x6cd   : > { %p14629_p12 = pnand %p14628_p11, %p14624_p8 }
 0x6cf   : > { %14632 = shalt.err (!%p14629_p12)
}
 0x6d0   : > { %s14674_s14 = smov 384   ;;  %s14675_s17 = smov 24  }
 0x6d1   : > { %13851 = dma.vmem_to_hbm [thread:$0]  (%p14754_p5), %s21688_s9, 12288, %s21686_s13, %s21694_s28, %s14674_s14, %s14674_s14, %s14675_s17  }
 0x6d2 PF: > { %p13857_p13 = scmp.ge.s32.totalorder %s14667_s27, 2  ;;  %s12137_s15 = sand.u32 1, %s14655_s24  }
 0x6d3   : > { %s12138_s16 = scalar_lea.sflag [#allocation5], %s12137_s15 }
 0x6d4   : > { %p13854_p0 = pnand %p13857_p13, %p14758_p6 }
 0x6d6   : > { %p13855_p1 = pneg %p13854_p0 }
 0x6d8   : > { %14650 = dma.done.wait (%p13855_p1), %s12138_s16, 12288  }
 0x6d9   : > { %14652 = vsyncadd (%p13855_p1), %s12138_s16, 4294955008  ;;  %p17_p2 = scmp.ge.s32.totalorder %s14741_s30, 4   ;;  %s22719_s24 = smov %s14659_s25 }
 0x6da   : > { %s22720_s25 = smov %s14663_s26  ;;  %s22721_s26 = smov %s14752_s10 }
 0x6db   : > { %s22722_s27 = smov %s14741_s30  ;;  %19 = sbr.rel (!%p17_p2) target bundleno = 3 (0x3), region = 93 }
 0x6e0   :  { %12143 = vsyncpa [#allocation5], 1 }
 0x6e1   :  { %12145 = vsyncpa [#allocation5 + $0x1], 1 }

</bundles_post_ra>
